<compile_context>
chip_gen: v7x
topology: tpu7x:2x2x1
jax: 0.10.0
libtpu: 0.0.40
codegen_flags: <defaults>
</compile_context>

<pallas_src>
import jax
import jax.numpy as jnp
from jax import lax
from jax.experimental import pallas as pl
from jax.experimental.pallas import tpu as pltpu


LEAKY_SLOPE = 0.1

# (in_channels, out_channels, depthwise_stride) for the 13 conv_dw blocks.
_BLOCK_CFG = (
    (8, 16, 1), (16, 32, 2), (32, 32, 1), (32, 64, 2), (64, 64, 1),              # stage1
    (64, 128, 2), (128, 128, 1), (128, 128, 1), (128, 128, 1), (128, 128, 1),
    (128, 128, 1),                                                               # stage2
    (128, 256, 2), (256, 256, 1),                                                # stage3
)


# ---------------------------------------------------------------------------
# Pointwise (1x1) conv + folded BN + LeakyReLU: per-image (Cout,Cin)@(Cin,HW_tile)
# ---------------------------------------------------------------------------
def _make_pw_kernel(slope):
    def kernel(x_ref, w_ref, b_ref, o_ref):
        # x_ref: (Cin, t)   w_ref: (Cout, Cin)   b_ref: (Cout, 1)   o_ref: (Cout, t)
        y = jnp.dot(w_ref[...], x_ref[...], preferred_element_type=jnp.float32)
        y = y + b_ref[...]
        o_ref[...] = jnp.where(y >= 0.0, y, y * slope).astype(o_ref.dtype)
    return kernel


def _pick_hw_tile(hw, max_tile=512):
    if hw <= max_tile:
        return hw
    for t in (max_tile, 256, 128):
        if hw % t == 0:
            return t
    return hw  # fall back to the whole row (no tiling) if nothing divides cleanly


def pointwise_conv_bn_leaky(x, w, scale, bias, *, slope=LEAKY_SLOPE, max_tile=512):
    """x: (N, Cin, H, W);  w: (Cout, Cin);  scale/bias: folded BN (per out-channel)."""
    N, Cin, H, W = x.shape
    Cout = w.shape[0]
    HW = H * W
    t = _pick_hw_tile(HW, max_tile)
    xf = x.reshape(N, Cin, HW)                         # contiguous view, no transpose
    wf = (w * scale[:, None]).astype(jnp.float32)      # fold BN scale into the weights
    bf = bias.reshape(Cout, 1).astype(jnp.float32)
    out = pl.pallas_call(
        _make_pw_kernel(slope),
        out_shape=jax.ShapeDtypeStruct((N, Cout, HW), x.dtype),
        grid=(N, HW // t),
        in_specs=[
            pl.BlockSpec((None, Cin, t), lambda n, j: (n, 0, j)),   # activation tile
            pl.BlockSpec((Cout, Cin), lambda n, j: (0, 0)),         # resident weight
            pl.BlockSpec((Cout, 1), lambda n, j: (0, 0)),           # resident bias
        ],
        out_specs=pl.BlockSpec((None, Cout, t), lambda n, j: (n, 0, j)),
        compiler_params=pltpu.CompilerParams(
            dimension_semantics=("parallel", "parallel")),
    )(xf, wf, bf)
    return out.reshape(N, Cout, H, W)


# ---------------------------------------------------------------------------
# Stem: 3x3 / stride-2 / pad-1 full conv (Cin=3) -> wrapper im2col + Pallas matmul
# ---------------------------------------------------------------------------
def stem_conv_bn_leaky(x, w, scale, bias, *, slope=LEAKY_SLOPE):
    N, Cin, H, W = x.shape
    Cout = w.shape[0]
    Ho = (H - 1) // 2 + 1
    Wo = (W - 1) // 2 + 1
    xp = jnp.pad(x, ((0, 0), (0, 0), (1, 1), (1, 1)))
    taps = [xp[:, :, kh:kh + 2 * Ho:2, kw:kw + 2 * Wo:2]
            for kh in range(3) for kw in range(3)]
    cols = jnp.stack(taps, axis=2).reshape(N, Cin * 9, Ho, Wo)     # (N, 27, Ho, Wo)
    return pointwise_conv_bn_leaky(cols, w.reshape(Cout, Cin * 9), scale, bias,
                                   slope=slope)


# ---------------------------------------------------------------------------
# Depthwise 3x3 conv + folded BN + LeakyReLU (NCHW, per image / channel block)
# ---------------------------------------------------------------------------
def _make_dw_s1_kernel(cb, Ho, Wo, slope):
    def kernel(x_ref, w_ref, b_ref, o_ref):
        # x_ref: (cb, Ho+2, Wo+2) VMEM (pre-padded)
        # w_ref: (C*9,) SMEM   b_ref: (C,) SMEM   o_ref: (cb, Ho, Wo)
        cblk = pl.program_id(1)

        def body(ci, carry):
            ch = cblk * cb + ci
            acc = jnp.zeros((Ho, Wo), jnp.float32)
            for kh in range(3):
                for kw in range(3):
                    acc = acc + (x_ref[ci, kh:kh + Ho, kw:kw + Wo]
                                 * w_ref[ch * 9 + kh * 3 + kw])
            y = acc + b_ref[ch]
            o_ref[ci] = jnp.where(y >= 0.0, y, y * slope).astype(o_ref.dtype)
            return carry

        lax.fori_loop(0, cb, body, 0)
    return kernel


def _make_dw_s2_kernel(cb, Ho, Wo, slope):
    def kernel(x00_ref, x01_ref, x10_ref, x11_ref, w_ref, b_ref, o_ref):
        # x{ph}{pw}_ref: spatial parity planes of the padded input -> unit-stride taps.
        parts = ((x00_ref, x01_ref), (x10_ref, x11_ref))
        cblk = pl.program_id(1)

        def body(ci, carry):
            ch = cblk * cb + ci
            acc = jnp.zeros((Ho, Wo), jnp.float32)
            for kh in range(3):
                for kw in range(3):
                    src = parts[kh % 2][kw % 2]
                    acc = acc + (src[ci, kh // 2:kh // 2 + Ho, kw // 2:kw // 2 + Wo]
                                 * w_ref[ch * 9 + kh * 3 + kw])
            y = acc + b_ref[ch]
            o_ref[ci] = jnp.where(y >= 0.0, y, y * slope).astype(o_ref.dtype)
            return carry

        lax.fori_loop(0, cb, body, 0)
    return kernel


def depthwise_conv_bn_leaky(x, w33, scale, bias, stride, *, slope=LEAKY_SLOPE,
                            max_channel_block=64):
    """x: (N, C, H, W);  w33: (C, 3, 3) depthwise taps;  BN folded into scale/bias."""
    N, C, H, W = x.shape
    Ho = (H - 1) // stride + 1
    Wo = (W - 1) // stride + 1
    cb = min(C, max_channel_block)
    assert C % cb == 0
    w_flat = (w33 * scale[:, None, None]).reshape(C * 9).astype(jnp.float32)
    b_flat = bias.astype(jnp.float32)
    xp = jnp.pad(x, ((0, 0), (0, 0), (1, 1), (1, 1)))
    smem = pl.BlockSpec(memory_space=pltpu.MemorySpace.SMEM)
    cparams = pltpu.CompilerParams(dimension_semantics=("parallel", "parallel"))
    out_spec = pl.BlockSpec((None, cb, Ho, Wo), lambda n, c: (n, c, 0, 0))
    out_shape = jax.ShapeDtypeStruct((N, C, Ho, Wo), x.dtype)

    if stride == 1:
        return pl.pallas_call(
            _make_dw_s1_kernel(cb, Ho, Wo, slope),
            out_shape=out_shape,
            grid=(N, C // cb),
            in_specs=[
                pl.BlockSpec((None, cb, Ho + 2, Wo + 2), lambda n, c: (n, c, 0, 0)),
                smem, smem,
            ],
            out_specs=out_spec,
            compiler_params=cparams,
        )(xp, w_flat, b_flat)

    # stride 2: split the padded input into its 4 spatial parity planes in the wrapper
    # so the kernel never needs lane/sublane-strided loads.
    parts = [xp[:, :, ph::2, pw::2] for ph in range(2) for pw in range(2)]
    part_specs = [pl.BlockSpec((None, cb) + p.shape[2:], lambda n, c: (n, c, 0, 0))
                  for p in parts]
    return pl.pallas_call(
        _make_dw_s2_kernel(cb, Ho, Wo, slope),
        out_shape=out_shape,
        grid=(N, C // cb),
        in_specs=part_specs + [smem, smem],
        out_specs=out_spec,
        compiler_params=cparams,
    )(*parts, w_flat, b_flat)


# ---------------------------------------------------------------------------
# Head: global average pool + fully connected layer (single Pallas kernel)
# ---------------------------------------------------------------------------
def _head_kernel(x_ref, w_ref, b_ref, o_ref):
    # x_ref: (N, C, HW)   w_ref: (C, num_classes)   b_ref: (1, num_classes)
    pooled = jnp.mean(x_ref[...], axis=-1)                     # AdaptiveAvgPool2d((1,1))
    y = jnp.dot(pooled, w_ref[...], preferred_element_type=jnp.float32) + b_ref[...]
    o_ref[...] = y.astype(o_ref.dtype)


def avgpool_fc(x, w_fc, b_fc):
    """x: (N, C, H, W);  w_fc: (num_classes, C) (torch layout);  b_fc: (num_classes,)."""
    N, C, H, W = x.shape
    nc = w_fc.shape[0]
    xf = x.reshape(N, C, H * W)
    return pl.pallas_call(
        _head_kernel,
        out_shape=jax.ShapeDtypeStruct((N, nc), x.dtype),
        grid=(1,),
        in_specs=[
            pl.BlockSpec((N, C, H * W), lambda i: (0, 0, 0)),
            pl.BlockSpec((C, nc), lambda i: (0, 0)),
            pl.BlockSpec((1, nc), lambda i: (0, 0)),
        ],
        out_specs=pl.BlockSpec((N, nc), lambda i: (0, 0)),
    )(xf, w_fc.T, b_fc.reshape(1, nc))


# ---------------------------------------------------------------------------
# Full forward pass
# ---------------------------------------------------------------------------
def mobilenet_v1_forward(x, params):
    p = params["stem"]
    y = stem_conv_bn_leaky(x, p["w"], p["scale"], p["bias"])
    for blk in params["blocks"]:
        y = depthwise_conv_bn_leaky(y, blk["dw_w"], blk["dw_scale"], blk["dw_bias"],
                                    blk["stride"])
        y = pointwise_conv_bn_leaky(y, blk["pw_w"], blk["pw_scale"], blk["pw_bias"])
    return avgpool_fc(y, params["fc"]["w"], params["fc"]["b"])


# ---------------------------------------------------------------------------
# Deterministic synthetic parameters (eval-mode BN folded to scale/bias)
# ---------------------------------------------------------------------------
def _bn_fold(key, c):
    k1, k2, k3, k4 = jax.random.split(key, 4)
    gamma = 1.0 + 0.1 * jax.random.normal(k1, (c,), jnp.float32)
    beta = 0.1 * jax.random.normal(k2, (c,), jnp.float32)
    mean = 0.1 * jax.random.normal(k3, (c,), jnp.float32)
    var = 1.0 + 0.1 * jax.random.uniform(k4, (c,), jnp.float32)
    scale = gamma * lax.rsqrt(var + 1e-5)
    bias = beta - mean * scale
    return scale, bias


def init_params(key):
    n_keys = 4 + 4 * len(_BLOCK_CFG)
    keys = iter(jax.random.split(key, n_keys))
    params = {}
    w1 = jax.random.normal(next(keys), (8, 3, 3, 3), jnp.float32) * (2.0 / 27.0) ** 0.5
    s1, b1 = _bn_fold(next(keys), 8)
    params["stem"] = {"w": w1, "scale": s1, "bias": b1}
    blocks = []
    for (cin, cout, stride) in _BLOCK_CFG:
        dw_w = jax.random.normal(next(keys), (cin, 3, 3), jnp.float32) * (2.0 / 9.0) ** 0.5
        dw_s, dw_b = _bn_fold(next(keys), cin)
        pw_w = jax.random.normal(next(keys), (cout, cin), jnp.float32) * (2.0 / cin) ** 0.5
        pw_s, pw_b = _bn_fold(next(keys), cout)
        blocks.append({"stride": stride,
                       "dw_w": dw_w, "dw_scale": dw_s, "dw_bias": dw_b,
                       "pw_w": pw_w, "pw_scale": pw_s, "pw_bias": pw_b})
    params["blocks"] = blocks
    fc_w = jax.random.normal(next(keys), (1000, 256), jnp.float32) * (1.0 / 256.0) ** 0.5
    fc_b = 0.1 * jax.random.normal(next(keys), (1000,), jnp.float32)
    params["fc"] = {"w": fc_w, "b": fc_b}
    return params


# ---------------------------------------------------------------------------
# Pure-JAX reference (same math as the PyTorch forward in eval mode)
# ---------------------------------------------------------------------------
def ref_forward(x, params, slope=LEAKY_SLOPE):
    hp = lax.Precision.HIGHEST

    def bn_leaky(y, scale, bias):
        y = y * scale[None, :, None, None] + bias[None, :, None, None]
        return jnp.where(y >= 0.0, y, y * slope)

    def conv(inp, w, stride, pad, groups=1):
        return lax.conv_general_dilated(
            inp, w, window_strides=(stride, stride), padding=(pad, pad),
            dimension_numbers=("NCHW", "OIHW", "NCHW"),
            feature_group_count=groups, precision=hp)

    p = params["stem"]
    y = bn_leaky(conv(x, p["w"], 2, (1, 1)), p["scale"], p["bias"])
    for blk in params["blocks"]:
        cin = blk["dw_w"].shape[0]
        y = bn_leaky(conv(y, blk["dw_w"].reshape(cin, 1, 3, 3), blk["stride"], (1, 1),
                          groups=cin),
                     blk["dw_scale"], blk["dw_bias"])
        y = bn_leaky(conv(y, blk["pw_w"][:, :, None, None], 1, (0, 0)),
                     blk["pw_scale"], blk["pw_bias"])
    y = jnp.mean(y, axis=(2, 3))
    return jnp.dot(y, params["fc"]["w"].T, precision=hp) + params["fc"]["b"]


if __name__ == "__main__":
    root = jax.random.PRNGKey(0)
    k_x, k_p = jax.random.split(root)
    x = jax.random.normal(k_x, (2, 3, 64, 64), dtype=jnp.float32)
    params = init_params(k_p)

    fwd = jax.jit(lambda inp: mobilenet_v1_forward(inp, params))
    out = jax.block_until_ready(fwd(x))
    assert out.shape == (2, 1000), out.shape

    ref = jax.block_until_ready(ref_forward(x, params))
    assert jnp.allclose(out, ref, rtol=3e-2, atol=3e-2), (
        "max abs err = %g" % float(jnp.max(jnp.abs(out - ref))))
    print("KERNEL_OK")
</pallas_src>

<mosaic_0001>
module attributes {stable_mosaic.version = 11 : i64} {
  func.func @kernel(%arg0: i32, %arg1: i32, %arg2: memref<1x27x512xf32, #tpu.memory_space<vmem>>, %arg3: memref<8x27xf32, #tpu.memory_space<vmem>>, %arg4: memref<8x1xf32, #tpu.memory_space<vmem>>, %arg5: memref<1x8x512xf32, #tpu.memory_space<vmem>>) attributes {dimension_semantics = [#tpu.dimension_semantics<parallel>, #tpu.dimension_semantics<parallel>], iteration_bounds = array<i64: 2, 2>, scalar_prefetch = 0 : i64, scratch_operands = 0 : i64, tpu.core_type = #tpu.core_type<tc>, window_params = [{transform_indices = @transform_0, window_bounds = array<i64: 1, 27, 512>}, {pipeline_mode = #tpu.pipeline_mode<synchronous>, transform_indices = @transform_1, window_bounds = array<i64: 8, 27>}, {pipeline_mode = #tpu.pipeline_mode<synchronous>, transform_indices = @transform_2, window_bounds = array<i64: 8, 1>}, {transform_indices = @transform_3, window_bounds = array<i64: 1, 8, 512>}]} {
    %c0 = arith.constant 0 : index
    %c0_0 = arith.constant 0 : index
    %0 = vector.load %arg3[%c0, %c0_0] : memref<8x27xf32, #tpu.memory_space<vmem>>, vector<8x27xf32>
    %c0_1 = arith.constant 0 : index
    %c0_2 = arith.constant 0 : index
    %c0_3 = arith.constant 0 : index
    %1 = vector.load %arg2[%c0_1, %c0_2, %c0_3] : memref<1x27x512xf32, #tpu.memory_space<vmem>>, vector<1x27x512xf32>
    %2 = vector.shape_cast %1 : vector<1x27x512xf32> to vector<27x512xf32>
    %cst = arith.constant dense<0.000000e+00> : vector<8x512xf32>
    %3 = tpu.matmul %0, %2, %cst {dimension_numbers = #tpu.dot_dimension_numbers<[1], [0], [0], [1], [0, 0, 1, 1], [], []>} : vector<8x27xf32>, vector<27x512xf32>, vector<8x512xf32> -> vector<8x512xf32>
    %c0_4 = arith.constant 0 : index
    %c0_5 = arith.constant 0 : index
    %4 = vector.load %arg4[%c0_4, %c0_5] : memref<8x1xf32, #tpu.memory_space<vmem>>, vector<8x1xf32>
    %5 = vector.broadcast %4 : vector<8x1xf32> to vector<8x512xf32>
    %6 = arith.addf %3, %5 : vector<8x512xf32>
    %cst_6 = arith.constant 0.000000e+00 : f32
    %7 = vector.broadcast %cst_6 : f32 to vector<8x512xf32>
    %8 = arith.cmpf oge, %6, %7 : vector<8x512xf32>
    %cst_7 = arith.constant 1.000000e-01 : f32
    %9 = vector.broadcast %cst_7 : f32 to vector<8x512xf32>
    %10 = arith.mulf %6, %9 : vector<8x512xf32>
    %11 = arith.select %8, %6, %10 : vector<8x512xi1>, vector<8x512xf32>
    %c0_8 = arith.constant 0 : index
    %c0_9 = arith.constant 0 : index
    %c0_10 = arith.constant 0 : index
    %12 = vector.load %arg5[%c0_8, %c0_9, %c0_10] : memref<1x8x512xf32, #tpu.memory_space<vmem>>, vector<1x8x512xf32>
    %13 = vector.shape_cast %12 : vector<1x8x512xf32> to vector<8x512xf32>
    %14 = vector.shape_cast %11 : vector<8x512xf32> to vector<1x8x512xf32>
    tpu.vector_store %arg5[%c0_8, %c0_9, %c0_10], %14 {strides = array<i32>} : memref<1x8x512xf32, #tpu.memory_space<vmem>>, vector<1x8x512xf32>,
    return
  }
  func.func @transform_0(%arg0: i32, %arg1: i32) -> (i32, i32, i32) {
    %c0_i32 = arith.constant 0 : i32
    %c0_i32_0 = arith.constant 0 : i32
    return %arg0, %c0_i32, %arg1 : i32, i32, i32
  }
  func.func @transform_1(%arg0: i32, %arg1: i32) -> (i32, i32) {
    %c0_i32 = arith.constant 0 : i32
    %c0_i32_0 = arith.constant 0 : i32
    %c0_i32_1 = arith.constant 0 : i32
    return %c0_i32, %c0_i32_0 : i32, i32
  }
  func.func @transform_2(%arg0: i32, %arg1: i32) -> (i32, i32) {
    %c0_i32 = arith.constant 0 : i32
    %c0_i32_0 = arith.constant 0 : i32
    %c0_i32_1 = arith.constant 0 : i32
    return %c0_i32, %c0_i32_0 : i32, i32
  }
  func.func @transform_3(%arg0: i32, %arg1: i32) -> (i32, i32, i32) {
    %c0_i32 = arith.constant 0 : i32
    %c0_i32_0 = arith.constant 0 : i32
    return %arg0, %c0_i32, %arg1 : i32, i32, i32
  }
}

module attributes {stable_mosaic.version = 11 : i64} {
  func.func @kernel(%arg0: i32, %arg1: i32, %arg2: memref<1x8x34x34xf32, #tpu.memory_space<vmem>>, %arg3: memref<72xf32, #tpu.memory_space<smem>>, %arg4: memref<8xf32, #tpu.memory_space<smem>>, %arg5: memref<1x8x32x32xf32, #tpu.memory_space<vmem>>) attributes {dimension_semantics = [#tpu.dimension_semantics<parallel>, #tpu.dimension_semantics<parallel>], iteration_bounds = array<i64: 2, 1>, scalar_prefetch = 0 : i64, scratch_operands = 0 : i64, tpu.core_type = #tpu.core_type<tc>, window_params = [{transform_indices = @transform_0, window_bounds = array<i64: 1, 8, 34, 34>}, {transform_indices = @transform_1, window_bounds = array<i64: 72>}, {transform_indices = @transform_2, window_bounds = array<i64: 8>}, {transform_indices = @transform_3, window_bounds = array<i64: 1, 8, 32, 32>}]} {
    %c0_i32 = arith.constant 0 : i32
    %c8_i32 = arith.constant 8 : i32
    %0 = arith.addi %c0_i32, %c8_i32 : i32
    %c1_i32 = arith.constant 1 : i32
    scf.for %arg6 = %c0_i32 to %0 step %c1_i32  : i32 {
      %c8_i32_1 = arith.constant 8 : i32
      %1 = arith.muli %arg1, %c8_i32_1 : i32
      %2 = arith.addi %1, %arg6 : i32
      %cst = arith.constant 0.000000e+00 : f32
      %3 = vector.broadcast %cst : f32 to vector<32x32xf32>
      %c0 = arith.constant 0 : index
      %4 = arith.index_cast %arg6 : i32 to index
      %c0_2 = arith.constant 0 : index
      %c0_3 = arith.constant 0 : index
      %5 = vector.load %arg2[%c0, %4, %c0_2, %c0_3] : memref<1x8x34x34xf32, #tpu.memory_space<vmem>>, vector<1x1x32x32xf32>
      %6 = vector.shape_cast %5 : vector<1x1x32x32xf32> to vector<32x32xf32>
      %c9_i32 = arith.constant 9 : i32
      %7 = arith.muli %2, %c9_i32 : i32
      %c0_i32_4 = arith.constant 0 : i32
      %8 = arith.addi %7, %c0_i32_4 : i32
      %c0_i32_5 = arith.constant 0 : i32
      %9 = arith.addi %8, %c0_i32_5 : i32
      %10 = arith.index_cast %9 : i32 to index
      %11 = memref.load %arg3[%10] : memref<72xf32, #tpu.memory_space<smem>>
      %12 = vector.broadcast %11 : f32 to vector<32x32xf32>
      %13 = arith.mulf %6, %12 : vector<32x32xf32>
      %14 = arith.addf %3, %13 : vector<32x32xf32>
      %c0_6 = arith.constant 0 : index
      %15 = arith.index_cast %arg6 : i32 to index
      %c0_7 = arith.constant 0 : index
      %c1 = arith.constant 1 : index
      %16 = vector.load %arg2[%c0_6, %15, %c0_7, %c1] : memref<1x8x34x34xf32, #tpu.memory_space<vmem>>, vector<1x1x32x32xf32>
      %17 = vector.shape_cast %16 : vector<1x1x32x32xf32> to vector<32x32xf32>
      %c9_i32_8 = arith.constant 9 : i32
      %18 = arith.muli %2, %c9_i32_8 : i32
      %c0_i32_9 = arith.constant 0 : i32
      %19 = arith.addi %18, %c0_i32_9 : i32
      %c1_i32_10 = arith.constant 1 : i32
      %20 = arith.addi %19, %c1_i32_10 : i32
      %21 = arith.index_cast %20 : i32 to index
      %22 = memref.load %arg3[%21] : memref<72xf32, #tpu.memory_space<smem>>
      %23 = vector.broadcast %22 : f32 to vector<32x32xf32>
      %24 = arith.mulf %17, %23 : vector<32x32xf32>
      %25 = arith.addf %14, %24 : vector<32x32xf32>
      %c0_11 = arith.constant 0 : index
      %26 = arith.index_cast %arg6 : i32 to index
      %c0_12 = arith.constant 0 : index
      %c2 = arith.constant 2 : index
      %27 = vector.load %arg2[%c0_11, %26, %c0_12, %c2] : memref<1x8x34x34xf32, #tpu.memory_space<vmem>>, vector<1x1x32x32xf32>
      %28 = vector.shape_cast %27 : vector<1x1x32x32xf32> to vector<32x32xf32>
      %c9_i32_13 = arith.constant 9 : i32
      %29 = arith.muli %2, %c9_i32_13 : i32
      %c0_i32_14 = arith.constant 0 : i32
      %30 = arith.addi %29, %c0_i32_14 : i32
      %c2_i32 = arith.constant 2 : i32
      %31 = arith.addi %30, %c2_i32 : i32
      %32 = arith.index_cast %31 : i32 to index
      %33 = memref.load %arg3[%32] : memref<72xf32, #tpu.memory_space<smem>>
      %34 = vector.broadcast %33 : f32 to vector<32x32xf32>
      %35 = arith.mulf %28, %34 : vector<32x32xf32>
      %36 = arith.addf %25, %35 : vector<32x32xf32>
      %c0_15 = arith.constant 0 : index
      %37 = arith.index_cast %arg6 : i32 to index
      %c1_16 = arith.constant 1 : index
      %c0_17 = arith.constant 0 : index
      %38 = vector.load %arg2[%c0_15, %37, %c1_16, %c0_17] : memref<1x8x34x34xf32, #tpu.memory_space<vmem>>, vector<1x1x32x32xf32>
      %39 = vector.shape_cast %38 : vector<1x1x32x32xf32> to vector<32x32xf32>
      %c9_i32_18 = arith.constant 9 : i32
      %40 = arith.muli %2, %c9_i32_18 : i32
      %c3_i32 = arith.constant 3 : i32
      %41 = arith.addi %40, %c3_i32 : i32
      %c0_i32_19 = arith.constant 0 : i32
      %42 = arith.addi %41, %c0_i32_19 : i32
      %43 = arith.index_cast %42 : i32 to index
      %44 = memref.load %arg3[%43] : memref<72xf32, #tpu.memory_space<smem>>
      %45 = vector.broadcast %44 : f32 to vector<32x32xf32>
      %46 = arith.mulf %39, %45 : vector<32x32xf32>
      %47 = arith.addf %36, %46 : vector<32x32xf32>
      %c0_20 = arith.constant 0 : index
      %48 = arith.index_cast %arg6 : i32 to index
      %c1_21 = arith.constant 1 : index
      %c1_22 = arith.constant 1 : index
      %49 = vector.load %arg2[%c0_20, %48, %c1_21, %c1_22] : memref<1x8x34x34xf32, #tpu.memory_space<vmem>>, vector<1x1x32x32xf32>
      %50 = vector.shape_cast %49 : vector<1x1x32x32xf32> to vector<32x32xf32>
      %c9_i32_23 = arith.constant 9 : i32
      %51 = arith.muli %2, %c9_i32_23 : i32
      %c3_i32_24 = arith.constant 3 : i32
      %52 = arith.addi %51, %c3_i32_24 : i32
      %c1_i32_25 = arith.constant 1 : i32
      %53 = arith.addi %52, %c1_i32_25 : i32
      %54 = arith.index_cast %53 : i32 to index
      %55 = memref.load %arg3[%54] : memref<72xf32, #tpu.memory_space<smem>>
      %56 = vector.broadcast %55 : f32 to vector<32x32xf32>
      %57 = arith.mulf %50, %56 : vector<32x32xf32>
      %58 = arith.addf %47, %57 : vector<32x32xf32>
      %c0_26 = arith.constant 0 : index
      %59 = arith.index_cast %arg6 : i32 to index
      %c1_27 = arith.constant 1 : index
      %c2_28 = arith.constant 2 : index
      %60 = vector.load %arg2[%c0_26, %59, %c1_27, %c2_28] : memref<1x8x34x34xf32, #tpu.memory_space<vmem>>, vector<1x1x32x32xf32>
      %61 = vector.shape_cast %60 : vector<1x1x32x32xf32> to vector<32x32xf32>
      %c9_i32_29 = arith.constant 9 : i32
      %62 = arith.muli %2, %c9_i32_29 : i32
      %c3_i32_30 = arith.constant 3 : i32
      %63 = arith.addi %62, %c3_i32_30 : i32
      %c2_i32_31 = arith.constant 2 : i32
      %64 = arith.addi %63, %c2_i32_31 : i32
      %65 = arith.index_cast %64 : i32 to index
      %66 = memref.load %arg3[%65] : memref<72xf32, #tpu.memory_space<smem>>
      %67 = vector.broadcast %66 : f32 to vector<32x32xf32>
      %68 = arith.mulf %61, %67 : vector<32x32xf32>
      %69 = arith.addf %58, %68 : vector<32x32xf32>
      %c0_32 = arith.constant 0 : index
      %70 = arith.index_cast %arg6 : i32 to index
      %c2_33 = arith.constant 2 : index
      %c0_34 = arith.constant 0 : index
      %71 = vector.load %arg2[%c0_32, %70, %c2_33, %c0_34] : memref<1x8x34x34xf32, #tpu.memory_space<vmem>>, vector<1x1x32x32xf32>
      %72 = vector.shape_cast %71 : vector<1x1x32x32xf32> to vector<32x32xf32>
      %c9_i32_35 = arith.constant 9 : i32
      %73 = arith.muli %2, %c9_i32_35 : i32
      %c6_i32 = arith.constant 6 : i32
      %74 = arith.addi %73, %c6_i32 : i32
      %c0_i32_36 = arith.constant 0 : i32
      %75 = arith.addi %74, %c0_i32_36 : i32
      %76 = arith.index_cast %75 : i32 to index
      %77 = memref.load %arg3[%76] : memref<72xf32, #tpu.memory_space<smem>>
      %78 = vector.broadcast %77 : f32 to vector<32x32xf32>
      %79 = arith.mulf %72, %78 : vector<32x32xf32>
      %80 = arith.addf %69, %79 : vector<32x32xf32>
      %c0_37 = arith.constant 0 : index
      %81 = arith.index_cast %arg6 : i32 to index
      %c2_38 = arith.constant 2 : index
      %c1_39 = arith.constant 1 : index
      %82 = vector.load %arg2[%c0_37, %81, %c2_38, %c1_39] : memref<1x8x34x34xf32, #tpu.memory_space<vmem>>, vector<1x1x32x32xf32>
      %83 = vector.shape_cast %82 : vector<1x1x32x32xf32> to vector<32x32xf32>
      %c9_i32_40 = arith.constant 9 : i32
      %84 = arith.muli %2, %c9_i32_40 : i32
      %c6_i32_41 = arith.constant 6 : i32
      %85 = arith.addi %84, %c6_i32_41 : i32
      %c1_i32_42 = arith.constant 1 : i32
      %86 = arith.addi %85, %c1_i32_42 : i32
      %87 = arith.index_cast %86 : i32 to index
      %88 = memref.load %arg3[%87] : memref<72xf32, #tpu.memory_space<smem>>
      %89 = vector.broadcast %88 : f32 to vector<32x32xf32>
      %90 = arith.mulf %83, %89 : vector<32x32xf32>
      %91 = arith.addf %80, %90 : vector<32x32xf32>
      %c0_43 = arith.constant 0 : index
      %92 = arith.index_cast %arg6 : i32 to index
      %c2_44 = arith.constant 2 : index
      %c2_45 = arith.constant 2 : index
      %93 = vector.load %arg2[%c0_43, %92, %c2_44, %c2_45] : memref<1x8x34x34xf32, #tpu.memory_space<vmem>>, vector<1x1x32x32xf32>
      %94 = vector.shape_cast %93 : vector<1x1x32x32xf32> to vector<32x32xf32>
      %c9_i32_46 = arith.constant 9 : i32
      %95 = arith.muli %2, %c9_i32_46 : i32
      %c6_i32_47 = arith.constant 6 : i32
      %96 = arith.addi %95, %c6_i32_47 : i32
      %c2_i32_48 = arith.constant 2 : i32
      %97 = arith.addi %96, %c2_i32_48 : i32
      %98 = arith.index_cast %97 : i32 to index
      %99 = memref.load %arg3[%98] : memref<72xf32, #tpu.memory_space<smem>>
      %100 = vector.broadcast %99 : f32 to vector<32x32xf32>
      %101 = arith.mulf %94, %100 : vector<32x32xf32>
      %102 = arith.addf %91, %101 : vector<32x32xf32>
      %103 = arith.index_cast %2 : i32 to index
      %104 = memref.load %arg4[%103] : memref<8xf32, #tpu.memory_space<smem>>
      %105 = vector.broadcast %104 : f32 to vector<32x32xf32>
      %106 = arith.addf %102, %105 : vector<32x32xf32>
      %cst_49 = arith.constant 0.000000e+00 : f32
      %107 = vector.broadcast %cst_49 : f32 to vector<32x32xf32>
      %108 = arith.cmpf oge, %106, %107 : vector<32x32xf32>
      %cst_50 = arith.constant 1.000000e-01 : f32
      %109 = vector.broadcast %cst_50 : f32 to vector<32x32xf32>
      %110 = arith.mulf %106, %109 : vector<32x32xf32>
      %111 = arith.select %108, %106, %110 : vector<32x32xi1>, vector<32x32xf32>
      %c0_51 = arith.constant 0 : index
      %112 = arith.index_cast %arg6 : i32 to index
      %c0_52 = arith.constant 0 : index
      %c0_53 = arith.constant 0 : index
      %113 = vector.load %arg5[%c0_51, %112, %c0_52, %c0_53] : memref<1x8x32x32xf32, #tpu.memory_space<vmem>>, vector<1x1x32x32xf32>
      %114 = vector.shape_cast %113 : vector<1x1x32x32xf32> to vector<32x32xf32>
      %115 = vector.shape_cast %111 : vector<32x32xf32> to vector<1x1x32x32xf32>
      tpu.vector_store %arg5[%c0_51, %112, %c0_52, %c0_53], %115 {strides = array<i32>} : memref<1x8x32x32xf32, #tpu.memory_space<vmem>>, vector<1x1x32x32xf32>,
    }
    %c8_i32_0 = arith.constant 8 : i32
    return
  }
  func.func @transform_0(%arg0: i32, %arg1: i32) -> (i32, i32, i32, i32) {
    %c0_i32 = arith.constant 0 : i32
    %c0_i32_0 = arith.constant 0 : i32
    %c0_i32_1 = arith.constant 0 : i32
    return %arg0, %arg1, %c0_i32, %c0_i32_0 : i32, i32, i32, i32
  }
  func.func @transform_1(%arg0: i32, %arg1: i32) -> i32 {
    %c0_i32 = arith.constant 0 : i32
    %c0_i32_0 = arith.constant 0 : i32
    return %c0_i32 : i32
  }
  func.func @transform_2(%arg0: i32, %arg1: i32) -> i32 {
    %c0_i32 = arith.constant 0 : i32
    %c0_i32_0 = arith.constant 0 : i32
    return %c0_i32 : i32
  }
  func.func @transform_3(%arg0: i32, %arg1: i32) -> (i32, i32, i32, i32) {
    %c0_i32 = arith.constant 0 : i32
    %c0_i32_0 = arith.constant 0 : i32
    %c0_i32_1 = arith.constant 0 : i32
    return %arg0, %arg1, %c0_i32, %c0_i32_0 : i32, i32, i32, i32
  }
}

module attributes {stable_mosaic.version = 11 : i64} {
  func.func @kernel(%arg0: i32, %arg1: i32, %arg2: memref<1x8x512xf32, #tpu.memory_space<vmem>>, %arg3: memref<16x8xf32, #tpu.memory_space<vmem>>, %arg4: memref<16x1xf32, #tpu.memory_space<vmem>>, %arg5: memref<1x16x512xf32, #tpu.memory_space<vmem>>) attributes {dimension_semantics = [#tpu.dimension_semantics<parallel>, #tpu.dimension_semantics<parallel>], iteration_bounds = array<i64: 2, 2>, scalar_prefetch = 0 : i64, scratch_operands = 0 : i64, tpu.core_type = #tpu.core_type<tc>, window_params = [{transform_indices = @transform_0, window_bounds = array<i64: 1, 8, 512>}, {pipeline_mode = #tpu.pipeline_mode<synchronous>, transform_indices = @transform_1, window_bounds = array<i64: 16, 8>}, {pipeline_mode = #tpu.pipeline_mode<synchronous>, transform_indices = @transform_2, window_bounds = array<i64: 16, 1>}, {transform_indices = @transform_3, window_bounds = array<i64: 1, 16, 512>}]} {
    %c0 = arith.constant 0 : index
    %c0_0 = arith.constant 0 : index
    %0 = vector.load %arg3[%c0, %c0_0] : memref<16x8xf32, #tpu.memory_space<vmem>>, vector<16x8xf32>
    %c0_1 = arith.constant 0 : index
    %c0_2 = arith.constant 0 : index
    %c0_3 = arith.constant 0 : index
    %1 = vector.load %arg2[%c0_1, %c0_2, %c0_3] : memref<1x8x512xf32, #tpu.memory_space<vmem>>, vector<1x8x512xf32>
    %2 = vector.shape_cast %1 : vector<1x8x512xf32> to vector<8x512xf32>
    %cst = arith.constant dense<0.000000e+00> : vector<16x512xf32>
    %3 = tpu.matmul %0, %2, %cst {dimension_numbers = #tpu.dot_dimension_numbers<[1], [0], [0], [1], [0, 0, 1, 1], [], []>} : vector<16x8xf32>, vector<8x512xf32>, vector<16x512xf32> -> vector<16x512xf32>
    %c0_4 = arith.constant 0 : index
    %c0_5 = arith.constant 0 : index
    %4 = vector.load %arg4[%c0_4, %c0_5] : memref<16x1xf32, #tpu.memory_space<vmem>>, vector<16x1xf32>
    %5 = vector.broadcast %4 : vector<16x1xf32> to vector<16x512xf32>
    %6 = arith.addf %3, %5 : vector<16x512xf32>
    %cst_6 = arith.constant 0.000000e+00 : f32
    %7 = vector.broadcast %cst_6 : f32 to vector<16x512xf32>
    %8 = arith.cmpf oge, %6, %7 : vector<16x512xf32>
    %cst_7 = arith.constant 1.000000e-01 : f32
    %9 = vector.broadcast %cst_7 : f32 to vector<16x512xf32>
    %10 = arith.mulf %6, %9 : vector<16x512xf32>
    %11 = arith.select %8, %6, %10 : vector<16x512xi1>, vector<16x512xf32>
    %c0_8 = arith.constant 0 : index
    %c0_9 = arith.constant 0 : index
    %c0_10 = arith.constant 0 : index
    %12 = vector.load %arg5[%c0_8, %c0_9, %c0_10] : memref<1x16x512xf32, #tpu.memory_space<vmem>>, vector<1x16x512xf32>
    %13 = vector.shape_cast %12 : vector<1x16x512xf32> to vector<16x512xf32>
    %14 = vector.shape_cast %11 : vector<16x512xf32> to vector<1x16x512xf32>
    tpu.vector_store %arg5[%c0_8, %c0_9, %c0_10], %14 {strides = array<i32>} : memref<1x16x512xf32, #tpu.memory_space<vmem>>, vector<1x16x512xf32>,
    return
  }
  func.func @transform_0(%arg0: i32, %arg1: i32) -> (i32, i32, i32) {
    %c0_i32 = arith.constant 0 : i32
    %c0_i32_0 = arith.constant 0 : i32
    return %arg0, %c0_i32, %arg1 : i32, i32, i32
  }
  func.func @transform_1(%arg0: i32, %arg1: i32) -> (i32, i32) {
    %c0_i32 = arith.constant 0 : i32
    %c0_i32_0 = arith.constant 0 : i32
    %c0_i32_1 = arith.constant 0 : i32
    return %c0_i32, %c0_i32_0 : i32, i32
  }
  func.func @transform_2(%arg0: i32, %arg1: i32) -> (i32, i32) {
    %c0_i32 = arith.constant 0 : i32
    %c0_i32_0 = arith.constant 0 : i32
    %c0_i32_1 = arith.constant 0 : i32
    return %c0_i32, %c0_i32_0 : i32, i32
  }
  func.func @transform_3(%arg0: i32, %arg1: i32) -> (i32, i32, i32) {
    %c0_i32 = arith.constant 0 : i32
    %c0_i32_0 = arith.constant 0 : i32
    return %arg0, %c0_i32, %arg1 : i32, i32, i32
  }
}

module attributes {stable_mosaic.version = 11 : i64} {
  func.func @kernel(%arg0: i32, %arg1: i32, %arg2: memref<1x16x17x17xf32, #tpu.memory_space<vmem>>, %arg3: memref<1x16x17x17xf32, #tpu.memory_space<vmem>>, %arg4: memref<1x16x17x17xf32, #tpu.memory_space<vmem>>, %arg5: memref<1x16x17x17xf32, #tpu.memory_space<vmem>>, %arg6: memref<144xf32, #tpu.memory_space<smem>>, %arg7: memref<16xf32, #tpu.memory_space<smem>>, %arg8: memref<1x16x16x16xf32, #tpu.memory_space<vmem>>) attributes {dimension_semantics = [#tpu.dimension_semantics<parallel>, #tpu.dimension_semantics<parallel>], iteration_bounds = array<i64: 2, 1>, scalar_prefetch = 0 : i64, scratch_operands = 0 : i64, tpu.core_type = #tpu.core_type<tc>, window_params = [{transform_indices = @transform_0, window_bounds = array<i64: 1, 16, 17, 17>}, {transform_indices = @transform_1, window_bounds = array<i64: 1, 16, 17, 17>}, {transform_indices = @transform_2, window_bounds = array<i64: 1, 16, 17, 17>}, {transform_indices = @transform_3, window_bounds = array<i64: 1, 16, 17, 17>}, {transform_indices = @transform_4, window_bounds = array<i64: 144>}, {transform_indices = @transform_5, window_bounds = array<i64: 16>}, {transform_indices = @transform_6, window_bounds = array<i64: 1, 16, 16, 16>}]} {
    %c0_i32 = arith.constant 0 : i32
    %c16_i32 = arith.constant 16 : i32
    %0 = arith.addi %c0_i32, %c16_i32 : i32
    %c1_i32 = arith.constant 1 : i32
    scf.for %arg9 = %c0_i32 to %0 step %c1_i32  : i32 {
      %c16_i32_1 = arith.constant 16 : i32
      %1 = arith.muli %arg1, %c16_i32_1 : i32
      %2 = arith.addi %1, %arg9 : i32
      %cst = arith.constant 0.000000e+00 : f32
      %3 = vector.broadcast %cst : f32 to vector<16x16xf32>
      %c0 = arith.constant 0 : index
      %4 = arith.index_cast %arg9 : i32 to index
      %c0_2 = arith.constant 0 : index
      %c0_3 = arith.constant 0 : index
      %5 = vector.load %arg2[%c0, %4, %c0_2, %c0_3] : memref<1x16x17x17xf32, #tpu.memory_space<vmem>>, vector<1x1x16x16xf32>
      %6 = vector.shape_cast %5 : vector<1x1x16x16xf32> to vector<16x16xf32>
      %c9_i32 = arith.constant 9 : i32
      %7 = arith.muli %2, %c9_i32 : i32
      %c0_i32_4 = arith.constant 0 : i32
      %8 = arith.addi %7, %c0_i32_4 : i32
      %c0_i32_5 = arith.constant 0 : i32
      %9 = arith.addi %8, %c0_i32_5 : i32
      %10 = arith.index_cast %9 : i32 to index
      %11 = memref.load %arg6[%10] : memref<144xf32, #tpu.memory_space<smem>>
      %12 = vector.broadcast %11 : f32 to vector<16x16xf32>
      %13 = arith.mulf %6, %12 : vector<16x16xf32>
      %14 = arith.addf %3, %13 : vector<16x16xf32>
      %c0_6 = arith.constant 0 : index
      %15 = arith.index_cast %arg9 : i32 to index
      %c0_7 = arith.constant 0 : index
      %c0_8 = arith.constant 0 : index
      %16 = vector.load %arg3[%c0_6, %15, %c0_7, %c0_8] : memref<1x16x17x17xf32, #tpu.memory_space<vmem>>, vector<1x1x16x16xf32>
      %17 = vector.shape_cast %16 : vector<1x1x16x16xf32> to vector<16x16xf32>
      %c9_i32_9 = arith.constant 9 : i32
      %18 = arith.muli %2, %c9_i32_9 : i32
      %c0_i32_10 = arith.constant 0 : i32
      %19 = arith.addi %18, %c0_i32_10 : i32
      %c1_i32_11 = arith.constant 1 : i32
      %20 = arith.addi %19, %c1_i32_11 : i32
      %21 = arith.index_cast %20 : i32 to index
      %22 = memref.load %arg6[%21] : memref<144xf32, #tpu.memory_space<smem>>
      %23 = vector.broadcast %22 : f32 to vector<16x16xf32>
      %24 = arith.mulf %17, %23 : vector<16x16xf32>
      %25 = arith.addf %14, %24 : vector<16x16xf32>
      %c0_12 = arith.constant 0 : index
      %26 = arith.index_cast %arg9 : i32 to index
      %c0_13 = arith.constant 0 : index
      %c1 = arith.constant 1 : index
      %27 = vector.load %arg2[%c0_12, %26, %c0_13, %c1] : memref<1x16x17x17xf32, #tpu.memory_space<vmem>>, vector<1x1x16x16xf32>
      %28 = vector.shape_cast %27 : vector<1x1x16x16xf32> to vector<16x16xf32>
      %c9_i32_14 = arith.constant 9 : i32
      %29 = arith.muli %2, %c9_i32_14 : i32
      %c0_i32_15 = arith.constant 0 : i32
      %30 = arith.addi %29, %c0_i32_15 : i32
      %c2_i32 = arith.constant 2 : i32
      %31 = arith.addi %30, %c2_i32 : i32
      %32 = arith.index_cast %31 : i32 to index
      %33 = memref.load %arg6[%32] : memref<144xf32, #tpu.memory_space<smem>>
      %34 = vector.broadcast %33 : f32 to vector<16x16xf32>
      %35 = arith.mulf %28, %34 : vector<16x16xf32>
      %36 = arith.addf %25, %35 : vector<16x16xf32>
      %c0_16 = arith.constant 0 : index
      %37 = arith.index_cast %arg9 : i32 to index
      %c0_17 = arith.constant 0 : index
      %c0_18 = arith.constant 0 : index
      %38 = vector.load %arg4[%c0_16, %37, %c0_17, %c0_18] : memref<1x16x17x17xf32, #tpu.memory_space<vmem>>, vector<1x1x16x16xf32>
      %39 = vector.shape_cast %38 : vector<1x1x16x16xf32> to vector<16x16xf32>
      %c9_i32_19 = arith.constant 9 : i32
      %40 = arith.muli %2, %c9_i32_19 : i32
      %c3_i32 = arith.constant 3 : i32
      %41 = arith.addi %40, %c3_i32 : i32
      %c0_i32_20 = arith.constant 0 : i32
      %42 = arith.addi %41, %c0_i32_20 : i32
      %43 = arith.index_cast %42 : i32 to index
      %44 = memref.load %arg6[%43] : memref<144xf32, #tpu.memory_space<smem>>
      %45 = vector.broadcast %44 : f32 to vector<16x16xf32>
      %46 = arith.mulf %39, %45 : vector<16x16xf32>
      %47 = arith.addf %36, %46 : vector<16x16xf32>
      %c0_21 = arith.constant 0 : index
      %48 = arith.index_cast %arg9 : i32 to index
      %c0_22 = arith.constant 0 : index
      %c0_23 = arith.constant 0 : index
      %49 = vector.load %arg5[%c0_21, %48, %c0_22, %c0_23] : memref<1x16x17x17xf32, #tpu.memory_space<vmem>>, vector<1x1x16x16xf32>
      %50 = vector.shape_cast %49 : vector<1x1x16x16xf32> to vector<16x16xf32>
      %c9_i32_24 = arith.constant 9 : i32
      %51 = arith.muli %2, %c9_i32_24 : i32
      %c3_i32_25 = arith.constant 3 : i32
      %52 = arith.addi %51, %c3_i32_25 : i32
      %c1_i32_26 = arith.constant 1 : i32
      %53 = arith.addi %52, %c1_i32_26 : i32
      %54 = arith.index_cast %53 : i32 to index
      %55 = memref.load %arg6[%54] : memref<144xf32, #tpu.memory_space<smem>>
      %56 = vector.broadcast %55 : f32 to vector<16x16xf32>
      %57 = arith.mulf %50, %56 : vector<16x16xf32>
      %58 = arith.addf %47, %57 : vector<16x16xf32>
      %c0_27 = arith.constant 0 : index
      %59 = arith.index_cast %arg9 : i32 to index
      %c0_28 = arith.constant 0 : index
      %c1_29 = arith.constant 1 : index
      %60 = vector.load %arg4[%c0_27, %59, %c0_28, %c1_29] : memref<1x16x17x17xf32, #tpu.memory_space<vmem>>, vector<1x1x16x16xf32>
      %61 = vector.shape_cast %60 : vector<1x1x16x16xf32> to vector<16x16xf32>
      %c9_i32_30 = arith.constant 9 : i32
      %62 = arith.muli %2, %c9_i32_30 : i32
      %c3_i32_31 = arith.constant 3 : i32
      %63 = arith.addi %62, %c3_i32_31 : i32
      %c2_i32_32 = arith.constant 2 : i32
      %64 = arith.addi %63, %c2_i32_32 : i32
      %65 = arith.index_cast %64 : i32 to index
      %66 = memref.load %arg6[%65] : memref<144xf32, #tpu.memory_space<smem>>
      %67 = vector.broadcast %66 : f32 to vector<16x16xf32>
      %68 = arith.mulf %61, %67 : vector<16x16xf32>
      %69 = arith.addf %58, %68 : vector<16x16xf32>
      %c0_33 = arith.constant 0 : index
      %70 = arith.index_cast %arg9 : i32 to index
      %c1_34 = arith.constant 1 : index
      %c0_35 = arith.constant 0 : index
      %71 = vector.load %arg2[%c0_33, %70, %c1_34, %c0_35] : memref<1x16x17x17xf32, #tpu.memory_space<vmem>>, vector<1x1x16x16xf32>
      %72 = vector.shape_cast %71 : vector<1x1x16x16xf32> to vector<16x16xf32>
      %c9_i32_36 = arith.constant 9 : i32
      %73 = arith.muli %2, %c9_i32_36 : i32
      %c6_i32 = arith.constant 6 : i32
      %74 = arith.addi %73, %c6_i32 : i32
      %c0_i32_37 = arith.constant 0 : i32
      %75 = arith.addi %74, %c0_i32_37 : i32
      %76 = arith.index_cast %75 : i32 to index
      %77 = memref.load %arg6[%76] : memref<144xf32, #tpu.memory_space<smem>>
      %78 = vector.broadcast %77 : f32 to vector<16x16xf32>
      %79 = arith.mulf %72, %78 : vector<16x16xf32>
      %80 = arith.addf %69, %79 : vector<16x16xf32>
      %c0_38 = arith.constant 0 : index
      %81 = arith.index_cast %arg9 : i32 to index
      %c1_39 = arith.constant 1 : index
      %c0_40 = arith.constant 0 : index
      %82 = vector.load %arg3[%c0_38, %81, %c1_39, %c0_40] : memref<1x16x17x17xf32, #tpu.memory_space<vmem>>, vector<1x1x16x16xf32>
      %83 = vector.shape_cast %82 : vector<1x1x16x16xf32> to vector<16x16xf32>
      %c9_i32_41 = arith.constant 9 : i32
      %84 = arith.muli %2, %c9_i32_41 : i32
      %c6_i32_42 = arith.constant 6 : i32
      %85 = arith.addi %84, %c6_i32_42 : i32
      %c1_i32_43 = arith.constant 1 : i32
      %86 = arith.addi %85, %c1_i32_43 : i32
      %87 = arith.index_cast %86 : i32 to index
      %88 = memref.load %arg6[%87] : memref<144xf32, #tpu.memory_space<smem>>
      %89 = vector.broadcast %88 : f32 to vector<16x16xf32>
      %90 = arith.mulf %83, %89 : vector<16x16xf32>
      %91 = arith.addf %80, %90 : vector<16x16xf32>
      %c0_44 = arith.constant 0 : index
      %92 = arith.index_cast %arg9 : i32 to index
      %c1_45 = arith.constant 1 : index
      %c1_46 = arith.constant 1 : index
      %93 = vector.load %arg2[%c0_44, %92, %c1_45, %c1_46] : memref<1x16x17x17xf32, #tpu.memory_space<vmem>>, vector<1x1x16x16xf32>
      %94 = vector.shape_cast %93 : vector<1x1x16x16xf32> to vector<16x16xf32>
      %c9_i32_47 = arith.constant 9 : i32
      %95 = arith.muli %2, %c9_i32_47 : i32
      %c6_i32_48 = arith.constant 6 : i32
      %96 = arith.addi %95, %c6_i32_48 : i32
      %c2_i32_49 = arith.constant 2 : i32
      %97 = arith.addi %96, %c2_i32_49 : i32
      %98 = arith.index_cast %97 : i32 to index
      %99 = memref.load %arg6[%98] : memref<144xf32, #tpu.memory_space<smem>>
      %100 = vector.broadcast %99 : f32 to vector<16x16xf32>
      %101 = arith.mulf %94, %100 : vector<16x16xf32>
      %102 = arith.addf %91, %101 : vector<16x16xf32>
      %103 = arith.index_cast %2 : i32 to index
      %104 = memref.load %arg7[%103] : memref<16xf32, #tpu.memory_space<smem>>
      %105 = vector.broadcast %104 : f32 to vector<16x16xf32>
      %106 = arith.addf %102, %105 : vector<16x16xf32>
      %cst_50 = arith.constant 0.000000e+00 : f32
      %107 = vector.broadcast %cst_50 : f32 to vector<16x16xf32>
      %108 = arith.cmpf oge, %106, %107 : vector<16x16xf32>
      %cst_51 = arith.constant 1.000000e-01 : f32
      %109 = vector.broadcast %cst_51 : f32 to vector<16x16xf32>
      %110 = arith.mulf %106, %109 : vector<16x16xf32>
      %111 = arith.select %108, %106, %110 : vector<16x16xi1>, vector<16x16xf32>
      %c0_52 = arith.constant 0 : index
      %112 = arith.index_cast %arg9 : i32 to index
      %c0_53 = arith.constant 0 : index
      %c0_54 = arith.constant 0 : index
      %113 = vector.load %arg8[%c0_52, %112, %c0_53, %c0_54] : memref<1x16x16x16xf32, #tpu.memory_space<vmem>>, vector<1x1x16x16xf32>
      %114 = vector.shape_cast %113 : vector<1x1x16x16xf32> to vector<16x16xf32>
      %115 = vector.shape_cast %111 : vector<16x16xf32> to vector<1x1x16x16xf32>
      tpu.vector_store %arg8[%c0_52, %112, %c0_53, %c0_54], %115 {strides = array<i32>} : memref<1x16x16x16xf32, #tpu.memory_space<vmem>>, vector<1x1x16x16xf32>,
    }
    %c16_i32_0 = arith.constant 16 : i32
    return
  }
  func.func @transform_0(%arg0: i32, %arg1: i32) -> (i32, i32, i32, i32) {
    %c0_i32 = arith.constant 0 : i32
    %c0_i32_0 = arith.constant 0 : i32
    %c0_i32_1 = arith.constant 0 : i32
    return %arg0, %arg1, %c0_i32, %c0_i32_0 : i32, i32, i32, i32
  }
  func.func @transform_1(%arg0: i32, %arg1: i32) -> (i32, i32, i32, i32) {
    %c0_i32 = arith.constant 0 : i32
    %c0_i32_0 = arith.constant 0 : i32
    %c0_i32_1 = arith.constant 0 : i32
    return %arg0, %arg1, %c0_i32, %c0_i32_0 : i32, i32, i32, i32
  }
  func.func @transform_2(%arg0: i32, %arg1: i32) -> (i32, i32, i32, i32) {
    %c0_i32 = arith.constant 0 : i32
    %c0_i32_0 = arith.constant 0 : i32
    %c0_i32_1 = arith.constant 0 : i32
    return %arg0, %arg1, %c0_i32, %c0_i32_0 : i32, i32, i32, i32
  }
  func.func @transform_3(%arg0: i32, %arg1: i32) -> (i32, i32, i32, i32) {
    %c0_i32 = arith.constant 0 : i32
    %c0_i32_0 = arith.constant 0 : i32
    %c0_i32_1 = arith.constant 0 : i32
    return %arg0, %arg1, %c0_i32, %c0_i32_0 : i32, i32, i32, i32
  }
  func.func @transform_4(%arg0: i32, %arg1: i32) -> i32 {
    %c0_i32 = arith.constant 0 : i32
    %c0_i32_0 = arith.constant 0 : i32
    return %c0_i32 : i32
  }
  func.func @transform_5(%arg0: i32, %arg1: i32) -> i32 {
    %c0_i32 = arith.constant 0 : i32
    %c0_i32_0 = arith.constant 0 : i32
    return %c0_i32 : i32
  }
  func.func @transform_6(%arg0: i32, %arg1: i32) -> (i32, i32, i32, i32) {
    %c0_i32 = arith.constant 0 : i32
    %c0_i32_0 = arith.constant 0 : i32
    %c0_i32_1 = arith.constant 0 : i32
    return %arg0, %arg1, %c0_i32, %c0_i32_0 : i32, i32, i32, i32
  }
}

module attributes {stable_mosaic.version = 11 : i64} {
  func.func @kernel(%arg0: i32, %arg1: i32, %arg2: memref<1x16x256xf32, #tpu.memory_space<vmem>>, %arg3: memref<32x16xf32, #tpu.memory_space<vmem>>, %arg4: memref<32x1xf32, #tpu.memory_space<vmem>>, %arg5: memref<1x32x256xf32, #tpu.memory_space<vmem>>) attributes {dimension_semantics = [#tpu.dimension_semantics<parallel>, #tpu.dimension_semantics<parallel>], iteration_bounds = array<i64: 2, 1>, scalar_prefetch = 0 : i64, scratch_operands = 0 : i64, tpu.core_type = #tpu.core_type<tc>, window_params = [{transform_indices = @transform_0, window_bounds = array<i64: 1, 16, 256>}, {pipeline_mode = #tpu.pipeline_mode<synchronous>, transform_indices = @transform_1, window_bounds = array<i64: 32, 16>}, {pipeline_mode = #tpu.pipeline_mode<synchronous>, transform_indices = @transform_2, window_bounds = array<i64: 32, 1>}, {transform_indices = @transform_3, window_bounds = array<i64: 1, 32, 256>}]} {
    %c0 = arith.constant 0 : index
    %c0_0 = arith.constant 0 : index
    %0 = vector.load %arg3[%c0, %c0_0] : memref<32x16xf32, #tpu.memory_space<vmem>>, vector<32x16xf32>
    %c0_1 = arith.constant 0 : index
    %c0_2 = arith.constant 0 : index
    %c0_3 = arith.constant 0 : index
    %1 = vector.load %arg2[%c0_1, %c0_2, %c0_3] : memref<1x16x256xf32, #tpu.memory_space<vmem>>, vector<1x16x256xf32>
    %2 = vector.shape_cast %1 : vector<1x16x256xf32> to vector<16x256xf32>
    %cst = arith.constant dense<0.000000e+00> : vector<32x256xf32>
    %3 = tpu.matmul %0, %2, %cst {dimension_numbers = #tpu.dot_dimension_numbers<[1], [0], [0], [1], [0, 0, 1, 1], [], []>} : vector<32x16xf32>, vector<16x256xf32>, vector<32x256xf32> -> vector<32x256xf32>
    %c0_4 = arith.constant 0 : index
    %c0_5 = arith.constant 0 : index
    %4 = vector.load %arg4[%c0_4, %c0_5] : memref<32x1xf32, #tpu.memory_space<vmem>>, vector<32x1xf32>
    %5 = vector.broadcast %4 : vector<32x1xf32> to vector<32x256xf32>
    %6 = arith.addf %3, %5 : vector<32x256xf32>
    %cst_6 = arith.constant 0.000000e+00 : f32
    %7 = vector.broadcast %cst_6 : f32 to vector<32x256xf32>
    %8 = arith.cmpf oge, %6, %7 : vector<32x256xf32>
    %cst_7 = arith.constant 1.000000e-01 : f32
    %9 = vector.broadcast %cst_7 : f32 to vector<32x256xf32>
    %10 = arith.mulf %6, %9 : vector<32x256xf32>
    %11 = arith.select %8, %6, %10 : vector<32x256xi1>, vector<32x256xf32>
    %c0_8 = arith.constant 0 : index
    %c0_9 = arith.constant 0 : index
    %c0_10 = arith.constant 0 : index
    %12 = vector.load %arg5[%c0_8, %c0_9, %c0_10] : memref<1x32x256xf32, #tpu.memory_space<vmem>>, vector<1x32x256xf32>
    %13 = vector.shape_cast %12 : vector<1x32x256xf32> to vector<32x256xf32>
    %14 = vector.shape_cast %11 : vector<32x256xf32> to vector<1x32x256xf32>
    tpu.vector_store %arg5[%c0_8, %c0_9, %c0_10], %14 {strides = array<i32>} : memref<1x32x256xf32, #tpu.memory_space<vmem>>, vector<1x32x256xf32>,
    return
  }
  func.func @transform_0(%arg0: i32, %arg1: i32) -> (i32, i32, i32) {
    %c0_i32 = arith.constant 0 : i32
    %c0_i32_0 = arith.constant 0 : i32
    return %arg0, %c0_i32, %arg1 : i32, i32, i32
  }
  func.func @transform_1(%arg0: i32, %arg1: i32) -> (i32, i32) {
    %c0_i32 = arith.constant 0 : i32
    %c0_i32_0 = arith.constant 0 : i32
    %c0_i32_1 = arith.constant 0 : i32
    return %c0_i32, %c0_i32_0 : i32, i32
  }
  func.func @transform_2(%arg0: i32, %arg1: i32) -> (i32, i32) {
    %c0_i32 = arith.constant 0 : i32
    %c0_i32_0 = arith.constant 0 : i32
    %c0_i32_1 = arith.constant 0 : i32
    return %c0_i32, %c0_i32_0 : i32, i32
  }
  func.func @transform_3(%arg0: i32, %arg1: i32) -> (i32, i32, i32) {
    %c0_i32 = arith.constant 0 : i32
    %c0_i32_0 = arith.constant 0 : i32
    return %arg0, %c0_i32, %arg1 : i32, i32, i32
  }
}

module attributes {stable_mosaic.version = 11 : i64} {
  func.func @kernel(%arg0: i32, %arg1: i32, %arg2: memref<1x32x18x18xf32, #tpu.memory_space<vmem>>, %arg3: memref<288xf32, #tpu.memory_space<smem>>, %arg4: memref<32xf32, #tpu.memory_space<smem>>, %arg5: memref<1x32x16x16xf32, #tpu.memory_space<vmem>>) attributes {dimension_semantics = [#tpu.dimension_semantics<parallel>, #tpu.dimension_semantics<parallel>], iteration_bounds = array<i64: 2, 1>, scalar_prefetch = 0 : i64, scratch_operands = 0 : i64, tpu.core_type = #tpu.core_type<tc>, window_params = [{transform_indices = @transform_0, window_bounds = array<i64: 1, 32, 18, 18>}, {transform_indices = @transform_1, window_bounds = array<i64: 288>}, {transform_indices = @transform_2, window_bounds = array<i64: 32>}, {transform_indices = @transform_3, window_bounds = array<i64: 1, 32, 16, 16>}]} {
    %c0_i32 = arith.constant 0 : i32
    %c32_i32 = arith.constant 32 : i32
    %0 = arith.addi %c0_i32, %c32_i32 : i32
    %c1_i32 = arith.constant 1 : i32
    scf.for %arg6 = %c0_i32 to %0 step %c1_i32  : i32 {
      %c32_i32_1 = arith.constant 32 : i32
      %1 = arith.muli %arg1, %c32_i32_1 : i32
      %2 = arith.addi %1, %arg6 : i32
      %cst = arith.constant 0.000000e+00 : f32
      %3 = vector.broadcast %cst : f32 to vector<16x16xf32>
      %c0 = arith.constant 0 : index
      %4 = arith.index_cast %arg6 : i32 to index
      %c0_2 = arith.constant 0 : index
      %c0_3 = arith.constant 0 : index
      %5 = vector.load %arg2[%c0, %4, %c0_2, %c0_3] : memref<1x32x18x18xf32, #tpu.memory_space<vmem>>, vector<1x1x16x16xf32>
      %6 = vector.shape_cast %5 : vector<1x1x16x16xf32> to vector<16x16xf32>
      %c9_i32 = arith.constant 9 : i32
      %7 = arith.muli %2, %c9_i32 : i32
      %c0_i32_4 = arith.constant 0 : i32
      %8 = arith.addi %7, %c0_i32_4 : i32
      %c0_i32_5 = arith.constant 0 : i32
      %9 = arith.addi %8, %c0_i32_5 : i32
      %10 = arith.index_cast %9 : i32 to index
      %11 = memref.load %arg3[%10] : memref<288xf32, #tpu.memory_space<smem>>
      %12 = vector.broadcast %11 : f32 to vector<16x16xf32>
      %13 = arith.mulf %6, %12 : vector<16x16xf32>
      %14 = arith.addf %3, %13 : vector<16x16xf32>
      %c0_6 = arith.constant 0 : index
      %15 = arith.index_cast %arg6 : i32 to index
      %c0_7 = arith.constant 0 : index
      %c1 = arith.constant 1 : index
      %16 = vector.load %arg2[%c0_6, %15, %c0_7, %c1] : memref<1x32x18x18xf32, #tpu.memory_space<vmem>>, vector<1x1x16x16xf32>
      %17 = vector.shape_cast %16 : vector<1x1x16x16xf32> to vector<16x16xf32>
      %c9_i32_8 = arith.constant 9 : i32
      %18 = arith.muli %2, %c9_i32_8 : i32
      %c0_i32_9 = arith.constant 0 : i32
      %19 = arith.addi %18, %c0_i32_9 : i32
      %c1_i32_10 = arith.constant 1 : i32
      %20 = arith.addi %19, %c1_i32_10 : i32
      %21 = arith.index_cast %20 : i32 to index
      %22 = memref.load %arg3[%21] : memref<288xf32, #tpu.memory_space<smem>>
      %23 = vector.broadcast %22 : f32 to vector<16x16xf32>
      %24 = arith.mulf %17, %23 : vector<16x16xf32>
      %25 = arith.addf %14, %24 : vector<16x16xf32>
      %c0_11 = arith.constant 0 : index
      %26 = arith.index_cast %arg6 : i32 to index
      %c0_12 = arith.constant 0 : index
      %c2 = arith.constant 2 : index
      %27 = vector.load %arg2[%c0_11, %26, %c0_12, %c2] : memref<1x32x18x18xf32, #tpu.memory_space<vmem>>, vector<1x1x16x16xf32>
      %28 = vector.shape_cast %27 : vector<1x1x16x16xf32> to vector<16x16xf32>
      %c9_i32_13 = arith.constant 9 : i32
      %29 = arith.muli %2, %c9_i32_13 : i32
      %c0_i32_14 = arith.constant 0 : i32
      %30 = arith.addi %29, %c0_i32_14 : i32
      %c2_i32 = arith.constant 2 : i32
      %31 = arith.addi %30, %c2_i32 : i32
      %32 = arith.index_cast %31 : i32 to index
      %33 = memref.load %arg3[%32] : memref<288xf32, #tpu.memory_space<smem>>
      %34 = vector.broadcast %33 : f32 to vector<16x16xf32>
      %35 = arith.mulf %28, %34 : vector<16x16xf32>
      %36 = arith.addf %25, %35 : vector<16x16xf32>
      %c0_15 = arith.constant 0 : index
      %37 = arith.index_cast %arg6 : i32 to index
      %c1_16 = arith.constant 1 : index
      %c0_17 = arith.constant 0 : index
      %38 = vector.load %arg2[%c0_15, %37, %c1_16, %c0_17] : memref<1x32x18x18xf32, #tpu.memory_space<vmem>>, vector<1x1x16x16xf32>
      %39 = vector.shape_cast %38 : vector<1x1x16x16xf32> to vector<16x16xf32>
      %c9_i32_18 = arith.constant 9 : i32
      %40 = arith.muli %2, %c9_i32_18 : i32
      %c3_i32 = arith.constant 3 : i32
      %41 = arith.addi %40, %c3_i32 : i32
      %c0_i32_19 = arith.constant 0 : i32
      %42 = arith.addi %41, %c0_i32_19 : i32
      %43 = arith.index_cast %42 : i32 to index
      %44 = memref.load %arg3[%43] : memref<288xf32, #tpu.memory_space<smem>>
      %45 = vector.broadcast %44 : f32 to vector<16x16xf32>
      %46 = arith.mulf %39, %45 : vector<16x16xf32>
      %47 = arith.addf %36, %46 : vector<16x16xf32>
      %c0_20 = arith.constant 0 : index
      %48 = arith.index_cast %arg6 : i32 to index
      %c1_21 = arith.constant 1 : index
      %c1_22 = arith.constant 1 : index
      %49 = vector.load %arg2[%c0_20, %48, %c1_21, %c1_22] : memref<1x32x18x18xf32, #tpu.memory_space<vmem>>, vector<1x1x16x16xf32>
      %50 = vector.shape_cast %49 : vector<1x1x16x16xf32> to vector<16x16xf32>
      %c9_i32_23 = arith.constant 9 : i32
      %51 = arith.muli %2, %c9_i32_23 : i32
      %c3_i32_24 = arith.constant 3 : i32
      %52 = arith.addi %51, %c3_i32_24 : i32
      %c1_i32_25 = arith.constant 1 : i32
      %53 = arith.addi %52, %c1_i32_25 : i32
      %54 = arith.index_cast %53 : i32 to index
      %55 = memref.load %arg3[%54] : memref<288xf32, #tpu.memory_space<smem>>
      %56 = vector.broadcast %55 : f32 to vector<16x16xf32>
      %57 = arith.mulf %50, %56 : vector<16x16xf32>
      %58 = arith.addf %47, %57 : vector<16x16xf32>
      %c0_26 = arith.constant 0 : index
      %59 = arith.index_cast %arg6 : i32 to index
      %c1_27 = arith.constant 1 : index
      %c2_28 = arith.constant 2 : index
      %60 = vector.load %arg2[%c0_26, %59, %c1_27, %c2_28] : memref<1x32x18x18xf32, #tpu.memory_space<vmem>>, vector<1x1x16x16xf32>
      %61 = vector.shape_cast %60 : vector<1x1x16x16xf32> to vector<16x16xf32>
      %c9_i32_29 = arith.constant 9 : i32
      %62 = arith.muli %2, %c9_i32_29 : i32
      %c3_i32_30 = arith.constant 3 : i32
      %63 = arith.addi %62, %c3_i32_30 : i32
      %c2_i32_31 = arith.constant 2 : i32
      %64 = arith.addi %63, %c2_i32_31 : i32
      %65 = arith.index_cast %64 : i32 to index
      %66 = memref.load %arg3[%65] : memref<288xf32, #tpu.memory_space<smem>>
      %67 = vector.broadcast %66 : f32 to vector<16x16xf32>
      %68 = arith.mulf %61, %67 : vector<16x16xf32>
      %69 = arith.addf %58, %68 : vector<16x16xf32>
      %c0_32 = arith.constant 0 : index
      %70 = arith.index_cast %arg6 : i32 to index
      %c2_33 = arith.constant 2 : index
      %c0_34 = arith.constant 0 : index
      %71 = vector.load %arg2[%c0_32, %70, %c2_33, %c0_34] : memref<1x32x18x18xf32, #tpu.memory_space<vmem>>, vector<1x1x16x16xf32>
      %72 = vector.shape_cast %71 : vector<1x1x16x16xf32> to vector<16x16xf32>
      %c9_i32_35 = arith.constant 9 : i32
      %73 = arith.muli %2, %c9_i32_35 : i32
      %c6_i32 = arith.constant 6 : i32
      %74 = arith.addi %73, %c6_i32 : i32
      %c0_i32_36 = arith.constant 0 : i32
      %75 = arith.addi %74, %c0_i32_36 : i32
      %76 = arith.index_cast %75 : i32 to index
      %77 = memref.load %arg3[%76] : memref<288xf32, #tpu.memory_space<smem>>
      %78 = vector.broadcast %77 : f32 to vector<16x16xf32>
      %79 = arith.mulf %72, %78 : vector<16x16xf32>
      %80 = arith.addf %69, %79 : vector<16x16xf32>
      %c0_37 = arith.constant 0 : index
      %81 = arith.index_cast %arg6 : i32 to index
      %c2_38 = arith.constant 2 : index
      %c1_39 = arith.constant 1 : index
      %82 = vector.load %arg2[%c0_37, %81, %c2_38, %c1_39] : memref<1x32x18x18xf32, #tpu.memory_space<vmem>>, vector<1x1x16x16xf32>
      %83 = vector.shape_cast %82 : vector<1x1x16x16xf32> to vector<16x16xf32>
      %c9_i32_40 = arith.constant 9 : i32
      %84 = arith.muli %2, %c9_i32_40 : i32
      %c6_i32_41 = arith.constant 6 : i32
      %85 = arith.addi %84, %c6_i32_41 : i32
      %c1_i32_42 = arith.constant 1 : i32
      %86 = arith.addi %85, %c1_i32_42 : i32
      %87 = arith.index_cast %86 : i32 to index
      %88 = memref.load %arg3[%87] : memref<288xf32, #tpu.memory_space<smem>>
      %89 = vector.broadcast %88 : f32 to vector<16x16xf32>
      %90 = arith.mulf %83, %89 : vector<16x16xf32>
      %91 = arith.addf %80, %90 : vector<16x16xf32>
      %c0_43 = arith.constant 0 : index
      %92 = arith.index_cast %arg6 : i32 to index
      %c2_44 = arith.constant 2 : index
      %c2_45 = arith.constant 2 : index
      %93 = vector.load %arg2[%c0_43, %92, %c2_44, %c2_45] : memref<1x32x18x18xf32, #tpu.memory_space<vmem>>, vector<1x1x16x16xf32>
      %94 = vector.shape_cast %93 : vector<1x1x16x16xf32> to vector<16x16xf32>
      %c9_i32_46 = arith.constant 9 : i32
      %95 = arith.muli %2, %c9_i32_46 : i32
      %c6_i32_47 = arith.constant 6 : i32
      %96 = arith.addi %95, %c6_i32_47 : i32
      %c2_i32_48 = arith.constant 2 : i32
      %97 = arith.addi %96, %c2_i32_48 : i32
      %98 = arith.index_cast %97 : i32 to index
      %99 = memref.load %arg3[%98] : memref<288xf32, #tpu.memory_space<smem>>
      %100 = vector.broadcast %99 : f32 to vector<16x16xf32>
      %101 = arith.mulf %94, %100 : vector<16x16xf32>
      %102 = arith.addf %91, %101 : vector<16x16xf32>
      %103 = arith.index_cast %2 : i32 to index
      %104 = memref.load %arg4[%103] : memref<32xf32, #tpu.memory_space<smem>>
      %105 = vector.broadcast %104 : f32 to vector<16x16xf32>
      %106 = arith.addf %102, %105 : vector<16x16xf32>
      %cst_49 = arith.constant 0.000000e+00 : f32
      %107 = vector.broadcast %cst_49 : f32 to vector<16x16xf32>
      %108 = arith.cmpf oge, %106, %107 : vector<16x16xf32>
      %cst_50 = arith.constant 1.000000e-01 : f32
      %109 = vector.broadcast %cst_50 : f32 to vector<16x16xf32>
      %110 = arith.mulf %106, %109 : vector<16x16xf32>
      %111 = arith.select %108, %106, %110 : vector<16x16xi1>, vector<16x16xf32>
      %c0_51 = arith.constant 0 : index
      %112 = arith.index_cast %arg6 : i32 to index
      %c0_52 = arith.constant 0 : index
      %c0_53 = arith.constant 0 : index
      %113 = vector.load %arg5[%c0_51, %112, %c0_52, %c0_53] : memref<1x32x16x16xf32, #tpu.memory_space<vmem>>, vector<1x1x16x16xf32>
      %114 = vector.shape_cast %113 : vector<1x1x16x16xf32> to vector<16x16xf32>
      %115 = vector.shape_cast %111 : vector<16x16xf32> to vector<1x1x16x16xf32>
      tpu.vector_store %arg5[%c0_51, %112, %c0_52, %c0_53], %115 {strides = array<i32>} : memref<1x32x16x16xf32, #tpu.memory_space<vmem>>, vector<1x1x16x16xf32>,
    }
    %c32_i32_0 = arith.constant 32 : i32
    return
  }
  func.func @transform_0(%arg0: i32, %arg1: i32) -> (i32, i32, i32, i32) {
    %c0_i32 = arith.constant 0 : i32
    %c0_i32_0 = arith.constant 0 : i32
    %c0_i32_1 = arith.constant 0 : i32
    return %arg0, %arg1, %c0_i32, %c0_i32_0 : i32, i32, i32, i32
  }
  func.func @transform_1(%arg0: i32, %arg1: i32) -> i32 {
    %c0_i32 = arith.constant 0 : i32
    %c0_i32_0 = arith.constant 0 : i32
    return %c0_i32 : i32
  }
  func.func @transform_2(%arg0: i32, %arg1: i32) -> i32 {
    %c0_i32 = arith.constant 0 : i32
    %c0_i32_0 = arith.constant 0 : i32
    return %c0_i32 : i32
  }
  func.func @transform_3(%arg0: i32, %arg1: i32) -> (i32, i32, i32, i32) {
    %c0_i32 = arith.constant 0 : i32
    %c0_i32_0 = arith.constant 0 : i32
    %c0_i32_1 = arith.constant 0 : i32
    return %arg0, %arg1, %c0_i32, %c0_i32_0 : i32, i32, i32, i32
  }
}

module attributes {stable_mosaic.version = 11 : i64} {
  func.func @kernel(%arg0: i32, %arg1: i32, %arg2: memref<1x32x256xf32, #tpu.memory_space<vmem>>, %arg3: memref<32x32xf32, #tpu.memory_space<vmem>>, %arg4: memref<32x1xf32, #tpu.memory_space<vmem>>, %arg5: memref<1x32x256xf32, #tpu.memory_space<vmem>>) attributes {dimension_semantics = [#tpu.dimension_semantics<parallel>, #tpu.dimension_semantics<parallel>], iteration_bounds = array<i64: 2, 1>, scalar_prefetch = 0 : i64, scratch_operands = 0 : i64, tpu.core_type = #tpu.core_type<tc>, window_params = [{transform_indices = @transform_0, window_bounds = array<i64: 1, 32, 256>}, {pipeline_mode = #tpu.pipeline_mode<synchronous>, transform_indices = @transform_1, window_bounds = array<i64: 32, 32>}, {pipeline_mode = #tpu.pipeline_mode<synchronous>, transform_indices = @transform_2, window_bounds = array<i64: 32, 1>}, {transform_indices = @transform_3, window_bounds = array<i64: 1, 32, 256>}]} {
    %c0 = arith.constant 0 : index
    %c0_0 = arith.constant 0 : index
    %0 = vector.load %arg3[%c0, %c0_0] : memref<32x32xf32, #tpu.memory_space<vmem>>, vector<32x32xf32>
    %c0_1 = arith.constant 0 : index
    %c0_2 = arith.constant 0 : index
    %c0_3 = arith.constant 0 : index
    %1 = vector.load %arg2[%c0_1, %c0_2, %c0_3] : memref<1x32x256xf32, #tpu.memory_space<vmem>>, vector<1x32x256xf32>
    %2 = vector.shape_cast %1 : vector<1x32x256xf32> to vector<32x256xf32>
    %cst = arith.constant dense<0.000000e+00> : vector<32x256xf32>
    %3 = tpu.matmul %0, %2, %cst {dimension_numbers = #tpu.dot_dimension_numbers<[1], [0], [0], [1], [0, 0, 1, 1], [], []>} : vector<32x32xf32>, vector<32x256xf32>, vector<32x256xf32> -> vector<32x256xf32>
    %c0_4 = arith.constant 0 : index
    %c0_5 = arith.constant 0 : index
    %4 = vector.load %arg4[%c0_4, %c0_5] : memref<32x1xf32, #tpu.memory_space<vmem>>, vector<32x1xf32>
    %5 = vector.broadcast %4 : vector<32x1xf32> to vector<32x256xf32>
    %6 = arith.addf %3, %5 : vector<32x256xf32>
    %cst_6 = arith.constant 0.000000e+00 : f32
    %7 = vector.broadcast %cst_6 : f32 to vector<32x256xf32>
    %8 = arith.cmpf oge, %6, %7 : vector<32x256xf32>
    %cst_7 = arith.constant 1.000000e-01 : f32
    %9 = vector.broadcast %cst_7 : f32 to vector<32x256xf32>
    %10 = arith.mulf %6, %9 : vector<32x256xf32>
    %11 = arith.select %8, %6, %10 : vector<32x256xi1>, vector<32x256xf32>
    %c0_8 = arith.constant 0 : index
    %c0_9 = arith.constant 0 : index
    %c0_10 = arith.constant 0 : index
    %12 = vector.load %arg5[%c0_8, %c0_9, %c0_10] : memref<1x32x256xf32, #tpu.memory_space<vmem>>, vector<1x32x256xf32>
    %13 = vector.shape_cast %12 : vector<1x32x256xf32> to vector<32x256xf32>
    %14 = vector.shape_cast %11 : vector<32x256xf32> to vector<1x32x256xf32>
    tpu.vector_store %arg5[%c0_8, %c0_9, %c0_10], %14 {strides = array<i32>} : memref<1x32x256xf32, #tpu.memory_space<vmem>>, vector<1x32x256xf32>,
    return
  }
  func.func @transform_0(%arg0: i32, %arg1: i32) -> (i32, i32, i32) {
    %c0_i32 = arith.constant 0 : i32
    %c0_i32_0 = arith.constant 0 : i32
    return %arg0, %c0_i32, %arg1 : i32, i32, i32
  }
  func.func @transform_1(%arg0: i32, %arg1: i32) -> (i32, i32) {
    %c0_i32 = arith.constant 0 : i32
    %c0_i32_0 = arith.constant 0 : i32
    %c0_i32_1 = arith.constant 0 : i32
    return %c0_i32, %c0_i32_0 : i32, i32
  }
  func.func @transform_2(%arg0: i32, %arg1: i32) -> (i32, i32) {
    %c0_i32 = arith.constant 0 : i32
    %c0_i32_0 = arith.constant 0 : i32
    %c0_i32_1 = arith.constant 0 : i32
    return %c0_i32, %c0_i32_0 : i32, i32
  }
  func.func @transform_3(%arg0: i32, %arg1: i32) -> (i32, i32, i32) {
    %c0_i32 = arith.constant 0 : i32
    %c0_i32_0 = arith.constant 0 : i32
    return %arg0, %c0_i32, %arg1 : i32, i32, i32
  }
}

module attributes {stable_mosaic.version = 11 : i64} {
  func.func @kernel(%arg0: i32, %arg1: i32, %arg2: memref<1x32x9x9xf32, #tpu.memory_space<vmem>>, %arg3: memref<1x32x9x9xf32, #tpu.memory_space<vmem>>, %arg4: memref<1x32x9x9xf32, #tpu.memory_space<vmem>>, %arg5: memref<1x32x9x9xf32, #tpu.memory_space<vmem>>, %arg6: memref<288xf32, #tpu.memory_space<smem>>, %arg7: memref<32xf32, #tpu.memory_space<smem>>, %arg8: memref<1x32x8x8xf32, #tpu.memory_space<vmem>>) attributes {dimension_semantics = [#tpu.dimension_semantics<parallel>, #tpu.dimension_semantics<parallel>], iteration_bounds = array<i64: 2, 1>, scalar_prefetch = 0 : i64, scratch_operands = 0 : i64, tpu.core_type = #tpu.core_type<tc>, window_params = [{transform_indices = @transform_0, window_bounds = array<i64: 1, 32, 9, 9>}, {transform_indices = @transform_1, window_bounds = array<i64: 1, 32, 9, 9>}, {transform_indices = @transform_2, window_bounds = array<i64: 1, 32, 9, 9>}, {transform_indices = @transform_3, window_bounds = array<i64: 1, 32, 9, 9>}, {transform_indices = @transform_4, window_bounds = array<i64: 288>}, {transform_indices = @transform_5, window_bounds = array<i64: 32>}, {transform_indices = @transform_6, window_bounds = array<i64: 1, 32, 8, 8>}]} {
    %c0_i32 = arith.constant 0 : i32
    %c32_i32 = arith.constant 32 : i32
    %0 = arith.addi %c0_i32, %c32_i32 : i32
    %c1_i32 = arith.constant 1 : i32
    scf.for %arg9 = %c0_i32 to %0 step %c1_i32  : i32 {
      %c32_i32_1 = arith.constant 32 : i32
      %1 = arith.muli %arg1, %c32_i32_1 : i32
      %2 = arith.addi %1, %arg9 : i32
      %cst = arith.constant 0.000000e+00 : f32
      %3 = vector.broadcast %cst : f32 to vector<8x8xf32>
      %c0 = arith.constant 0 : index
      %4 = arith.index_cast %arg9 : i32 to index
      %c0_2 = arith.constant 0 : index
      %c0_3 = arith.constant 0 : index
      %5 = vector.load %arg2[%c0, %4, %c0_2, %c0_3] : memref<1x32x9x9xf32, #tpu.memory_space<vmem>>, vector<1x1x8x8xf32>
      %6 = vector.shape_cast %5 : vector<1x1x8x8xf32> to vector<8x8xf32>
      %c9_i32 = arith.constant 9 : i32
      %7 = arith.muli %2, %c9_i32 : i32
      %c0_i32_4 = arith.constant 0 : i32
      %8 = arith.addi %7, %c0_i32_4 : i32
      %c0_i32_5 = arith.constant 0 : i32
      %9 = arith.addi %8, %c0_i32_5 : i32
      %10 = arith.index_cast %9 : i32 to index
      %11 = memref.load %arg6[%10] : memref<288xf32, #tpu.memory_space<smem>>
      %12 = vector.broadcast %11 : f32 to vector<8x8xf32>
      %13 = arith.mulf %6, %12 : vector<8x8xf32>
      %14 = arith.addf %3, %13 : vector<8x8xf32>
      %c0_6 = arith.constant 0 : index
      %15 = arith.index_cast %arg9 : i32 to index
      %c0_7 = arith.constant 0 : index
      %c0_8 = arith.constant 0 : index
      %16 = vector.load %arg3[%c0_6, %15, %c0_7, %c0_8] : memref<1x32x9x9xf32, #tpu.memory_space<vmem>>, vector<1x1x8x8xf32>
      %17 = vector.shape_cast %16 : vector<1x1x8x8xf32> to vector<8x8xf32>
      %c9_i32_9 = arith.constant 9 : i32
      %18 = arith.muli %2, %c9_i32_9 : i32
      %c0_i32_10 = arith.constant 0 : i32
      %19 = arith.addi %18, %c0_i32_10 : i32
      %c1_i32_11 = arith.constant 1 : i32
      %20 = arith.addi %19, %c1_i32_11 : i32
      %21 = arith.index_cast %20 : i32 to index
      %22 = memref.load %arg6[%21] : memref<288xf32, #tpu.memory_space<smem>>
      %23 = vector.broadcast %22 : f32 to vector<8x8xf32>
      %24 = arith.mulf %17, %23 : vector<8x8xf32>
      %25 = arith.addf %14, %24 : vector<8x8xf32>
      %c0_12 = arith.constant 0 : index
      %26 = arith.index_cast %arg9 : i32 to index
      %c0_13 = arith.constant 0 : index
      %c1 = arith.constant 1 : index
      %27 = vector.load %arg2[%c0_12, %26, %c0_13, %c1] : memref<1x32x9x9xf32, #tpu.memory_space<vmem>>, vector<1x1x8x8xf32>
      %28 = vector.shape_cast %27 : vector<1x1x8x8xf32> to vector<8x8xf32>
      %c9_i32_14 = arith.constant 9 : i32
      %29 = arith.muli %2, %c9_i32_14 : i32
      %c0_i32_15 = arith.constant 0 : i32
      %30 = arith.addi %29, %c0_i32_15 : i32
      %c2_i32 = arith.constant 2 : i32
      %31 = arith.addi %30, %c2_i32 : i32
      %32 = arith.index_cast %31 : i32 to index
      %33 = memref.load %arg6[%32] : memref<288xf32, #tpu.memory_space<smem>>
      %34 = vector.broadcast %33 : f32 to vector<8x8xf32>
      %35 = arith.mulf %28, %34 : vector<8x8xf32>
      %36 = arith.addf %25, %35 : vector<8x8xf32>
      %c0_16 = arith.constant 0 : index
      %37 = arith.index_cast %arg9 : i32 to index
      %c0_17 = arith.constant 0 : index
      %c0_18 = arith.constant 0 : index
      %38 = vector.load %arg4[%c0_16, %37, %c0_17, %c0_18] : memref<1x32x9x9xf32, #tpu.memory_space<vmem>>, vector<1x1x8x8xf32>
      %39 = vector.shape_cast %38 : vector<1x1x8x8xf32> to vector<8x8xf32>
      %c9_i32_19 = arith.constant 9 : i32
      %40 = arith.muli %2, %c9_i32_19 : i32
      %c3_i32 = arith.constant 3 : i32
      %41 = arith.addi %40, %c3_i32 : i32
      %c0_i32_20 = arith.constant 0 : i32
      %42 = arith.addi %41, %c0_i32_20 : i32
      %43 = arith.index_cast %42 : i32 to index
      %44 = memref.load %arg6[%43] : memref<288xf32, #tpu.memory_space<smem>>
      %45 = vector.broadcast %44 : f32 to vector<8x8xf32>
      %46 = arith.mulf %39, %45 : vector<8x8xf32>
      %47 = arith.addf %36, %46 : vector<8x8xf32>
      %c0_21 = arith.constant 0 : index
      %48 = arith.index_cast %arg9 : i32 to index
      %c0_22 = arith.constant 0 : index
      %c0_23 = arith.constant 0 : index
      %49 = vector.load %arg5[%c0_21, %48, %c0_22, %c0_23] : memref<1x32x9x9xf32, #tpu.memory_space<vmem>>, vector<1x1x8x8xf32>
      %50 = vector.shape_cast %49 : vector<1x1x8x8xf32> to vector<8x8xf32>
      %c9_i32_24 = arith.constant 9 : i32
      %51 = arith.muli %2, %c9_i32_24 : i32
      %c3_i32_25 = arith.constant 3 : i32
      %52 = arith.addi %51, %c3_i32_25 : i32
      %c1_i32_26 = arith.constant 1 : i32
      %53 = arith.addi %52, %c1_i32_26 : i32
      %54 = arith.index_cast %53 : i32 to index
      %55 = memref.load %arg6[%54] : memref<288xf32, #tpu.memory_space<smem>>
      %56 = vector.broadcast %55 : f32 to vector<8x8xf32>
      %57 = arith.mulf %50, %56 : vector<8x8xf32>
      %58 = arith.addf %47, %57 : vector<8x8xf32>
      %c0_27 = arith.constant 0 : index
      %59 = arith.index_cast %arg9 : i32 to index
      %c0_28 = arith.constant 0 : index
      %c1_29 = arith.constant 1 : index
      %60 = vector.load %arg4[%c0_27, %59, %c0_28, %c1_29] : memref<1x32x9x9xf32, #tpu.memory_space<vmem>>, vector<1x1x8x8xf32>
      %61 = vector.shape_cast %60 : vector<1x1x8x8xf32> to vector<8x8xf32>
      %c9_i32_30 = arith.constant 9 : i32
      %62 = arith.muli %2, %c9_i32_30 : i32
      %c3_i32_31 = arith.constant 3 : i32
      %63 = arith.addi %62, %c3_i32_31 : i32
      %c2_i32_32 = arith.constant 2 : i32
      %64 = arith.addi %63, %c2_i32_32 : i32
      %65 = arith.index_cast %64 : i32 to index
      %66 = memref.load %arg6[%65] : memref<288xf32, #tpu.memory_space<smem>>
      %67 = vector.broadcast %66 : f32 to vector<8x8xf32>
      %68 = arith.mulf %61, %67 : vector<8x8xf32>
      %69 = arith.addf %58, %68 : vector<8x8xf32>
      %c0_33 = arith.constant 0 : index
      %70 = arith.index_cast %arg9 : i32 to index
      %c1_34 = arith.constant 1 : index
      %c0_35 = arith.constant 0 : index
      %71 = vector.load %arg2[%c0_33, %70, %c1_34, %c0_35] : memref<1x32x9x9xf32, #tpu.memory_space<vmem>>, vector<1x1x8x8xf32>
      %72 = vector.shape_cast %71 : vector<1x1x8x8xf32> to vector<8x8xf32>
      %c9_i32_36 = arith.constant 9 : i32
      %73 = arith.muli %2, %c9_i32_36 : i32
      %c6_i32 = arith.constant 6 : i32
      %74 = arith.addi %73, %c6_i32 : i32
      %c0_i32_37 = arith.constant 0 : i32
      %75 = arith.addi %74, %c0_i32_37 : i32
      %76 = arith.index_cast %75 : i32 to index
      %77 = memref.load %arg6[%76] : memref<288xf32, #tpu.memory_space<smem>>
      %78 = vector.broadcast %77 : f32 to vector<8x8xf32>
      %79 = arith.mulf %72, %78 : vector<8x8xf32>
      %80 = arith.addf %69, %79 : vector<8x8xf32>
      %c0_38 = arith.constant 0 : index
      %81 = arith.index_cast %arg9 : i32 to index
      %c1_39 = arith.constant 1 : index
      %c0_40 = arith.constant 0 : index
      %82 = vector.load %arg3[%c0_38, %81, %c1_39, %c0_40] : memref<1x32x9x9xf32, #tpu.memory_space<vmem>>, vector<1x1x8x8xf32>
      %83 = vector.shape_cast %82 : vector<1x1x8x8xf32> to vector<8x8xf32>
      %c9_i32_41 = arith.constant 9 : i32
      %84 = arith.muli %2, %c9_i32_41 : i32
      %c6_i32_42 = arith.constant 6 : i32
      %85 = arith.addi %84, %c6_i32_42 : i32
      %c1_i32_43 = arith.constant 1 : i32
      %86 = arith.addi %85, %c1_i32_43 : i32
      %87 = arith.index_cast %86 : i32 to index
      %88 = memref.load %arg6[%87] : memref<288xf32, #tpu.memory_space<smem>>
      %89 = vector.broadcast %88 : f32 to vector<8x8xf32>
      %90 = arith.mulf %83, %89 : vector<8x8xf32>
      %91 = arith.addf %80, %90 : vector<8x8xf32>
      %c0_44 = arith.constant 0 : index
      %92 = arith.index_cast %arg9 : i32 to index
      %c1_45 = arith.constant 1 : index
      %c1_46 = arith.constant 1 : index
      %93 = vector.load %arg2[%c0_44, %92, %c1_45, %c1_46] : memref<1x32x9x9xf32, #tpu.memory_space<vmem>>, vector<1x1x8x8xf32>
      %94 = vector.shape_cast %93 : vector<1x1x8x8xf32> to vector<8x8xf32>
      %c9_i32_47 = arith.constant 9 : i32
      %95 = arith.muli %2, %c9_i32_47 : i32
      %c6_i32_48 = arith.constant 6 : i32
      %96 = arith.addi %95, %c6_i32_48 : i32
      %c2_i32_49 = arith.constant 2 : i32
      %97 = arith.addi %96, %c2_i32_49 : i32
      %98 = arith.index_cast %97 : i32 to index
      %99 = memref.load %arg6[%98] : memref<288xf32, #tpu.memory_space<smem>>
      %100 = vector.broadcast %99 : f32 to vector<8x8xf32>
      %101 = arith.mulf %94, %100 : vector<8x8xf32>
      %102 = arith.addf %91, %101 : vector<8x8xf32>
      %103 = arith.index_cast %2 : i32 to index
      %104 = memref.load %arg7[%103] : memref<32xf32, #tpu.memory_space<smem>>
      %105 = vector.broadcast %104 : f32 to vector<8x8xf32>
      %106 = arith.addf %102, %105 : vector<8x8xf32>
      %cst_50 = arith.constant 0.000000e+00 : f32
      %107 = vector.broadcast %cst_50 : f32 to vector<8x8xf32>
      %108 = arith.cmpf oge, %106, %107 : vector<8x8xf32>
      %cst_51 = arith.constant 1.000000e-01 : f32
      %109 = vector.broadcast %cst_51 : f32 to vector<8x8xf32>
      %110 = arith.mulf %106, %109 : vector<8x8xf32>
      %111 = arith.select %108, %106, %110 : vector<8x8xi1>, vector<8x8xf32>
      %c0_52 = arith.constant 0 : index
      %112 = arith.index_cast %arg9 : i32 to index
      %c0_53 = arith.constant 0 : index
      %c0_54 = arith.constant 0 : index
      %113 = vector.load %arg8[%c0_52, %112, %c0_53, %c0_54] : memref<1x32x8x8xf32, #tpu.memory_space<vmem>>, vector<1x1x8x8xf32>
      %114 = vector.shape_cast %113 : vector<1x1x8x8xf32> to vector<8x8xf32>
      %115 = vector.shape_cast %111 : vector<8x8xf32> to vector<1x1x8x8xf32>
      tpu.vector_store %arg8[%c0_52, %112, %c0_53, %c0_54], %115 {strides = array<i32>} : memref<1x32x8x8xf32, #tpu.memory_space<vmem>>, vector<1x1x8x8xf32>,
    }
    %c32_i32_0 = arith.constant 32 : i32
    return
  }
  func.func @transform_0(%arg0: i32, %arg1: i32) -> (i32, i32, i32, i32) {
    %c0_i32 = arith.constant 0 : i32
    %c0_i32_0 = arith.constant 0 : i32
    %c0_i32_1 = arith.constant 0 : i32
    return %arg0, %arg1, %c0_i32, %c0_i32_0 : i32, i32, i32, i32
  }
  func.func @transform_1(%arg0: i32, %arg1: i32) -> (i32, i32, i32, i32) {
    %c0_i32 = arith.constant 0 : i32
    %c0_i32_0 = arith.constant 0 : i32
    %c0_i32_1 = arith.constant 0 : i32
    return %arg0, %arg1, %c0_i32, %c0_i32_0 : i32, i32, i32, i32
  }
  func.func @transform_2(%arg0: i32, %arg1: i32) -> (i32, i32, i32, i32) {
    %c0_i32 = arith.constant 0 : i32
    %c0_i32_0 = arith.constant 0 : i32
    %c0_i32_1 = arith.constant 0 : i32
    return %arg0, %arg1, %c0_i32, %c0_i32_0 : i32, i32, i32, i32
  }
  func.func @transform_3(%arg0: i32, %arg1: i32) -> (i32, i32, i32, i32) {
    %c0_i32 = arith.constant 0 : i32
    %c0_i32_0 = arith.constant 0 : i32
    %c0_i32_1 = arith.constant 0 : i32
    return %arg0, %arg1, %c0_i32, %c0_i32_0 : i32, i32, i32, i32
  }
  func.func @transform_4(%arg0: i32, %arg1: i32) -> i32 {
    %c0_i32 = arith.constant 0 : i32
    %c0_i32_0 = arith.constant 0 : i32
    return %c0_i32 : i32
  }
  func.func @transform_5(%arg0: i32, %arg1: i32) -> i32 {
    %c0_i32 = arith.constant 0 : i32
    %c0_i32_0 = arith.constant 0 : i32
    return %c0_i32 : i32
  }
  func.func @transform_6(%arg0: i32, %arg1: i32) -> (i32, i32, i32, i32) {
    %c0_i32 = arith.constant 0 : i32
    %c0_i32_0 = arith.constant 0 : i32
    %c0_i32_1 = arith.constant 0 : i32
    return %arg0, %arg1, %c0_i32, %c0_i32_0 : i32, i32, i32, i32
  }
}

module attributes {stable_mosaic.version = 11 : i64} {
  func.func @kernel(%arg0: i32, %arg1: i32, %arg2: memref<1x32x64xf32, #tpu.memory_space<vmem>>, %arg3: memref<64x32xf32, #tpu.memory_space<vmem>>, %arg4: memref<64x1xf32, #tpu.memory_space<vmem>>, %arg5: memref<1x64x64xf32, #tpu.memory_space<vmem>>) attributes {dimension_semantics = [#tpu.dimension_semantics<parallel>, #tpu.dimension_semantics<parallel>], iteration_bounds = array<i64: 2, 1>, scalar_prefetch = 0 : i64, scratch_operands = 0 : i64, tpu.core_type = #tpu.core_type<tc>, window_params = [{transform_indices = @transform_0, window_bounds = array<i64: 1, 32, 64>}, {pipeline_mode = #tpu.pipeline_mode<synchronous>, transform_indices = @transform_1, window_bounds = array<i64: 64, 32>}, {pipeline_mode = #tpu.pipeline_mode<synchronous>, transform_indices = @transform_2, window_bounds = array<i64: 64, 1>}, {transform_indices = @transform_3, window_bounds = array<i64: 1, 64, 64>}]} {
    %c0 = arith.constant 0 : index
    %c0_0 = arith.constant 0 : index
    %0 = vector.load %arg3[%c0, %c0_0] : memref<64x32xf32, #tpu.memory_space<vmem>>, vector<64x32xf32>
    %c0_1 = arith.constant 0 : index
    %c0_2 = arith.constant 0 : index
    %c0_3 = arith.constant 0 : index
    %1 = vector.load %arg2[%c0_1, %c0_2, %c0_3] : memref<1x32x64xf32, #tpu.memory_space<vmem>>, vector<1x32x64xf32>
    %2 = vector.shape_cast %1 : vector<1x32x64xf32> to vector<32x64xf32>
    %cst = arith.constant dense<0.000000e+00> : vector<64x64xf32>
    %3 = tpu.matmul %0, %2, %cst {dimension_numbers = #tpu.dot_dimension_numbers<[1], [0], [0], [1], [0, 0, 1, 1], [], []>} : vector<64x32xf32>, vector<32x64xf32>, vector<64x64xf32> -> vector<64x64xf32>
    %c0_4 = arith.constant 0 : index
    %c0_5 = arith.constant 0 : index
    %4 = vector.load %arg4[%c0_4, %c0_5] : memref<64x1xf32, #tpu.memory_space<vmem>>, vector<64x1xf32>
    %5 = vector.broadcast %4 : vector<64x1xf32> to vector<64x64xf32>
    %6 = arith.addf %3, %5 : vector<64x64xf32>
    %cst_6 = arith.constant 0.000000e+00 : f32
    %7 = vector.broadcast %cst_6 : f32 to vector<64x64xf32>
    %8 = arith.cmpf oge, %6, %7 : vector<64x64xf32>
    %cst_7 = arith.constant 1.000000e-01 : f32
    %9 = vector.broadcast %cst_7 : f32 to vector<64x64xf32>
    %10 = arith.mulf %6, %9 : vector<64x64xf32>
    %11 = arith.select %8, %6, %10 : vector<64x64xi1>, vector<64x64xf32>
    %c0_8 = arith.constant 0 : index
    %c0_9 = arith.constant 0 : index
    %c0_10 = arith.constant 0 : index
    %12 = vector.load %arg5[%c0_8, %c0_9, %c0_10] : memref<1x64x64xf32, #tpu.memory_space<vmem>>, vector<1x64x64xf32>
    %13 = vector.shape_cast %12 : vector<1x64x64xf32> to vector<64x64xf32>
    %14 = vector.shape_cast %11 : vector<64x64xf32> to vector<1x64x64xf32>
    tpu.vector_store %arg5[%c0_8, %c0_9, %c0_10], %14 {strides = array<i32>} : memref<1x64x64xf32, #tpu.memory_space<vmem>>, vector<1x64x64xf32>,
    return
  }
  func.func @transform_0(%arg0: i32, %arg1: i32) -> (i32, i32, i32) {
    %c0_i32 = arith.constant 0 : i32
    %c0_i32_0 = arith.constant 0 : i32
    return %arg0, %c0_i32, %arg1 : i32, i32, i32
  }
  func.func @transform_1(%arg0: i32, %arg1: i32) -> (i32, i32) {
    %c0_i32 = arith.constant 0 : i32
    %c0_i32_0 = arith.constant 0 : i32
    %c0_i32_1 = arith.constant 0 : i32
    return %c0_i32, %c0_i32_0 : i32, i32
  }
  func.func @transform_2(%arg0: i32, %arg1: i32) -> (i32, i32) {
    %c0_i32 = arith.constant 0 : i32
    %c0_i32_0 = arith.constant 0 : i32
    %c0_i32_1 = arith.constant 0 : i32
    return %c0_i32, %c0_i32_0 : i32, i32
  }
  func.func @transform_3(%arg0: i32, %arg1: i32) -> (i32, i32, i32) {
    %c0_i32 = arith.constant 0 : i32
    %c0_i32_0 = arith.constant 0 : i32
    return %arg0, %c0_i32, %arg1 : i32, i32, i32
  }
}

module attributes {stable_mosaic.version = 11 : i64} {
  func.func @kernel(%arg0: i32, %arg1: i32, %arg2: memref<1x64x10x10xf32, #tpu.memory_space<vmem>>, %arg3: memref<576xf32, #tpu.memory_space<smem>>, %arg4: memref<64xf32, #tpu.memory_space<smem>>, %arg5: memref<1x64x8x8xf32, #tpu.memory_space<vmem>>) attributes {dimension_semantics = [#tpu.dimension_semantics<parallel>, #tpu.dimension_semantics<parallel>], iteration_bounds = array<i64: 2, 1>, scalar_prefetch = 0 : i64, scratch_operands = 0 : i64, tpu.core_type = #tpu.core_type<tc>, window_params = [{transform_indices = @transform_0, window_bounds = array<i64: 1, 64, 10, 10>}, {transform_indices = @transform_1, window_bounds = array<i64: 576>}, {transform_indices = @transform_2, window_bounds = array<i64: 64>}, {transform_indices = @transform_3, window_bounds = array<i64: 1, 64, 8, 8>}]} {
    %c0_i32 = arith.constant 0 : i32
    %c64_i32 = arith.constant 64 : i32
    %0 = arith.addi %c0_i32, %c64_i32 : i32
    %c1_i32 = arith.constant 1 : i32
    scf.for %arg6 = %c0_i32 to %0 step %c1_i32  : i32 {
      %c64_i32_1 = arith.constant 64 : i32
      %1 = arith.muli %arg1, %c64_i32_1 : i32
      %2 = arith.addi %1, %arg6 : i32
      %cst = arith.constant 0.000000e+00 : f32
      %3 = vector.broadcast %cst : f32 to vector<8x8xf32>
      %c0 = arith.constant 0 : index
      %4 = arith.index_cast %arg6 : i32 to index
      %c0_2 = arith.constant 0 : index
      %c0_3 = arith.constant 0 : index
      %5 = vector.load %arg2[%c0, %4, %c0_2, %c0_3] : memref<1x64x10x10xf32, #tpu.memory_space<vmem>>, vector<1x1x8x8xf32>
      %6 = vector.shape_cast %5 : vector<1x1x8x8xf32> to vector<8x8xf32>
      %c9_i32 = arith.constant 9 : i32
      %7 = arith.muli %2, %c9_i32 : i32
      %c0_i32_4 = arith.constant 0 : i32
      %8 = arith.addi %7, %c0_i32_4 : i32
      %c0_i32_5 = arith.constant 0 : i32
      %9 = arith.addi %8, %c0_i32_5 : i32
      %10 = arith.index_cast %9 : i32 to index
      %11 = memref.load %arg3[%10] : memref<576xf32, #tpu.memory_space<smem>>
      %12 = vector.broadcast %11 : f32 to vector<8x8xf32>
      %13 = arith.mulf %6, %12 : vector<8x8xf32>
      %14 = arith.addf %3, %13 : vector<8x8xf32>
      %c0_6 = arith.constant 0 : index
      %15 = arith.index_cast %arg6 : i32 to index
      %c0_7 = arith.constant 0 : index
      %c1 = arith.constant 1 : index
      %16 = vector.load %arg2[%c0_6, %15, %c0_7, %c1] : memref<1x64x10x10xf32, #tpu.memory_space<vmem>>, vector<1x1x8x8xf32>
      %17 = vector.shape_cast %16 : vector<1x1x8x8xf32> to vector<8x8xf32>
      %c9_i32_8 = arith.constant 9 : i32
      %18 = arith.muli %2, %c9_i32_8 : i32
      %c0_i32_9 = arith.constant 0 : i32
      %19 = arith.addi %18, %c0_i32_9 : i32
      %c1_i32_10 = arith.constant 1 : i32
      %20 = arith.addi %19, %c1_i32_10 : i32
      %21 = arith.index_cast %20 : i32 to index
      %22 = memref.load %arg3[%21] : memref<576xf32, #tpu.memory_space<smem>>
      %23 = vector.broadcast %22 : f32 to vector<8x8xf32>
      %24 = arith.mulf %17, %23 : vector<8x8xf32>
      %25 = arith.addf %14, %24 : vector<8x8xf32>
      %c0_11 = arith.constant 0 : index
      %26 = arith.index_cast %arg6 : i32 to index
      %c0_12 = arith.constant 0 : index
      %c2 = arith.constant 2 : index
      %27 = vector.load %arg2[%c0_11, %26, %c0_12, %c2] : memref<1x64x10x10xf32, #tpu.memory_space<vmem>>, vector<1x1x8x8xf32>
      %28 = vector.shape_cast %27 : vector<1x1x8x8xf32> to vector<8x8xf32>
      %c9_i32_13 = arith.constant 9 : i32
      %29 = arith.muli %2, %c9_i32_13 : i32
      %c0_i32_14 = arith.constant 0 : i32
      %30 = arith.addi %29, %c0_i32_14 : i32
      %c2_i32 = arith.constant 2 : i32
      %31 = arith.addi %30, %c2_i32 : i32
      %32 = arith.index_cast %31 : i32 to index
      %33 = memref.load %arg3[%32] : memref<576xf32, #tpu.memory_space<smem>>
      %34 = vector.broadcast %33 : f32 to vector<8x8xf32>
      %35 = arith.mulf %28, %34 : vector<8x8xf32>
      %36 = arith.addf %25, %35 : vector<8x8xf32>
      %c0_15 = arith.constant 0 : index
      %37 = arith.index_cast %arg6 : i32 to index
      %c1_16 = arith.constant 1 : index
      %c0_17 = arith.constant 0 : index
      %38 = vector.load %arg2[%c0_15, %37, %c1_16, %c0_17] : memref<1x64x10x10xf32, #tpu.memory_space<vmem>>, vector<1x1x8x8xf32>
      %39 = vector.shape_cast %38 : vector<1x1x8x8xf32> to vector<8x8xf32>
      %c9_i32_18 = arith.constant 9 : i32
      %40 = arith.muli %2, %c9_i32_18 : i32
      %c3_i32 = arith.constant 3 : i32
      %41 = arith.addi %40, %c3_i32 : i32
      %c0_i32_19 = arith.constant 0 : i32
      %42 = arith.addi %41, %c0_i32_19 : i32
      %43 = arith.index_cast %42 : i32 to index
      %44 = memref.load %arg3[%43] : memref<576xf32, #tpu.memory_space<smem>>
      %45 = vector.broadcast %44 : f32 to vector<8x8xf32>
      %46 = arith.mulf %39, %45 : vector<8x8xf32>
      %47 = arith.addf %36, %46 : vector<8x8xf32>
      %c0_20 = arith.constant 0 : index
      %48 = arith.index_cast %arg6 : i32 to index
      %c1_21 = arith.constant 1 : index
      %c1_22 = arith.constant 1 : index
      %49 = vector.load %arg2[%c0_20, %48, %c1_21, %c1_22] : memref<1x64x10x10xf32, #tpu.memory_space<vmem>>, vector<1x1x8x8xf32>
      %50 = vector.shape_cast %49 : vector<1x1x8x8xf32> to vector<8x8xf32>
      %c9_i32_23 = arith.constant 9 : i32
      %51 = arith.muli %2, %c9_i32_23 : i32
      %c3_i32_24 = arith.constant 3 : i32
      %52 = arith.addi %51, %c3_i32_24 : i32
      %c1_i32_25 = arith.constant 1 : i32
      %53 = arith.addi %52, %c1_i32_25 : i32
      %54 = arith.index_cast %53 : i32 to index
      %55 = memref.load %arg3[%54] : memref<576xf32, #tpu.memory_space<smem>>
      %56 = vector.broadcast %55 : f32 to vector<8x8xf32>
      %57 = arith.mulf %50, %56 : vector<8x8xf32>
      %58 = arith.addf %47, %57 : vector<8x8xf32>
      %c0_26 = arith.constant 0 : index
      %59 = arith.index_cast %arg6 : i32 to index
      %c1_27 = arith.constant 1 : index
      %c2_28 = arith.constant 2 : index
      %60 = vector.load %arg2[%c0_26, %59, %c1_27, %c2_28] : memref<1x64x10x10xf32, #tpu.memory_space<vmem>>, vector<1x1x8x8xf32>
      %61 = vector.shape_cast %60 : vector<1x1x8x8xf32> to vector<8x8xf32>
      %c9_i32_29 = arith.constant 9 : i32
      %62 = arith.muli %2, %c9_i32_29 : i32
      %c3_i32_30 = arith.constant 3 : i32
      %63 = arith.addi %62, %c3_i32_30 : i32
      %c2_i32_31 = arith.constant 2 : i32
      %64 = arith.addi %63, %c2_i32_31 : i32
      %65 = arith.index_cast %64 : i32 to index
      %66 = memref.load %arg3[%65] : memref<576xf32, #tpu.memory_space<smem>>
      %67 = vector.broadcast %66 : f32 to vector<8x8xf32>
      %68 = arith.mulf %61, %67 : vector<8x8xf32>
      %69 = arith.addf %58, %68 : vector<8x8xf32>
      %c0_32 = arith.constant 0 : index
      %70 = arith.index_cast %arg6 : i32 to index
      %c2_33 = arith.constant 2 : index
      %c0_34 = arith.constant 0 : index
      %71 = vector.load %arg2[%c0_32, %70, %c2_33, %c0_34] : memref<1x64x10x10xf32, #tpu.memory_space<vmem>>, vector<1x1x8x8xf32>
      %72 = vector.shape_cast %71 : vector<1x1x8x8xf32> to vector<8x8xf32>
      %c9_i32_35 = arith.constant 9 : i32
      %73 = arith.muli %2, %c9_i32_35 : i32
      %c6_i32 = arith.constant 6 : i32
      %74 = arith.addi %73, %c6_i32 : i32
      %c0_i32_36 = arith.constant 0 : i32
      %75 = arith.addi %74, %c0_i32_36 : i32
      %76 = arith.index_cast %75 : i32 to index
      %77 = memref.load %arg3[%76] : memref<576xf32, #tpu.memory_space<smem>>
      %78 = vector.broadcast %77 : f32 to vector<8x8xf32>
      %79 = arith.mulf %72, %78 : vector<8x8xf32>
      %80 = arith.addf %69, %79 : vector<8x8xf32>
      %c0_37 = arith.constant 0 : index
      %81 = arith.index_cast %arg6 : i32 to index
      %c2_38 = arith.constant 2 : index
      %c1_39 = arith.constant 1 : index
      %82 = vector.load %arg2[%c0_37, %81, %c2_38, %c1_39] : memref<1x64x10x10xf32, #tpu.memory_space<vmem>>, vector<1x1x8x8xf32>
      %83 = vector.shape_cast %82 : vector<1x1x8x8xf32> to vector<8x8xf32>
      %c9_i32_40 = arith.constant 9 : i32
      %84 = arith.muli %2, %c9_i32_40 : i32
      %c6_i32_41 = arith.constant 6 : i32
      %85 = arith.addi %84, %c6_i32_41 : i32
      %c1_i32_42 = arith.constant 1 : i32
      %86 = arith.addi %85, %c1_i32_42 : i32
      %87 = arith.index_cast %86 : i32 to index
      %88 = memref.load %arg3[%87] : memref<576xf32, #tpu.memory_space<smem>>
      %89 = vector.broadcast %88 : f32 to vector<8x8xf32>
      %90 = arith.mulf %83, %89 : vector<8x8xf32>
      %91 = arith.addf %80, %90 : vector<8x8xf32>
      %c0_43 = arith.constant 0 : index
      %92 = arith.index_cast %arg6 : i32 to index
      %c2_44 = arith.constant 2 : index
      %c2_45 = arith.constant 2 : index
      %93 = vector.load %arg2[%c0_43, %92, %c2_44, %c2_45] : memref<1x64x10x10xf32, #tpu.memory_space<vmem>>, vector<1x1x8x8xf32>
      %94 = vector.shape_cast %93 : vector<1x1x8x8xf32> to vector<8x8xf32>
      %c9_i32_46 = arith.constant 9 : i32
      %95 = arith.muli %2, %c9_i32_46 : i32
      %c6_i32_47 = arith.constant 6 : i32
      %96 = arith.addi %95, %c6_i32_47 : i32
      %c2_i32_48 = arith.constant 2 : i32
      %97 = arith.addi %96, %c2_i32_48 : i32
      %98 = arith.index_cast %97 : i32 to index
      %99 = memref.load %arg3[%98] : memref<576xf32, #tpu.memory_space<smem>>
      %100 = vector.broadcast %99 : f32 to vector<8x8xf32>
      %101 = arith.mulf %94, %100 : vector<8x8xf32>
      %102 = arith.addf %91, %101 : vector<8x8xf32>
      %103 = arith.index_cast %2 : i32 to index
      %104 = memref.load %arg4[%103] : memref<64xf32, #tpu.memory_space<smem>>
      %105 = vector.broadcast %104 : f32 to vector<8x8xf32>
      %106 = arith.addf %102, %105 : vector<8x8xf32>
      %cst_49 = arith.constant 0.000000e+00 : f32
      %107 = vector.broadcast %cst_49 : f32 to vector<8x8xf32>
      %108 = arith.cmpf oge, %106, %107 : vector<8x8xf32>
      %cst_50 = arith.constant 1.000000e-01 : f32
      %109 = vector.broadcast %cst_50 : f32 to vector<8x8xf32>
      %110 = arith.mulf %106, %109 : vector<8x8xf32>
      %111 = arith.select %108, %106, %110 : vector<8x8xi1>, vector<8x8xf32>
      %c0_51 = arith.constant 0 : index
      %112 = arith.index_cast %arg6 : i32 to index
      %c0_52 = arith.constant 0 : index
      %c0_53 = arith.constant 0 : index
      %113 = vector.load %arg5[%c0_51, %112, %c0_52, %c0_53] : memref<1x64x8x8xf32, #tpu.memory_space<vmem>>, vector<1x1x8x8xf32>
      %114 = vector.shape_cast %113 : vector<1x1x8x8xf32> to vector<8x8xf32>
      %115 = vector.shape_cast %111 : vector<8x8xf32> to vector<1x1x8x8xf32>
      tpu.vector_store %arg5[%c0_51, %112, %c0_52, %c0_53], %115 {strides = array<i32>} : memref<1x64x8x8xf32, #tpu.memory_space<vmem>>, vector<1x1x8x8xf32>,
    }
    %c64_i32_0 = arith.constant 64 : i32
    return
  }
  func.func @transform_0(%arg0: i32, %arg1: i32) -> (i32, i32, i32, i32) {
    %c0_i32 = arith.constant 0 : i32
    %c0_i32_0 = arith.constant 0 : i32
    %c0_i32_1 = arith.constant 0 : i32
    return %arg0, %arg1, %c0_i32, %c0_i32_0 : i32, i32, i32, i32
  }
  func.func @transform_1(%arg0: i32, %arg1: i32) -> i32 {
    %c0_i32 = arith.constant 0 : i32
    %c0_i32_0 = arith.constant 0 : i32
    return %c0_i32 : i32
  }
  func.func @transform_2(%arg0: i32, %arg1: i32) -> i32 {
    %c0_i32 = arith.constant 0 : i32
    %c0_i32_0 = arith.constant 0 : i32
    return %c0_i32 : i32
  }
  func.func @transform_3(%arg0: i32, %arg1: i32) -> (i32, i32, i32, i32) {
    %c0_i32 = arith.constant 0 : i32
    %c0_i32_0 = arith.constant 0 : i32
    %c0_i32_1 = arith.constant 0 : i32
    return %arg0, %arg1, %c0_i32, %c0_i32_0 : i32, i32, i32, i32
  }
}

module attributes {stable_mosaic.version = 11 : i64} {
  func.func @kernel(%arg0: i32, %arg1: i32, %arg2: memref<1x64x64xf32, #tpu.memory_space<vmem>>, %arg3: memref<64x64xf32, #tpu.memory_space<vmem>>, %arg4: memref<64x1xf32, #tpu.memory_space<vmem>>, %arg5: memref<1x64x64xf32, #tpu.memory_space<vmem>>) attributes {dimension_semantics = [#tpu.dimension_semantics<parallel>, #tpu.dimension_semantics<parallel>], iteration_bounds = array<i64: 2, 1>, scalar_prefetch = 0 : i64, scratch_operands = 0 : i64, tpu.core_type = #tpu.core_type<tc>, window_params = [{transform_indices = @transform_0, window_bounds = array<i64: 1, 64, 64>}, {pipeline_mode = #tpu.pipeline_mode<synchronous>, transform_indices = @transform_1, window_bounds = array<i64: 64, 64>}, {pipeline_mode = #tpu.pipeline_mode<synchronous>, transform_indices = @transform_2, window_bounds = array<i64: 64, 1>}, {transform_indices = @transform_3, window_bounds = array<i64: 1, 64, 64>}]} {
    %c0 = arith.constant 0 : index
    %c0_0 = arith.constant 0 : index
    %0 = vector.load %arg3[%c0, %c0_0] : memref<64x64xf32, #tpu.memory_space<vmem>>, vector<64x64xf32>
    %c0_1 = arith.constant 0 : index
    %c0_2 = arith.constant 0 : index
    %c0_3 = arith.constant 0 : index
    %1 = vector.load %arg2[%c0_1, %c0_2, %c0_3] : memref<1x64x64xf32, #tpu.memory_space<vmem>>, vector<1x64x64xf32>
    %2 = vector.shape_cast %1 : vector<1x64x64xf32> to vector<64x64xf32>
    %cst = arith.constant dense<0.000000e+00> : vector<64x64xf32>
    %3 = tpu.matmul %0, %2, %cst {dimension_numbers = #tpu.dot_dimension_numbers<[1], [0], [0], [1], [0, 0, 1, 1], [], []>} : vector<64x64xf32>, vector<64x64xf32>, vector<64x64xf32> -> vector<64x64xf32>
    %c0_4 = arith.constant 0 : index
    %c0_5 = arith.constant 0 : index
    %4 = vector.load %arg4[%c0_4, %c0_5] : memref<64x1xf32, #tpu.memory_space<vmem>>, vector<64x1xf32>
    %5 = vector.broadcast %4 : vector<64x1xf32> to vector<64x64xf32>
    %6 = arith.addf %3, %5 : vector<64x64xf32>
    %cst_6 = arith.constant 0.000000e+00 : f32
    %7 = vector.broadcast %cst_6 : f32 to vector<64x64xf32>
    %8 = arith.cmpf oge, %6, %7 : vector<64x64xf32>
    %cst_7 = arith.constant 1.000000e-01 : f32
    %9 = vector.broadcast %cst_7 : f32 to vector<64x64xf32>
    %10 = arith.mulf %6, %9 : vector<64x64xf32>
    %11 = arith.select %8, %6, %10 : vector<64x64xi1>, vector<64x64xf32>
    %c0_8 = arith.constant 0 : index
    %c0_9 = arith.constant 0 : index
    %c0_10 = arith.constant 0 : index
    %12 = vector.load %arg5[%c0_8, %c0_9, %c0_10] : memref<1x64x64xf32, #tpu.memory_space<vmem>>, vector<1x64x64xf32>
    %13 = vector.shape_cast %12 : vector<1x64x64xf32> to vector<64x64xf32>
    %14 = vector.shape_cast %11 : vector<64x64xf32> to vector<1x64x64xf32>
    tpu.vector_store %arg5[%c0_8, %c0_9, %c0_10], %14 {strides = array<i32>} : memref<1x64x64xf32, #tpu.memory_space<vmem>>, vector<1x64x64xf32>,
    return
  }
  func.func @transform_0(%arg0: i32, %arg1: i32) -> (i32, i32, i32) {
    %c0_i32 = arith.constant 0 : i32
    %c0_i32_0 = arith.constant 0 : i32
    return %arg0, %c0_i32, %arg1 : i32, i32, i32
  }
  func.func @transform_1(%arg0: i32, %arg1: i32) -> (i32, i32) {
    %c0_i32 = arith.constant 0 : i32
    %c0_i32_0 = arith.constant 0 : i32
    %c0_i32_1 = arith.constant 0 : i32
    return %c0_i32, %c0_i32_0 : i32, i32
  }
  func.func @transform_2(%arg0: i32, %arg1: i32) -> (i32, i32) {
    %c0_i32 = arith.constant 0 : i32
    %c0_i32_0 = arith.constant 0 : i32
    %c0_i32_1 = arith.constant 0 : i32
    return %c0_i32, %c0_i32_0 : i32, i32
  }
  func.func @transform_3(%arg0: i32, %arg1: i32) -> (i32, i32, i32) {
    %c0_i32 = arith.constant 0 : i32
    %c0_i32_0 = arith.constant 0 : i32
    return %arg0, %c0_i32, %arg1 : i32, i32, i32
  }
}

module attributes {stable_mosaic.version = 11 : i64} {
  func.func @kernel(%arg0: i32, %arg1: i32, %arg2: memref<1x64x5x5xf32, #tpu.memory_space<vmem>>, %arg3: memref<1x64x5x5xf32, #tpu.memory_space<vmem>>, %arg4: memref<1x64x5x5xf32, #tpu.memory_space<vmem>>, %arg5: memref<1x64x5x5xf32, #tpu.memory_space<vmem>>, %arg6: memref<576xf32, #tpu.memory_space<smem>>, %arg7: memref<64xf32, #tpu.memory_space<smem>>, %arg8: memref<1x64x4x4xf32, #tpu.memory_space<vmem>>) attributes {dimension_semantics = [#tpu.dimension_semantics<parallel>, #tpu.dimension_semantics<parallel>], iteration_bounds = array<i64: 2, 1>, scalar_prefetch = 0 : i64, scratch_operands = 0 : i64, tpu.core_type = #tpu.core_type<tc>, window_params = [{transform_indices = @transform_0, window_bounds = array<i64: 1, 64, 5, 5>}, {transform_indices = @transform_1, window_bounds = array<i64: 1, 64, 5, 5>}, {transform_indices = @transform_2, window_bounds = array<i64: 1, 64, 5, 5>}, {transform_indices = @transform_3, window_bounds = array<i64: 1, 64, 5, 5>}, {transform_indices = @transform_4, window_bounds = array<i64: 576>}, {transform_indices = @transform_5, window_bounds = array<i64: 64>}, {transform_indices = @transform_6, window_bounds = array<i64: 1, 64, 4, 4>}]} {
    %c0_i32 = arith.constant 0 : i32
    %c64_i32 = arith.constant 64 : i32
    %0 = arith.addi %c0_i32, %c64_i32 : i32
    %c1_i32 = arith.constant 1 : i32
    scf.for %arg9 = %c0_i32 to %0 step %c1_i32  : i32 {
      %c64_i32_1 = arith.constant 64 : i32
      %1 = arith.muli %arg1, %c64_i32_1 : i32
      %2 = arith.addi %1, %arg9 : i32
      %cst = arith.constant 0.000000e+00 : f32
      %3 = vector.broadcast %cst : f32 to vector<4x4xf32>
      %c0 = arith.constant 0 : index
      %4 = arith.index_cast %arg9 : i32 to index
      %c0_2 = arith.constant 0 : index
      %c0_3 = arith.constant 0 : index
      %5 = vector.load %arg2[%c0, %4, %c0_2, %c0_3] : memref<1x64x5x5xf32, #tpu.memory_space<vmem>>, vector<1x1x4x4xf32>
      %6 = vector.shape_cast %5 : vector<1x1x4x4xf32> to vector<4x4xf32>
      %c9_i32 = arith.constant 9 : i32
      %7 = arith.muli %2, %c9_i32 : i32
      %c0_i32_4 = arith.constant 0 : i32
      %8 = arith.addi %7, %c0_i32_4 : i32
      %c0_i32_5 = arith.constant 0 : i32
      %9 = arith.addi %8, %c0_i32_5 : i32
      %10 = arith.index_cast %9 : i32 to index
      %11 = memref.load %arg6[%10] : memref<576xf32, #tpu.memory_space<smem>>
      %12 = vector.broadcast %11 : f32 to vector<4x4xf32>
      %13 = arith.mulf %6, %12 : vector<4x4xf32>
      %14 = arith.addf %3, %13 : vector<4x4xf32>
      %c0_6 = arith.constant 0 : index
      %15 = arith.index_cast %arg9 : i32 to index
      %c0_7 = arith.constant 0 : index
      %c0_8 = arith.constant 0 : index
      %16 = vector.load %arg3[%c0_6, %15, %c0_7, %c0_8] : memref<1x64x5x5xf32, #tpu.memory_space<vmem>>, vector<1x1x4x4xf32>
      %17 = vector.shape_cast %16 : vector<1x1x4x4xf32> to vector<4x4xf32>
      %c9_i32_9 = arith.constant 9 : i32
      %18 = arith.muli %2, %c9_i32_9 : i32
      %c0_i32_10 = arith.constant 0 : i32
      %19 = arith.addi %18, %c0_i32_10 : i32
      %c1_i32_11 = arith.constant 1 : i32
      %20 = arith.addi %19, %c1_i32_11 : i32
      %21 = arith.index_cast %20 : i32 to index
      %22 = memref.load %arg6[%21] : memref<576xf32, #tpu.memory_space<smem>>
      %23 = vector.broadcast %22 : f32 to vector<4x4xf32>
      %24 = arith.mulf %17, %23 : vector<4x4xf32>
      %25 = arith.addf %14, %24 : vector<4x4xf32>
      %c0_12 = arith.constant 0 : index
      %26 = arith.index_cast %arg9 : i32 to index
      %c0_13 = arith.constant 0 : index
      %c1 = arith.constant 1 : index
      %27 = vector.load %arg2[%c0_12, %26, %c0_13, %c1] : memref<1x64x5x5xf32, #tpu.memory_space<vmem>>, vector<1x1x4x4xf32>
      %28 = vector.shape_cast %27 : vector<1x1x4x4xf32> to vector<4x4xf32>
      %c9_i32_14 = arith.constant 9 : i32
      %29 = arith.muli %2, %c9_i32_14 : i32
      %c0_i32_15 = arith.constant 0 : i32
      %30 = arith.addi %29, %c0_i32_15 : i32
      %c2_i32 = arith.constant 2 : i32
      %31 = arith.addi %30, %c2_i32 : i32
      %32 = arith.index_cast %31 : i32 to index
      %33 = memref.load %arg6[%32] : memref<576xf32, #tpu.memory_space<smem>>
      %34 = vector.broadcast %33 : f32 to vector<4x4xf32>
      %35 = arith.mulf %28, %34 : vector<4x4xf32>
      %36 = arith.addf %25, %35 : vector<4x4xf32>
      %c0_16 = arith.constant 0 : index
      %37 = arith.index_cast %arg9 : i32 to index
      %c0_17 = arith.constant 0 : index
      %c0_18 = arith.constant 0 : index
      %38 = vector.load %arg4[%c0_16, %37, %c0_17, %c0_18] : memref<1x64x5x5xf32, #tpu.memory_space<vmem>>, vector<1x1x4x4xf32>
      %39 = vector.shape_cast %38 : vector<1x1x4x4xf32> to vector<4x4xf32>
      %c9_i32_19 = arith.constant 9 : i32
      %40 = arith.muli %2, %c9_i32_19 : i32
      %c3_i32 = arith.constant 3 : i32
      %41 = arith.addi %40, %c3_i32 : i32
      %c0_i32_20 = arith.constant 0 : i32
      %42 = arith.addi %41, %c0_i32_20 : i32
      %43 = arith.index_cast %42 : i32 to index
      %44 = memref.load %arg6[%43] : memref<576xf32, #tpu.memory_space<smem>>
      %45 = vector.broadcast %44 : f32 to vector<4x4xf32>
      %46 = arith.mulf %39, %45 : vector<4x4xf32>
      %47 = arith.addf %36, %46 : vector<4x4xf32>
      %c0_21 = arith.constant 0 : index
      %48 = arith.index_cast %arg9 : i32 to index
      %c0_22 = arith.constant 0 : index
      %c0_23 = arith.constant 0 : index
      %49 = vector.load %arg5[%c0_21, %48, %c0_22, %c0_23] : memref<1x64x5x5xf32, #tpu.memory_space<vmem>>, vector<1x1x4x4xf32>
      %50 = vector.shape_cast %49 : vector<1x1x4x4xf32> to vector<4x4xf32>
      %c9_i32_24 = arith.constant 9 : i32
      %51 = arith.muli %2, %c9_i32_24 : i32
      %c3_i32_25 = arith.constant 3 : i32
      %52 = arith.addi %51, %c3_i32_25 : i32
      %c1_i32_26 = arith.constant 1 : i32
      %53 = arith.addi %52, %c1_i32_26 : i32
      %54 = arith.index_cast %53 : i32 to index
      %55 = memref.load %arg6[%54] : memref<576xf32, #tpu.memory_space<smem>>
      %56 = vector.broadcast %55 : f32 to vector<4x4xf32>
      %57 = arith.mulf %50, %56 : vector<4x4xf32>
      %58 = arith.addf %47, %57 : vector<4x4xf32>
      %c0_27 = arith.constant 0 : index
      %59 = arith.index_cast %arg9 : i32 to index
      %c0_28 = arith.constant 0 : index
      %c1_29 = arith.constant 1 : index
      %60 = vector.load %arg4[%c0_27, %59, %c0_28, %c1_29] : memref<1x64x5x5xf32, #tpu.memory_space<vmem>>, vector<1x1x4x4xf32>
      %61 = vector.shape_cast %60 : vector<1x1x4x4xf32> to vector<4x4xf32>
      %c9_i32_30 = arith.constant 9 : i32
      %62 = arith.muli %2, %c9_i32_30 : i32
      %c3_i32_31 = arith.constant 3 : i32
      %63 = arith.addi %62, %c3_i32_31 : i32
      %c2_i32_32 = arith.constant 2 : i32
      %64 = arith.addi %63, %c2_i32_32 : i32
      %65 = arith.index_cast %64 : i32 to index
      %66 = memref.load %arg6[%65] : memref<576xf32, #tpu.memory_space<smem>>
      %67 = vector.broadcast %66 : f32 to vector<4x4xf32>
      %68 = arith.mulf %61, %67 : vector<4x4xf32>
      %69 = arith.addf %58, %68 : vector<4x4xf32>
      %c0_33 = arith.constant 0 : index
      %70 = arith.index_cast %arg9 : i32 to index
      %c1_34 = arith.constant 1 : index
      %c0_35 = arith.constant 0 : index
      %71 = vector.load %arg2[%c0_33, %70, %c1_34, %c0_35] : memref<1x64x5x5xf32, #tpu.memory_space<vmem>>, vector<1x1x4x4xf32>
      %72 = vector.shape_cast %71 : vector<1x1x4x4xf32> to vector<4x4xf32>
      %c9_i32_36 = arith.constant 9 : i32
      %73 = arith.muli %2, %c9_i32_36 : i32
      %c6_i32 = arith.constant 6 : i32
      %74 = arith.addi %73, %c6_i32 : i32
      %c0_i32_37 = arith.constant 0 : i32
      %75 = arith.addi %74, %c0_i32_37 : i32
      %76 = arith.index_cast %75 : i32 to index
      %77 = memref.load %arg6[%76] : memref<576xf32, #tpu.memory_space<smem>>
      %78 = vector.broadcast %77 : f32 to vector<4x4xf32>
      %79 = arith.mulf %72, %78 : vector<4x4xf32>
      %80 = arith.addf %69, %79 : vector<4x4xf32>
      %c0_38 = arith.constant 0 : index
      %81 = arith.index_cast %arg9 : i32 to index
      %c1_39 = arith.constant 1 : index
      %c0_40 = arith.constant 0 : index
      %82 = vector.load %arg3[%c0_38, %81, %c1_39, %c0_40] : memref<1x64x5x5xf32, #tpu.memory_space<vmem>>, vector<1x1x4x4xf32>
      %83 = vector.shape_cast %82 : vector<1x1x4x4xf32> to vector<4x4xf32>
      %c9_i32_41 = arith.constant 9 : i32
      %84 = arith.muli %2, %c9_i32_41 : i32
      %c6_i32_42 = arith.constant 6 : i32
      %85 = arith.addi %84, %c6_i32_42 : i32
      %c1_i32_43 = arith.constant 1 : i32
      %86 = arith.addi %85, %c1_i32_43 : i32
      %87 = arith.index_cast %86 : i32 to index
      %88 = memref.load %arg6[%87] : memref<576xf32, #tpu.memory_space<smem>>
      %89 = vector.broadcast %88 : f32 to vector<4x4xf32>
      %90 = arith.mulf %83, %89 : vector<4x4xf32>
      %91 = arith.addf %80, %90 : vector<4x4xf32>
      %c0_44 = arith.constant 0 : index
      %92 = arith.index_cast %arg9 : i32 to index
      %c1_45 = arith.constant 1 : index
      %c1_46 = arith.constant 1 : index
      %93 = vector.load %arg2[%c0_44, %92, %c1_45, %c1_46] : memref<1x64x5x5xf32, #tpu.memory_space<vmem>>, vector<1x1x4x4xf32>
      %94 = vector.shape_cast %93 : vector<1x1x4x4xf32> to vector<4x4xf32>
      %c9_i32_47 = arith.constant 9 : i32
      %95 = arith.muli %2, %c9_i32_47 : i32
      %c6_i32_48 = arith.constant 6 : i32
      %96 = arith.addi %95, %c6_i32_48 : i32
      %c2_i32_49 = arith.constant 2 : i32
      %97 = arith.addi %96, %c2_i32_49 : i32
      %98 = arith.index_cast %97 : i32 to index
      %99 = memref.load %arg6[%98] : memref<576xf32, #tpu.memory_space<smem>>
      %100 = vector.broadcast %99 : f32 to vector<4x4xf32>
      %101 = arith.mulf %94, %100 : vector<4x4xf32>
      %102 = arith.addf %91, %101 : vector<4x4xf32>
      %103 = arith.index_cast %2 : i32 to index
      %104 = memref.load %arg7[%103] : memref<64xf32, #tpu.memory_space<smem>>
      %105 = vector.broadcast %104 : f32 to vector<4x4xf32>
      %106 = arith.addf %102, %105 : vector<4x4xf32>
      %cst_50 = arith.constant 0.000000e+00 : f32
      %107 = vector.broadcast %cst_50 : f32 to vector<4x4xf32>
      %108 = arith.cmpf oge, %106, %107 : vector<4x4xf32>
      %cst_51 = arith.constant 1.000000e-01 : f32
      %109 = vector.broadcast %cst_51 : f32 to vector<4x4xf32>
      %110 = arith.mulf %106, %109 : vector<4x4xf32>
      %111 = arith.select %108, %106, %110 : vector<4x4xi1>, vector<4x4xf32>
      %c0_52 = arith.constant 0 : index
      %112 = arith.index_cast %arg9 : i32 to index
      %c0_53 = arith.constant 0 : index
      %c0_54 = arith.constant 0 : index
      %113 = vector.load %arg8[%c0_52, %112, %c0_53, %c0_54] : memref<1x64x4x4xf32, #tpu.memory_space<vmem>>, vector<1x1x4x4xf32>
      %114 = vector.shape_cast %113 : vector<1x1x4x4xf32> to vector<4x4xf32>
      %115 = vector.shape_cast %111 : vector<4x4xf32> to vector<1x1x4x4xf32>
      tpu.vector_store %arg8[%c0_52, %112, %c0_53, %c0_54], %115 {strides = array<i32>} : memref<1x64x4x4xf32, #tpu.memory_space<vmem>>, vector<1x1x4x4xf32>,
    }
    %c64_i32_0 = arith.constant 64 : i32
    return
  }
  func.func @transform_0(%arg0: i32, %arg1: i32) -> (i32, i32, i32, i32) {
    %c0_i32 = arith.constant 0 : i32
    %c0_i32_0 = arith.constant 0 : i32
    %c0_i32_1 = arith.constant 0 : i32
    return %arg0, %arg1, %c0_i32, %c0_i32_0 : i32, i32, i32, i32
  }
  func.func @transform_1(%arg0: i32, %arg1: i32) -> (i32, i32, i32, i32) {
    %c0_i32 = arith.constant 0 : i32
    %c0_i32_0 = arith.constant 0 : i32
    %c0_i32_1 = arith.constant 0 : i32
    return %arg0, %arg1, %c0_i32, %c0_i32_0 : i32, i32, i32, i32
  }
  func.func @transform_2(%arg0: i32, %arg1: i32) -> (i32, i32, i32, i32) {
    %c0_i32 = arith.constant 0 : i32
    %c0_i32_0 = arith.constant 0 : i32
    %c0_i32_1 = arith.constant 0 : i32
    return %arg0, %arg1, %c0_i32, %c0_i32_0 : i32, i32, i32, i32
  }
  func.func @transform_3(%arg0: i32, %arg1: i32) -> (i32, i32, i32, i32) {
    %c0_i32 = arith.constant 0 : i32
    %c0_i32_0 = arith.constant 0 : i32
    %c0_i32_1 = arith.constant 0 : i32
    return %arg0, %arg1, %c0_i32, %c0_i32_0 : i32, i32, i32, i32
  }
  func.func @transform_4(%arg0: i32, %arg1: i32) -> i32 {
    %c0_i32 = arith.constant 0 : i32
    %c0_i32_0 = arith.constant 0 : i32
    return %c0_i32 : i32
  }
  func.func @transform_5(%arg0: i32, %arg1: i32) -> i32 {
    %c0_i32 = arith.constant 0 : i32
    %c0_i32_0 = arith.constant 0 : i32
    return %c0_i32 : i32
  }
  func.func @transform_6(%arg0: i32, %arg1: i32) -> (i32, i32, i32, i32) {
    %c0_i32 = arith.constant 0 : i32
    %c0_i32_0 = arith.constant 0 : i32
    %c0_i32_1 = arith.constant 0 : i32
    return %arg0, %arg1, %c0_i32, %c0_i32_0 : i32, i32, i32, i32
  }
}

module attributes {stable_mosaic.version = 11 : i64} {
  func.func @kernel(%arg0: i32, %arg1: i32, %arg2: memref<1x64x16xf32, #tpu.memory_space<vmem>>, %arg3: memref<128x64xf32, #tpu.memory_space<vmem>>, %arg4: memref<128x1xf32, #tpu.memory_space<vmem>>, %arg5: memref<1x128x16xf32, #tpu.memory_space<vmem>>) attributes {dimension_semantics = [#tpu.dimension_semantics<parallel>, #tpu.dimension_semantics<parallel>], iteration_bounds = array<i64: 2, 1>, scalar_prefetch = 0 : i64, scratch_operands = 0 : i64, tpu.core_type = #tpu.core_type<tc>, window_params = [{transform_indices = @transform_0, window_bounds = array<i64: 1, 64, 16>}, {pipeline_mode = #tpu.pipeline_mode<synchronous>, transform_indices = @transform_1, window_bounds = array<i64: 128, 64>}, {pipeline_mode = #tpu.pipeline_mode<synchronous>, transform_indices = @transform_2, window_bounds = array<i64: 128, 1>}, {transform_indices = @transform_3, window_bounds = array<i64: 1, 128, 16>}]} {
    %c0 = arith.constant 0 : index
    %c0_0 = arith.constant 0 : index
    %0 = vector.load %arg3[%c0, %c0_0] : memref<128x64xf32, #tpu.memory_space<vmem>>, vector<128x64xf32>
    %c0_1 = arith.constant 0 : index
    %c0_2 = arith.constant 0 : index
    %c0_3 = arith.constant 0 : index
    %1 = vector.load %arg2[%c0_1, %c0_2, %c0_3] : memref<1x64x16xf32, #tpu.memory_space<vmem>>, vector<1x64x16xf32>
    %2 = vector.shape_cast %1 : vector<1x64x16xf32> to vector<64x16xf32>
    %cst = arith.constant dense<0.000000e+00> : vector<128x16xf32>
    %3 = tpu.matmul %0, %2, %cst {dimension_numbers = #tpu.dot_dimension_numbers<[1], [0], [0], [1], [0, 0, 1, 1], [], []>} : vector<128x64xf32>, vector<64x16xf32>, vector<128x16xf32> -> vector<128x16xf32>
    %c0_4 = arith.constant 0 : index
    %c0_5 = arith.constant 0 : index
    %4 = vector.load %arg4[%c0_4, %c0_5] : memref<128x1xf32, #tpu.memory_space<vmem>>, vector<128x1xf32>
    %5 = vector.broadcast %4 : vector<128x1xf32> to vector<128x16xf32>
    %6 = arith.addf %3, %5 : vector<128x16xf32>
    %cst_6 = arith.constant 0.000000e+00 : f32
    %7 = vector.broadcast %cst_6 : f32 to vector<128x16xf32>
    %8 = arith.cmpf oge, %6, %7 : vector<128x16xf32>
    %cst_7 = arith.constant 1.000000e-01 : f32
    %9 = vector.broadcast %cst_7 : f32 to vector<128x16xf32>
    %10 = arith.mulf %6, %9 : vector<128x16xf32>
    %11 = arith.select %8, %6, %10 : vector<128x16xi1>, vector<128x16xf32>
    %c0_8 = arith.constant 0 : index
    %c0_9 = arith.constant 0 : index
    %c0_10 = arith.constant 0 : index
    %12 = vector.load %arg5[%c0_8, %c0_9, %c0_10] : memref<1x128x16xf32, #tpu.memory_space<vmem>>, vector<1x128x16xf32>
    %13 = vector.shape_cast %12 : vector<1x128x16xf32> to vector<128x16xf32>
    %14 = vector.shape_cast %11 : vector<128x16xf32> to vector<1x128x16xf32>
    tpu.vector_store %arg5[%c0_8, %c0_9, %c0_10], %14 {strides = array<i32>} : memref<1x128x16xf32, #tpu.memory_space<vmem>>, vector<1x128x16xf32>,
    return
  }
  func.func @transform_0(%arg0: i32, %arg1: i32) -> (i32, i32, i32) {
    %c0_i32 = arith.constant 0 : i32
    %c0_i32_0 = arith.constant 0 : i32
    return %arg0, %c0_i32, %arg1 : i32, i32, i32
  }
  func.func @transform_1(%arg0: i32, %arg1: i32) -> (i32, i32) {
    %c0_i32 = arith.constant 0 : i32
    %c0_i32_0 = arith.constant 0 : i32
    %c0_i32_1 = arith.constant 0 : i32
    return %c0_i32, %c0_i32_0 : i32, i32
  }
  func.func @transform_2(%arg0: i32, %arg1: i32) -> (i32, i32) {
    %c0_i32 = arith.constant 0 : i32
    %c0_i32_0 = arith.constant 0 : i32
    %c0_i32_1 = arith.constant 0 : i32
    return %c0_i32, %c0_i32_0 : i32, i32
  }
  func.func @transform_3(%arg0: i32, %arg1: i32) -> (i32, i32, i32) {
    %c0_i32 = arith.constant 0 : i32
    %c0_i32_0 = arith.constant 0 : i32
    return %arg0, %c0_i32, %arg1 : i32, i32, i32
  }
}

module attributes {stable_mosaic.version = 11 : i64} {
  func.func @kernel(%arg0: i32, %arg1: i32, %arg2: memref<1x64x6x6xf32, #tpu.memory_space<vmem>>, %arg3: memref<1152xf32, #tpu.memory_space<smem>>, %arg4: memref<128xf32, #tpu.memory_space<smem>>, %arg5: memref<1x64x4x4xf32, #tpu.memory_space<vmem>>) attributes {dimension_semantics = [#tpu.dimension_semantics<parallel>, #tpu.dimension_semantics<parallel>], iteration_bounds = array<i64: 2, 2>, scalar_prefetch = 0 : i64, scratch_operands = 0 : i64, tpu.core_type = #tpu.core_type<tc>, window_params = [{transform_indices = @transform_0, window_bounds = array<i64: 1, 64, 6, 6>}, {transform_indices = @transform_1, window_bounds = array<i64: 1152>}, {transform_indices = @transform_2, window_bounds = array<i64: 128>}, {transform_indices = @transform_3, window_bounds = array<i64: 1, 64, 4, 4>}]} {
    %c0_i32 = arith.constant 0 : i32
    %c64_i32 = arith.constant 64 : i32
    %0 = arith.addi %c0_i32, %c64_i32 : i32
    %c1_i32 = arith.constant 1 : i32
    scf.for %arg6 = %c0_i32 to %0 step %c1_i32  : i32 {
      %c64_i32_1 = arith.constant 64 : i32
      %1 = arith.muli %arg1, %c64_i32_1 : i32
      %2 = arith.addi %1, %arg6 : i32
      %cst = arith.constant 0.000000e+00 : f32
      %3 = vector.broadcast %cst : f32 to vector<4x4xf32>
      %c0 = arith.constant 0 : index
      %4 = arith.index_cast %arg6 : i32 to index
      %c0_2 = arith.constant 0 : index
      %c0_3 = arith.constant 0 : index
      %5 = vector.load %arg2[%c0, %4, %c0_2, %c0_3] : memref<1x64x6x6xf32, #tpu.memory_space<vmem>>, vector<1x1x4x4xf32>
      %6 = vector.shape_cast %5 : vector<1x1x4x4xf32> to vector<4x4xf32>
      %c9_i32 = arith.constant 9 : i32
      %7 = arith.muli %2, %c9_i32 : i32
      %c0_i32_4 = arith.constant 0 : i32
      %8 = arith.addi %7, %c0_i32_4 : i32
      %c0_i32_5 = arith.constant 0 : i32
      %9 = arith.addi %8, %c0_i32_5 : i32
      %10 = arith.index_cast %9 : i32 to index
      %11 = memref.load %arg3[%10] : memref<1152xf32, #tpu.memory_space<smem>>
      %12 = vector.broadcast %11 : f32 to vector<4x4xf32>
      %13 = arith.mulf %6, %12 : vector<4x4xf32>
      %14 = arith.addf %3, %13 : vector<4x4xf32>
      %c0_6 = arith.constant 0 : index
      %15 = arith.index_cast %arg6 : i32 to index
      %c0_7 = arith.constant 0 : index
      %c1 = arith.constant 1 : index
      %16 = vector.load %arg2[%c0_6, %15, %c0_7, %c1] : memref<1x64x6x6xf32, #tpu.memory_space<vmem>>, vector<1x1x4x4xf32>
      %17 = vector.shape_cast %16 : vector<1x1x4x4xf32> to vector<4x4xf32>
      %c9_i32_8 = arith.constant 9 : i32
      %18 = arith.muli %2, %c9_i32_8 : i32
      %c0_i32_9 = arith.constant 0 : i32
      %19 = arith.addi %18, %c0_i32_9 : i32
      %c1_i32_10 = arith.constant 1 : i32
      %20 = arith.addi %19, %c1_i32_10 : i32
      %21 = arith.index_cast %20 : i32 to index
      %22 = memref.load %arg3[%21] : memref<1152xf32, #tpu.memory_space<smem>>
      %23 = vector.broadcast %22 : f32 to vector<4x4xf32>
      %24 = arith.mulf %17, %23 : vector<4x4xf32>
      %25 = arith.addf %14, %24 : vector<4x4xf32>
      %c0_11 = arith.constant 0 : index
      %26 = arith.index_cast %arg6 : i32 to index
      %c0_12 = arith.constant 0 : index
      %c2 = arith.constant 2 : index
      %27 = vector.load %arg2[%c0_11, %26, %c0_12, %c2] : memref<1x64x6x6xf32, #tpu.memory_space<vmem>>, vector<1x1x4x4xf32>
      %28 = vector.shape_cast %27 : vector<1x1x4x4xf32> to vector<4x4xf32>
      %c9_i32_13 = arith.constant 9 : i32
      %29 = arith.muli %2, %c9_i32_13 : i32
      %c0_i32_14 = arith.constant 0 : i32
      %30 = arith.addi %29, %c0_i32_14 : i32
      %c2_i32 = arith.constant 2 : i32
      %31 = arith.addi %30, %c2_i32 : i32
      %32 = arith.index_cast %31 : i32 to index
      %33 = memref.load %arg3[%32] : memref<1152xf32, #tpu.memory_space<smem>>
      %34 = vector.broadcast %33 : f32 to vector<4x4xf32>
      %35 = arith.mulf %28, %34 : vector<4x4xf32>
      %36 = arith.addf %25, %35 : vector<4x4xf32>
      %c0_15 = arith.constant 0 : index
      %37 = arith.index_cast %arg6 : i32 to index
      %c1_16 = arith.constant 1 : index
      %c0_17 = arith.constant 0 : index
      %38 = vector.load %arg2[%c0_15, %37, %c1_16, %c0_17] : memref<1x64x6x6xf32, #tpu.memory_space<vmem>>, vector<1x1x4x4xf32>
      %39 = vector.shape_cast %38 : vector<1x1x4x4xf32> to vector<4x4xf32>
      %c9_i32_18 = arith.constant 9 : i32
      %40 = arith.muli %2, %c9_i32_18 : i32
      %c3_i32 = arith.constant 3 : i32
      %41 = arith.addi %40, %c3_i32 : i32
      %c0_i32_19 = arith.constant 0 : i32
      %42 = arith.addi %41, %c0_i32_19 : i32
      %43 = arith.index_cast %42 : i32 to index
      %44 = memref.load %arg3[%43] : memref<1152xf32, #tpu.memory_space<smem>>
      %45 = vector.broadcast %44 : f32 to vector<4x4xf32>
      %46 = arith.mulf %39, %45 : vector<4x4xf32>
      %47 = arith.addf %36, %46 : vector<4x4xf32>
      %c0_20 = arith.constant 0 : index
      %48 = arith.index_cast %arg6 : i32 to index
      %c1_21 = arith.constant 1 : index
      %c1_22 = arith.constant 1 : index
      %49 = vector.load %arg2[%c0_20, %48, %c1_21, %c1_22] : memref<1x64x6x6xf32, #tpu.memory_space<vmem>>, vector<1x1x4x4xf32>
      %50 = vector.shape_cast %49 : vector<1x1x4x4xf32> to vector<4x4xf32>
      %c9_i32_23 = arith.constant 9 : i32
      %51 = arith.muli %2, %c9_i32_23 : i32
      %c3_i32_24 = arith.constant 3 : i32
      %52 = arith.addi %51, %c3_i32_24 : i32
      %c1_i32_25 = arith.constant 1 : i32
      %53 = arith.addi %52, %c1_i32_25 : i32
      %54 = arith.index_cast %53 : i32 to index
      %55 = memref.load %arg3[%54] : memref<1152xf32, #tpu.memory_space<smem>>
      %56 = vector.broadcast %55 : f32 to vector<4x4xf32>
      %57 = arith.mulf %50, %56 : vector<4x4xf32>
      %58 = arith.addf %47, %57 : vector<4x4xf32>
      %c0_26 = arith.constant 0 : index
      %59 = arith.index_cast %arg6 : i32 to index
      %c1_27 = arith.constant 1 : index
      %c2_28 = arith.constant 2 : index
      %60 = vector.load %arg2[%c0_26, %59, %c1_27, %c2_28] : memref<1x64x6x6xf32, #tpu.memory_space<vmem>>, vector<1x1x4x4xf32>
      %61 = vector.shape_cast %60 : vector<1x1x4x4xf32> to vector<4x4xf32>
      %c9_i32_29 = arith.constant 9 : i32
      %62 = arith.muli %2, %c9_i32_29 : i32
      %c3_i32_30 = arith.constant 3 : i32
      %63 = arith.addi %62, %c3_i32_30 : i32
      %c2_i32_31 = arith.constant 2 : i32
      %64 = arith.addi %63, %c2_i32_31 : i32
      %65 = arith.index_cast %64 : i32 to index
      %66 = memref.load %arg3[%65] : memref<1152xf32, #tpu.memory_space<smem>>
      %67 = vector.broadcast %66 : f32 to vector<4x4xf32>
      %68 = arith.mulf %61, %67 : vector<4x4xf32>
      %69 = arith.addf %58, %68 : vector<4x4xf32>
      %c0_32 = arith.constant 0 : index
      %70 = arith.index_cast %arg6 : i32 to index
      %c2_33 = arith.constant 2 : index
      %c0_34 = arith.constant 0 : index
      %71 = vector.load %arg2[%c0_32, %70, %c2_33, %c0_34] : memref<1x64x6x6xf32, #tpu.memory_space<vmem>>, vector<1x1x4x4xf32>
      %72 = vector.shape_cast %71 : vector<1x1x4x4xf32> to vector<4x4xf32>
      %c9_i32_35 = arith.constant 9 : i32
      %73 = arith.muli %2, %c9_i32_35 : i32
      %c6_i32 = arith.constant 6 : i32
      %74 = arith.addi %73, %c6_i32 : i32
      %c0_i32_36 = arith.constant 0 : i32
      %75 = arith.addi %74, %c0_i32_36 : i32
      %76 = arith.index_cast %75 : i32 to index
      %77 = memref.load %arg3[%76] : memref<1152xf32, #tpu.memory_space<smem>>
      %78 = vector.broadcast %77 : f32 to vector<4x4xf32>
      %79 = arith.mulf %72, %78 : vector<4x4xf32>
      %80 = arith.addf %69, %79 : vector<4x4xf32>
      %c0_37 = arith.constant 0 : index
      %81 = arith.index_cast %arg6 : i32 to index
      %c2_38 = arith.constant 2 : index
      %c1_39 = arith.constant 1 : index
      %82 = vector.load %arg2[%c0_37, %81, %c2_38, %c1_39] : memref<1x64x6x6xf32, #tpu.memory_space<vmem>>, vector<1x1x4x4xf32>
      %83 = vector.shape_cast %82 : vector<1x1x4x4xf32> to vector<4x4xf32>
      %c9_i32_40 = arith.constant 9 : i32
      %84 = arith.muli %2, %c9_i32_40 : i32
      %c6_i32_41 = arith.constant 6 : i32
      %85 = arith.addi %84, %c6_i32_41 : i32
      %c1_i32_42 = arith.constant 1 : i32
      %86 = arith.addi %85, %c1_i32_42 : i32
      %87 = arith.index_cast %86 : i32 to index
      %88 = memref.load %arg3[%87] : memref<1152xf32, #tpu.memory_space<smem>>
      %89 = vector.broadcast %88 : f32 to vector<4x4xf32>
      %90 = arith.mulf %83, %89 : vector<4x4xf32>
      %91 = arith.addf %80, %90 : vector<4x4xf32>
      %c0_43 = arith.constant 0 : index
      %92 = arith.index_cast %arg6 : i32 to index
      %c2_44 = arith.constant 2 : index
      %c2_45 = arith.constant 2 : index
      %93 = vector.load %arg2[%c0_43, %92, %c2_44, %c2_45] : memref<1x64x6x6xf32, #tpu.memory_space<vmem>>, vector<1x1x4x4xf32>
      %94 = vector.shape_cast %93 : vector<1x1x4x4xf32> to vector<4x4xf32>
      %c9_i32_46 = arith.constant 9 : i32
      %95 = arith.muli %2, %c9_i32_46 : i32
      %c6_i32_47 = arith.constant 6 : i32
      %96 = arith.addi %95, %c6_i32_47 : i32
      %c2_i32_48 = arith.constant 2 : i32
      %97 = arith.addi %96, %c2_i32_48 : i32
      %98 = arith.index_cast %97 : i32 to index
      %99 = memref.load %arg3[%98] : memref<1152xf32, #tpu.memory_space<smem>>
      %100 = vector.broadcast %99 : f32 to vector<4x4xf32>
      %101 = arith.mulf %94, %100 : vector<4x4xf32>
      %102 = arith.addf %91, %101 : vector<4x4xf32>
      %103 = arith.index_cast %2 : i32 to index
      %104 = memref.load %arg4[%103] : memref<128xf32, #tpu.memory_space<smem>>
      %105 = vector.broadcast %104 : f32 to vector<4x4xf32>
      %106 = arith.addf %102, %105 : vector<4x4xf32>
      %cst_49 = arith.constant 0.000000e+00 : f32
      %107 = vector.broadcast %cst_49 : f32 to vector<4x4xf32>
      %108 = arith.cmpf oge, %106, %107 : vector<4x4xf32>
      %cst_50 = arith.constant 1.000000e-01 : f32
      %109 = vector.broadcast %cst_50 : f32 to vector<4x4xf32>
      %110 = arith.mulf %106, %109 : vector<4x4xf32>
      %111 = arith.select %108, %106, %110 : vector<4x4xi1>, vector<4x4xf32>
      %c0_51 = arith.constant 0 : index
      %112 = arith.index_cast %arg6 : i32 to index
      %c0_52 = arith.constant 0 : index
      %c0_53 = arith.constant 0 : index
      %113 = vector.load %arg5[%c0_51, %112, %c0_52, %c0_53] : memref<1x64x4x4xf32, #tpu.memory_space<vmem>>, vector<1x1x4x4xf32>
      %114 = vector.shape_cast %113 : vector<1x1x4x4xf32> to vector<4x4xf32>
      %115 = vector.shape_cast %111 : vector<4x4xf32> to vector<1x1x4x4xf32>
      tpu.vector_store %arg5[%c0_51, %112, %c0_52, %c0_53], %115 {strides = array<i32>} : memref<1x64x4x4xf32, #tpu.memory_space<vmem>>, vector<1x1x4x4xf32>,
    }
    %c64_i32_0 = arith.constant 64 : i32
    return
  }
  func.func @transform_0(%arg0: i32, %arg1: i32) -> (i32, i32, i32, i32) {
    %c0_i32 = arith.constant 0 : i32
    %c0_i32_0 = arith.constant 0 : i32
    %c0_i32_1 = arith.constant 0 : i32
    return %arg0, %arg1, %c0_i32, %c0_i32_0 : i32, i32, i32, i32
  }
  func.func @transform_1(%arg0: i32, %arg1: i32) -> i32 {
    %c0_i32 = arith.constant 0 : i32
    %c0_i32_0 = arith.constant 0 : i32
    return %c0_i32 : i32
  }
  func.func @transform_2(%arg0: i32, %arg1: i32) -> i32 {
    %c0_i32 = arith.constant 0 : i32
    %c0_i32_0 = arith.constant 0 : i32
    return %c0_i32 : i32
  }
  func.func @transform_3(%arg0: i32, %arg1: i32) -> (i32, i32, i32, i32) {
    %c0_i32 = arith.constant 0 : i32
    %c0_i32_0 = arith.constant 0 : i32
    %c0_i32_1 = arith.constant 0 : i32
    return %arg0, %arg1, %c0_i32, %c0_i32_0 : i32, i32, i32, i32
  }
}

module attributes {stable_mosaic.version = 11 : i64} {
  func.func @kernel(%arg0: i32, %arg1: i32, %arg2: memref<1x128x16xf32, #tpu.memory_space<vmem>>, %arg3: memref<128x128xf32, #tpu.memory_space<vmem>>, %arg4: memref<128x1xf32, #tpu.memory_space<vmem>>, %arg5: memref<1x128x16xf32, #tpu.memory_space<vmem>>) attributes {dimension_semantics = [#tpu.dimension_semantics<parallel>, #tpu.dimension_semantics<parallel>], iteration_bounds = array<i64: 2, 1>, scalar_prefetch = 0 : i64, scratch_operands = 0 : i64, tpu.core_type = #tpu.core_type<tc>, window_params = [{transform_indices = @transform_0, window_bounds = array<i64: 1, 128, 16>}, {pipeline_mode = #tpu.pipeline_mode<synchronous>, transform_indices = @transform_1, window_bounds = array<i64: 128, 128>}, {pipeline_mode = #tpu.pipeline_mode<synchronous>, transform_indices = @transform_2, window_bounds = array<i64: 128, 1>}, {transform_indices = @transform_3, window_bounds = array<i64: 1, 128, 16>}]} {
    %c0 = arith.constant 0 : index
    %c0_0 = arith.constant 0 : index
    %0 = vector.load %arg3[%c0, %c0_0] : memref<128x128xf32, #tpu.memory_space<vmem>>, vector<128x128xf32>
    %c0_1 = arith.constant 0 : index
    %c0_2 = arith.constant 0 : index
    %c0_3 = arith.constant 0 : index
    %1 = vector.load %arg2[%c0_1, %c0_2, %c0_3] : memref<1x128x16xf32, #tpu.memory_space<vmem>>, vector<1x128x16xf32>
    %2 = vector.shape_cast %1 : vector<1x128x16xf32> to vector<128x16xf32>
    %cst = arith.constant dense<0.000000e+00> : vector<128x16xf32>
    %3 = tpu.matmul %0, %2, %cst {dimension_numbers = #tpu.dot_dimension_numbers<[1], [0], [0], [1], [0, 0, 1, 1], [], []>} : vector<128x128xf32>, vector<128x16xf32>, vector<128x16xf32> -> vector<128x16xf32>
    %c0_4 = arith.constant 0 : index
    %c0_5 = arith.constant 0 : index
    %4 = vector.load %arg4[%c0_4, %c0_5] : memref<128x1xf32, #tpu.memory_space<vmem>>, vector<128x1xf32>
    %5 = vector.broadcast %4 : vector<128x1xf32> to vector<128x16xf32>
    %6 = arith.addf %3, %5 : vector<128x16xf32>
    %cst_6 = arith.constant 0.000000e+00 : f32
    %7 = vector.broadcast %cst_6 : f32 to vector<128x16xf32>
    %8 = arith.cmpf oge, %6, %7 : vector<128x16xf32>
    %cst_7 = arith.constant 1.000000e-01 : f32
    %9 = vector.broadcast %cst_7 : f32 to vector<128x16xf32>
    %10 = arith.mulf %6, %9 : vector<128x16xf32>
    %11 = arith.select %8, %6, %10 : vector<128x16xi1>, vector<128x16xf32>
    %c0_8 = arith.constant 0 : index
    %c0_9 = arith.constant 0 : index
    %c0_10 = arith.constant 0 : index
    %12 = vector.load %arg5[%c0_8, %c0_9, %c0_10] : memref<1x128x16xf32, #tpu.memory_space<vmem>>, vector<1x128x16xf32>
    %13 = vector.shape_cast %12 : vector<1x128x16xf32> to vector<128x16xf32>
    %14 = vector.shape_cast %11 : vector<128x16xf32> to vector<1x128x16xf32>
    tpu.vector_store %arg5[%c0_8, %c0_9, %c0_10], %14 {strides = array<i32>} : memref<1x128x16xf32, #tpu.memory_space<vmem>>, vector<1x128x16xf32>,
    return
  }
  func.func @transform_0(%arg0: i32, %arg1: i32) -> (i32, i32, i32) {
    %c0_i32 = arith.constant 0 : i32
    %c0_i32_0 = arith.constant 0 : i32
    return %arg0, %c0_i32, %arg1 : i32, i32, i32
  }
  func.func @transform_1(%arg0: i32, %arg1: i32) -> (i32, i32) {
    %c0_i32 = arith.constant 0 : i32
    %c0_i32_0 = arith.constant 0 : i32
    %c0_i32_1 = arith.constant 0 : i32
    return %c0_i32, %c0_i32_0 : i32, i32
  }
  func.func @transform_2(%arg0: i32, %arg1: i32) -> (i32, i32) {
    %c0_i32 = arith.constant 0 : i32
    %c0_i32_0 = arith.constant 0 : i32
    %c0_i32_1 = arith.constant 0 : i32
    return %c0_i32, %c0_i32_0 : i32, i32
  }
  func.func @transform_3(%arg0: i32, %arg1: i32) -> (i32, i32, i32) {
    %c0_i32 = arith.constant 0 : i32
    %c0_i32_0 = arith.constant 0 : i32
    return %arg0, %c0_i32, %arg1 : i32, i32, i32
  }
}

module attributes {stable_mosaic.version = 11 : i64} {
  func.func @kernel(%arg0: i32, %arg1: i32, %arg2: memref<1x64x3x3xf32, #tpu.memory_space<vmem>>, %arg3: memref<1x64x3x3xf32, #tpu.memory_space<vmem>>, %arg4: memref<1x64x3x3xf32, #tpu.memory_space<vmem>>, %arg5: memref<1x64x3x3xf32, #tpu.memory_space<vmem>>, %arg6: memref<1152xf32, #tpu.memory_space<smem>>, %arg7: memref<128xf32, #tpu.memory_space<smem>>, %arg8: memref<1x64x2x2xf32, #tpu.memory_space<vmem>>) attributes {dimension_semantics = [#tpu.dimension_semantics<parallel>, #tpu.dimension_semantics<parallel>], iteration_bounds = array<i64: 2, 2>, scalar_prefetch = 0 : i64, scratch_operands = 0 : i64, tpu.core_type = #tpu.core_type<tc>, window_params = [{transform_indices = @transform_0, window_bounds = array<i64: 1, 64, 3, 3>}, {transform_indices = @transform_1, window_bounds = array<i64: 1, 64, 3, 3>}, {transform_indices = @transform_2, window_bounds = array<i64: 1, 64, 3, 3>}, {transform_indices = @transform_3, window_bounds = array<i64: 1, 64, 3, 3>}, {transform_indices = @transform_4, window_bounds = array<i64: 1152>}, {transform_indices = @transform_5, window_bounds = array<i64: 128>}, {transform_indices = @transform_6, window_bounds = array<i64: 1, 64, 2, 2>}]} {
    %c0_i32 = arith.constant 0 : i32
    %c64_i32 = arith.constant 64 : i32
    %0 = arith.addi %c0_i32, %c64_i32 : i32
    %c1_i32 = arith.constant 1 : i32
    scf.for %arg9 = %c0_i32 to %0 step %c1_i32  : i32 {
      %c64_i32_1 = arith.constant 64 : i32
      %1 = arith.muli %arg1, %c64_i32_1 : i32
      %2 = arith.addi %1, %arg9 : i32
      %cst = arith.constant 0.000000e+00 : f32
      %3 = vector.broadcast %cst : f32 to vector<2x2xf32>
      %c0 = arith.constant 0 : index
      %4 = arith.index_cast %arg9 : i32 to index
      %c0_2 = arith.constant 0 : index
      %c0_3 = arith.constant 0 : index
      %5 = vector.load %arg2[%c0, %4, %c0_2, %c0_3] : memref<1x64x3x3xf32, #tpu.memory_space<vmem>>, vector<1x1x2x2xf32>
      %6 = vector.shape_cast %5 : vector<1x1x2x2xf32> to vector<2x2xf32>
      %c9_i32 = arith.constant 9 : i32
      %7 = arith.muli %2, %c9_i32 : i32
      %c0_i32_4 = arith.constant 0 : i32
      %8 = arith.addi %7, %c0_i32_4 : i32
      %c0_i32_5 = arith.constant 0 : i32
      %9 = arith.addi %8, %c0_i32_5 : i32
      %10 = arith.index_cast %9 : i32 to index
      %11 = memref.load %arg6[%10] : memref<1152xf32, #tpu.memory_space<smem>>
      %12 = vector.broadcast %11 : f32 to vector<2x2xf32>
      %13 = arith.mulf %6, %12 : vector<2x2xf32>
      %14 = arith.addf %3, %13 : vector<2x2xf32>
      %c0_6 = arith.constant 0 : index
      %15 = arith.index_cast %arg9 : i32 to index
      %c0_7 = arith.constant 0 : index
      %c0_8 = arith.constant 0 : index
      %16 = vector.load %arg3[%c0_6, %15, %c0_7, %c0_8] : memref<1x64x3x3xf32, #tpu.memory_space<vmem>>, vector<1x1x2x2xf32>
      %17 = vector.shape_cast %16 : vector<1x1x2x2xf32> to vector<2x2xf32>
      %c9_i32_9 = arith.constant 9 : i32
      %18 = arith.muli %2, %c9_i32_9 : i32
      %c0_i32_10 = arith.constant 0 : i32
      %19 = arith.addi %18, %c0_i32_10 : i32
      %c1_i32_11 = arith.constant 1 : i32
      %20 = arith.addi %19, %c1_i32_11 : i32
      %21 = arith.index_cast %20 : i32 to index
      %22 = memref.load %arg6[%21] : memref<1152xf32, #tpu.memory_space<smem>>
      %23 = vector.broadcast %22 : f32 to vector<2x2xf32>
      %24 = arith.mulf %17, %23 : vector<2x2xf32>
      %25 = arith.addf %14, %24 : vector<2x2xf32>
      %c0_12 = arith.constant 0 : index
      %26 = arith.index_cast %arg9 : i32 to index
      %c0_13 = arith.constant 0 : index
      %c1 = arith.constant 1 : index
      %27 = vector.load %arg2[%c0_12, %26, %c0_13, %c1] : memref<1x64x3x3xf32, #tpu.memory_space<vmem>>, vector<1x1x2x2xf32>
      %28 = vector.shape_cast %27 : vector<1x1x2x2xf32> to vector<2x2xf32>
      %c9_i32_14 = arith.constant 9 : i32
      %29 = arith.muli %2, %c9_i32_14 : i32
      %c0_i32_15 = arith.constant 0 : i32
      %30 = arith.addi %29, %c0_i32_15 : i32
      %c2_i32 = arith.constant 2 : i32
      %31 = arith.addi %30, %c2_i32 : i32
      %32 = arith.index_cast %31 : i32 to index
      %33 = memref.load %arg6[%32] : memref<1152xf32, #tpu.memory_space<smem>>
      %34 = vector.broadcast %33 : f32 to vector<2x2xf32>
      %35 = arith.mulf %28, %34 : vector<2x2xf32>
      %36 = arith.addf %25, %35 : vector<2x2xf32>
      %c0_16 = arith.constant 0 : index
      %37 = arith.index_cast %arg9 : i32 to index
      %c0_17 = arith.constant 0 : index
      %c0_18 = arith.constant 0 : index
      %38 = vector.load %arg4[%c0_16, %37, %c0_17, %c0_18] : memref<1x64x3x3xf32, #tpu.memory_space<vmem>>, vector<1x1x2x2xf32>
      %39 = vector.shape_cast %38 : vector<1x1x2x2xf32> to vector<2x2xf32>
      %c9_i32_19 = arith.constant 9 : i32
      %40 = arith.muli %2, %c9_i32_19 : i32
      %c3_i32 = arith.constant 3 : i32
      %41 = arith.addi %40, %c3_i32 : i32
      %c0_i32_20 = arith.constant 0 : i32
      %42 = arith.addi %41, %c0_i32_20 : i32
      %43 = arith.index_cast %42 : i32 to index
      %44 = memref.load %arg6[%43] : memref<1152xf32, #tpu.memory_space<smem>>
      %45 = vector.broadcast %44 : f32 to vector<2x2xf32>
      %46 = arith.mulf %39, %45 : vector<2x2xf32>
      %47 = arith.addf %36, %46 : vector<2x2xf32>
      %c0_21 = arith.constant 0 : index
      %48 = arith.index_cast %arg9 : i32 to index
      %c0_22 = arith.constant 0 : index
      %c0_23 = arith.constant 0 : index
      %49 = vector.load %arg5[%c0_21, %48, %c0_22, %c0_23] : memref<1x64x3x3xf32, #tpu.memory_space<vmem>>, vector<1x1x2x2xf32>
      %50 = vector.shape_cast %49 : vector<1x1x2x2xf32> to vector<2x2xf32>
      %c9_i32_24 = arith.constant 9 : i32
      %51 = arith.muli %2, %c9_i32_24 : i32
      %c3_i32_25 = arith.constant 3 : i32
      %52 = arith.addi %51, %c3_i32_25 : i32
      %c1_i32_26 = arith.constant 1 : i32
      %53 = arith.addi %52, %c1_i32_26 : i32
      %54 = arith.index_cast %53 : i32 to index
      %55 = memref.load %arg6[%54] : memref<1152xf32, #tpu.memory_space<smem>>
      %56 = vector.broadcast %55 : f32 to vector<2x2xf32>
      %57 = arith.mulf %50, %56 : vector<2x2xf32>
      %58 = arith.addf %47, %57 : vector<2x2xf32>
      %c0_27 = arith.constant 0 : index
      %59 = arith.index_cast %arg9 : i32 to index
      %c0_28 = arith.constant 0 : index
      %c1_29 = arith.constant 1 : index
      %60 = vector.load %arg4[%c0_27, %59, %c0_28, %c1_29] : memref<1x64x3x3xf32, #tpu.memory_space<vmem>>, vector<1x1x2x2xf32>
      %61 = vector.shape_cast %60 : vector<1x1x2x2xf32> to vector<2x2xf32>
      %c9_i32_30 = arith.constant 9 : i32
      %62 = arith.muli %2, %c9_i32_30 : i32
      %c3_i32_31 = arith.constant 3 : i32
      %63 = arith.addi %62, %c3_i32_31 : i32
      %c2_i32_32 = arith.constant 2 : i32
      %64 = arith.addi %63, %c2_i32_32 : i32
      %65 = arith.index_cast %64 : i32 to index
      %66 = memref.load %arg6[%65] : memref<1152xf32, #tpu.memory_space<smem>>
      %67 = vector.broadcast %66 : f32 to vector<2x2xf32>
      %68 = arith.mulf %61, %67 : vector<2x2xf32>
      %69 = arith.addf %58, %68 : vector<2x2xf32>
      %c0_33 = arith.constant 0 : index
      %70 = arith.index_cast %arg9 : i32 to index
      %c1_34 = arith.constant 1 : index
      %c0_35 = arith.constant 0 : index
      %71 = vector.load %arg2[%c0_33, %70, %c1_34, %c0_35] : memref<1x64x3x3xf32, #tpu.memory_space<vmem>>, vector<1x1x2x2xf32>
      %72 = vector.shape_cast %71 : vector<1x1x2x2xf32> to vector<2x2xf32>
      %c9_i32_36 = arith.constant 9 : i32
      %73 = arith.muli %2, %c9_i32_36 : i32
      %c6_i32 = arith.constant 6 : i32
      %74 = arith.addi %73, %c6_i32 : i32
      %c0_i32_37 = arith.constant 0 : i32
      %75 = arith.addi %74, %c0_i32_37 : i32
      %76 = arith.index_cast %75 : i32 to index
      %77 = memref.load %arg6[%76] : memref<1152xf32, #tpu.memory_space<smem>>
      %78 = vector.broadcast %77 : f32 to vector<2x2xf32>
      %79 = arith.mulf %72, %78 : vector<2x2xf32>
      %80 = arith.addf %69, %79 : vector<2x2xf32>
      %c0_38 = arith.constant 0 : index
      %81 = arith.index_cast %arg9 : i32 to index
      %c1_39 = arith.constant 1 : index
      %c0_40 = arith.constant 0 : index
      %82 = vector.load %arg3[%c0_38, %81, %c1_39, %c0_40] : memref<1x64x3x3xf32, #tpu.memory_space<vmem>>, vector<1x1x2x2xf32>
      %83 = vector.shape_cast %82 : vector<1x1x2x2xf32> to vector<2x2xf32>
      %c9_i32_41 = arith.constant 9 : i32
      %84 = arith.muli %2, %c9_i32_41 : i32
      %c6_i32_42 = arith.constant 6 : i32
      %85 = arith.addi %84, %c6_i32_42 : i32
      %c1_i32_43 = arith.constant 1 : i32
      %86 = arith.addi %85, %c1_i32_43 : i32
      %87 = arith.index_cast %86 : i32 to index
      %88 = memref.load %arg6[%87] : memref<1152xf32, #tpu.memory_space<smem>>
      %89 = vector.broadcast %88 : f32 to vector<2x2xf32>
      %90 = arith.mulf %83, %89 : vector<2x2xf32>
      %91 = arith.addf %80, %90 : vector<2x2xf32>
      %c0_44 = arith.constant 0 : index
      %92 = arith.index_cast %arg9 : i32 to index
      %c1_45 = arith.constant 1 : index
      %c1_46 = arith.constant 1 : index
      %93 = vector.load %arg2[%c0_44, %92, %c1_45, %c1_46] : memref<1x64x3x3xf32, #tpu.memory_space<vmem>>, vector<1x1x2x2xf32>
      %94 = vector.shape_cast %93 : vector<1x1x2x2xf32> to vector<2x2xf32>
      %c9_i32_47 = arith.constant 9 : i32
      %95 = arith.muli %2, %c9_i32_47 : i32
      %c6_i32_48 = arith.constant 6 : i32
      %96 = arith.addi %95, %c6_i32_48 : i32
      %c2_i32_49 = arith.constant 2 : i32
      %97 = arith.addi %96, %c2_i32_49 : i32
      %98 = arith.index_cast %97 : i32 to index
      %99 = memref.load %arg6[%98] : memref<1152xf32, #tpu.memory_space<smem>>
      %100 = vector.broadcast %99 : f32 to vector<2x2xf32>
      %101 = arith.mulf %94, %100 : vector<2x2xf32>
      %102 = arith.addf %91, %101 : vector<2x2xf32>
      %103 = arith.index_cast %2 : i32 to index
      %104 = memref.load %arg7[%103] : memref<128xf32, #tpu.memory_space<smem>>
      %105 = vector.broadcast %104 : f32 to vector<2x2xf32>
      %106 = arith.addf %102, %105 : vector<2x2xf32>
      %cst_50 = arith.constant 0.000000e+00 : f32
      %107 = vector.broadcast %cst_50 : f32 to vector<2x2xf32>
      %108 = arith.cmpf oge, %106, %107 : vector<2x2xf32>
      %cst_51 = arith.constant 1.000000e-01 : f32
      %109 = vector.broadcast %cst_51 : f32 to vector<2x2xf32>
      %110 = arith.mulf %106, %109 : vector<2x2xf32>
      %111 = arith.select %108, %106, %110 : vector<2x2xi1>, vector<2x2xf32>
      %c0_52 = arith.constant 0 : index
      %112 = arith.index_cast %arg9 : i32 to index
      %c0_53 = arith.constant 0 : index
      %c0_54 = arith.constant 0 : index
      %113 = vector.load %arg8[%c0_52, %112, %c0_53, %c0_54] : memref<1x64x2x2xf32, #tpu.memory_space<vmem>>, vector<1x1x2x2xf32>
      %114 = vector.shape_cast %113 : vector<1x1x2x2xf32> to vector<2x2xf32>
      %115 = vector.shape_cast %111 : vector<2x2xf32> to vector<1x1x2x2xf32>
      tpu.vector_store %arg8[%c0_52, %112, %c0_53, %c0_54], %115 {strides = array<i32>} : memref<1x64x2x2xf32, #tpu.memory_space<vmem>>, vector<1x1x2x2xf32>,
    }
    %c64_i32_0 = arith.constant 64 : i32
    return
  }
  func.func @transform_0(%arg0: i32, %arg1: i32) -> (i32, i32, i32, i32) {
    %c0_i32 = arith.constant 0 : i32
    %c0_i32_0 = arith.constant 0 : i32
    %c0_i32_1 = arith.constant 0 : i32
    return %arg0, %arg1, %c0_i32, %c0_i32_0 : i32, i32, i32, i32
  }
  func.func @transform_1(%arg0: i32, %arg1: i32) -> (i32, i32, i32, i32) {
    %c0_i32 = arith.constant 0 : i32
    %c0_i32_0 = arith.constant 0 : i32
    %c0_i32_1 = arith.constant 0 : i32
    return %arg0, %arg1, %c0_i32, %c0_i32_0 : i32, i32, i32, i32
  }
  func.func @transform_2(%arg0: i32, %arg1: i32) -> (i32, i32, i32, i32) {
    %c0_i32 = arith.constant 0 : i32
    %c0_i32_0 = arith.constant 0 : i32
    %c0_i32_1 = arith.constant 0 : i32
    return %arg0, %arg1, %c0_i32, %c0_i32_0 : i32, i32, i32, i32
  }
  func.func @transform_3(%arg0: i32, %arg1: i32) -> (i32, i32, i32, i32) {
    %c0_i32 = arith.constant 0 : i32
    %c0_i32_0 = arith.constant 0 : i32
    %c0_i32_1 = arith.constant 0 : i32
    return %arg0, %arg1, %c0_i32, %c0_i32_0 : i32, i32, i32, i32
  }
  func.func @transform_4(%arg0: i32, %arg1: i32) -> i32 {
    %c0_i32 = arith.constant 0 : i32
    %c0_i32_0 = arith.constant 0 : i32
    return %c0_i32 : i32
  }
  func.func @transform_5(%arg0: i32, %arg1: i32) -> i32 {
    %c0_i32 = arith.constant 0 : i32
    %c0_i32_0 = arith.constant 0 : i32
    return %c0_i32 : i32
  }
  func.func @transform_6(%arg0: i32, %arg1: i32) -> (i32, i32, i32, i32) {
    %c0_i32 = arith.constant 0 : i32
    %c0_i32_0 = arith.constant 0 : i32
    %c0_i32_1 = arith.constant 0 : i32
    return %arg0, %arg1, %c0_i32, %c0_i32_0 : i32, i32, i32, i32
  }
}

module attributes {stable_mosaic.version = 11 : i64} {
  func.func @kernel(%arg0: i32, %arg1: i32, %arg2: memref<1x128x4xf32, #tpu.memory_space<vmem>>, %arg3: memref<256x128xf32, #tpu.memory_space<vmem>>, %arg4: memref<256x1xf32, #tpu.memory_space<vmem>>, %arg5: memref<1x256x4xf32, #tpu.memory_space<vmem>>) attributes {dimension_semantics = [#tpu.dimension_semantics<parallel>, #tpu.dimension_semantics<parallel>], iteration_bounds = array<i64: 2, 1>, scalar_prefetch = 0 : i64, scratch_operands = 0 : i64, tpu.core_type = #tpu.core_type<tc>, window_params = [{transform_indices = @transform_0, window_bounds = array<i64: 1, 128, 4>}, {pipeline_mode = #tpu.pipeline_mode<synchronous>, transform_indices = @transform_1, window_bounds = array<i64: 256, 128>}, {pipeline_mode = #tpu.pipeline_mode<synchronous>, transform_indices = @transform_2, window_bounds = array<i64: 256, 1>}, {transform_indices = @transform_3, window_bounds = array<i64: 1, 256, 4>}]} {
    %c0 = arith.constant 0 : index
    %c0_0 = arith.constant 0 : index
    %0 = vector.load %arg3[%c0, %c0_0] : memref<256x128xf32, #tpu.memory_space<vmem>>, vector<256x128xf32>
    %c0_1 = arith.constant 0 : index
    %c0_2 = arith.constant 0 : index
    %c0_3 = arith.constant 0 : index
    %1 = vector.load %arg2[%c0_1, %c0_2, %c0_3] : memref<1x128x4xf32, #tpu.memory_space<vmem>>, vector<1x128x4xf32>
    %2 = vector.shape_cast %1 : vector<1x128x4xf32> to vector<128x4xf32>
    %cst = arith.constant dense<0.000000e+00> : vector<256x4xf32>
    %3 = tpu.matmul %0, %2, %cst {dimension_numbers = #tpu.dot_dimension_numbers<[1], [0], [0], [1], [0, 0, 1, 1], [], []>} : vector<256x128xf32>, vector<128x4xf32>, vector<256x4xf32> -> vector<256x4xf32>
    %c0_4 = arith.constant 0 : index
    %c0_5 = arith.constant 0 : index
    %4 = vector.load %arg4[%c0_4, %c0_5] : memref<256x1xf32, #tpu.memory_space<vmem>>, vector<256x1xf32>
    %5 = vector.broadcast %4 : vector<256x1xf32> to vector<256x4xf32>
    %6 = arith.addf %3, %5 : vector<256x4xf32>
    %cst_6 = arith.constant 0.000000e+00 : f32
    %7 = vector.broadcast %cst_6 : f32 to vector<256x4xf32>
    %8 = arith.cmpf oge, %6, %7 : vector<256x4xf32>
    %cst_7 = arith.constant 1.000000e-01 : f32
    %9 = vector.broadcast %cst_7 : f32 to vector<256x4xf32>
    %10 = arith.mulf %6, %9 : vector<256x4xf32>
    %11 = arith.select %8, %6, %10 : vector<256x4xi1>, vector<256x4xf32>
    %c0_8 = arith.constant 0 : index
    %c0_9 = arith.constant 0 : index
    %c0_10 = arith.constant 0 : index
    %12 = vector.load %arg5[%c0_8, %c0_9, %c0_10] : memref<1x256x4xf32, #tpu.memory_space<vmem>>, vector<1x256x4xf32>
    %13 = vector.shape_cast %12 : vector<1x256x4xf32> to vector<256x4xf32>
    %14 = vector.shape_cast %11 : vector<256x4xf32> to vector<1x256x4xf32>
    tpu.vector_store %arg5[%c0_8, %c0_9, %c0_10], %14 {strides = array<i32>} : memref<1x256x4xf32, #tpu.memory_space<vmem>>, vector<1x256x4xf32>,
    return
  }
  func.func @transform_0(%arg0: i32, %arg1: i32) -> (i32, i32, i32) {
    %c0_i32 = arith.constant 0 : i32
    %c0_i32_0 = arith.constant 0 : i32
    return %arg0, %c0_i32, %arg1 : i32, i32, i32
  }
  func.func @transform_1(%arg0: i32, %arg1: i32) -> (i32, i32) {
    %c0_i32 = arith.constant 0 : i32
    %c0_i32_0 = arith.constant 0 : i32
    %c0_i32_1 = arith.constant 0 : i32
    return %c0_i32, %c0_i32_0 : i32, i32
  }
  func.func @transform_2(%arg0: i32, %arg1: i32) -> (i32, i32) {
    %c0_i32 = arith.constant 0 : i32
    %c0_i32_0 = arith.constant 0 : i32
    %c0_i32_1 = arith.constant 0 : i32
    return %c0_i32, %c0_i32_0 : i32, i32
  }
  func.func @transform_3(%arg0: i32, %arg1: i32) -> (i32, i32, i32) {
    %c0_i32 = arith.constant 0 : i32
    %c0_i32_0 = arith.constant 0 : i32
    return %arg0, %c0_i32, %arg1 : i32, i32, i32
  }
}

module attributes {stable_mosaic.version = 11 : i64} {
  func.func @kernel(%arg0: i32, %arg1: i32, %arg2: memref<1x64x4x4xf32, #tpu.memory_space<vmem>>, %arg3: memref<2304xf32, #tpu.memory_space<smem>>, %arg4: memref<256xf32, #tpu.memory_space<smem>>, %arg5: memref<1x64x2x2xf32, #tpu.memory_space<vmem>>) attributes {dimension_semantics = [#tpu.dimension_semantics<parallel>, #tpu.dimension_semantics<parallel>], iteration_bounds = array<i64: 2, 4>, scalar_prefetch = 0 : i64, scratch_operands = 0 : i64, tpu.core_type = #tpu.core_type<tc>, window_params = [{transform_indices = @transform_0, window_bounds = array<i64: 1, 64, 4, 4>}, {transform_indices = @transform_1, window_bounds = array<i64: 2304>}, {transform_indices = @transform_2, window_bounds = array<i64: 256>}, {transform_indices = @transform_3, window_bounds = array<i64: 1, 64, 2, 2>}]} {
    %c0_i32 = arith.constant 0 : i32
    %c64_i32 = arith.constant 64 : i32
    %0 = arith.addi %c0_i32, %c64_i32 : i32
    %c1_i32 = arith.constant 1 : i32
    scf.for %arg6 = %c0_i32 to %0 step %c1_i32  : i32 {
      %c64_i32_1 = arith.constant 64 : i32
      %1 = arith.muli %arg1, %c64_i32_1 : i32
      %2 = arith.addi %1, %arg6 : i32
      %cst = arith.constant 0.000000e+00 : f32
      %3 = vector.broadcast %cst : f32 to vector<2x2xf32>
      %c0 = arith.constant 0 : index
      %4 = arith.index_cast %arg6 : i32 to index
      %c0_2 = arith.constant 0 : index
      %c0_3 = arith.constant 0 : index
      %5 = vector.load %arg2[%c0, %4, %c0_2, %c0_3] : memref<1x64x4x4xf32, #tpu.memory_space<vmem>>, vector<1x1x2x2xf32>
      %6 = vector.shape_cast %5 : vector<1x1x2x2xf32> to vector<2x2xf32>
      %c9_i32 = arith.constant 9 : i32
      %7 = arith.muli %2, %c9_i32 : i32
      %c0_i32_4 = arith.constant 0 : i32
      %8 = arith.addi %7, %c0_i32_4 : i32
      %c0_i32_5 = arith.constant 0 : i32
      %9 = arith.addi %8, %c0_i32_5 : i32
      %10 = arith.index_cast %9 : i32 to index
      %11 = memref.load %arg3[%10] : memref<2304xf32, #tpu.memory_space<smem>>
      %12 = vector.broadcast %11 : f32 to vector<2x2xf32>
      %13 = arith.mulf %6, %12 : vector<2x2xf32>
      %14 = arith.addf %3, %13 : vector<2x2xf32>
      %c0_6 = arith.constant 0 : index
      %15 = arith.index_cast %arg6 : i32 to index
      %c0_7 = arith.constant 0 : index
      %c1 = arith.constant 1 : index
      %16 = vector.load %arg2[%c0_6, %15, %c0_7, %c1] : memref<1x64x4x4xf32, #tpu.memory_space<vmem>>, vector<1x1x2x2xf32>
      %17 = vector.shape_cast %16 : vector<1x1x2x2xf32> to vector<2x2xf32>
      %c9_i32_8 = arith.constant 9 : i32
      %18 = arith.muli %2, %c9_i32_8 : i32
      %c0_i32_9 = arith.constant 0 : i32
      %19 = arith.addi %18, %c0_i32_9 : i32
      %c1_i32_10 = arith.constant 1 : i32
      %20 = arith.addi %19, %c1_i32_10 : i32
      %21 = arith.index_cast %20 : i32 to index
      %22 = memref.load %arg3[%21] : memref<2304xf32, #tpu.memory_space<smem>>
      %23 = vector.broadcast %22 : f32 to vector<2x2xf32>
      %24 = arith.mulf %17, %23 : vector<2x2xf32>
      %25 = arith.addf %14, %24 : vector<2x2xf32>
      %c0_11 = arith.constant 0 : index
      %26 = arith.index_cast %arg6 : i32 to index
      %c0_12 = arith.constant 0 : index
      %c2 = arith.constant 2 : index
      %27 = vector.load %arg2[%c0_11, %26, %c0_12, %c2] : memref<1x64x4x4xf32, #tpu.memory_space<vmem>>, vector<1x1x2x2xf32>
      %28 = vector.shape_cast %27 : vector<1x1x2x2xf32> to vector<2x2xf32>
      %c9_i32_13 = arith.constant 9 : i32
      %29 = arith.muli %2, %c9_i32_13 : i32
      %c0_i32_14 = arith.constant 0 : i32
      %30 = arith.addi %29, %c0_i32_14 : i32
      %c2_i32 = arith.constant 2 : i32
      %31 = arith.addi %30, %c2_i32 : i32
      %32 = arith.index_cast %31 : i32 to index
      %33 = memref.load %arg3[%32] : memref<2304xf32, #tpu.memory_space<smem>>
      %34 = vector.broadcast %33 : f32 to vector<2x2xf32>
      %35 = arith.mulf %28, %34 : vector<2x2xf32>
      %36 = arith.addf %25, %35 : vector<2x2xf32>
      %c0_15 = arith.constant 0 : index
      %37 = arith.index_cast %arg6 : i32 to index
      %c1_16 = arith.constant 1 : index
      %c0_17 = arith.constant 0 : index
      %38 = vector.load %arg2[%c0_15, %37, %c1_16, %c0_17] : memref<1x64x4x4xf32, #tpu.memory_space<vmem>>, vector<1x1x2x2xf32>
      %39 = vector.shape_cast %38 : vector<1x1x2x2xf32> to vector<2x2xf32>
      %c9_i32_18 = arith.constant 9 : i32
      %40 = arith.muli %2, %c9_i32_18 : i32
      %c3_i32 = arith.constant 3 : i32
      %41 = arith.addi %40, %c3_i32 : i32
      %c0_i32_19 = arith.constant 0 : i32
      %42 = arith.addi %41, %c0_i32_19 : i32
      %43 = arith.index_cast %42 : i32 to index
      %44 = memref.load %arg3[%43] : memref<2304xf32, #tpu.memory_space<smem>>
      %45 = vector.broadcast %44 : f32 to vector<2x2xf32>
      %46 = arith.mulf %39, %45 : vector<2x2xf32>
      %47 = arith.addf %36, %46 : vector<2x2xf32>
      %c0_20 = arith.constant 0 : index
      %48 = arith.index_cast %arg6 : i32 to index
      %c1_21 = arith.constant 1 : index
      %c1_22 = arith.constant 1 : index
      %49 = vector.load %arg2[%c0_20, %48, %c1_21, %c1_22] : memref<1x64x4x4xf32, #tpu.memory_space<vmem>>, vector<1x1x2x2xf32>
      %50 = vector.shape_cast %49 : vector<1x1x2x2xf32> to vector<2x2xf32>
      %c9_i32_23 = arith.constant 9 : i32
      %51 = arith.muli %2, %c9_i32_23 : i32
      %c3_i32_24 = arith.constant 3 : i32
      %52 = arith.addi %51, %c3_i32_24 : i32
      %c1_i32_25 = arith.constant 1 : i32
      %53 = arith.addi %52, %c1_i32_25 : i32
      %54 = arith.index_cast %53 : i32 to index
      %55 = memref.load %arg3[%54] : memref<2304xf32, #tpu.memory_space<smem>>
      %56 = vector.broadcast %55 : f32 to vector<2x2xf32>
      %57 = arith.mulf %50, %56 : vector<2x2xf32>
      %58 = arith.addf %47, %57 : vector<2x2xf32>
      %c0_26 = arith.constant 0 : index
      %59 = arith.index_cast %arg6 : i32 to index
      %c1_27 = arith.constant 1 : index
      %c2_28 = arith.constant 2 : index
      %60 = vector.load %arg2[%c0_26, %59, %c1_27, %c2_28] : memref<1x64x4x4xf32, #tpu.memory_space<vmem>>, vector<1x1x2x2xf32>
      %61 = vector.shape_cast %60 : vector<1x1x2x2xf32> to vector<2x2xf32>
      %c9_i32_29 = arith.constant 9 : i32
      %62 = arith.muli %2, %c9_i32_29 : i32
      %c3_i32_30 = arith.constant 3 : i32
      %63 = arith.addi %62, %c3_i32_30 : i32
      %c2_i32_31 = arith.constant 2 : i32
      %64 = arith.addi %63, %c2_i32_31 : i32
      %65 = arith.index_cast %64 : i32 to index
      %66 = memref.load %arg3[%65] : memref<2304xf32, #tpu.memory_space<smem>>
      %67 = vector.broadcast %66 : f32 to vector<2x2xf32>
      %68 = arith.mulf %61, %67 : vector<2x2xf32>
      %69 = arith.addf %58, %68 : vector<2x2xf32>
      %c0_32 = arith.constant 0 : index
      %70 = arith.index_cast %arg6 : i32 to index
      %c2_33 = arith.constant 2 : index
      %c0_34 = arith.constant 0 : index
      %71 = vector.load %arg2[%c0_32, %70, %c2_33, %c0_34] : memref<1x64x4x4xf32, #tpu.memory_space<vmem>>, vector<1x1x2x2xf32>
      %72 = vector.shape_cast %71 : vector<1x1x2x2xf32> to vector<2x2xf32>
      %c9_i32_35 = arith.constant 9 : i32
      %73 = arith.muli %2, %c9_i32_35 : i32
      %c6_i32 = arith.constant 6 : i32
      %74 = arith.addi %73, %c6_i32 : i32
      %c0_i32_36 = arith.constant 0 : i32
      %75 = arith.addi %74, %c0_i32_36 : i32
      %76 = arith.index_cast %75 : i32 to index
      %77 = memref.load %arg3[%76] : memref<2304xf32, #tpu.memory_space<smem>>
      %78 = vector.broadcast %77 : f32 to vector<2x2xf32>
      %79 = arith.mulf %72, %78 : vector<2x2xf32>
      %80 = arith.addf %69, %79 : vector<2x2xf32>
      %c0_37 = arith.constant 0 : index
      %81 = arith.index_cast %arg6 : i32 to index
      %c2_38 = arith.constant 2 : index
      %c1_39 = arith.constant 1 : index
      %82 = vector.load %arg2[%c0_37, %81, %c2_38, %c1_39] : memref<1x64x4x4xf32, #tpu.memory_space<vmem>>, vector<1x1x2x2xf32>
      %83 = vector.shape_cast %82 : vector<1x1x2x2xf32> to vector<2x2xf32>
      %c9_i32_40 = arith.constant 9 : i32
      %84 = arith.muli %2, %c9_i32_40 : i32
      %c6_i32_41 = arith.constant 6 : i32
      %85 = arith.addi %84, %c6_i32_41 : i32
      %c1_i32_42 = arith.constant 1 : i32
      %86 = arith.addi %85, %c1_i32_42 : i32
      %87 = arith.index_cast %86 : i32 to index
      %88 = memref.load %arg3[%87] : memref<2304xf32, #tpu.memory_space<smem>>
      %89 = vector.broadcast %88 : f32 to vector<2x2xf32>
      %90 = arith.mulf %83, %89 : vector<2x2xf32>
      %91 = arith.addf %80, %90 : vector<2x2xf32>
      %c0_43 = arith.constant 0 : index
      %92 = arith.index_cast %arg6 : i32 to index
      %c2_44 = arith.constant 2 : index
      %c2_45 = arith.constant 2 : index
      %93 = vector.load %arg2[%c0_43, %92, %c2_44, %c2_45] : memref<1x64x4x4xf32, #tpu.memory_space<vmem>>, vector<1x1x2x2xf32>
      %94 = vector.shape_cast %93 : vector<1x1x2x2xf32> to vector<2x2xf32>
      %c9_i32_46 = arith.constant 9 : i32
      %95 = arith.muli %2, %c9_i32_46 : i32
      %c6_i32_47 = arith.constant 6 : i32
      %96 = arith.addi %95, %c6_i32_47 : i32
      %c2_i32_48 = arith.constant 2 : i32
      %97 = arith.addi %96, %c2_i32_48 : i32
      %98 = arith.index_cast %97 : i32 to index
      %99 = memref.load %arg3[%98] : memref<2304xf32, #tpu.memory_space<smem>>
      %100 = vector.broadcast %99 : f32 to vector<2x2xf32>
      %101 = arith.mulf %94, %100 : vector<2x2xf32>
      %102 = arith.addf %91, %101 : vector<2x2xf32>
      %103 = arith.index_cast %2 : i32 to index
      %104 = memref.load %arg4[%103] : memref<256xf32, #tpu.memory_space<smem>>
      %105 = vector.broadcast %104 : f32 to vector<2x2xf32>
      %106 = arith.addf %102, %105 : vector<2x2xf32>
      %cst_49 = arith.constant 0.000000e+00 : f32
      %107 = vector.broadcast %cst_49 : f32 to vector<2x2xf32>
      %108 = arith.cmpf oge, %106, %107 : vector<2x2xf32>
      %cst_50 = arith.constant 1.000000e-01 : f32
      %109 = vector.broadcast %cst_50 : f32 to vector<2x2xf32>
      %110 = arith.mulf %106, %109 : vector<2x2xf32>
      %111 = arith.select %108, %106, %110 : vector<2x2xi1>, vector<2x2xf32>
      %c0_51 = arith.constant 0 : index
      %112 = arith.index_cast %arg6 : i32 to index
      %c0_52 = arith.constant 0 : index
      %c0_53 = arith.constant 0 : index
      %113 = vector.load %arg5[%c0_51, %112, %c0_52, %c0_53] : memref<1x64x2x2xf32, #tpu.memory_space<vmem>>, vector<1x1x2x2xf32>
      %114 = vector.shape_cast %113 : vector<1x1x2x2xf32> to vector<2x2xf32>
      %115 = vector.shape_cast %111 : vector<2x2xf32> to vector<1x1x2x2xf32>
      tpu.vector_store %arg5[%c0_51, %112, %c0_52, %c0_53], %115 {strides = array<i32>} : memref<1x64x2x2xf32, #tpu.memory_space<vmem>>, vector<1x1x2x2xf32>,
    }
    %c64_i32_0 = arith.constant 64 : i32
    return
  }
  func.func @transform_0(%arg0: i32, %arg1: i32) -> (i32, i32, i32, i32) {
    %c0_i32 = arith.constant 0 : i32
    %c0_i32_0 = arith.constant 0 : i32
    %c0_i32_1 = arith.constant 0 : i32
    return %arg0, %arg1, %c0_i32, %c0_i32_0 : i32, i32, i32, i32
  }
  func.func @transform_1(%arg0: i32, %arg1: i32) -> i32 {
    %c0_i32 = arith.constant 0 : i32
    %c0_i32_0 = arith.constant 0 : i32
    return %c0_i32 : i32
  }
  func.func @transform_2(%arg0: i32, %arg1: i32) -> i32 {
    %c0_i32 = arith.constant 0 : i32
    %c0_i32_0 = arith.constant 0 : i32
    return %c0_i32 : i32
  }
  func.func @transform_3(%arg0: i32, %arg1: i32) -> (i32, i32, i32, i32) {
    %c0_i32 = arith.constant 0 : i32
    %c0_i32_0 = arith.constant 0 : i32
    %c0_i32_1 = arith.constant 0 : i32
    return %arg0, %arg1, %c0_i32, %c0_i32_0 : i32, i32, i32, i32
  }
}

module attributes {stable_mosaic.version = 11 : i64} {
  func.func @kernel(%arg0: i32, %arg1: i32, %arg2: memref<1x256x4xf32, #tpu.memory_space<vmem>>, %arg3: memref<256x256xf32, #tpu.memory_space<vmem>>, %arg4: memref<256x1xf32, #tpu.memory_space<vmem>>, %arg5: memref<1x256x4xf32, #tpu.memory_space<vmem>>) attributes {dimension_semantics = [#tpu.dimension_semantics<parallel>, #tpu.dimension_semantics<parallel>], iteration_bounds = array<i64: 2, 1>, scalar_prefetch = 0 : i64, scratch_operands = 0 : i64, tpu.core_type = #tpu.core_type<tc>, window_params = [{transform_indices = @transform_0, window_bounds = array<i64: 1, 256, 4>}, {pipeline_mode = #tpu.pipeline_mode<synchronous>, transform_indices = @transform_1, window_bounds = array<i64: 256, 256>}, {pipeline_mode = #tpu.pipeline_mode<synchronous>, transform_indices = @transform_2, window_bounds = array<i64: 256, 1>}, {transform_indices = @transform_3, window_bounds = array<i64: 1, 256, 4>}]} {
    %c0 = arith.constant 0 : index
    %c0_0 = arith.constant 0 : index
    %0 = vector.load %arg3[%c0, %c0_0] : memref<256x256xf32, #tpu.memory_space<vmem>>, vector<256x256xf32>
    %c0_1 = arith.constant 0 : index
    %c0_2 = arith.constant 0 : index
    %c0_3 = arith.constant 0 : index
    %1 = vector.load %arg2[%c0_1, %c0_2, %c0_3] : memref<1x256x4xf32, #tpu.memory_space<vmem>>, vector<1x256x4xf32>
    %2 = vector.shape_cast %1 : vector<1x256x4xf32> to vector<256x4xf32>
    %cst = arith.constant dense<0.000000e+00> : vector<256x4xf32>
    %3 = tpu.matmul %0, %2, %cst {dimension_numbers = #tpu.dot_dimension_numbers<[1], [0], [0], [1], [0, 0, 1, 1], [], []>} : vector<256x256xf32>, vector<256x4xf32>, vector<256x4xf32> -> vector<256x4xf32>
    %c0_4 = arith.constant 0 : index
    %c0_5 = arith.constant 0 : index
    %4 = vector.load %arg4[%c0_4, %c0_5] : memref<256x1xf32, #tpu.memory_space<vmem>>, vector<256x1xf32>
    %5 = vector.broadcast %4 : vector<256x1xf32> to vector<256x4xf32>
    %6 = arith.addf %3, %5 : vector<256x4xf32>
    %cst_6 = arith.constant 0.000000e+00 : f32
    %7 = vector.broadcast %cst_6 : f32 to vector<256x4xf32>
    %8 = arith.cmpf oge, %6, %7 : vector<256x4xf32>
    %cst_7 = arith.constant 1.000000e-01 : f32
    %9 = vector.broadcast %cst_7 : f32 to vector<256x4xf32>
    %10 = arith.mulf %6, %9 : vector<256x4xf32>
    %11 = arith.select %8, %6, %10 : vector<256x4xi1>, vector<256x4xf32>
    %c0_8 = arith.constant 0 : index
    %c0_9 = arith.constant 0 : index
    %c0_10 = arith.constant 0 : index
    %12 = vector.load %arg5[%c0_8, %c0_9, %c0_10] : memref<1x256x4xf32, #tpu.memory_space<vmem>>, vector<1x256x4xf32>
    %13 = vector.shape_cast %12 : vector<1x256x4xf32> to vector<256x4xf32>
    %14 = vector.shape_cast %11 : vector<256x4xf32> to vector<1x256x4xf32>
    tpu.vector_store %arg5[%c0_8, %c0_9, %c0_10], %14 {strides = array<i32>} : memref<1x256x4xf32, #tpu.memory_space<vmem>>, vector<1x256x4xf32>,
    return
  }
  func.func @transform_0(%arg0: i32, %arg1: i32) -> (i32, i32, i32) {
    %c0_i32 = arith.constant 0 : i32
    %c0_i32_0 = arith.constant 0 : i32
    return %arg0, %c0_i32, %arg1 : i32, i32, i32
  }
  func.func @transform_1(%arg0: i32, %arg1: i32) -> (i32, i32) {
    %c0_i32 = arith.constant 0 : i32
    %c0_i32_0 = arith.constant 0 : i32
    %c0_i32_1 = arith.constant 0 : i32
    return %c0_i32, %c0_i32_0 : i32, i32
  }
  func.func @transform_2(%arg0: i32, %arg1: i32) -> (i32, i32) {
    %c0_i32 = arith.constant 0 : i32
    %c0_i32_0 = arith.constant 0 : i32
    %c0_i32_1 = arith.constant 0 : i32
    return %c0_i32, %c0_i32_0 : i32, i32
  }
  func.func @transform_3(%arg0: i32, %arg1: i32) -> (i32, i32, i32) {
    %c0_i32 = arith.constant 0 : i32
    %c0_i32_0 = arith.constant 0 : i32
    return %arg0, %c0_i32, %arg1 : i32, i32, i32
  }
}

module attributes {stable_mosaic.version = 11 : i64} {
  func.func @_head_kernel(%arg0: i32, %arg1: memref<2x256x4xf32, #tpu.memory_space<vmem>>, %arg2: memref<256x1000xf32, #tpu.memory_space<vmem>>, %arg3: memref<1x1000xf32, #tpu.memory_space<vmem>>, %arg4: memref<2x1000xf32, #tpu.memory_space<vmem>>) attributes {dimension_semantics = [#tpu.dimension_semantics<arbitrary>], iteration_bounds = array<i64: 1>, scalar_prefetch = 0 : i64, scratch_operands = 0 : i64, tpu.core_type = #tpu.core_type<tc>, window_params = [{pipeline_mode = #tpu.pipeline_mode<synchronous>, transform_indices = @transform_0, window_bounds = array<i64: 2, 256, 4>}, {pipeline_mode = #tpu.pipeline_mode<synchronous>, transform_indices = @transform_1, window_bounds = array<i64: 256, 1000>}, {pipeline_mode = #tpu.pipeline_mode<synchronous>, transform_indices = @transform_2, window_bounds = array<i64: 1, 1000>}, {pipeline_mode = #tpu.pipeline_mode<synchronous>, transform_indices = @transform_3, window_bounds = array<i64: 2, 1000>}]} {
    %c0 = arith.constant 0 : index
    %c0_0 = arith.constant 0 : index
    %c0_1 = arith.constant 0 : index
    %0 = vector.load %arg1[%c0, %c0_0, %c0_1] : memref<2x256x4xf32, #tpu.memory_space<vmem>>, vector<2x256x4xf32>
    %cst = arith.constant dense<0.000000e+00> : vector<2x256xf32>
    %1 = vector.multi_reduction <add>, %0, %cst [2] : vector<2x256x4xf32> to vector<2x256xf32>
    %cst_2 = arith.constant 4.000000e+00 : f32
    %2 = vector.broadcast %cst_2 : f32 to vector<2x256xf32>
    %3 = arith.divf %1, %2 : vector<2x256xf32>
    %c0_3 = arith.constant 0 : index
    %c0_4 = arith.constant 0 : index
    %4 = vector.load %arg2[%c0_3, %c0_4] : memref<256x1000xf32, #tpu.memory_space<vmem>>, vector<256x1000xf32>
    %cst_5 = arith.constant dense<0.000000e+00> : vector<2x1000xf32>
    %5 = tpu.matmul %3, %4, %cst_5 {dimension_numbers = #tpu.dot_dimension_numbers<[1], [0], [0], [1], [0, 0, 1, 1], [], []>} : vector<2x256xf32>, vector<256x1000xf32>, vector<2x1000xf32> -> vector<2x1000xf32>
    %c0_6 = arith.constant 0 : index
    %c0_7 = arith.constant 0 : index
    %6 = vector.load %arg3[%c0_6, %c0_7] : memref<1x1000xf32, #tpu.memory_space<vmem>>, vector<1x1000xf32>
    %7 = vector.broadcast %6 : vector<1x1000xf32> to vector<2x1000xf32>
    %8 = arith.addf %5, %7 : vector<2x1000xf32>
    %c0_8 = arith.constant 0 : index
    %c0_9 = arith.constant 0 : index
    %9 = vector.load %arg4[%c0_8, %c0_9] : memref<2x1000xf32, #tpu.memory_space<vmem>>, vector<2x1000xf32>
    tpu.vector_store %arg4[%c0_8, %c0_9], %8 {strides = array<i32>} : memref<2x1000xf32, #tpu.memory_space<vmem>>, vector<2x1000xf32>,
    return
  }
  func.func @transform_0(%arg0: i32) -> (i32, i32, i32) {
    %c0_i32 = arith.constant 0 : i32
    %c0_i32_0 = arith.constant 0 : i32
    %c0_i32_1 = arith.constant 0 : i32
    %c0_i32_2 = arith.constant 0 : i32
    return %c0_i32, %c0_i32_0, %c0_i32_1 : i32, i32, i32
  }
  func.func @transform_1(%arg0: i32) -> (i32, i32) {
    %c0_i32 = arith.constant 0 : i32
    %c0_i32_0 = arith.constant 0 : i32
    %c0_i32_1 = arith.constant 0 : i32
    return %c0_i32, %c0_i32_0 : i32, i32
  }
  func.func @transform_2(%arg0: i32) -> (i32, i32) {
    %c0_i32 = arith.constant 0 : i32
    %c0_i32_0 = arith.constant 0 : i32
    %c0_i32_1 = arith.constant 0 : i32
    return %c0_i32, %c0_i32_0 : i32, i32
  }
  func.func @transform_3(%arg0: i32) -> (i32, i32) {
    %c0_i32 = arith.constant 0 : i32
    %c0_i32_0 = arith.constant 0 : i32
    %c0_i32_1 = arith.constant 0 : i32
    return %c0_i32, %c0_i32_0 : i32, i32
  }
}

</mosaic_0001>

<bundles_post_ra>
// kernel: _lambda_.28
= control target key start
LH: loop header
LB: loop body
LE: loop exit
PB: predicated region body
PF: predicated region fallthrough
CT: control target
= control target key end

     0   :  { %s720_s12 = smov 0   ;;  %s722_s13 = smov 0   ;;  %s846_s0 = inlined_call_operand.vmem [shape: f32[2,27,1024], index: 0, kind: input, shape index: {}]   ;;  %s847_s1 = inlined_call_operand.vmem [shape: f32[8,27], index: 1, kind: input, shape index: {}]   ;;  %s848_s2 = inlined_call_operand.vmem [shape: f32[8,1], index: 2, kind: input, shape index: {}]   ;;  %s849_s3 = inlined_call_operand.vmem [shape: f32[2,8,1024], index: 3, kind: output, shape index: {}]  }
   0x1   :  { %s724_s14 = smov 0   ;;  %s726_s15 = smov 0  }
   0x2   :  { %s728_s16 = smov 0   ;;  %s730_s17 = smov 0  }
   0x3   :  { %s732_s18 = smov 0  }
   0x4 LB: > { %s22_s19 = sadd.s32 1, %s687_s16  ;;  %s25_s20 = sadd.s32 1, %s691_s17  ;;  %s695_s18 = sphi %s732_s18, %s13_s18   ;;  %s691_s17 = sphi %s730_s17, %s857_s17   ;;  %s687_s16 = sphi %s728_s16, %s856_s16   ;;  %s683_s15 = sphi %s726_s15, %s855_s15   ;;  %s679_s14 = sphi %s724_s14, %s854_s14   ;;  %s675_s13 = sphi %s722_s13, %s853_s13   ;;  %s671_s12 = sphi %s720_s12, %s852_s12  }
   0x5   : > { %p23_p0 = scmp.ge.s32.totalorder %s22_s19, 2  ;;  %p41_p1 = scmp.ne.s32.totalorder %s675_s13, %s671_s12 }
   0x6   : > { %p42_p2 = scmp.eq.s32.totalorder %s695_s18, 0  ;;  %s34_s24 = sadd.s32 1, %s675_s13 }
   0x7   : > { %s859_s19 = smov (%p23_p0, %s22_s19), 0  ;;  %s861_s20 = smov (!%p23_p0, %s25_s20), %s691_s17 }
   0x8   : > { %p43_p3 = por %p42_p2, %p41_p1  ;;  %p27_p4 = scmp.ge.s32.totalorder %s861_s20, 2 }
   0x9   : > { %s30_s21 = ssub.s32 %s687_s16, %s859_s19  ;;  %p543_p6 = scmp.ge.s32.totalorder %s695_s18, 4 }
   0xa   : > { %s863_s20 = smov (%p27_p4, %s861_s20), 0 }
   0xb   : > { %s29_s22 = ssub.s32 %s691_s17, %s863_s20  ;;  %143 = sbr.rel (%p543_p6) target bundleno = 33 (0x21), region = 24 }
   0xc   : > { %s31_s23 = sor.u32 %s30_s21, %s29_s22 }
   0xd   : > { %p32_p5 = scmp.eq.s32.totalorder %s31_s23, 0 }
   0xf   : > { %s771_s25 = scalar_select %p32_p5, %s675_s13, %s34_s24  }
  0x12   : > { %146 = sbr.rel (!%p43_p3) target bundleno = 33 (0x21), region = 28  ;;  %s148_s26 = sand.u32 (%p43_p3), 1, %s675_s13  }
  0x13   : > { %s545_s27 = sshll.u32 (%p43_p3), %s687_s16, 2  ;;  %s544_s28 = sshll.u32 (%p43_p3), %s148_s26, 7 }
  0x14   : > { %s546_s29 = sshll.u32 (%p43_p3), %s691_s17, 5  ;;  %s150_s8 = scalar_lea.vmem (%p43_p3), [#allocation2], %s544_s28 }
  0x15   : > { %s153_s30 = sadd.s32 (%p43_p3), %s546_s29, %s545_s27 }
  0x16   : > { %s547_s4 = sshll.u32 (%p43_p3), %s153_s30, 3 }
  0x17   : > { %s780_s7 = scalar_lea.vmem (%p43_p3), %s846_s0, %s547_s4 }
  0x18   : > { %v168_v0 = vld [vmem:[%s780_s7] sm:$0xff] (%p43_p3)  ;;  %v170_v1 = vld [vmem:[%s780_s7 + $0x8] sm:$0xff] (%p43_p3)  ;;  %v172_v2 = vld [vmem:[%s780_s7 + $0x10] sm:$0xff] (%p43_p3) }
  0x19   : > { %169 = vst [vmem:[%s150_s8] sm:$0xff] %v168_v0  ;;  %171 = vst [vmem:[%s150_s8 + $0x8] sm:$0xff] %v170_v1  ;;  %v174_v3 = vld [vmem:[%s780_s7 + $0x18] sm:$0xff]  ;;  %v176_v4 = vld [vmem:[%s780_s7 + $0x40] sm:$0xff] }
  0x1a   : > { %173 = vst [vmem:[%s150_s8 + $0x10] sm:$0xff] %v172_v2  ;;  %v178_v5 = vld [vmem:[%s780_s7 + $0x48] sm:$0xff]  ;;  %175 = vst [vmem:[%s150_s8 + $0x18] sm:$0xff] %v174_v3  ;;  %v180_v6 = vld [vmem:[%s780_s7 + $0x50] sm:$0xff] }
  0x1b   : > { %177 = vst [vmem:[%s150_s8 + $0x20] sm:$0xff] %v176_v4  ;;  %179 = vst [vmem:[%s150_s8 + $0x28] sm:$0xff] %v178_v5  ;;  %v182_v7 = vld [vmem:[%s780_s7 + $0x58] sm:$0xff]  ;;  %v184_v8 = vld [vmem:[%s780_s7 + $0x80] sm:$0xff] }
  0x1c   : > { %181 = vst [vmem:[%s150_s8 + $0x30] sm:$0xff] %v180_v6  ;;  %183 = vst [vmem:[%s150_s8 + $0x38] sm:$0xff] %v182_v7  ;;  %v186_v9 = vld [vmem:[%s780_s7 + $0x88] sm:$0xff]  ;;  %v188_v10 = vld [vmem:[%s780_s7 + $0x90] sm:$0xff] }
  0x1d   : > { %185 = vst [vmem:[%s150_s8 + $0x40] sm:$0xff] %v184_v8  ;;  %v190_v11 = vld [vmem:[%s780_s7 + $0x98] sm:$0xff]  ;;  %187 = vst [vmem:[%s150_s8 + $0x48] sm:$0xff] %v186_v9  ;;  %v192_v12 = vld [vmem:[%s780_s7 + $0xc0] sm:$0xff] }
  0x1e   : > { %189 = vst [vmem:[%s150_s8 + $0x50] sm:$0xff] %v188_v10  ;;  %191 = vst [vmem:[%s150_s8 + $0x58] sm:$0xff] %v190_v11  ;;  %v194_v13 = vld [vmem:[%s780_s7 + $0xc8] sm:$0xff]  ;;  %v196_v14 = vld [vmem:[%s780_s7 + $0xd0] sm:$0xff] }
  0x1f   : > { %193 = vst [vmem:[%s150_s8 + $0x60] sm:$0xff] %v192_v12  ;;  %195 = vst [vmem:[%s150_s8 + $0x68] sm:$0xff] %v194_v13  ;;  %v198_v15 = vld [vmem:[%s780_s7 + $0xd8] sm:$0xff] }
  0x20   : > { %197 = vst [vmem:[%s150_s8 + $0x70] sm:$0xff] %v196_v14  ;;  %199 = vst [vmem:[%s150_s8 + $0x78] sm:$0xff] %v198_v15 }
  0x21 PF: > { %p548_p7 = scmp.ge.s32.totalorder %s695_s18, 1  ;;  %p204_p8 = scmp.lt.s32.totalorder %s695_s18, 5 }
  0x23   : > { %p205_p9 = pnand %p548_p7, %p204_p8 }
  0x24   : > { %s211_s9 = sand.u32 (!%p205_p9), 1, %s671_s12   ;;  %vm276_vm0 = vcmask (!%p205_p9), 1042432   ;;  %v697_v16 = vmov (!%p205_p9), 0.0   ;;  %v266_v17 = vld [vmem:[%s848_s2] sm:$0xff] (!%p205_p9)  ;;  %vm698_vm1 = vmmov (!%p205_p9), 1   ;;  %v699_v19 = vmov (!%p205_p9), 0  }
  0x25   : > { %208 = sbr.rel (%p205_p9) target bundleno = 271 (0x10f), region = 51  ;;  %s549_s10 = sshll.u32 (!%p205_p9), %s211_s9, 7  ;;  %353 = vmatprep.mubr.f32.mxu0 (!%p205_p9), %v697_v16  ;;  %424 = vmatprep.mubr.f32.mxu1 (!%p205_p9), %v697_v16  ;;  %vm804_vm2 = vmpackc.low (!%p205_p9), %vm276_vm0, %vm698_vm1  ;;  %v249_v44 = vld [vmem:[%s847_s1] sm:$0xff] (!%p205_p9)  ;;  %vm272_vm3 = vcmask (!%p205_p9), 220160  }
  0x26   : > { %640 = vset.pattern.permute.xlu0 (!%p205_p9), %v699_v19  ;;  %s213_s22 = scalar_lea.vmem (!%p205_p9), [#allocation2], %s549_s10  ;;  %s550_s24 = sshll.u32 (!%p205_p9), %s679_s14, 2 }
  0x27   : > { %v251_v20 = vld [vmem:[%s213_s22 + $0x8] sm:$0xff] (!%p205_p9)  ;;  %v253_v22 = vld [vmem:[%s213_s22 + $0x18] sm:$0xff] (!%p205_p9)  ;;  %269 = vperm.xlu0 (!%p205_p9), %640, %v266_v17   ;;  %v250_v25 = vld [vmem:[%s213_s22] sm:$0xff] (!%p205_p9)  ;;  %p240_p10 = scmp.lt.s32.totalorder (!%p205_p9), %s683_s15, 1  ;;  %p242_p11 = scmp.lt.s32.totalorder (!%p205_p9), %s550_s24, 7 }
  0x28   : > { %v255_v21 = vld [vmem:[%s213_s22 + $0x28] sm:$0xff] (!%p205_p9)  ;;  %v257_v24 = vld [vmem:[%s213_s22 + $0x38] sm:$0xff] (!%p205_p9)  ;;  %v254_v26 = vld [vmem:[%s213_s22 + $0x20] sm:$0xff] (!%p205_p9) }
  0x29   : > { %v561_v23 = vpack.c.bf16 (!%p205_p9), %v255_v21, %v251_v20  ;;  %v571_v27 = vpack.c.bf16 (!%p205_p9), %v257_v24, %v253_v22  ;;  %v563_v28 = vpack.c.bf16 (!%p205_p9), %v254_v26, %v250_v25  ;;  %v252_v29 = vld [vmem:[%s213_s22 + $0x10] sm:$0xff] (!%p205_p9)  ;;  %v259_v31 = vld [vmem:[%s213_s22 + $0x48] sm:$0xff] (!%p205_p9)  ;;  %v261_v34 = vld [vmem:[%s213_s22 + $0x58] sm:$0xff] (!%p205_p9) }
  0x2a   : > { %v256_v30 = vld [vmem:[%s213_s22 + $0x30] sm:$0xff] (!%p205_p9)  ;;  %v263_v33 = vld [vmem:[%s213_s22 + $0x68] sm:$0x7] (!%p205_p9)  ;;  %v265_v35 = vld [vmem:[%s213_s22 + $0x78] sm:$0x7] (!%p205_p9) }
  0x2b   : > { %562 = vmatprep.subr.bf16.mxu0 (!%p205_p9), %v561_v23  ;;  %v573_v32 = vpack.c.bf16 (!%p205_p9), %v256_v30, %v252_v29  ;;  %572 = vmatprep.subr.bf16.mxu1 (!%p205_p9), %v571_v27  ;;  %v565_v36 = vpack.c.bf16 (!%p205_p9), %v263_v33, %v259_v31  ;;  %v575_v37 = vpack.c.bf16 (!%p205_p9), %v265_v35, %v261_v34  ;;  %v258_v38 = vld [vmem:[%s213_s22 + $0x40] sm:$0xff] (!%p205_p9)  ;;  %v260_v40 = vld [vmem:[%s213_s22 + $0x50] sm:$0xff] (!%p205_p9) }
  0x2c   : > { %564 = vmatpush1.bf16.msra.mxu0 %v563_v28  ;;  %v262_v39 = vld [vmem:[%s213_s22 + $0x60] sm:$0x7]  ;;  %v264_v42 = vld [vmem:[%s213_s22 + $0x70] sm:$0x7]  ;;  %s865_s15 = smov (!%p240_p10, %s683_s15), 1  ;;  %s867_s24 = smov (!%p242_p11, %s550_s24), 7 }
  0x2d   : > { %574 = vmatpush1.bf16.msra.mxu1 %v573_v32  ;;  %v568_v41 = vpack.c.bf16 %v262_v39, %v258_v38  ;;  %567 = vmatprep.subr.msk.bf16.mxu0 %vm804_vm2, %v565_v36  ;;  %v578_v43 = vpack.c.bf16 %v264_v42, %v260_v40  ;;  %s551_s26 = sshll.u32 %s865_s15, 3 }
  0x2e   : > { %577 = vmatprep.subr.msk.bf16.mxu1 %vm804_vm2, %v575_v37  ;;  %s245_s27 = sadd.s32 %s551_s26, %s867_s24 }
  0x2f   : > { %s552_s28 = sshll.u32 %s245_s27, 3 }
  0x30   : > { %570 = vmatpush1.bf16.msk.msra.mxu0 %vm804_vm2, %v568_v41  ;;  %s247_s4 = scalar_lea.vmem %s849_s3, %s552_s28 }
  0x31   : > { %580 = vmatpush1.bf16.msk.msra.mxu1 %vm804_vm2, %v578_v43 }
  0x33   : > { %555 = vmatmul.mubr.msk.f32.vlgmr.msra.gmra.mrb[0].mxu0 %vm272_vm3, %v249_v44 }
  0x34   : > { %558 = vmatmul.mubr.msk.f32.vlgmr.msra.gmra.mrb[0].mxu1 %vm272_vm3, %v249_v44 }
  0xa6   : > { %v270_v45 = vpop.permute.xlu0 %269 }
 0x106   : > { %v355_v46 = vpop.f32.mrb[0].mxu0 }
 0x107   : > { %v356_v47 = vadd.f32 %v355_v46, %v270_v45  ;;  %v426_v48 = vpop.f32.mrb[0].mxu1  ;;  %v357_v49 = vpop.f32.mrb[1].mxu0 }
 0x108   : > { %v427_v50 = vadd.f32 %v426_v48, %v270_v45  ;;  %v358_v51 = vadd.f32 %v357_v49, %v270_v45  ;;  %v428_v52 = vpop.f32.mrb[1].mxu1 }
 0x109   : > { %vm431_vm4 = vcmp.ge.f32.partialorder %v356_v47, 0.0  ;;  %v435_v53 = vmul.f32 0.1, %v356_v47  ;;  %v429_v54 = vadd.f32 %v428_v52, %v270_v45 }
 0x10a   : > { %vm433_vm5 = vcmp.ge.f32.partialorder %v427_v50, 0.0  ;;  %v437_v55 = vmul.f32 0.1, %v427_v50  ;;  %vm432_vm6 = vcmp.ge.f32.partialorder %v358_v51, 0.0  ;;  %v436_v56 = vmul.f32 0.1, %v358_v51 }
 0x10b   : > { %v439_v57 = vsel %vm431_vm4, %v356_v47, %v435_v53  ;;  %vm434_vm7 = vcmp.ge.f32.partialorder %v429_v54, 0.0  ;;  %v438_v58 = vmul.f32 0.1, %v429_v54 }
 0x10c   : > { %443 = vst [vmem:[%s247_s4] sm:$0xff] %v439_v57  ;;  %v441_v59 = vsel %vm433_vm5, %v427_v50, %v437_v55  ;;  %v440_v60 = vsel %vm432_vm6, %v358_v51, %v436_v56 }
 0x10d   : > { %445 = vst [vmem:[%s247_s4 + $0x10] sm:$0xff] %v441_v59  ;;  %444 = vst [vmem:[%s247_s4 + $0x8] sm:$0xff] %v440_v60  ;;  %v442_v61 = vsel %vm434_vm7, %v429_v54, %v438_v58 }
 0x10e   : > { %446 = vst [vmem:[%s247_s4 + $0x18] sm:$0xff] %v442_v61 }
 0x10f PF: > { %s13_s18 = sadd.s32 1, %s695_s18   ;;  %s852_s12 = smov %s675_s13 }
 0x110   : > { %p10_p12 = scmp.ge.s32.totalorder %s13_s18, 6   ;;  %s853_s13 = smov %s771_s25 }
 0x111   : > { %s854_s14 = smov %s687_s16  ;;  %s855_s15 = smov %s691_s17 }
 0x112   : > { %s856_s16 = smov %s859_s19  ;;  %s857_s17 = smov %s863_s20 }
 0x113   :  { %12 = sbr.rel (!%p10_p12) target bundleno = 4 (0x4), region = 90 }

// kernel: _lambda_.29
= control target key start
LH: loop header
LB: loop body
LE: loop exit
PB: predicated region body
PF: predicated region fallthrough
CT: control target
= control target key end

     0   :  { %8 = vsyncpa [#allocation3], 0  ;;  %s960_s0 = inlined_call_operand.vmem [shape: f32[2,8,34,34], index: 0, kind: input, shape index: {}]   ;;  %s961_s1 = inlined_call_operand.vmem [shape: f32[72], index: 1, kind: input, shape index: {}]   ;;  %s962_s2 = inlined_call_operand.vmem [shape: f32[8], index: 2, kind: input, shape index: {}]   ;;  %s963_s3 = inlined_call_operand.vmem [shape: f32[2,8,32,32], index: 3, kind: output, shape index: {}]  }
   0x1   :  { %9 = vsyncpa [#allocation5], 0  ;;  %s777_s12 = smov 0   ;;  %s779_s13 = smov 0  }
   0x2   :  { %s781_s14 = smov 0  }
   0x3 LB: > { %s611_s15 = sadd.s32 4294967295, %s747_s14   ;;  %s27_s16 = sadd.s32 1, %s743_s13  ;;  %s747_s14 = sphi %s781_s14, %s15_s14   ;;  %s743_s13 = sphi %s779_s13, %s973_s13   ;;  %s739_s12 = sphi %s777_s12, %s972_s12  }
   0x4   : > { %p29_p0 = scmp.ge.s32.totalorder %s27_s16, 2  ;;  %p613_p1 = scmp.ge.s32.totalorder %s747_s14, 1 }
   0x5   : > { %p130_p2 = scmp.lt.s32.totalorder %s747_s14, 3  ;;  %p802_p4 = scmp.eq.s32.totalorder %s611_s15, 0 }
   0x6   : > { %s975_s16 = smov (%p29_p0, %s27_s16), 0  ;;  %s143_s21 = sshll.u32 %s961_s1, 4  ;;  %s144_s21 = int_to_ptr.vmem [resolvable:$true] %s143_s21 }
   0x7   : > { %p798_p3 = pnand %p613_p1, %p130_p2  ;;  %s154_s24 = sshll.u32 %s962_s2, 4  ;;  %s155_s24 = int_to_ptr.vmem [resolvable:$true] %s154_s24 }
   0x8   : > { %s968_s18 = scalar_select %p802_p4, 1, 0 }
   0x9   : > { %s967_s17 = scalar_select %p798_p3, 1, 0 }
   0xa   : > { %p636_p5 = pneg %p798_p3  ;;  %s683_s26 = scalar_lea.vmem %s144_s21, 16 }
   0xb   : > { %p684_p7 = scmp.ne.s32.totalorder %s144_s21, %s683_s26  ;;  %p691_p11 = scmp.lt.s32.totalorder %s144_s21, %s144_s21 }
   0xc   : > { %p816_p6 = pnand %p802_p4, %p636_p5  ;;  %p692_p12 = scmp.lt.s32.totalorder %s683_s26, %s683_s26 }
   0xe   : > { %p685_p8 = pneg %p816_p6  ;;  %p693_p13 = por %p692_p12, %p691_p11 }
  0x10   : > { %p686_p9 = pnand %p685_p8, %p684_p7 }
  0x12   : > { %p687_p10 = pneg %p686_p9 }
  0x14   : > { %p694_p0 = pnand %p693_p13, %p687_p10 }
  0x16   : > { %697 = shalt.err (!%p694_p0)
}
  0x17   : > { %s753_s27 = smov [#allocation2]   ;;  %s698_s28 = scalar_lea.vmem %s155_s24, 16 }
  0x18   : > { %639 = dma.vmem_to_smem (!%p816_p6), %s144_s21, 16, %s753_s27, [#allocation3]  }
  0x19   : > { %p699_p1 = scmp.ne.s32.totalorder %s155_s24, %s698_s28  ;;  %p706_p4 = scmp.lt.s32.totalorder %s155_s24, %s155_s24 }
  0x1a   : > { %p707_p3 = scmp.lt.s32.totalorder %s698_s28, %s698_s28 }
  0x1b   : > { %p701_p2 = pnand %p699_p1, %p685_p8 }
  0x1c   : > { %p708_p7 = por %p707_p3, %p706_p4 }
  0x1d   : > { %p702_p5 = pneg %p701_p2 }
  0x1f   : > { %p709_p9 = pnand %p708_p7, %p702_p5 }
  0x21   : > { %712 = shalt.err (!%p709_p9)
}
  0x22   : > { %s754_s29 = smov [#allocation4]   ;;  %p970_p10 = scmp.ne.s32.totalorder %s967_s17, 0 }
  0x23   : > { %642 = dma.vmem_to_smem (!%p816_p6), %s155_s24, 16, %s754_s29, [#allocation5]  }
  0x24   : > { %181 = sbr.rel (%p970_p10) target bundleno = 235 (0xeb), region = 32  ;;  %p971_p11 = scmp.ne.s32.totalorder (!%p970_p10), %s968_s18, 0 }
  0x2b   : > { %730 = dma.done.wait (%p971_p11), [#allocation3], 16  }
  0x2c   : > { %732 = vsyncadd (%p971_p11), [#allocation3], 4294967280 }
  0x2d   : > { %734 = dma.done.wait (%p971_p11), [#allocation5], 16  }
  0x2e   : > { %736 = vsyncadd (%p971_p11), [#allocation5], 4294967280 }
  0x2f   : > { %191 = sfence }
  0x30   : > { %p221_p3 = scmp.lt.s32.totalorder %s739_s12, 1  ;;  %s848_s11 = smov 0  }
  0x32   : > { %s977_s12 = smov (!%p221_p3, %s739_s12), 1 }
  0x33   : > { %s627_s30 = smul.u32 320, %s977_s12  ;;  %s626_s4 = sshll.u32 %s977_s12, 8 }
  0x34   : > { %s841_s7 = scalar_lea.vmem %s963_s3, %s626_s4 }
  0x35   : > { %s846_s10 = scalar_lea.vmem %s960_s0, %s627_s30 }
  0x36 LB: >> { %s250_s12 = smul.u32 40, %s751_s11  ;;  %s755_s26 = smov 127   ;;  %vm479_vm0 = vcmask 261120   ;;  %s751_s11 = sphi %s848_s11, %s247_s11  }
  0x37   : >> { %s855_s15 = smul.u32 9, %s751_s11  ;;  %s756_s4 = smov 126  }
  0x38   : >> { %s860_s20 = scalar_lea.vmem %s846_s10, %s250_s12 }
  0x39   : >> { %s267_s17 = sadd.s32 1, %s855_s15  ;;  %s294_s18 = sadd.s32 2, %s855_s15  ;;  %v254_v0 = vld [vmem:[%s860_s20 + $0x10] sm:$0xff]  ;;  %v252_v1 = vld [vmem:[%s860_s20] sm:$0xff]  ;;  %v255_v3 = vld [vmem:[%s860_s20 + $0x18] sm:$0xff] }
  0x3a   : >> { %s268_s19 = sld [smem:[#allocation2 + %s267_s17]]  ;;  %s325_s23 = sadd.s32 3, %s855_s15  ;;  %v253_v4 = vld [vmem:[%s860_s20 + $0x8] sm:$0xff]  ;;  %v324_v16 = vld [vmem:[%s860_s20 + $0x19] sm:$0xff]  ;;  %v323_v20 = vld [vmem:[%s860_s20 + $0x11] sm:$0xff] }
  0x3b   : >> { %s295_s21 = sld [smem:[#allocation2 + %s294_s18]]  ;;  %s336_s25 = sadd.s32 4, %s855_s15  ;;  %v322_v14 = vld [vmem:[%s860_s20 + $0x9] sm:$0xff]  ;;  %v321_v15 = vld [vmem:[%s860_s20 + $0x1] sm:$0xff]  ;;  %v392_v37 = vld [vmem:[%s860_s20 + $0x12] sm:$0xff] }
  0x3c   : >> { %s257_s22 = sld [smem:[#allocation2 + %s855_s15]]  ;;  %s394_s28 = sadd.s32 6, %s855_s15  ;;  %v391_v29 = vld [vmem:[%s860_s20 + $0xa] sm:$0xff]  ;;  %v390_v30 = vld [vmem:[%s860_s20 + $0x2] sm:$0xff]  ;;  %v393_v36 = vld [vmem:[%s860_s20 + $0x1a] sm:$0xff] }
  0x3d   : >> { %s326_s24 = sld [smem:[#allocation2 + %s325_s23]]  ;;  %s363_s30 = sadd.s32 5, %s855_s15 }
  0x3e   : >> { %s337_s27 = sld [smem:[#allocation2 + %s336_s25]]  ;;  %s405_s6 = sadd.s32 7, %s855_s15 }
  0x3f   : >> { %s395_s29 = sld [smem:[#allocation2 + %s394_s28]]  ;;  %s432_s9 = sadd.s32 8, %s855_s15 }
  0x40   : >> { %v269_v2 = vstv %s268_s19  ;;  %s364_s5 = sld [smem:[#allocation2 + %s363_s30]]  ;;  %s623_s17 = sshll.u32 %s751_s11, 5 }
  0x41   : >> { %v272_v5 = vmul.f32 %v269_v2, %v254_v0  ;;  %v270_v6 = vmul.f32 %v269_v2, %v252_v1  ;;  %v273_v7 = vmul.f32 %v269_v2, %v255_v3  ;;  %v271_v8 = vmul.f32 %v269_v2, %v253_v4  ;;  %s406_s8 = sld [smem:[#allocation2 + %s405_s6]]  ;;  %s478_s18 = scalar_lea.vmem %s841_s7, %s623_s17 }
  0x42   : >> { %v296_v9 = vstv %s295_s21  ;;  %v258_v10 = vstv %s257_s22  ;;  %s433_s12 = sld [smem:[#allocation2 + %s432_s9]] }
  0x43   : >> { %282 = vrot.lane.b32.xlu1 %v272_v5, %s755_s26  ;;  %278 = vrot.lane.b32.xlu0 %v270_v6, %s755_s26  ;;  %v298_v11 = vmul.f32 %v296_v9, %v253_v4  ;;  %v297_v12 = vmul.f32 %v296_v9, %v252_v1  ;;  %v327_v13 = vstv %s326_s24  ;;  %v878_v17 = vmul.f32 %v258_v10, %v254_v0  ;;  %s459_s15 = sld [smem:[#allocation4 + %s751_s11]]  ;;  %s247_s11 = sadd.s32 1, %s751_s11  }
  0x44   : >> { %v880_v18 = vmul.f32 %v258_v10, %v252_v1  ;;  %v882_v19 = vmul.f32 %v258_v10, %v255_v3  ;;  %v885_v21 = vmul.f32 %v258_v10, %v253_v4  ;;  %v887_v22 = vmul.f32 %v327_v13, %v322_v14  ;;  %p244_p4 = scmp.ge.s32.totalorder %s247_s11, 8  }
  0x45   : >> { %v889_v23 = vmul.f32 %v327_v13, %v321_v15  ;;  %v891_v24 = vmul.f32 %v327_v13, %v324_v16  ;;  %v300_v25 = vmul.f32 %v296_v9, %v255_v3  ;;  %v299_v26 = vmul.f32 %v296_v9, %v254_v0 }
  0x46   : >> { %v895_v27 = vmul.f32 %v327_v13, %v323_v20  ;;  %v338_v28 = vstv %s337_s27  ;;  %v396_v31 = vstv %s395_s29  ;;  %v365_v42 = vstv %s364_s5 }
  0x47   : >> { %284 = vrot.lane.b32.xlu1 %v273_v7, %s755_s26  ;;  %280 = vrot.lane.b32.xlu0 %v271_v8, %s755_s26  ;;  %v899_v32 = vmul.f32 %v396_v31, %v391_v29  ;;  %v901_v33 = vmul.f32 %v396_v31, %v390_v30  ;;  %v340_v34 = vmul.f32 %v338_v28, %v322_v14  ;;  %v407_v47 = vstv %s406_s8 }
  0x48   : >> { %v339_v35 = vmul.f32 %v338_v28, %v321_v15  ;;  %v908_v38 = vmul.f32 %v396_v31, %v393_v36  ;;  %v910_v39 = vmul.f32 %v396_v31, %v392_v37  ;;  %v342_v40 = vmul.f32 %v338_v28, %v324_v16 }
  0x49   : >> { %v341_v41 = vmul.f32 %v338_v28, %v323_v20  ;;  %v367_v43 = vmul.f32 %v365_v42, %v322_v14  ;;  %v366_v44 = vmul.f32 %v365_v42, %v321_v15  ;;  %v369_v45 = vmul.f32 %v365_v42, %v324_v16 }
  0x4a   : >> { %v368_v46 = vmul.f32 %v365_v42, %v323_v20  ;;  %v409_v48 = vmul.f32 %v407_v47, %v391_v29  ;;  %v408_v49 = vmul.f32 %v407_v47, %v390_v30  ;;  %v411_v50 = vmul.f32 %v407_v47, %v393_v36 }
  0x4b   : >> { %307 = vrot.lane.b32.xlu1 %v298_v11, %s756_s4  ;;  %305 = vrot.lane.b32.xlu0 %v297_v12, %s756_s4  ;;  %v410_v51 = vmul.f32 %v407_v47, %v392_v37  ;;  %v434_v52 = vstv %s433_s12 }
  0x4c   : >> { %v436_v53 = vmul.f32 %v434_v52, %v391_v29  ;;  %v435_v54 = vmul.f32 %v434_v52, %v390_v30  ;;  %v438_v55 = vmul.f32 %v434_v52, %v393_v36  ;;  %v437_v56 = vmul.f32 %v434_v52, %v392_v37 }
  0x4f   : >> { %311 = vrot.lane.b32.xlu1 %v300_v25, %s756_s4  ;;  %309 = vrot.lane.b32.xlu0 %v299_v26, %s756_s4 }
  0x53   : >> { %349 = vrot.lane.b32.xlu1 %v340_v34, %s755_s26  ;;  %347 = vrot.lane.b32.xlu0 %v339_v35, %s755_s26 }
  0x57   : >> { %353 = vrot.lane.b32.xlu1 %v342_v40, %s755_s26  ;;  %351 = vrot.lane.b32.xlu0 %v341_v41, %s755_s26 }
  0x5b   : >> { %376 = vrot.lane.b32.xlu1 %v367_v43, %s756_s4  ;;  %374 = vrot.lane.b32.xlu0 %v366_v44, %s756_s4 }
  0x5f   : >> { %380 = vrot.lane.b32.xlu1 %v369_v45, %s756_s4  ;;  %378 = vrot.lane.b32.xlu0 %v368_v46, %s756_s4 }
  0x63   : >> { %418 = vrot.lane.b32.xlu1 %v409_v48, %s755_s26  ;;  %416 = vrot.lane.b32.xlu0 %v408_v49, %s755_s26 }
  0x67   : >> { %422 = vrot.lane.b32.xlu1 %v411_v50, %s755_s26  ;;  %420 = vrot.lane.b32.xlu0 %v410_v51, %s755_s26 }
  0x6b   : >> { %445 = vrot.lane.b32.xlu1 %v436_v53, %s756_s4  ;;  %443 = vrot.lane.b32.xlu0 %v435_v54, %s756_s4 }
  0x6f   : >> { %449 = vrot.lane.b32.xlu1 %v438_v55, %s756_s4  ;;  %447 = vrot.lane.b32.xlu0 %v437_v56, %s756_s4 }
  0xb5   : >> { %v283_v57 = vpop.permute.xlu1 %282  ;;  %v279_v58 = vpop.permute.xlu0 %278 }
  0xb6   : >> { %v290_v61 = vadd.f32 %v279_v58, %v880_v18  ;;  %v292_v3 = vadd.f32 %v283_v57, %v878_v17 }
  0xb9   : >> { %v285_v59 = vpop.permute.xlu1 %284  ;;  %v281_v60 = vpop.permute.xlu0 %280 }
  0xba   : >> { %v291_v62 = vadd.f32 %v281_v60, %v885_v21  ;;  %v293_v4 = vadd.f32 %v285_v59, %v882_v19 }
  0xbd   : >> { %v308_v63 = vpop.permute.xlu1 %307  ;;  %v306_v0 = vpop.permute.xlu0 %305 }
  0xbe   : >> { %v318_v1 = vadd.f32 %v308_v63, %v291_v62  ;;  %v317_v2 = vadd.f32 %v306_v0, %v290_v61 }
  0xc0   : >> { %v333_v5 = vadd.f32 %v887_v22, %v318_v1  ;;  %v332_v6 = vadd.f32 %v889_v23, %v317_v2 }
  0xc1   : >> { %v312_v7 = vpop.permute.xlu1 %311  ;;  %v310_v8 = vpop.permute.xlu0 %309 }
  0xc2   : >> { %v320_v9 = vadd.f32 %v312_v7, %v293_v4  ;;  %v319_v10 = vadd.f32 %v310_v8, %v292_v3 }
  0xc4   : >> { %v335_v11 = vadd.f32 %v891_v24, %v320_v9  ;;  %v334_v12 = vadd.f32 %v895_v27, %v319_v10 }
  0xc5   : >> { %v350_v13 = vpop.permute.xlu1 %349  ;;  %v348_v14 = vpop.permute.xlu0 %347 }
  0xc6   : >> { %v360_v18 = vadd.f32 %v350_v13, %v333_v5  ;;  %v359_v17 = vadd.f32 %v348_v14, %v332_v6 }
  0xc9   : >> { %v354_v15 = vpop.permute.xlu1 %353  ;;  %v352_v16 = vpop.permute.xlu0 %351 }
  0xca   : >> { %v362_v23 = vadd.f32 %v354_v15, %v335_v11  ;;  %v361_v25 = vadd.f32 %v352_v16, %v334_v12 }
  0xcd   : >> { %v377_v20 = vpop.permute.xlu1 %376  ;;  %v375_v19 = vpop.permute.xlu0 %374 }
  0xce   : >> { %v387_v21 = vadd.f32 %v377_v20, %v360_v18  ;;  %v386_v22 = vadd.f32 %v375_v19, %v359_v17 }
  0xd0   : >> { %v402_v26 = vadd.f32 %v899_v32, %v387_v21  ;;  %v401_v28 = vadd.f32 %v901_v33, %v386_v22  ;;  %v460_v32 = vstv %s459_s15 }
  0xd1   : >> { %v381_v24 = vpop.permute.xlu1 %380  ;;  %v379_v29 = vpop.permute.xlu0 %378 }
  0xd2   : >> { %v389_v27 = vadd.f32 %v381_v24, %v362_v23  ;;  %v388_v30 = vadd.f32 %v379_v29, %v361_v25 }
  0xd4   : >> { %v404_v31 = vadd.f32 %v908_v38, %v389_v27  ;;  %v403_v34 = vadd.f32 %v910_v39, %v388_v30 }
  0xd5   : >> { %v419_v35 = vpop.permute.xlu1 %418  ;;  %v417_v36 = vpop.permute.xlu0 %416 }
  0xd6   : >> { %v429_v41 = vadd.f32 %v419_v35, %v402_v26  ;;  %v428_v42 = vadd.f32 %v417_v36, %v401_v28 }
  0xd9   : >> { %v423_v37 = vpop.permute.xlu1 %422  ;;  %v421_v40 = vpop.permute.xlu0 %420 }
  0xda   : >> { %v431_v48 = vadd.f32 %v423_v37, %v404_v31  ;;  %v430_v38 = vadd.f32 %v421_v40, %v403_v34 }
  0xdd   : >> { %v446_v43 = vpop.permute.xlu1 %445  ;;  %v444_v33 = vpop.permute.xlu0 %443 }
  0xde   : >> { %v456_v44 = vadd.f32 %v446_v43, %v429_v41  ;;  %v455_v45 = vadd.f32 %v444_v33, %v428_v42 }
  0xe0   : >> { %v462_v46 = vadd.f32 %v460_v32, %v456_v44  ;;  %v461_v47 = vadd.f32 %v460_v32, %v455_v45 }
  0xe1   : >> { %v450_v39 = vpop.permute.xlu1 %449  ;;  %v448_v49 = vpop.permute.xlu0 %447 }
  0xe2   : >> { %vm466_vm1 = vcmp.ge.f32.partialorder %v462_v46, 0.0  ;;  %v470_v50 = vmul.f32 0.1, %v462_v46  ;;  %vm465_vm2 = vcmp.ge.f32.partialorder %v461_v47, 0.0  ;;  %v469_v51 = vmul.f32 0.1, %v461_v47 }
  0xe3   : >> { %v458_v52 = vadd.f32 %v450_v39, %v431_v48  ;;  %v457_v53 = vadd.f32 %v448_v49, %v430_v38 }
  0xe4   : >> { %v474_v54 = vsel %vm466_vm1, %v462_v46, %v470_v50  ;;  %v473_v55 = vsel %vm465_vm2, %v461_v47, %v469_v51  ;;  %246 = sbr.rel (!%p244_p4) target bundleno = 54 (0x36), region = 80 }
  0xe5   : >> { %481 = vst.msk [vmem:[%s478_s18 + $0x8] sm:$0xff] %vm479_vm0, %v474_v54  ;;  %480 = vst.msk [vmem:[%s478_s18] sm:$0xff] %vm479_vm0, %v473_v55  ;;  %v464_v56 = vadd.f32 %v460_v32, %v458_v52  ;;  %v463_v57 = vadd.f32 %v460_v32, %v457_v53 }
  0xe7   : >> { %vm468_vm3 = vcmp.ge.f32.partialorder %v464_v56, 0.0  ;;  %v472_v58 = vmul.f32 0.1, %v464_v56  ;;  %vm467_vm4 = vcmp.ge.f32.partialorder %v463_v57, 0.0  ;;  %v471_v59 = vmul.f32 0.1, %v463_v57 }
  0xe9   : >> { %v476_v60 = vsel %vm468_vm3, %v464_v56, %v472_v58  ;;  %v475_v61 = vsel %vm467_vm4, %v463_v57, %v471_v59 }
  0xea   : >> { %483 = vst.msk [vmem:[%s478_s18 + $0x18] sm:$0xff] %vm479_vm0, %v476_v60  ;;  %482 = vst.msk [vmem:[%s478_s18 + $0x10] sm:$0xff] %vm479_vm0, %v475_v61 }
  0xeb PF: > { %s15_s14 = sadd.s32 1, %s747_s14   ;;  %s972_s12 = smov %s743_s13 }
  0xec   : > { %p12_p6 = scmp.ge.s32.totalorder %s15_s14, 4   ;;  %s973_s13 = smov %s975_s16 }
  0xee   :  { %14 = sbr.rel (!%p12_p6) target bundleno = 3 (0x3), region = 91 }
  0xf5   :  { %516 = vsyncpa [#allocation3], 1 }
  0xf6   :  { %518 = vsyncpa [#allocation3 + $0x1], 1 }
  0xf7   :  { %519 = vsyncpa [#allocation5], 1 }

// kernel: _lambda_.30
= control target key start
LH: loop header
LB: loop body
LE: loop exit
PB: predicated region body
PF: predicated region fallthrough
CT: control target
= control target key end

     0   :  { %s677_s12 = smov 0   ;;  %s679_s13 = smov 0   ;;  %s802_s0 = inlined_call_operand.vmem [shape: f32[2,8,1024], index: 0, kind: input, shape index: {}]   ;;  %s803_s1 = inlined_call_operand.vmem [shape: f32[16,8], index: 1, kind: input, shape index: {}]   ;;  %s804_s2 = inlined_call_operand.vmem [shape: f32[16,1], index: 2, kind: input, shape index: {}]   ;;  %s805_s3 = inlined_call_operand.vmem [shape: f32[2,16,1024], index: 3, kind: output, shape index: {}]  }
   0x1   :  { %s681_s14 = smov 0   ;;  %s683_s15 = smov 0  }
   0x2   :  { %s685_s16 = smov 0   ;;  %s687_s17 = smov 0  }
   0x3   :  { %s689_s18 = smov 0  }
   0x4 LB: > { %s22_s19 = sadd.s32 1, %s645_s16  ;;  %s25_s20 = sadd.s32 1, %s649_s17  ;;  %s653_s18 = sphi %s689_s18, %s13_s18   ;;  %s649_s17 = sphi %s687_s17, %s812_s17   ;;  %s645_s16 = sphi %s685_s16, %s811_s16   ;;  %s641_s15 = sphi %s683_s15, %s810_s15   ;;  %s637_s14 = sphi %s681_s14, %s809_s14   ;;  %s633_s13 = sphi %s679_s13, %s808_s13   ;;  %s629_s12 = sphi %s677_s12, %s807_s12  }
   0x5   : > { %p23_p0 = scmp.ge.s32.totalorder %s22_s19, 2  ;;  %s521_s21 = sadd.s32 4294967295, %s653_s18  }
   0x6   : > { %p114_p1 = scmp.ne.s32.totalorder %s633_s13, %s629_s12  ;;  %p115_p2 = scmp.eq.s32.totalorder %s521_s21, 3 }
   0x7   : > { %s814_s19 = smov (%p23_p0, %s22_s19), 0  ;;  %s816_s20 = smov (!%p23_p0, %s25_s20), %s649_s17 }
   0x8   : > { %s100_s22 = ssub.s32 %s645_s16, %s814_s19  ;;  %p27_p3 = scmp.ge.s32.totalorder %s816_s20, 2 }
   0x9   : > { %p525_p4 = scmp.ge.s32.totalorder %s653_s18, 1  ;;  %p721_p5 = por %p115_p2, %p114_p1 }
   0xa   : > { %p158_p6 = scmp.lt.s32.totalorder %s653_s18, 5  ;;  %s818_s20 = smov (%p27_p3, %s816_s20), 0 }
   0xb   : > { %s99_s24 = ssub.s32 %s649_s17, %s818_s20  ;;  %s104_s26 = sadd.s32 1, %s633_s13 }
   0xc   : > { %p159_p7 = pnand %p525_p4, %p158_p6  ;;  %s101_s25 = sor.u32 %s100_s22, %s99_s24 }
   0xd   : > { %p102_p8 = scmp.eq.s32.totalorder %s101_s25, 0  ;;  %s734_s28 = sshll.u32 (!%p159_p7), %s637_s14, 2  ;;  %v655_v0 = vmov (!%p159_p7), 0.0   ;;  %v202_v1 = vld [vmem:[%s804_s2] sm:$0xff] (!%p159_p7)  ;;  %v656_v2 = vmov (!%p159_p7), 0   ;;  %v203_v3 = vld [vmem:[%s804_s2 + $0x8] sm:$0xff] (!%p159_p7) }
   0xe   : > { %162 = sbr.rel (%p159_p7) target bundleno = 263 (0x107), region = 32  ;;  %p186_p9 = scmp.lt.s32.totalorder (!%p159_p7), %s641_s15, 1  ;;  %285 = vmatprep.mubr.f32.mxu0 (!%p159_p7), %v655_v0  ;;  %362 = vmatprep.mubr.f32.mxu1 (!%p159_p7), %v655_v0  ;;  %v196_v4 = vld [vmem:[%s803_s1] sm:$0xff] (!%p159_p7)  ;;  %vm214_vm0 = vcmask (!%p159_p7), 64512   ;;  %v197_v9 = vld [vmem:[%s803_s1 + $0x8] sm:$0xff] (!%p159_p7) }
   0xf   : > { %s732_s27 = scalar_select %p102_p8, %s633_s13, %s104_s26  }
  0x10   : > { %p188_p10 = scmp.lt.s32.totalorder (!%p159_p7), %s734_s28, 7  ;;  %598 = vset.pattern.permute.xlu0 (!%p159_p7), %v656_v2  ;;  %s182_s29 = sand.u32 (!%p159_p7), 1, %s629_s12  }
  0x11   : > { %206 = vperm.xlu0 (!%p159_p7), %598, %v202_v1   ;;  %s526_s30 = sshll.u32 (!%p159_p7), %s182_s29, 6 }
  0x12   : > { %s756_s12 = scalar_lea.vmem (!%p159_p7), [#allocation2], %s526_s30 }
  0x15   : > { %s187_s4 = scalar_select %p186_p9, %s641_s15, 1  ;;  %211 = vperm.xlu0 %598, %v203_v3  }
  0x16   : > { %s189_s5 = scalar_select %p188_p10, %s734_s28, 7 }
  0x17   : > { %s528_s6 = sshll.u32 %s187_s4, 3  ;;  %s536_s4 = sshll.u32 (%p721_p5), %s641_s15, 4 }
  0x18   : > { %s191_s9 = sadd.s32 %s528_s6, %s189_s5  ;;  %s416_s5 = sadd.s32 (%p721_p5), %s536_s4, %s734_s28 }
  0x19   : > { %s529_s10 = sshll.u32 %s191_s9, 3  ;;  %s537_s23 = sshll.u32 (%p721_p5), %s416_s5, 3 }
  0x1a   : > { %s193_s21 = scalar_lea.vmem %s802_s0, %s529_s10  ;;  %s418_s8 = scalar_lea.vmem (%p721_p5), %s805_s3, %s537_s23 }
  0x1b   : > { %v199_v5 = vld [vmem:[%s193_s21 + $0x8] sm:$0xff]  ;;  %v201_v6 = vld [vmem:[%s193_s21 + $0x18] sm:$0xff]  ;;  %v198_v7 = vld [vmem:[%s193_s21] sm:$0xff] }
  0x1c   : > { %221 = vmatprep.subr.mxu0 %v199_v5  ;;  %298 = vmatprep.subr.mxu1 %v201_v6  ;;  %v200_v8 = vld [vmem:[%s193_s21 + $0x10] sm:$0xff] }
  0x1d   : > { %222 = vmatpush1.msra.mxu0 %v198_v7  ;;  %299 = vmatpush1.msra.mxu1 %v200_v8 }
  0x1e   : > { %530 = vmatmul.mubr.msk.f32.vlgmr.msra.gmra.mrb[0].mxu0 %vm214_vm0, %v196_v4  ;;  %532 = vmatmul.mubr.msk.f32.vlgmr.msra.gmra.mrb[0].mxu1 %vm214_vm0, %v196_v4 }
  0x1f   : > { %291 = vmatprep.mubr.f32.mxu0 %v655_v0  ;;  %368 = vmatprep.mubr.f32.mxu1 %v655_v0 }
  0x22   : > { %531 = vmatmul.mubr.msk.f32.gmra.mrb[2].mxu0 %vm214_vm0, %v197_v9  ;;  %533 = vmatmul.mubr.msk.f32.gmra.mrb[2].mxu1 %vm214_vm0, %v197_v9 }
  0x90   : > { %v207_v10 = vpop.permute.xlu0 %206 }
  0x94   : > { %v212_v21 = vpop.permute.xlu0 %211 }
  0xf1   : > { %v287_v11 = vpop.f32.mrb[0].mxu0  ;;  %v364_v12 = vpop.f32.mrb[0].mxu1 }
  0xf2   : > { %v288_v13 = vadd.f32 %v287_v11, %v207_v10  ;;  %v365_v14 = vadd.f32 %v364_v12, %v207_v10  ;;  %v289_v15 = vpop.f32.mrb[1].mxu0  ;;  %v366_v16 = vpop.f32.mrb[1].mxu1 }
  0xf3   : > { %v290_v17 = vadd.f32 %v289_v15, %v207_v10  ;;  %v367_v18 = vadd.f32 %v366_v16, %v207_v10 }
  0xf4   : > { %vm375_vm1 = vcmp.ge.f32.partialorder %v288_v13, 0.0  ;;  %v383_v19 = vmul.f32 0.1, %v288_v13  ;;  %vm377_vm2 = vcmp.ge.f32.partialorder %v365_v14, 0.0  ;;  %v385_v20 = vmul.f32 0.1, %v365_v14 }
  0xf5   : > { %vm376_vm3 = vcmp.ge.f32.partialorder %v290_v17, 0.0  ;;  %v384_v22 = vmul.f32 0.1, %v290_v17  ;;  %vm378_vm4 = vcmp.ge.f32.partialorder %v367_v18, 0.0  ;;  %v386_v23 = vmul.f32 0.1, %v367_v18 }
  0xf6   : > { %v391_v24 = vsel %vm375_vm1, %v288_v13, %v383_v19  ;;  %v393_v25 = vsel %vm377_vm2, %v365_v14, %v385_v20  ;;  %v293_v26 = vpop.f32.mrb[2].mxu0  ;;  %v370_v27 = vpop.f32.mrb[2].mxu1 }
  0xf7   : > { %399 = vst [vmem:[%s756_s12] sm:$0xff] %v391_v24  ;;  %401 = vst [vmem:[%s756_s12 + $0x10] sm:$0xff] %v393_v25  ;;  %v392_v28 = vsel %vm376_vm3, %v290_v17, %v384_v22  ;;  %v394_v29 = vsel %vm378_vm4, %v367_v18, %v386_v23  ;;  %v294_v30 = vadd.f32 %v293_v26, %v212_v21  ;;  %v295_v32 = vpop.f32.mrb[3].mxu0  ;;  %v372_v33 = vpop.f32.mrb[3].mxu1 }
  0xf8   : > { %v371_v31 = vadd.f32 %v370_v27, %v212_v21  ;;  %400 = vst [vmem:[%s756_s12 + $0x8] sm:$0xff] %v392_v28  ;;  %402 = vst [vmem:[%s756_s12 + $0x18] sm:$0xff] %v394_v29  ;;  %v296_v34 = vadd.f32 %v295_v32, %v212_v21  ;;  %v373_v35 = vadd.f32 %v372_v33, %v212_v21  ;;  %413 = sbr.rel (!%p721_p5) target bundleno = 263 (0x107), region = 36 }
  0xf9   : > { %vm379_vm5 = vcmp.ge.f32.partialorder %v294_v30, 0.0  ;;  %v387_v36 = vmul.f32 0.1, %v294_v30 }
  0xfa   : > { %vm381_vm6 = vcmp.ge.f32.partialorder %v371_v31, 0.0  ;;  %v389_v37 = vmul.f32 0.1, %v371_v31  ;;  %vm380_vm7 = vcmp.ge.f32.partialorder %v296_v34, 0.0  ;;  %v388_v38 = vmul.f32 0.1, %v296_v34 }
  0xfb   : > { %vm382_vm8 = vcmp.ge.f32.partialorder %v373_v35, 0.0  ;;  %v390_v39 = vmul.f32 0.1, %v373_v35  ;;  %v395_v40 = vsel %vm379_vm5, %v294_v30, %v387_v36 }
  0xfc   : > { %v397_v41 = vsel %vm381_vm6, %v371_v31, %v389_v37  ;;  %403 = vst [vmem:[%s756_s12 + $0x20] sm:$0xff] %v395_v40  ;;  %v396_v42 = vsel %vm380_vm7, %v296_v34, %v388_v38 }
  0xfd   : > { %405 = vst [vmem:[%s756_s12 + $0x30] sm:$0xff] %v397_v41  ;;  %v398_v43 = vsel %vm382_vm8, %v373_v35, %v390_v39  ;;  %404 = vst [vmem:[%s756_s12 + $0x28] sm:$0xff] %v396_v42 }
  0xfe   : > { %406 = vst [vmem:[%s756_s12 + $0x38] sm:$0xff] %v398_v43  ;;  %v431_v44 = vld [vmem:[%s756_s12] sm:$0xff] (%p721_p5)  ;;  %v435_v46 = vld [vmem:[%s756_s12 + $0x10] sm:$0xff] (%p721_p5) }
  0xff   : > { %v433_v45 = vld [vmem:[%s756_s12 + $0x8] sm:$0xff]  ;;  %v437_v47 = vld [vmem:[%s756_s12 + $0x18] sm:$0xff]  ;;  %432 = vst [vmem:[%s418_s8] sm:$0xff] %v431_v44  ;;  %436 = vst [vmem:[%s418_s8 + $0x10] sm:$0xff] %v435_v46 }
 0x100   : > { %434 = vst [vmem:[%s418_s8 + $0x8] sm:$0xff] %v433_v45  ;;  %438 = vst [vmem:[%s418_s8 + $0x18] sm:$0xff] %v437_v47 }
 0x103   : > { %v439_v48 = vld [vmem:[%s756_s12 + $0x20] sm:$0xff] }
 0x104   : > { %v441_v49 = vld [vmem:[%s756_s12 + $0x28] sm:$0xff]  ;;  %v443_v50 = vld [vmem:[%s756_s12 + $0x30] sm:$0xff]  ;;  %440 = vst [vmem:[%s418_s8 + $0x40] sm:$0xff] %v439_v48 }
 0x105   : > { %v445_v51 = vld [vmem:[%s756_s12 + $0x38] sm:$0xff]  ;;  %442 = vst [vmem:[%s418_s8 + $0x48] sm:$0xff] %v441_v49  ;;  %444 = vst [vmem:[%s418_s8 + $0x50] sm:$0xff] %v443_v50 }
 0x106   : > { %446 = vst [vmem:[%s418_s8 + $0x58] sm:$0xff] %v445_v51 }
 0x107 PF: > { %s13_s18 = sadd.s32 1, %s653_s18   ;;  %s807_s12 = smov %s633_s13 }
 0x108   : > { %p10_p11 = scmp.ge.s32.totalorder %s13_s18, 6   ;;  %s808_s13 = smov %s732_s27 }
 0x109   : > { %s809_s14 = smov %s645_s16  ;;  %s810_s15 = smov %s649_s17 }
 0x10a   : > { %s811_s16 = smov %s814_s19  ;;  %s812_s17 = smov %s818_s20 }
 0x10b   :  { %12 = sbr.rel (!%p10_p11) target bundleno = 4 (0x4), region = 85 }

// kernel: _lambda_.31
= control target key start
LH: loop header
LB: loop body
LE: loop exit
PB: predicated region body
PF: predicated region fallthrough
CT: control target
= control target key end

     0   :  { %s1121_s0 = inlined_call_operand.vmem [shape: f32[2,16,17,17], index: 0, kind: input, shape index: {}]   ;;  %s1122_s1 = inlined_call_operand.vmem [shape: f32[2,16,17,17], index: 1, kind: input, shape index: {}]   ;;  %s1123_s2 = inlined_call_operand.vmem [shape: f32[2,16,17,17], index: 2, kind: input, shape index: {}]   ;;  %s1124_s3 = inlined_call_operand.vmem [shape: f32[2,16,17,17], index: 3, kind: input, shape index: {}]   ;;  %s1125_s4 = inlined_call_operand.vmem [shape: f32[144], index: 4, kind: input, shape index: {}]   ;;  %s1126_s5 = inlined_call_operand.vmem [shape: f32[16], index: 5, kind: input, shape index: {}]   ;;  %s1127_s6 = inlined_call_operand.vmem [shape: f32[2,16,16,16], index: 6, kind: output, shape index: {}]  }
   0x1   :  { %1131 = sst [smem:[#allocation8_spill]] %s1121_s0 }
   0x2   :  { %1132 = sst [smem:[#allocation9_spill]] %s1123_s2 }
   0x3   :  { %11 = vsyncpa [#allocation3], 0 }
   0x4   :  { %12 = vsyncpa [#allocation5], 0  ;;  %s945_s21 = smov 0   ;;  %s947_s22 = smov 0  }
   0x5   :  { %s949_s23 = smov 0  }
   0x6 LB: > { %s763_s24 = sadd.s32 4294967295, %s901_s23   ;;  %s30_s25 = sadd.s32 1, %s897_s22  ;;  %s901_s23 = sphi %s949_s23, %s18_s23   ;;  %s897_s22 = sphi %s947_s22, %s1146_s22   ;;  %s893_s21 = sphi %s945_s21, %s1145_s21  }
   0x7   : > { %p32_p0 = scmp.ge.s32.totalorder %s30_s25, 2  ;;  %p765_p1 = scmp.ge.s32.totalorder %s901_s23, 1 }
   0x8   : > { %p217_p2 = scmp.lt.s32.totalorder %s901_s23, 3  ;;  %p970_p4 = scmp.eq.s32.totalorder %s763_s24, 0 }
   0x9   : > { %s1148_s25 = smov (%p32_p0, %s30_s25), 0  ;;  %s230_s30 = sshll.u32 %s1125_s4, 4  ;;  %s231_s30 = int_to_ptr.vmem [resolvable:$true] %s230_s30 }
   0xa   : > { %p966_p3 = pnand %p765_p1, %p217_p2  ;;  %s241_s9 = sshll.u32 %s1126_s5, 4  ;;  %s242_s9 = int_to_ptr.vmem [resolvable:$true] %s241_s9 }
   0xb   : > { %s1134_s27 = scalar_select %p970_p4, 1, 0 }
   0xc   : > { %s1133_s26 = scalar_select %p966_p3, 1, 0 }
   0xd   : > { %p791_p5 = pneg %p966_p3  ;;  %s837_s11 = scalar_lea.vmem %s231_s30, 32 }
   0xe   : > { %p838_p7 = scmp.ne.s32.totalorder %s231_s30, %s837_s11  ;;  %p845_p11 = scmp.lt.s32.totalorder %s231_s30, %s231_s30 }
   0xf   : > { %p984_p6 = pnand %p970_p4, %p791_p5  ;;  %p846_p12 = scmp.lt.s32.totalorder %s837_s11, %s837_s11 }
  0x11   : > { %p839_p8 = pneg %p984_p6  ;;  %p847_p13 = por %p846_p12, %p845_p11 }
  0x13   : > { %p840_p9 = pnand %p839_p8, %p838_p7 }
  0x15   : > { %p841_p10 = pneg %p840_p9 }
  0x17   : > { %p848_p0 = pnand %p847_p13, %p841_p10 }
  0x19   : > { %851 = shalt.err (!%p848_p0)
}
  0x1a   : > { %s907_s12 = smov [#allocation2]   ;;  %s852_s13 = scalar_lea.vmem %s242_s9, 16 }
  0x1b   : > { %794 = dma.vmem_to_smem (!%p984_p6), %s231_s30, 32, %s907_s12, [#allocation3]  }
  0x1c   : > { %p853_p1 = scmp.ne.s32.totalorder %s242_s9, %s852_s13  ;;  %p860_p4 = scmp.lt.s32.totalorder %s242_s9, %s242_s9 }
  0x1d   : > { %p861_p3 = scmp.lt.s32.totalorder %s852_s13, %s852_s13 }
  0x1e   : > { %p855_p2 = pnand %p853_p1, %p839_p8 }
  0x1f   : > { %p862_p7 = por %p861_p3, %p860_p4 }
  0x20   : > { %p856_p5 = pneg %p855_p2 }
  0x22   : > { %p863_p9 = pnand %p862_p7, %p856_p5 }
  0x24   : > { %866 = shalt.err (!%p863_p9)
}
  0x25   : > { %s908_s14 = smov [#allocation4]   ;;  %p1136_p10 = scmp.ne.s32.totalorder %s1133_s26, 0 }
  0x26   : > { %797 = dma.vmem_to_smem (!%p984_p6), %s242_s9, 16, %s908_s14, [#allocation5]  }
  0x27   : > { %310 = sbr.rel (%p1136_p10) target bundleno = 211 (0xd3), region = 44  ;;  %p1137_p11 = scmp.ne.s32.totalorder (!%p1136_p10), %s1134_s27, 0 }
  0x2e   : > { %884 = dma.done.wait (%p1137_p11), [#allocation3], 32  }
  0x2f   : > { %886 = vsyncadd (%p1137_p11), [#allocation3], 4294967264 }
  0x30   : > { %888 = dma.done.wait (%p1137_p11), [#allocation5], 16  }
  0x31   : > { %890 = vsyncadd (%p1137_p11), [#allocation5], 4294967280 }
  0x32   : > { %320 = sfence }
  0x33   : > { %p386_p3 = scmp.lt.s32.totalorder %s893_s21, 1  ;;  %s1029_s11 = smov 0  }
  0x35   : > { %s1150_s21 = smov (!%p386_p3, %s893_s21), 1 }
  0x36   : > { %s1006_s15 = smul.u32 384, %s1150_s21  ;;  %s781_s16 = sshll.u32 %s1150_s21, 8 }
  0x37   : > { %s1011_s19 = scalar_lea.vmem %s1127_s6, %s781_s16 }
  0x38   : > { %s405_s29 = scalar_lea.vmem %s1122_s1, %s1006_s15 }
  0x39 LB: >> { %s448_s12 = smul.u32 24, %s905_s11  ;;  %s1140_s0 = sld [smem:[#allocation8_spill]]  ;;  %vm564_vm0 = vcmask 130048   ;;  %s905_s11 = sphi %s1029_s11, %s445_s11  }
  0x3a   : >> { %s1036_s13 = smul.u32 9, %s905_s11  ;;  %s1142_s2 = sld [smem:[#allocation9_spill]] }
  0x3c   : >> { %s453_s27 = sld [smem:[#allocation2 + %s1036_s13]]  ;;  %s469_s28 = sadd.s32 2, %s1036_s13 }
  0x3d   : >> { %s1052_s30 = sld [smem:[#allocation2 + %s469_s28]]  ;;  %s487_s7 = sadd.s32 3, %s1036_s13 }
  0x3e   : >> { %s488_s9 = sld [smem:[#allocation2 + %s487_s7]]  ;;  %s504_s10 = sadd.s32 5, %s1036_s13 }
  0x3f   : >> { %s1141_s26 = scalar_lea.vmem %s1140_s0, %s1006_s15  ;;  %s1056_s14 = sld [smem:[#allocation2 + %s504_s10]] }
  0x40   : >> { %s1043_s17 = scalar_lea.vmem %s1141_s26, %s448_s12  ;;  %s1143_s8 = scalar_lea.vmem %s1142_s2, %s1006_s15 }
  0x41   : >> { %s484_s24 = scalar_lea.vmem %s1143_s8, %s448_s12  ;;  %s537_s16 = sadd.s32 8, %s1036_s13  ;;  %v450_v0 = vld [vmem:[%s1043_s17] sm:$0xff]  ;;  %v451_v1 = vld [vmem:[%s1043_s17 + $0x8] sm:$0xff] }
  0x42   : >> { %s1059_s26 = sld [smem:[#allocation2 + %s537_s16]]  ;;  %s1066_s8 = scalar_lea.vmem %s405_s29, %s448_s12  ;;  %v454_v2 = vstv %s453_s27  ;;  %v485_v5 = vld [vmem:[%s484_s24] sm:$0xff]  ;;  %v486_v8 = vld [vmem:[%s484_s24 + $0x8] sm:$0xff] }
  0x43   : >> { %s462_s21 = sadd.s32 1, %s1036_s13  ;;  %s1144_s2 = scalar_lea.vmem %s1124_s3, %s1006_s15  ;;  %v471_v3 = vstv %s1052_s30  ;;  %v455_v4 = vmul.f32 %v454_v2, %v450_v0  ;;  %v456_v6 = vmul.f32 %v454_v2, %v451_v1  ;;  %v460_v15 = vld [vmem:[%s1066_s8] sm:$0xff]  ;;  %v461_v16 = vld [vmem:[%s1066_s8 + $0x8] sm:$0xff] }
  0x44   : >> { %s494_s7 = scalar_lea.vmem %s1144_s2, %s448_s12  ;;  %s1076_s10 = sld [smem:[#allocation2 + %s462_s21]]  ;;  %v472_v7 = vmul.f32 %v471_v3, %v450_v0  ;;  %v489_v9 = vstv %s488_s9  ;;  %v473_v13 = vmul.f32 %v471_v3, %v451_v1  ;;  %v519_v17 = vld [vmem:[%s1043_s17 + $0x1] sm:$0xff]  ;;  %v520_v23 = vld [vmem:[%s1043_s17 + $0x9] sm:$0xff] }
  0x45   : >> { %s497_s16 = sadd.s32 4, %s1036_s13  ;;  %s521_s20 = sadd.s32 6, %s1036_s13  ;;  %v506_v10 = vstv %s1056_s14  ;;  %v490_v11 = vmul.f32 %v489_v9, %v485_v5  ;;  %v491_v12 = vmul.f32 %v489_v9, %v486_v8  ;;  %v495_v19 = vld [vmem:[%s494_s7] sm:$0xff]  ;;  %v496_v20 = vld [vmem:[%s494_s7 + $0x8] sm:$0xff] }
  0x46   : >> { %s1080_s18 = sld [smem:[#allocation2 + %s497_s16]]  ;;  %s530_s2 = sadd.s32 7, %s1036_s13  ;;  %v507_v14 = vmul.f32 %v506_v10, %v485_v5  ;;  %v508_v21 = vmul.f32 %v506_v10, %v486_v8  ;;  %v528_v31 = vld [vmem:[%s1066_s8 + $0x1] sm:$0xff]  ;;  %v529_v32 = vld [vmem:[%s1066_s8 + $0x9] sm:$0xff] }
  0x47   : >> { %s1083_s0 = sld [smem:[#allocation2 + %s521_s20]]  ;;  %s909_s12 = smov 127  }
  0x48   : >> { %s1087_s21 = sld [smem:[#allocation2 + %s530_s2]]  ;;  %476 = vrot.lane.b32.xlu0 %v472_v7, %s909_s12  ;;  %v539_v18 = vstv %s1059_s26  ;;  %511 = vrot.lane.b32.xlu1 %v507_v14, %s909_s12  ;;  %s778_s8 = sshll.u32 %s905_s11, 4 }
  0x49   : >> { %v540_v27 = vmul.f32 %v539_v18, %v519_v17  ;;  %v541_v37 = vmul.f32 %v539_v18, %v520_v23  ;;  %s552_s26 = sld [smem:[#allocation4 + %s905_s11]]  ;;  %s563_s13 = scalar_lea.vmem %s1011_s19, %s778_s8 }
  0x4a   : >> { %v464_v22 = vstv %s1076_s10  ;;  %s445_s11 = sadd.s32 1, %s905_s11  }
  0x4b   : >> { %v465_v24 = vmul.f32 %v464_v22, %v460_v15  ;;  %v466_v25 = vmul.f32 %v464_v22, %v461_v16  ;;  %p442_p4 = scmp.ge.s32.totalorder %s445_s11, 16  }
  0x4c   : >> { %v499_v26 = vstv %s1080_s18  ;;  %478 = vrot.lane.b32.xlu0 %v473_v13, %s909_s12  ;;  %513 = vrot.lane.b32.xlu1 %v508_v21, %s909_s12 }
  0x4d   : >> { %v500_v28 = vmul.f32 %v499_v26, %v495_v19  ;;  %v523_v29 = vstv %s1083_s0  ;;  %v501_v30 = vmul.f32 %v499_v26, %v496_v20  ;;  %v467_v33 = vadd.f32 %v465_v24, %v455_v4 }
  0x4e   : >> { %v468_v34 = vadd.f32 %v466_v25, %v456_v6  ;;  %v524_v35 = vmul.f32 %v523_v29, %v519_v17  ;;  %v525_v36 = vmul.f32 %v523_v29, %v520_v23  ;;  %v532_v38 = vstv %s1087_s21 }
  0x4f   : >> { %v533_v39 = vmul.f32 %v532_v38, %v528_v31  ;;  %v534_v40 = vmul.f32 %v532_v38, %v529_v32  ;;  %v553_v56 = vstv %s552_s26 }
  0x50   : >> { %544 = vrot.lane.b32.xlu0 %v540_v27, %s909_s12  ;;  %546 = vrot.lane.b32.xlu1 %v541_v37, %s909_s12 }
  0xba   : >> { %v477_v41 = vpop.permute.xlu0 %476  ;;  %v512_v43 = vpop.permute.xlu1 %511 }
  0xbb   : >> { %v482_v42 = vadd.f32 %v477_v41, %v467_v33 }
  0xbd   : >> { %v492_v44 = vadd.f32 %v490_v11, %v482_v42 }
  0xbe   : >> { %v479_v45 = vpop.permute.xlu0 %478  ;;  %v514_v50 = vpop.permute.xlu1 %513 }
  0xbf   : >> { %v483_v46 = vadd.f32 %v479_v45, %v468_v34  ;;  %v502_v47 = vadd.f32 %v500_v28, %v492_v44 }
  0xc1   : >> { %v493_v48 = vadd.f32 %v491_v12, %v483_v46  ;;  %v517_v49 = vadd.f32 %v512_v43, %v502_v47 }
  0xc2   : >> { %v545_v53 = vpop.permute.xlu0 %544  ;;  %v547_v59 = vpop.permute.xlu1 %546 }
  0xc3   : >> { %v526_v51 = vadd.f32 %v524_v35, %v517_v49  ;;  %v503_v52 = vadd.f32 %v501_v30, %v493_v48 }
  0xc5   : >> { %v518_v54 = vadd.f32 %v514_v50, %v503_v52  ;;  %v535_v55 = vadd.f32 %v533_v39, %v526_v51 }
  0xc7   : >> { %v527_v57 = vadd.f32 %v525_v36, %v518_v54  ;;  %v550_v58 = vadd.f32 %v545_v53, %v535_v55 }
  0xc9   : >> { %v554_v60 = vadd.f32 %v553_v56, %v550_v58  ;;  %v536_v61 = vadd.f32 %v534_v40, %v527_v57 }
  0xcb   : >> { %vm556_vm1 = vcmp.ge.f32.partialorder %v554_v60, 0.0  ;;  %v558_v62 = vmul.f32 0.1, %v554_v60  ;;  %v551_v63 = vadd.f32 %v547_v59, %v536_v61 }
  0xcc   : > { %444 = sbr.rel (!%p442_p4) target bundleno = 57 (0x39), region = 104 }
  0xcd   : >> { %v560_v0 = vsel %vm556_vm1, %v554_v60, %v558_v62  ;;  %v555_v1 = vadd.f32 %v553_v56, %v551_v63 }
  0xce   : >> { %565 = vst.msk [vmem:[%s563_s13] sm:$0xff] %vm564_vm0, %v560_v0 }
  0xcf   : >> { %vm557_vm2 = vcmp.ge.f32.partialorder %v555_v1, 0.0  ;;  %v559_v2 = vmul.f32 0.1, %v555_v1 }
  0xd1   : >> { %v561_v3 = vsel %vm557_vm2, %v555_v1, %v559_v2 }
  0xd2   : >> { %566 = vst.msk [vmem:[%s563_s13 + $0x8] sm:$0xff] %vm564_vm0, %v561_v3 }
  0xd3 PF: > { %s18_s23 = sadd.s32 1, %s901_s23   ;;  %s1145_s21 = smov %s897_s22 }
  0xd4   : > { %p15_p6 = scmp.ge.s32.totalorder %s18_s23, 4   ;;  %s1146_s22 = smov %s1148_s25 }
  0xd6   :  { %17 = sbr.rel (!%p15_p6) target bundleno = 6 (0x6), region = 115 }
  0xdd   :  { %599 = vsyncpa [#allocation3], 1 }
  0xde   :  { %601 = vsyncpa [#allocation3 + $0x1], 1 }
  0xdf   :  { %602 = vsyncpa [#allocation5], 1 }

// kernel: _lambda_.32
= control target key start
LH: loop header
LB: loop body
LE: loop exit
PB: predicated region body
PF: predicated region fallthrough
CT: control target
= control target key end

     0   :  { %s560_s12 = smov 0   ;;  %s562_s13 = smov 0   ;;  %s631_s0 = inlined_call_operand.vmem [shape: f32[2,16,256], index: 0, kind: input, shape index: {}]   ;;  %s632_s1 = inlined_call_operand.vmem [shape: f32[32,16], index: 1, kind: input, shape index: {}]   ;;  %s633_s2 = inlined_call_operand.vmem [shape: f32[32,1], index: 2, kind: input, shape index: {}]   ;;  %s634_s3 = inlined_call_operand.vmem [shape: f32[2,32,256], index: 3, kind: output, shape index: {}]  }
   0x1   :  { %s564_s14 = smov 0  }
   0x2 LB: > { %s25_s15 = sadd.s32 1, %s532_s13  ;;  %p467_p0 = scmp.ge.s32.totalorder %s536_s14, 1  ;;  %s536_s14 = sphi %s564_s14, %s13_s14   ;;  %s532_s13 = sphi %s562_s13, %s636_s13   ;;  %s528_s12 = sphi %s560_s12, %s635_s12  }
   0x3   : > { %p27_p1 = scmp.ge.s32.totalorder %s25_s15, 2  ;;  %p158_p2 = scmp.lt.s32.totalorder %s536_s14, 3 }
   0x5   : > { %s638_s15 = smov (%p27_p1, %s25_s15), 0  ;;  %p159_p3 = pnand %p467_p0, %p158_p2 }
   0x6   : > { %p191_p4 = scmp.lt.s32.totalorder (!%p159_p3), %s528_s12, 1  ;;  %v538_v0 = vmov (!%p159_p3), 0.0   ;;  %v220_v1 = vld [vmem:[%s633_s2 + $0x10] sm:$0xff] (!%p159_p3)  ;;  %v218_v2 = vld [vmem:[%s633_s2] sm:$0xff] (!%p159_p3)  ;;  %v539_v3 = vmov (!%p159_p3), 0   ;;  %v221_v4 = vld [vmem:[%s633_s2 + $0x18] sm:$0xff] (!%p159_p3) }
   0x7   : > { %162 = sbr.rel (%p159_p3) target bundleno = 249 (0xf9), region = 32  ;;  %319 = vmatprep.mubr.f32.mxu0 (!%p159_p3), %v538_v0  ;;  %331 = vmatprep.mubr.f32.mxu1 (!%p159_p3), %v538_v0  ;;  %v219_v5 = vld [vmem:[%s633_s2 + $0x8] sm:$0xff] (!%p159_p3)  ;;  %v210_v12 = vld [vmem:[%s632_s1] sm:$0xff] (!%p159_p3)  ;;  %vm242_vm0 = vcmask (!%p159_p3), 130048   ;;  %v212_v13 = vld [vmem:[%s632_s1 + $0x10] sm:$0xff] (!%p159_p3) }
   0x8   : > { %513 = vset.pattern.permute.xlu1 (!%p159_p3), %v539_v3  ;;  %512 = vset.pattern.permute.xlu0 (!%p159_p3), %v539_v3  ;;  %v211_v14 = vld [vmem:[%s632_s1 + $0x8] sm:$0xff] (!%p159_p3)  ;;  %v213_v15 = vld [vmem:[%s632_s1 + $0x18] sm:$0xff] (!%p159_p3) }
   0x9   : > { %234 = vperm.xlu1 (!%p159_p3), %513, %v220_v1   ;;  %224 = vperm.xlu0 (!%p159_p3), %512, %v218_v2  }
   0xd   : > { %239 = vperm.xlu1 (!%p159_p3), %513, %v221_v4   ;;  %229 = vperm.xlu0 (!%p159_p3), %512, %v219_v5  }
   0xe   : > { %s640_s12 = smov (!%p191_p4, %s528_s12), 1 }
   0xf   : > { %s478_s20 = sshll.u32 %s640_s12, 5  ;;  %s479_s9 = sshll.u32 %s640_s12, 6 }
  0x10   : > { %s198_s27 = scalar_lea.vmem %s631_s0, %s478_s20  ;;  %s612_s16 = scalar_lea.vmem %s634_s3, %s479_s9 }
  0x11   : > { %v215_v6 = vld [vmem:[%s198_s27 + $0x8] sm:$0xff]  ;;  %v217_v7 = vld [vmem:[%s198_s27 + $0x18] sm:$0xff]  ;;  %v214_v8 = vld [vmem:[%s198_s27] sm:$0xff] }
  0x12   : > { %v480_v9 = vpack.c.bf16 %v217_v7, %v215_v6  ;;  %v216_v10 = vld [vmem:[%s198_s27 + $0x10] sm:$0xff] }
  0x13   : > { %v482_v11 = vpack.c.bf16 %v216_v10, %v214_v8 }
  0x14   : > { %481 = vmatprep.subr.bf16.mxu0 %v480_v9  ;;  %484 = vmatprep.subr.bf16.mxu1 %v480_v9 }
  0x15   : > { %483 = vmatpush1.bf16.msra.mxu0 %v482_v11  ;;  %485 = vmatpush1.bf16.msra.mxu1 %v482_v11 }
  0x18   : > { %472 = vmatmul.mubr.msk.f32.vlgmr.msra.gmra.mrb[0].mxu0 %vm242_vm0, %v210_v12  ;;  %474 = vmatmul.mubr.msk.f32.vlgmr.msra.gmra.mrb[0].mxu1 %vm242_vm0, %v212_v13 }
  0x19   : > { %325 = vmatprep.mubr.f32.mxu0 %v538_v0  ;;  %337 = vmatprep.mubr.f32.mxu1 %v538_v0 }
  0x1c   : > { %473 = vmatmul.mubr.msk.f32.gmra.mrb[2].mxu0 %vm242_vm0, %v211_v14  ;;  %475 = vmatmul.mubr.msk.f32.gmra.mrb[2].mxu1 %vm242_vm0, %v213_v15 }
  0x88   : > { %v235_v16 = vpop.permute.xlu1 %234  ;;  %v225_v17 = vpop.permute.xlu0 %224 }
  0x8c   : > { %v240_v28 = vpop.permute.xlu1 %239  ;;  %v230_v29 = vpop.permute.xlu0 %229 }
  0xeb   : > { %v321_v18 = vpop.f32.mrb[0].mxu0  ;;  %v333_v19 = vpop.f32.mrb[0].mxu1 }
  0xec   : > { %v322_v20 = vadd.f32 %v321_v18, %v225_v17  ;;  %v334_v21 = vadd.f32 %v333_v19, %v235_v16  ;;  %v323_v22 = vpop.f32.mrb[1].mxu0  ;;  %v335_v23 = vpop.f32.mrb[1].mxu1 }
  0xed   : > { %v324_v24 = vadd.f32 %v323_v22, %v225_v17  ;;  %v336_v25 = vadd.f32 %v335_v23, %v235_v16 }
  0xee   : > { %vm344_vm1 = vcmp.ge.f32.partialorder %v322_v20, 0.0  ;;  %v352_v26 = vmul.f32 0.1, %v322_v20  ;;  %vm348_vm2 = vcmp.ge.f32.partialorder %v334_v21, 0.0  ;;  %v356_v27 = vmul.f32 0.1, %v334_v21 }
  0xef   : > { %vm345_vm3 = vcmp.ge.f32.partialorder %v324_v24, 0.0  ;;  %v353_v30 = vmul.f32 0.1, %v324_v24  ;;  %vm349_vm4 = vcmp.ge.f32.partialorder %v336_v25, 0.0  ;;  %v357_v31 = vmul.f32 0.1, %v336_v25 }
  0xf0   : > { %v360_v32 = vsel %vm344_vm1, %v322_v20, %v352_v26  ;;  %v364_v33 = vsel %vm348_vm2, %v334_v21, %v356_v27  ;;  %v327_v34 = vpop.f32.mrb[2].mxu0  ;;  %v339_v35 = vpop.f32.mrb[2].mxu1 }
  0xf1   : > { %368 = vst [vmem:[%s612_s16] sm:$0xff] %v360_v32  ;;  %372 = vst [vmem:[%s612_s16 + $0x20] sm:$0xff] %v364_v33  ;;  %v361_v36 = vsel %vm345_vm3, %v324_v24, %v353_v30  ;;  %v365_v37 = vsel %vm349_vm4, %v336_v25, %v357_v31  ;;  %v328_v38 = vadd.f32 %v327_v34, %v230_v29  ;;  %v329_v40 = vpop.f32.mrb[3].mxu0  ;;  %v341_v41 = vpop.f32.mrb[3].mxu1 }
  0xf2   : > { %v340_v39 = vadd.f32 %v339_v35, %v240_v28  ;;  %369 = vst [vmem:[%s612_s16 + $0x8] sm:$0xff] %v361_v36  ;;  %373 = vst [vmem:[%s612_s16 + $0x28] sm:$0xff] %v365_v37  ;;  %v330_v42 = vadd.f32 %v329_v40, %v230_v29  ;;  %v342_v43 = vadd.f32 %v341_v41, %v240_v28 }
  0xf3   : > { %vm346_vm5 = vcmp.ge.f32.partialorder %v328_v38, 0.0  ;;  %v354_v44 = vmul.f32 0.1, %v328_v38 }
  0xf4   : > { %vm350_vm6 = vcmp.ge.f32.partialorder %v340_v39, 0.0  ;;  %v358_v45 = vmul.f32 0.1, %v340_v39  ;;  %vm347_vm7 = vcmp.ge.f32.partialorder %v330_v42, 0.0  ;;  %v355_v46 = vmul.f32 0.1, %v330_v42 }
  0xf5   : > { %vm351_vm8 = vcmp.ge.f32.partialorder %v342_v43, 0.0  ;;  %v359_v47 = vmul.f32 0.1, %v342_v43  ;;  %v362_v48 = vsel %vm346_vm5, %v328_v38, %v354_v44 }
  0xf6   : > { %v366_v49 = vsel %vm350_vm6, %v340_v39, %v358_v45  ;;  %370 = vst [vmem:[%s612_s16 + $0x10] sm:$0xff] %v362_v48  ;;  %v363_v50 = vsel %vm347_vm7, %v330_v42, %v355_v46 }
  0xf7   : > { %374 = vst [vmem:[%s612_s16 + $0x30] sm:$0xff] %v366_v49  ;;  %v367_v51 = vsel %vm351_vm8, %v342_v43, %v359_v47  ;;  %371 = vst [vmem:[%s612_s16 + $0x18] sm:$0xff] %v363_v50 }
  0xf8   : > { %375 = vst [vmem:[%s612_s16 + $0x38] sm:$0xff] %v367_v51 }
  0xf9 PF: > { %s13_s14 = sadd.s32 1, %s536_s14   ;;  %s635_s12 = smov %s532_s13 }
  0xfa   : > { %p10_p5 = scmp.ge.s32.totalorder %s13_s14, 4   ;;  %s636_s13 = smov %s638_s15 }
  0xfc   :  { %12 = sbr.rel (!%p10_p5) target bundleno = 2 (0x2), region = 62 }

// kernel: _lambda_.33
= control target key start
LH: loop header
LB: loop body
LE: loop exit
PB: predicated region body
PF: predicated region fallthrough
CT: control target
= control target key end

     0   :  { %8 = vsyncpa [#allocation3], 0  ;;  %s817_s0 = inlined_call_operand.vmem [shape: f32[2,32,18,18], index: 0, kind: input, shape index: {}]   ;;  %s818_s1 = inlined_call_operand.vmem [shape: f32[288], index: 1, kind: input, shape index: {}]   ;;  %s819_s2 = inlined_call_operand.vmem [shape: f32[32], index: 2, kind: input, shape index: {}]   ;;  %s820_s3 = inlined_call_operand.vmem [shape: f32[2,32,16,16], index: 3, kind: output, shape index: {}]  }
   0x1   :  { %9 = vsyncpa [#allocation5], 0  ;;  %s677_s12 = smov 0   ;;  %s679_s13 = smov 0  }
   0x2   :  { %s681_s14 = smov 0  }
   0x3 LB: > { %s511_s15 = sadd.s32 4294967295, %s647_s14   ;;  %s27_s16 = sadd.s32 1, %s643_s13  ;;  %s647_s14 = sphi %s681_s14, %s15_s14   ;;  %s643_s13 = sphi %s679_s13, %s830_s13   ;;  %s639_s12 = sphi %s677_s12, %s829_s12  }
   0x4   : > { %p29_p0 = scmp.ge.s32.totalorder %s27_s16, 2  ;;  %p513_p1 = scmp.ge.s32.totalorder %s647_s14, 1 }
   0x5   : > { %p130_p2 = scmp.lt.s32.totalorder %s647_s14, 3  ;;  %p702_p4 = scmp.eq.s32.totalorder %s511_s15, 0 }
   0x6   : > { %s832_s16 = smov (%p29_p0, %s27_s16), 0  ;;  %s143_s21 = sshll.u32 %s818_s1, 4  ;;  %s144_s21 = int_to_ptr.vmem [resolvable:$true] %s143_s21 }
   0x7   : > { %p698_p3 = pnand %p513_p1, %p130_p2  ;;  %s154_s24 = sshll.u32 %s819_s2, 4  ;;  %s155_s24 = int_to_ptr.vmem [resolvable:$true] %s154_s24 }
   0x8   : > { %s825_s18 = scalar_select %p702_p4, 1, 0 }
   0x9   : > { %s824_s17 = scalar_select %p698_p3, 1, 0 }
   0xa   : > { %p536_p5 = pneg %p698_p3  ;;  %s583_s26 = scalar_lea.vmem %s144_s21, 48 }
   0xb   : > { %p584_p7 = scmp.ne.s32.totalorder %s144_s21, %s583_s26  ;;  %s590_s27 = scalar_lea.vmem %s144_s21, 64 }
   0xc   : > { %p716_p6 = pnand %p702_p4, %p536_p5  ;;  %p591_p11 = scmp.lt.s32.totalorder %s144_s21, %s144_s21 }
   0xd   : > { %p592_p12 = scmp.lt.s32.totalorder %s590_s27, %s583_s26 }
   0xe   : > { %p585_p8 = pneg %p716_p6 }
   0xf   : > { %p593_p13 = por %p592_p12, %p591_p11 }
  0x10   : > { %p586_p9 = pnand %p585_p8, %p584_p7 }
  0x12   : > { %p587_p10 = pneg %p586_p9 }
  0x14   : > { %p594_p0 = pnand %p593_p13, %p587_p10 }
  0x16   : > { %597 = shalt.err (!%p594_p0)
}
  0x17   : > { %s653_s28 = smov [#allocation2]   ;;  %s598_s29 = scalar_lea.vmem %s155_s24, 16 }
  0x18   : > { %539 = dma.vmem_to_smem (!%p716_p6), %s144_s21, 48, %s653_s28, [#allocation3]  }
  0x19   : > { %p599_p1 = scmp.ne.s32.totalorder %s155_s24, %s598_s29  ;;  %p606_p4 = scmp.lt.s32.totalorder %s155_s24, %s155_s24 }
  0x1a   : > { %p607_p7 = scmp.lt.s32.totalorder %s598_s29, %s598_s29 }
  0x1b   : > { %p601_p2 = pnand %p599_p1, %p585_p8 }
  0x1c   : > { %p608_p9 = por %p607_p7, %p606_p4 }
  0x1d   : > { %p602_p5 = pneg %p601_p2 }
  0x1f   : > { %p609_p3 = pnand %p608_p9, %p602_p5 }
  0x21   : > { %612 = shalt.err (!%p609_p3)
}
  0x22   : > { %s654_s30 = smov [#allocation4]   ;;  %p827_p10 = scmp.ne.s32.totalorder %s824_s17, 0 }
  0x23   : > { %542 = dma.vmem_to_smem (!%p716_p6), %s155_s24, 16, %s654_s30, [#allocation5]  }
  0x24   : > { %181 = sbr.rel (%p827_p10) target bundleno = 211 (0xd3), region = 32  ;;  %p828_p11 = scmp.ne.s32.totalorder (!%p827_p10), %s825_s18, 0 }
  0x2b   : > { %630 = dma.done.wait (%p828_p11), [#allocation3], 48  }
  0x2c   : > { %632 = vsyncadd (%p828_p11), [#allocation3], 4294967248 }
  0x2d   : > { %634 = dma.done.wait (%p828_p11), [#allocation5], 16  }
  0x2e   : > { %636 = vsyncadd (%p828_p11), [#allocation5], 4294967280 }
  0x2f   : > { %191 = sfence }
  0x30   : > { %p221_p3 = scmp.lt.s32.totalorder %s639_s12, 1  ;;  %s754_s15 = smov 0  }
  0x32   : > { %s834_s12 = smov (!%p221_p3, %s639_s12), 1 }
  0x33   : > { %s527_s4 = smul.u32 768, %s834_s12  ;;  %s526_s5 = sshll.u32 %s834_s12, 9 }
  0x34   : > { %s747_s8 = scalar_lea.vmem %s820_s3, %s526_s5 }
  0x35   : > { %s752_s11 = scalar_lea.vmem %s817_s0, %s527_s4 }
  0x36 LB: >> { %s250_s12 = smul.u32 24, %s651_s15  ;;  %s655_s6 = smov 126   ;;  %vm381_vm0 = vcmask 130048   ;;  %s651_s15 = sphi %s754_s15, %s247_s15  }
  0x37   : >> { %s761_s17 = smul.u32 9, %s651_s15  ;;  %s656_s7 = smov 127  }
  0x38   : >> { %s764_s18 = scalar_lea.vmem %s752_s11, %s250_s12 }
  0x39   : >> { %s276_s19 = sadd.s32 2, %s761_s17  ;;  %s261_s20 = sadd.s32 1, %s761_s17  ;;  %v252_v0 = vld [vmem:[%s764_s18] sm:$0xff]  ;;  %v253_v1 = vld [vmem:[%s764_s18 + $0x8] sm:$0xff] }
  0x3a   : >> { %s277_s21 = sld [smem:[#allocation2 + %s276_s19]]  ;;  %s300_s23 = sadd.s32 4, %s761_s17  ;;  %v292_v6 = vld [vmem:[%s764_s18 + $0x9] sm:$0xff]  ;;  %v291_v10 = vld [vmem:[%s764_s18 + $0x1] sm:$0xff] }
  0x3b   : >> { %s262_s22 = sld [smem:[#allocation2 + %s261_s20]]  ;;  %s315_s24 = sadd.s32 5, %s761_s17  ;;  %v331_v13 = vld [vmem:[%s764_s18 + $0xa] sm:$0xff]  ;;  %v330_v16 = vld [vmem:[%s764_s18 + $0x2] sm:$0xff] }
  0x3c   : >> { %s301_s25 = sld [smem:[#allocation2 + %s300_s23]]  ;;  %s293_s28 = sadd.s32 3, %s761_s17 }
  0x3d   : >> { %s771_s26 = sld [smem:[#allocation2 + %s315_s24]]  ;;  %s332_s30 = sadd.s32 6, %s761_s17 }
  0x3e   : >> { %s774_s27 = sld [smem:[#allocation2 + %s761_s17]]  ;;  %s339_s4 = sadd.s32 7, %s761_s17 }
  0x3f   : >> { %s778_s29 = sld [smem:[#allocation2 + %s293_s28]]  ;;  %s354_s10 = sadd.s32 8, %s761_s17 }
  0x40   : >> { %v278_v2 = vstv %s277_s21  ;;  %s333_s5 = sld [smem:[#allocation2 + %s332_s30]]  ;;  %s523_s18 = sshll.u32 %s651_s15, 4 }
  0x41   : >> { %v263_v3 = vstv %s262_s22  ;;  %v279_v4 = vmul.f32 %v278_v2, %v252_v0  ;;  %v280_v7 = vmul.f32 %v278_v2, %v253_v1  ;;  %s340_s9 = sld [smem:[#allocation2 + %s339_s4]]  ;;  %s380_s19 = scalar_lea.vmem %s747_s8, %s523_s18 }
  0x42   : >> { %v264_v5 = vmul.f32 %v263_v3, %v252_v0  ;;  %v265_v8 = vmul.f32 %v263_v3, %v253_v1  ;;  %v302_v9 = vstv %s301_s25  ;;  %s355_s12 = sld [smem:[#allocation2 + %s354_s10]] }
  0x43   : >> { %283 = vrot.lane.b32.xlu1 %v279_v4, %s655_s6  ;;  %v304_v11 = vmul.f32 %v302_v9, %v292_v6  ;;  %v303_v12 = vmul.f32 %v302_v9, %v291_v10  ;;  %v317_v21 = vstv %s771_s26  ;;  %s369_s17 = sld [smem:[#allocation4 + %s651_s15]]  ;;  %s247_s15 = sadd.s32 1, %s651_s15  }
  0x44   : >> { %268 = vrot.lane.b32.xlu0 %v264_v5, %s656_s7  ;;  %v256_v14 = vstv %s774_s27  ;;  %v319_v25 = vmul.f32 %v317_v21, %v292_v6  ;;  %v318_v26 = vmul.f32 %v317_v21, %v291_v10  ;;  %p244_p4 = scmp.ge.s32.totalorder %s247_s15, 32  }
  0x45   : >> { %v295_v15 = vstv %s778_s29  ;;  %v257_v17 = vmul.f32 %v256_v14, %v252_v0  ;;  %v258_v18 = vmul.f32 %v256_v14, %v253_v1 }
  0x46   : >> { %v297_v19 = vmul.f32 %v295_v15, %v292_v6  ;;  %v334_v20 = vstv %s333_s5  ;;  %v296_v22 = vmul.f32 %v295_v15, %v291_v10 }
  0x47   : >> { %285 = vrot.lane.b32.xlu1 %v280_v7, %s655_s6  ;;  %v336_v23 = vmul.f32 %v334_v20, %v331_v13  ;;  %v335_v24 = vmul.f32 %v334_v20, %v330_v16  ;;  %v341_v27 = vstv %s340_s9 }
  0x48   : >> { %270 = vrot.lane.b32.xlu0 %v265_v8, %s656_s7  ;;  %v343_v28 = vmul.f32 %v341_v27, %v331_v13  ;;  %v342_v29 = vmul.f32 %v341_v27, %v330_v16  ;;  %v356_v30 = vstv %s355_s12 }
  0x49   : >> { %v358_v31 = vmul.f32 %v356_v30, %v331_v13  ;;  %v357_v32 = vmul.f32 %v356_v30, %v330_v16  ;;  %v370_v57 = vstv %s369_s17 }
  0x4b   : >> { %309 = vrot.lane.b32.xlu1 %v304_v11, %s656_s7 }
  0x4c   : >> { %307 = vrot.lane.b32.xlu0 %v303_v12, %s656_s7 }
  0x4f   : >> { %324 = vrot.lane.b32.xlu1 %v319_v25, %s655_s6 }
  0x50   : >> { %322 = vrot.lane.b32.xlu0 %v318_v26, %s655_s6 }
  0x53   : >> { %348 = vrot.lane.b32.xlu1 %v343_v28, %s656_s7 }
  0x54   : >> { %346 = vrot.lane.b32.xlu0 %v342_v29, %s656_s7 }
  0x57   : >> { %363 = vrot.lane.b32.xlu1 %v358_v31, %s655_s6 }
  0x58   : >> { %361 = vrot.lane.b32.xlu0 %v357_v32, %s655_s6 }
  0xb5   : >> { %v284_v33 = vpop.permute.xlu1 %283 }
  0xb6   : >> { %v269_v34 = vpop.permute.xlu0 %268 }
  0xb7   : >> { %v274_v35 = vadd.f32 %v269_v34, %v257_v17 }
  0xb9   : >> { %v289_v36 = vadd.f32 %v284_v33, %v274_v35  ;;  %v286_v37 = vpop.permute.xlu1 %285 }
  0xba   : >> { %v271_v38 = vpop.permute.xlu0 %270 }
  0xbb   : >> { %v275_v39 = vadd.f32 %v271_v38, %v258_v18  ;;  %v298_v40 = vadd.f32 %v296_v22, %v289_v36 }
  0xbd   : >> { %v290_v41 = vadd.f32 %v286_v37, %v275_v39  ;;  %v310_v42 = vpop.permute.xlu1 %309 }
  0xbe   : >> { %v308_v43 = vpop.permute.xlu0 %307 }
  0xbf   : >> { %v299_v44 = vadd.f32 %v297_v19, %v290_v41  ;;  %v313_v46 = vadd.f32 %v308_v43, %v298_v40 }
  0xc1   : >> { %v314_v45 = vadd.f32 %v310_v42, %v299_v44  ;;  %v325_v47 = vpop.permute.xlu1 %324 }
  0xc2   : >> { %v323_v48 = vpop.permute.xlu0 %322 }
  0xc3   : >> { %v329_v49 = vadd.f32 %v325_v47, %v314_v45  ;;  %v328_v50 = vadd.f32 %v323_v48, %v313_v46 }
  0xc5   : >> { %v338_v51 = vadd.f32 %v336_v23, %v329_v49  ;;  %v337_v52 = vadd.f32 %v335_v24, %v328_v50  ;;  %v349_v53 = vpop.permute.xlu1 %348 }
  0xc6   : >> { %v347_v54 = vpop.permute.xlu0 %346 }
  0xc7   : >> { %v353_v55 = vadd.f32 %v349_v53, %v338_v51  ;;  %v352_v56 = vadd.f32 %v347_v54, %v337_v52 }
  0xc9   : >> { %v364_v58 = vpop.permute.xlu1 %363 }
  0xca   : >> { %v362_v59 = vpop.permute.xlu0 %361  ;;  %v368_v60 = vadd.f32 %v364_v58, %v353_v55 }
  0xcb   : >> { %v367_v61 = vadd.f32 %v362_v59, %v352_v56 }
  0xcc   : >> { %v372_v62 = vadd.f32 %v370_v57, %v368_v60  ;;  %246 = sbr.rel (!%p244_p4) target bundleno = 54 (0x36), region = 80 }
  0xcd   : >> { %v371_v63 = vadd.f32 %v370_v57, %v367_v61 }
  0xce   : >> { %vm374_vm1 = vcmp.ge.f32.partialorder %v372_v62, 0.0  ;;  %v376_v0 = vmul.f32 0.1, %v372_v62 }
  0xcf   : >> { %vm373_vm2 = vcmp.ge.f32.partialorder %v371_v63, 0.0  ;;  %v375_v1 = vmul.f32 0.1, %v371_v63 }
  0xd0   : >> { %v378_v2 = vsel %vm374_vm1, %v372_v62, %v376_v0 }
  0xd1   : >> { %v377_v3 = vsel %vm373_vm2, %v371_v63, %v375_v1  ;;  %383 = vst.msk [vmem:[%s380_s19 + $0x8] sm:$0xff] %vm381_vm0, %v378_v2 }
  0xd2   : >> { %382 = vst.msk [vmem:[%s380_s19] sm:$0xff] %vm381_vm0, %v377_v3 }
  0xd3 PF: > { %s15_s14 = sadd.s32 1, %s647_s14   ;;  %s829_s12 = smov %s643_s13 }
  0xd4   : > { %p12_p6 = scmp.ge.s32.totalorder %s15_s14, 4   ;;  %s830_s13 = smov %s832_s16 }
  0xd6   :  { %14 = sbr.rel (!%p12_p6) target bundleno = 3 (0x3), region = 91 }
  0xdd   :  { %416 = vsyncpa [#allocation3], 1 }
  0xde   :  { %418 = vsyncpa [#allocation3 + $0x1], 1 }
  0xdf   :  { %419 = vsyncpa [#allocation5], 1 }

// kernel: _lambda_.34
= control target key start
LH: loop header
LB: loop body
LE: loop exit
PB: predicated region body
PF: predicated region fallthrough
CT: control target
= control target key end

     0   :  { %s570_s12 = smov 0   ;;  %s572_s13 = smov 0   ;;  %s644_s0 = inlined_call_operand.vmem [shape: f32[2,32,256], index: 0, kind: input, shape index: {}]   ;;  %s645_s1 = inlined_call_operand.vmem [shape: f32[32,32], index: 1, kind: input, shape index: {}]   ;;  %s646_s2 = inlined_call_operand.vmem [shape: f32[32,1], index: 2, kind: input, shape index: {}]   ;;  %s647_s3 = inlined_call_operand.vmem [shape: f32[2,32,256], index: 3, kind: output, shape index: {}]  }
   0x1   :  { %s574_s14 = smov 0  }
   0x2 LB: > { %s25_s15 = sadd.s32 1, %s542_s13  ;;  %p471_p0 = scmp.ge.s32.totalorder %s546_s14, 1  ;;  %s546_s14 = sphi %s574_s14, %s13_s14   ;;  %s542_s13 = sphi %s572_s13, %s649_s13   ;;  %s538_s12 = sphi %s570_s12, %s648_s12  }
   0x3   : > { %p27_p1 = scmp.ge.s32.totalorder %s25_s15, 2  ;;  %p158_p2 = scmp.lt.s32.totalorder %s546_s14, 3 }
   0x5   : > { %s651_s15 = smov (%p27_p1, %s25_s15), 0  ;;  %p159_p3 = pnand %p471_p0, %p158_p2 }
   0x6   : > { %p191_p4 = scmp.lt.s32.totalorder (!%p159_p3), %s538_s12, 1  ;;  %v548_v0 = vmov (!%p159_p3), 0.0   ;;  %v224_v1 = vld [vmem:[%s646_s2 + $0x10] sm:$0xff] (!%p159_p3)  ;;  %v222_v2 = vld [vmem:[%s646_s2] sm:$0xff] (!%p159_p3)  ;;  %v549_v3 = vmov (!%p159_p3), 0   ;;  %v225_v4 = vld [vmem:[%s646_s2 + $0x18] sm:$0xff] (!%p159_p3) }
   0x7   : > { %162 = sbr.rel (%p159_p3) target bundleno = 253 (0xfd), region = 32  ;;  %323 = vmatprep.mubr.f32.mxu0 (!%p159_p3), %v548_v0  ;;  %335 = vmatprep.mubr.f32.mxu1 (!%p159_p3), %v548_v0  ;;  %v223_v5 = vld [vmem:[%s646_s2 + $0x8] sm:$0xff] (!%p159_p3)  ;;  %v210_v18 = vld [vmem:[%s645_s1] sm:$0xff] (!%p159_p3)  ;;  %vm246_vm0 = vcmask (!%p159_p3), 261120   ;;  %v212_v19 = vld [vmem:[%s645_s1 + $0x10] sm:$0xff] (!%p159_p3) }
   0x8   : > { %523 = vset.pattern.permute.xlu1 (!%p159_p3), %v549_v3  ;;  %522 = vset.pattern.permute.xlu0 (!%p159_p3), %v549_v3  ;;  %v211_v20 = vld [vmem:[%s645_s1 + $0x8] sm:$0xff] (!%p159_p3)  ;;  %v213_v21 = vld [vmem:[%s645_s1 + $0x18] sm:$0xff] (!%p159_p3) }
   0x9   : > { %238 = vperm.xlu1 (!%p159_p3), %523, %v224_v1   ;;  %228 = vperm.xlu0 (!%p159_p3), %522, %v222_v2  }
   0xd   : > { %243 = vperm.xlu1 (!%p159_p3), %523, %v225_v4   ;;  %233 = vperm.xlu0 (!%p159_p3), %522, %v223_v5  }
   0xe   : > { %s653_s12 = smov (!%p191_p4, %s538_s12), 1 }
   0xf   : > { %s482_s20 = sshll.u32 %s653_s12, 6 }
  0x10   : > { %s198_s27 = scalar_lea.vmem %s644_s0, %s482_s20  ;;  %s625_s11 = scalar_lea.vmem %s647_s3, %s482_s20 }
  0x11   : > { %v215_v6 = vld [vmem:[%s198_s27 + $0x8] sm:$0xff]  ;;  %v217_v7 = vld [vmem:[%s198_s27 + $0x18] sm:$0xff]  ;;  %v214_v8 = vld [vmem:[%s198_s27] sm:$0xff] }
  0x12   : > { %v484_v9 = vpack.c.bf16 %v217_v7, %v215_v6  ;;  %v216_v10 = vld [vmem:[%s198_s27 + $0x10] sm:$0xff]  ;;  %v219_v11 = vld [vmem:[%s198_s27 + $0x28] sm:$0xff]  ;;  %v221_v12 = vld [vmem:[%s198_s27 + $0x38] sm:$0xff] }
  0x13   : > { %v486_v13 = vpack.c.bf16 %v216_v10, %v214_v8  ;;  %v488_v14 = vpack.c.bf16 %v221_v12, %v219_v11  ;;  %v218_v15 = vld [vmem:[%s198_s27 + $0x20] sm:$0xff]  ;;  %v220_v16 = vld [vmem:[%s198_s27 + $0x30] sm:$0xff] }
  0x14   : > { %485 = vmatprep.subr.bf16.mxu0 %v484_v9  ;;  %492 = vmatprep.subr.bf16.mxu1 %v484_v9  ;;  %v490_v17 = vpack.c.bf16 %v220_v16, %v218_v15 }
  0x15   : > { %487 = vmatpush1.bf16.msra.mxu0 %v486_v13  ;;  %494 = vmatpush1.bf16.msra.mxu1 %v486_v13 }
  0x16   : > { %489 = vmatprep.subr.bf16.mxu0 %v488_v14  ;;  %493 = vmatprep.subr.bf16.mxu1 %v488_v14 }
  0x19   : > { %491 = vmatpush1.bf16.msra.mxu0 %v490_v17  ;;  %495 = vmatpush1.bf16.msra.mxu1 %v490_v17 }
  0x1c   : > { %476 = vmatmul.mubr.msk.f32.vlgmr.msra.gmra.mrb[0].mxu0 %vm246_vm0, %v210_v18  ;;  %478 = vmatmul.mubr.msk.f32.vlgmr.msra.gmra.mrb[0].mxu1 %vm246_vm0, %v212_v19 }
  0x1d   : > { %329 = vmatprep.mubr.f32.mxu0 %v548_v0  ;;  %341 = vmatprep.mubr.f32.mxu1 %v548_v0 }
  0x20   : > { %477 = vmatmul.mubr.msk.f32.gmra.mrb[2].mxu0 %vm246_vm0, %v211_v20  ;;  %479 = vmatmul.mubr.msk.f32.gmra.mrb[2].mxu1 %vm246_vm0, %v213_v21 }
  0x88   : > { %v239_v22 = vpop.permute.xlu1 %238  ;;  %v229_v23 = vpop.permute.xlu0 %228 }
  0x8c   : > { %v244_v34 = vpop.permute.xlu1 %243  ;;  %v234_v35 = vpop.permute.xlu0 %233 }
  0xef   : > { %v325_v24 = vpop.f32.mrb[0].mxu0  ;;  %v337_v25 = vpop.f32.mrb[0].mxu1 }
  0xf0   : > { %v326_v26 = vadd.f32 %v325_v24, %v229_v23  ;;  %v338_v27 = vadd.f32 %v337_v25, %v239_v22  ;;  %v327_v28 = vpop.f32.mrb[1].mxu0  ;;  %v339_v29 = vpop.f32.mrb[1].mxu1 }
  0xf1   : > { %v328_v30 = vadd.f32 %v327_v28, %v229_v23  ;;  %v340_v31 = vadd.f32 %v339_v29, %v239_v22 }
  0xf2   : > { %vm348_vm1 = vcmp.ge.f32.partialorder %v326_v26, 0.0  ;;  %v356_v32 = vmul.f32 0.1, %v326_v26  ;;  %vm352_vm2 = vcmp.ge.f32.partialorder %v338_v27, 0.0  ;;  %v360_v33 = vmul.f32 0.1, %v338_v27 }
  0xf3   : > { %vm349_vm3 = vcmp.ge.f32.partialorder %v328_v30, 0.0  ;;  %v357_v36 = vmul.f32 0.1, %v328_v30  ;;  %vm353_vm4 = vcmp.ge.f32.partialorder %v340_v31, 0.0  ;;  %v361_v37 = vmul.f32 0.1, %v340_v31 }
  0xf4   : > { %v364_v38 = vsel %vm348_vm1, %v326_v26, %v356_v32  ;;  %v368_v39 = vsel %vm352_vm2, %v338_v27, %v360_v33  ;;  %v331_v40 = vpop.f32.mrb[2].mxu0  ;;  %v343_v41 = vpop.f32.mrb[2].mxu1 }
  0xf5   : > { %372 = vst [vmem:[%s625_s11] sm:$0xff] %v364_v38  ;;  %376 = vst [vmem:[%s625_s11 + $0x20] sm:$0xff] %v368_v39  ;;  %v365_v42 = vsel %vm349_vm3, %v328_v30, %v357_v36  ;;  %v369_v43 = vsel %vm353_vm4, %v340_v31, %v361_v37  ;;  %v332_v44 = vadd.f32 %v331_v40, %v234_v35  ;;  %v333_v46 = vpop.f32.mrb[3].mxu0  ;;  %v345_v47 = vpop.f32.mrb[3].mxu1 }
  0xf6   : > { %v344_v45 = vadd.f32 %v343_v41, %v244_v34  ;;  %373 = vst [vmem:[%s625_s11 + $0x8] sm:$0xff] %v365_v42  ;;  %377 = vst [vmem:[%s625_s11 + $0x28] sm:$0xff] %v369_v43  ;;  %v334_v48 = vadd.f32 %v333_v46, %v234_v35  ;;  %v346_v49 = vadd.f32 %v345_v47, %v244_v34 }
  0xf7   : > { %vm350_vm5 = vcmp.ge.f32.partialorder %v332_v44, 0.0  ;;  %v358_v50 = vmul.f32 0.1, %v332_v44 }
  0xf8   : > { %vm354_vm6 = vcmp.ge.f32.partialorder %v344_v45, 0.0  ;;  %v362_v51 = vmul.f32 0.1, %v344_v45  ;;  %vm351_vm7 = vcmp.ge.f32.partialorder %v334_v48, 0.0  ;;  %v359_v52 = vmul.f32 0.1, %v334_v48 }
  0xf9   : > { %vm355_vm8 = vcmp.ge.f32.partialorder %v346_v49, 0.0  ;;  %v363_v53 = vmul.f32 0.1, %v346_v49  ;;  %v366_v54 = vsel %vm350_vm5, %v332_v44, %v358_v50 }
  0xfa   : > { %v370_v55 = vsel %vm354_vm6, %v344_v45, %v362_v51  ;;  %374 = vst [vmem:[%s625_s11 + $0x10] sm:$0xff] %v366_v54  ;;  %v367_v56 = vsel %vm351_vm7, %v334_v48, %v359_v52 }
  0xfb   : > { %378 = vst [vmem:[%s625_s11 + $0x30] sm:$0xff] %v370_v55  ;;  %v371_v57 = vsel %vm355_vm8, %v346_v49, %v363_v53  ;;  %375 = vst [vmem:[%s625_s11 + $0x18] sm:$0xff] %v367_v56 }
  0xfc   : > { %379 = vst [vmem:[%s625_s11 + $0x38] sm:$0xff] %v371_v57 }
  0xfd PF: > { %s13_s14 = sadd.s32 1, %s546_s14   ;;  %s648_s12 = smov %s542_s13 }
  0xfe   : > { %p10_p5 = scmp.ge.s32.totalorder %s13_s14, 4   ;;  %s649_s13 = smov %s651_s15 }
 0x100   :  { %12 = sbr.rel (!%p10_p5) target bundleno = 2 (0x2), region = 62 }

// kernel: _lambda_.35
= control target key start
LH: loop header
LB: loop body
LE: loop exit
PB: predicated region body
PF: predicated region fallthrough
CT: control target
= control target key end

     0   :  { %s1053_s0 = inlined_call_operand.vmem [shape: f32[2,32,9,9], index: 0, kind: input, shape index: {}]   ;;  %s1054_s1 = inlined_call_operand.vmem [shape: f32[2,32,9,9], index: 1, kind: input, shape index: {}]   ;;  %s1055_s2 = inlined_call_operand.vmem [shape: f32[2,32,9,9], index: 2, kind: input, shape index: {}]   ;;  %s1056_s3 = inlined_call_operand.vmem [shape: f32[2,32,9,9], index: 3, kind: input, shape index: {}]   ;;  %s1057_s4 = inlined_call_operand.vmem [shape: f32[288], index: 4, kind: input, shape index: {}]   ;;  %s1058_s5 = inlined_call_operand.vmem [shape: f32[32], index: 5, kind: input, shape index: {}]   ;;  %s1059_s6 = inlined_call_operand.vmem [shape: f32[2,32,8,8], index: 6, kind: output, shape index: {}]  }
   0x1   :  { %1063 = sst [smem:[#allocation8_spill]] %s1053_s0 }
   0x2   :  { %1064 = sst [smem:[#allocation9_spill]] %s1055_s2 }
   0x3   :  { %1065 = sst [smem:[#allocation10_spill]] %s1057_s4 }
   0x4   :  { %1066 = sst [smem:[#allocation11_spill]] %s1058_s5 }
   0x5   :  { %11 = vsyncpa [#allocation3], 0 }
   0x6   :  { %12 = vsyncpa [#allocation5], 0  ;;  %s904_s21 = smov 0   ;;  %s906_s22 = smov 0  }
   0x7   :  { %s908_s23 = smov 0  }
   0x8 LB: > { %s714_s24 = sadd.s32 4294967295, %s860_s23   ;;  %s30_s25 = sadd.s32 1, %s856_s22  ;;  %s860_s23 = sphi %s908_s23, %s18_s23   ;;  %s856_s22 = sphi %s906_s22, %s1083_s22   ;;  %s852_s21 = sphi %s904_s21, %s1082_s21  }
   0x9   : > { %p32_p0 = scmp.ge.s32.totalorder %s30_s25, 2  ;;  %p716_p1 = scmp.ge.s32.totalorder %s860_s23, 1 }
   0xa   : > { %p217_p2 = scmp.lt.s32.totalorder %s860_s23, 3  ;;  %p929_p4 = scmp.eq.s32.totalorder %s714_s24, 0 }
   0xb   : > { %s1085_s25 = smov (%p32_p0, %s30_s25), 0  ;;  %s1069_s4 = sld [smem:[#allocation10_spill]] }
   0xc   : > { %p925_p3 = pnand %p716_p1, %p217_p2  ;;  %s1070_s5 = sld [smem:[#allocation11_spill]] }
   0xd   : > { %s1068_s27 = scalar_select %p929_p4, 1, 0 }
   0xe   : > { %s1067_s26 = scalar_select %p925_p3, 1, 0 }
   0xf   : > { %p750_p5 = pneg %p925_p3 }
  0x11   : > { %s230_s30 = sshll.u32 %s1069_s4, 4  ;;  %p943_p6 = pnand %p929_p4, %p750_p5  ;;  %s231_s30 = int_to_ptr.vmem [resolvable:$true] %s230_s30 }
  0x12   : > { %s241_s9 = sshll.u32 %s1070_s5, 4  ;;  %s796_s11 = scalar_lea.vmem %s231_s30, 48  ;;  %s242_s9 = int_to_ptr.vmem [resolvable:$true] %s241_s9 }
  0x13   : > { %p797_p7 = scmp.ne.s32.totalorder %s231_s30, %s796_s11  ;;  %p798_p8 = pneg %p943_p6 }
  0x14   : > { %s803_s12 = scalar_lea.vmem %s231_s30, 64  ;;  %p804_p11 = scmp.lt.s32.totalorder %s231_s30, %s231_s30 }
  0x15   : > { %p799_p9 = pnand %p798_p8, %p797_p7  ;;  %p805_p12 = scmp.lt.s32.totalorder %s803_s12, %s796_s11 }
  0x17   : > { %p800_p10 = pneg %p799_p9  ;;  %p806_p13 = por %p805_p12, %p804_p11 }
  0x19   : > { %p807_p0 = pnand %p806_p13, %p800_p10 }
  0x1b   : > { %810 = shalt.err (!%p807_p0)
}
  0x1c   : > { %s866_s13 = smov [#allocation2]   ;;  %s811_s14 = scalar_lea.vmem %s242_s9, 16 }
  0x1d   : > { %753 = dma.vmem_to_smem (!%p943_p6), %s231_s30, 48, %s866_s13, [#allocation3]  }
  0x1e   : > { %p812_p1 = scmp.ne.s32.totalorder %s242_s9, %s811_s14  ;;  %p819_p4 = scmp.lt.s32.totalorder %s242_s9, %s242_s9 }
  0x1f   : > { %p820_p7 = scmp.lt.s32.totalorder %s811_s14, %s811_s14 }
  0x20   : > { %p814_p2 = pnand %p812_p1, %p798_p8 }
  0x21   : > { %p821_p9 = por %p820_p7, %p819_p4 }
  0x22   : > { %p815_p5 = pneg %p814_p2 }
  0x24   : > { %p822_p3 = pnand %p821_p9, %p815_p5 }
  0x26   : > { %825 = shalt.err (!%p822_p3)
}
  0x27   : > { %s867_s15 = smov [#allocation4]   ;;  %p1072_p10 = scmp.ne.s32.totalorder %s1067_s26, 0 }
  0x28   : > { %756 = dma.vmem_to_smem (!%p943_p6), %s242_s9, 16, %s867_s15, [#allocation5]  }
  0x29   : > { %310 = sbr.rel (%p1072_p10) target bundleno = 208 (0xd0), region = 44  ;;  %p1073_p11 = scmp.ne.s32.totalorder (!%p1072_p10), %s1068_s27, 0 }
  0x30   : > { %843 = dma.done.wait (%p1073_p11), [#allocation3], 48  }
  0x31   : > { %845 = vsyncadd (%p1073_p11), [#allocation3], 4294967248 }
  0x32   : > { %847 = dma.done.wait (%p1073_p11), [#allocation5], 16  }
  0x33   : > { %849 = vsyncadd (%p1073_p11), [#allocation5], 4294967280 }
  0x34   : > { %320 = sfence }
  0x35   : > { %p385_p3 = scmp.lt.s32.totalorder %s852_s21, 1  ;;  %s994_s12 = smov 0  }
  0x37   : > { %s1087_s21 = smov (!%p385_p3, %s852_s21), 1 }
  0x38   : > { %s971_s16 = sshll.u32 %s1087_s21, 9  ;;  %s741_s17 = sshll.u32 %s1087_s21, 8 }
  0x39   : > { %s992_s21 = scalar_lea.vmem %s1059_s6, %s741_s17 }
  0x3a LB: >> { %s1000_s13 = sshll.u32 %s864_s12, 4  ;;  %s1003_s14 = smul.u32 9, %s864_s12  ;;  %vm522_vm0 = vcmask 64512   ;;  %s864_s12 = sphi %s994_s12, %s443_s12  }
  0x3b   : >> { %s1076_s0 = sld [smem:[#allocation8_spill]]  ;;  %s1078_s2 = sld [smem:[#allocation9_spill]] }
  0x3c   : >> { %s450_s19 = sld [smem:[#allocation2 + %s1003_s14]]  ;;  %s461_s24 = sadd.s32 2, %s1003_s14 }
  0x3d   : >> { %s462_s26 = sld [smem:[#allocation2 + %s461_s24]]  ;;  %s484_s28 = sadd.s32 5, %s1003_s14 }
  0x3e   : >> { %s485_s29 = sld [smem:[#allocation2 + %s484_s28]]  ;;  %s494_s7 = sadd.s32 6, %s1003_s14 }
  0x3f   : >> { %s495_s8 = sld [smem:[#allocation2 + %s494_s7]]  ;;  %s505_s10 = sadd.s32 8, %s1003_s14 }
  0x40   : >> { %s506_s9 = sld [smem:[#allocation2 + %s505_s10]]  ;;  %s472_s24 = sadd.s32 3, %s1003_s14 }
  0x41   : >> { %s1077_s20 = scalar_lea.vmem %s1076_s0, %s971_s16  ;;  %s1079_s30 = scalar_lea.vmem %s1078_s2, %s971_s16 }
  0x42   : >> { %s447_s18 = scalar_lea.vmem %s1077_s20, %s1000_s13  ;;  %s470_s17 = scalar_lea.vmem %s1079_s30, %s1000_s13  ;;  %v451_v1 = vstv %s450_s19 }
  0x43   : >> { %v448_v0 = vld [vmem:[%s447_s18] sm:$0xff]  ;;  %s456_s20 = sadd.s32 1, %s1003_s14  ;;  %s473_s0 = sld [smem:[#allocation2 + %s472_s24]]  ;;  %v463_v2 = vstv %s462_s26 }
  0x44   : >> { %s457_s27 = sld [smem:[#allocation2 + %s456_s20]]  ;;  %v452_v3 = vmul.f32 %v451_v1, %v448_v0  ;;  %v471_v4 = vld [vmem:[%s470_s17] sm:$0xff]  ;;  %s1080_s4 = scalar_lea.vmem %s1054_s1, %s971_s16  ;;  %v464_v5 = vmul.f32 %v463_v2, %v448_v0  ;;  %v486_v6 = vstv %s485_s29 }
  0x45   : >> { %s454_s11 = scalar_lea.vmem %s1080_s4, %s1000_s13  ;;  %s479_s15 = sadd.s32 4, %s1003_s14  ;;  %v493_v7 = vld [vmem:[%s447_s18 + $0x1] sm:$0xff]  ;;  %v496_v8 = vstv %s495_s8  ;;  %v487_v9 = vmul.f32 %v486_v6, %v471_v4 }
  0x46   : >> { %s480_s10 = sld [smem:[#allocation2 + %s479_s15]]  ;;  %s500_s30 = sadd.s32 7, %s1003_s14  ;;  %v507_v10 = vstv %s506_s9  ;;  %v497_v11 = vmul.f32 %v496_v8, %v493_v7  ;;  %v455_v12 = vld [vmem:[%s454_s11] sm:$0xff] }
  0x47   : >> { %s1081_s20 = scalar_lea.vmem %s1056_s3, %s971_s16  ;;  %s501_s26 = sld [smem:[#allocation2 + %s500_s30]]  ;;  %v508_v13 = vmul.f32 %v507_v10, %v493_v7  ;;  %v499_v19 = vld [vmem:[%s454_s11 + $0x1] sm:$0xff] }
  0x48   : >> { %s477_s19 = scalar_lea.vmem %s1081_s20, %s1000_s13  ;;  %s868_s24 = smov 127  }
  0x49   : >> { %466 = vrot.lane.b32.xlu0 %v464_v5, %s868_s24  ;;  %v474_v15 = vstv %s473_s0  ;;  %v478_v16 = vld [vmem:[%s477_s19] sm:$0xff]  ;;  %510 = vrot.lane.b32.xlu1 %v508_v13, %s868_s24  ;;  %s514_s2 = sld [smem:[#allocation4 + %s864_s12]]  ;;  %s734_s0 = sshll.u32 %s864_s12, 3 }
  0x4a   : >> { %v458_v14 = vstv %s457_s27  ;;  %v475_v18 = vmul.f32 %v474_v15, %v471_v4  ;;  %s521_s4 = scalar_lea.vmem %s992_s21, %s734_s0  ;;  %s443_s12 = sadd.s32 1, %s864_s12  }
  0x4b   : >> { %v459_v17 = vmul.f32 %v458_v14, %v455_v12  ;;  %p440_p4 = scmp.ge.s32.totalorder %s443_s12, 32  }
  0x4c   : >> { %v481_v20 = vstv %s480_s10 }
  0x4d   : >> { %489 = vrot.lane.b32.xlu0 %v487_v9, %s868_s24  ;;  %v460_v21 = vadd.f32 %v459_v17, %v452_v3  ;;  %v482_v22 = vmul.f32 %v481_v20, %v478_v16  ;;  %v502_v23 = vstv %s501_s26 }
  0x4e   : >> { %v503_v24 = vmul.f32 %v502_v23, %v499_v19 }
  0x4f   : >> { %v515_v34 = vstv %s514_s2 }
  0xbb   : >> { %v467_v25 = vpop.permute.xlu0 %466  ;;  %v511_v32 = vpop.permute.xlu1 %510 }
  0xbc   : >> { %v469_v26 = vadd.f32 %v467_v25, %v460_v21 }
  0xbe   : >> { %v476_v27 = vadd.f32 %v475_v18, %v469_v26 }
  0xbf   : >> { %v490_v28 = vpop.permute.xlu0 %489 }
  0xc0   : >> { %v483_v29 = vadd.f32 %v482_v22, %v476_v27 }
  0xc2   : >> { %v492_v30 = vadd.f32 %v490_v28, %v483_v29 }
  0xc4   : >> { %v498_v31 = vadd.f32 %v497_v11, %v492_v30 }
  0xc6   : >> { %v504_v33 = vadd.f32 %v503_v24, %v498_v31 }
  0xc8   : >> { %v513_v35 = vadd.f32 %v511_v32, %v504_v33 }
  0xc9   : > { %442 = sbr.rel (!%p440_p4) target bundleno = 58 (0x3a), region = 104 }
  0xca   : >> { %v516_v36 = vadd.f32 %v515_v34, %v513_v35 }
  0xcc   : >> { %vm517_vm1 = vcmp.ge.f32.partialorder %v516_v36, 0.0  ;;  %v518_v37 = vmul.f32 0.1, %v516_v36 }
  0xce   : >> { %v519_v38 = vsel %vm517_vm1, %v516_v36, %v518_v37 }
  0xcf   : >> { %523 = vst.msk [vmem:[%s521_s4] sm:$0xff] %vm522_vm0, %v519_v38 }
  0xd0 PF: > { %s18_s23 = sadd.s32 1, %s860_s23   ;;  %s1082_s21 = smov %s856_s22 }
  0xd1   : > { %p15_p6 = scmp.ge.s32.totalorder %s18_s23, 4   ;;  %s1083_s22 = smov %s1085_s25 }
  0xd3   :  { %17 = sbr.rel (!%p15_p6) target bundleno = 8 (0x8), region = 115 }
  0xda   :  { %554 = vsyncpa [#allocation3], 1 }
  0xdb   :  { %556 = vsyncpa [#allocation3 + $0x1], 1 }
  0xdc   :  { %557 = vsyncpa [#allocation5], 1 }

// kernel: _lambda_.36
= control target key start
LH: loop header
LB: loop body
LE: loop exit
PB: predicated region body
PF: predicated region fallthrough
CT: control target
= control target key end

     0   :  { %s645_s12 = smov 0   ;;  %s647_s13 = smov 0   ;;  %s756_s0 = inlined_call_operand.vmem [shape: f32[2,32,64], index: 0, kind: input, shape index: {}]   ;;  %s757_s1 = inlined_call_operand.vmem [shape: f32[64,32], index: 1, kind: input, shape index: {}]   ;;  %s758_s2 = inlined_call_operand.vmem [shape: f32[64,1], index: 2, kind: input, shape index: {}]   ;;  %s759_s3 = inlined_call_operand.vmem [shape: f32[2,64,64], index: 3, kind: output, shape index: {}]  }
   0x1   :  { %s649_s14 = smov 0  }
   0x2 LB: > { %s25_s15 = sadd.s32 1, %s618_s13  ;;  %p512_p0 = scmp.ge.s32.totalorder %s622_s14, 1  ;;  %s622_s14 = sphi %s649_s14, %s13_s14   ;;  %s618_s13 = sphi %s647_s13, %s761_s13   ;;  %s614_s12 = sphi %s645_s12, %s760_s12  }
   0x3   : > { %p27_p1 = scmp.ge.s32.totalorder %s25_s15, 2  ;;  %p156_p2 = scmp.lt.s32.totalorder %s622_s14, 3 }
   0x5   : > { %s763_s15 = smov (%p27_p1, %s25_s15), 0  ;;  %p157_p3 = pnand %p512_p0, %p156_p2 }
   0x6   : > { %p186_p4 = scmp.lt.s32.totalorder (!%p157_p3), %s614_s12, 1  ;;  %v202_v0 = vld [vmem:[%s757_s1] sm:$0xff] (!%p157_p3)  ;;  %vm262_vm0 = vcmask (!%p157_p3), 261120   ;;  %v624_v2 = vmov (!%p157_p3), 0   ;;  %v216_v3 = vld [vmem:[%s758_s2 + $0x10] sm:$0xff] (!%p157_p3)  ;;  %v217_v5 = vld [vmem:[%s758_s2 + $0x18] sm:$0xff] (!%p157_p3) }
   0x7   : > { %160 = sbr.rel (%p157_p3) target bundleno = 253 (0xfd), region = 32  ;;  %v206_v1 = vld [vmem:[%s757_s1 + $0x20] sm:$0xff] (!%p157_p3)  ;;  %549 = vmatprep.mubr.msk.f32.mxu0 (!%p157_p3), %vm262_vm0, %v202_v0  ;;  %599 = vset.pattern.permute.xlu1 (!%p157_p3), %v624_v2  ;;  %v215_v6 = vld [vmem:[%s758_s2 + $0x8] sm:$0xff] (!%p157_p3)  ;;  %v221_v15 = vld [vmem:[%s758_s2 + $0x38] sm:$0xff] (!%p157_p3)  ;;  %vm416_vm1 = vcmask (!%p157_p3), 523264  }
   0x8   : > { %555 = vmatprep.mubr.msk.f32.mxu1 (!%p157_p3), %vm262_vm0, %v206_v1  ;;  %598 = vset.pattern.permute.xlu0 (!%p157_p3), %v624_v2  ;;  %v214_v4 = vld [vmem:[%s758_s2] sm:$0xff] (!%p157_p3)  ;;  %v219_v13 = vld [vmem:[%s758_s2 + $0x28] sm:$0xff] (!%p157_p3)  ;;  %v220_v16 = vld [vmem:[%s758_s2 + $0x30] sm:$0xff] (!%p157_p3) }
   0x9   : > { %234 = vperm.xlu1 (!%p157_p3), %599, %v216_v3   ;;  %224 = vperm.xlu0 (!%p157_p3), %598, %v214_v4   ;;  %v218_v14 = vld [vmem:[%s758_s2 + $0x20] sm:$0xff] (!%p157_p3)  ;;  %v203_v17 = vld [vmem:[%s757_s1 + $0x8] sm:$0xff] (!%p157_p3)  ;;  %v204_v19 = vld [vmem:[%s757_s1 + $0x10] sm:$0xff] (!%p157_p3) }
   0xa   : > { %v207_v18 = vld [vmem:[%s757_s1 + $0x28] sm:$0xff] (!%p157_p3)  ;;  %v208_v20 = vld [vmem:[%s757_s1 + $0x30] sm:$0xff] (!%p157_p3)  ;;  %v205_v21 = vld [vmem:[%s757_s1 + $0x18] sm:$0xff] (!%p157_p3) }
   0xb   : > { %v209_v22 = vld [vmem:[%s757_s1 + $0x38] sm:$0xff] (!%p157_p3) }
   0xd   : > { %239 = vperm.xlu1 (!%p157_p3), %599, %v217_v5   ;;  %229 = vperm.xlu0 (!%p157_p3), %598, %v215_v6  }
   0xe   : > { %s765_s12 = smov (!%p186_p4, %s614_s12), 1 }
   0xf   : > { %s527_s24 = sshll.u32 %s765_s12, 5 }
  0x10   : > { %s193_s29 = scalar_lea.vmem %s756_s0, %s527_s24 }
  0x11   : > { %v210_v7 = vld [vmem:[%s193_s29] sm:$0xff]  ;;  %v211_v8 = vld [vmem:[%s193_s29 + $0x8] sm:$0xff]  ;;  %v212_v9 = vld [vmem:[%s193_s29 + $0x10] sm:$0xff]  ;;  %249 = vperm.xlu1 %599, %v219_v13   ;;  %244 = vperm.xlu0 %598, %v218_v14  }
  0x12   : > { %v561_v10 = vpack.c.bf16 %v211_v8, %v210_v7  ;;  %v213_v11 = vld [vmem:[%s193_s29 + $0x18] sm:$0xff]  ;;  %s528_s29 = sshll.u32 %s765_s12, 6 }
  0x13   : > { %v565_v12 = vpack.c.bf16 %v213_v11, %v212_v9  ;;  %s729_s5 = scalar_lea.vmem %s759_s3, %s528_s29 }
  0x14   : > { %562 = vmatprep.subr.bf16.mxu0 %v561_v10  ;;  %569 = vmatprep.subr.bf16.mxu1 %v561_v10 }
  0x15   : > { %564 = vmatpush3.bf16.msra.mxu0 %v561_v10  ;;  %571 = vmatpush3.bf16.msra.mxu1 %v561_v10 }
  0x16   : > { %566 = vmatprep.subr.bf16.mxu0 %v565_v12  ;;  %570 = vmatprep.subr.bf16.mxu1 %v565_v12 }
  0x17   : > { %259 = vperm.xlu1 %599, %v221_v15   ;;  %254 = vperm.xlu0 %598, %v220_v16  }
  0x19   : > { %568 = vmatpush3.bf16.msra.mxu0 %v565_v12  ;;  %572 = vmatpush3.bf16.msra.mxu1 %v565_v12 }
  0x1c   : > { %550 = vmatmul.mubr.msk.f32.vlgmr.msra.gmra.mrb[0].mxu0 %vm262_vm0, %v203_v17  ;;  %556 = vmatmul.mubr.msk.f32.vlgmr.msra.gmra.mrb[0].mxu1 %vm262_vm0, %v207_v18 }
  0x1d   : > { %552 = vmatprep.mubr.msk.f32.mxu0 %vm262_vm0, %v204_v19  ;;  %558 = vmatprep.mubr.msk.f32.mxu1 %vm262_vm0, %v208_v20 }
  0x20   : > { %553 = vmatmul.mubr.msk.f32.gmra.mrb[2].mxu0 %vm262_vm0, %v205_v21  ;;  %559 = vmatmul.mubr.msk.f32.gmra.mrb[2].mxu1 %vm262_vm0, %v209_v22 }
  0x88   : > { %v235_v23 = vpop.permute.xlu1 %234  ;;  %v225_v24 = vpop.permute.xlu0 %224 }
  0x8c   : > { %v240_v25 = vpop.permute.xlu1 %239  ;;  %v230_v26 = vpop.permute.xlu0 %229 }
  0x90   : > { %v250_v27 = vpop.permute.xlu1 %249  ;;  %v245_v28 = vpop.permute.xlu0 %244 }
  0x96   : > { %v260_v39 = vpop.permute.xlu1 %259  ;;  %v255_v40 = vpop.permute.xlu0 %254 }
  0xef   : > { %v551_v29 = vpop.f32.mrb[0].mxu0  ;;  %v557_v30 = vpop.f32.mrb[0].mxu1 }
  0xf0   : > { %v359_v31 = vadd.f32 %v551_v29, %v230_v26  ;;  %v379_v32 = vadd.f32 %v557_v30, %v250_v27  ;;  %v353_v33 = vpop.f32.mrb[1].mxu0  ;;  %v373_v34 = vpop.f32.mrb[1].mxu1 }
  0xf1   : > { %v354_v35 = vadd.f32 %v353_v33, %v225_v24  ;;  %v374_v36 = vadd.f32 %v373_v34, %v245_v28 }
  0xf2   : > { %vm393_vm2 = vcmp.ge.f32.partialorder %v359_v31, 0.0  ;;  %v401_v37 = vmul.f32 0.1, %v359_v31  ;;  %vm397_vm3 = vcmp.ge.f32.partialorder %v379_v32, 0.0  ;;  %v405_v38 = vmul.f32 0.1, %v379_v32 }
  0xf3   : > { %vm392_vm4 = vcmp.ge.f32.partialorder %v354_v35, 0.0  ;;  %v400_v41 = vmul.f32 0.1, %v354_v35  ;;  %vm396_vm5 = vcmp.ge.f32.partialorder %v374_v36, 0.0  ;;  %v404_v42 = vmul.f32 0.1, %v374_v36 }
  0xf4   : > { %v409_v43 = vsel %vm393_vm2, %v359_v31, %v401_v37  ;;  %v413_v44 = vsel %vm397_vm3, %v379_v32, %v405_v38  ;;  %v554_v45 = vpop.f32.mrb[2].mxu0  ;;  %v560_v46 = vpop.f32.mrb[2].mxu1 }
  0xf5   : > { %418 = vst.msk [vmem:[%s729_s5 + $0x8] sm:$0xff] %vm416_vm1, %v409_v43  ;;  %422 = vst.msk [vmem:[%s729_s5 + $0x28] sm:$0xff] %vm416_vm1, %v413_v44  ;;  %v408_v47 = vsel %vm392_vm4, %v354_v35, %v400_v41  ;;  %v412_v48 = vsel %vm396_vm5, %v374_v36, %v404_v42  ;;  %v369_v49 = vadd.f32 %v554_v45, %v240_v25  ;;  %v363_v51 = vpop.f32.mrb[3].mxu0  ;;  %v383_v52 = vpop.f32.mrb[3].mxu1 }
  0xf6   : > { %v389_v50 = vadd.f32 %v560_v46, %v260_v39  ;;  %417 = vst.msk [vmem:[%s729_s5] sm:$0xff] %vm416_vm1, %v408_v47  ;;  %421 = vst.msk [vmem:[%s729_s5 + $0x20] sm:$0xff] %vm416_vm1, %v412_v48  ;;  %v364_v53 = vadd.f32 %v363_v51, %v235_v23  ;;  %v384_v54 = vadd.f32 %v383_v52, %v255_v40 }
  0xf7   : > { %vm395_vm6 = vcmp.ge.f32.partialorder %v369_v49, 0.0  ;;  %v403_v55 = vmul.f32 0.1, %v369_v49 }
  0xf8   : > { %vm399_vm7 = vcmp.ge.f32.partialorder %v389_v50, 0.0  ;;  %v407_v56 = vmul.f32 0.1, %v389_v50  ;;  %vm394_vm8 = vcmp.ge.f32.partialorder %v364_v53, 0.0  ;;  %v402_v57 = vmul.f32 0.1, %v364_v53 }
  0xf9   : > { %vm398_vm9 = vcmp.ge.f32.partialorder %v384_v54, 0.0  ;;  %v406_v58 = vmul.f32 0.1, %v384_v54  ;;  %v411_v59 = vsel %vm395_vm6, %v369_v49, %v403_v55 }
  0xfa   : > { %v415_v60 = vsel %vm399_vm7, %v389_v50, %v407_v56  ;;  %420 = vst.msk [vmem:[%s729_s5 + $0x18] sm:$0xff] %vm416_vm1, %v411_v59  ;;  %v410_v61 = vsel %vm394_vm8, %v364_v53, %v402_v57 }
  0xfb   : > { %424 = vst.msk [vmem:[%s729_s5 + $0x38] sm:$0xff] %vm416_vm1, %v415_v60  ;;  %v414_v62 = vsel %vm398_vm9, %v384_v54, %v406_v58  ;;  %419 = vst.msk [vmem:[%s729_s5 + $0x10] sm:$0xff] %vm416_vm1, %v410_v61 }
  0xfc   : > { %423 = vst.msk [vmem:[%s729_s5 + $0x30] sm:$0xff] %vm416_vm1, %v414_v62 }
  0xfd PF: > { %s13_s14 = sadd.s32 1, %s622_s14   ;;  %s760_s12 = smov %s618_s13 }
  0xfe   : > { %p10_p5 = scmp.ge.s32.totalorder %s13_s14, 4   ;;  %s761_s13 = smov %s763_s15 }
 0x100   :  { %12 = sbr.rel (!%p10_p5) target bundleno = 2 (0x2), region = 62 }

// kernel: _lambda_.37
= control target key start
LH: loop header
LB: loop body
LE: loop exit
PB: predicated region body
PF: predicated region fallthrough
CT: control target
= control target key end

     0   :  { %8 = vsyncpa [#allocation3], 0  ;;  %s724_s0 = inlined_call_operand.vmem [shape: f32[2,64,10,10], index: 0, kind: input, shape index: {}]   ;;  %s725_s1 = inlined_call_operand.vmem [shape: f32[576], index: 1, kind: input, shape index: {}]   ;;  %s726_s2 = inlined_call_operand.vmem [shape: f32[64], index: 2, kind: input, shape index: {}]   ;;  %s727_s3 = inlined_call_operand.vmem [shape: f32[2,64,8,8], index: 3, kind: output, shape index: {}]  }
   0x1   :  { %9 = vsyncpa [#allocation5], 0  ;;  %s621_s12 = smov 0   ;;  %s623_s13 = smov 0  }
   0x2   :  { %s625_s14 = smov 0  }
   0x3 LB: > { %s453_s15 = sadd.s32 4294967295, %s591_s14   ;;  %s27_s16 = sadd.s32 1, %s587_s13  ;;  %s591_s14 = sphi %s625_s14, %s15_s14   ;;  %s587_s13 = sphi %s623_s13, %s737_s13   ;;  %s583_s12 = sphi %s621_s12, %s736_s12  }
   0x4   : > { %p29_p0 = scmp.ge.s32.totalorder %s27_s16, 2  ;;  %p455_p1 = scmp.ge.s32.totalorder %s591_s14, 1 }
   0x5   : > { %p130_p2 = scmp.lt.s32.totalorder %s591_s14, 3  ;;  %p646_p4 = scmp.eq.s32.totalorder %s453_s15, 0 }
   0x6   : > { %s739_s16 = smov (%p29_p0, %s27_s16), 0  ;;  %s143_s21 = sshll.u32 %s725_s1, 4  ;;  %s144_s21 = int_to_ptr.vmem [resolvable:$true] %s143_s21 }
   0x7   : > { %p642_p3 = pnand %p455_p1, %p130_p2  ;;  %s154_s24 = sshll.u32 %s726_s2, 4  ;;  %s155_s24 = int_to_ptr.vmem [resolvable:$true] %s154_s24 }
   0x8   : > { %s732_s18 = scalar_select %p646_p4, 1, 0 }
   0x9   : > { %s731_s17 = scalar_select %p642_p3, 1, 0 }
   0xa   : > { %p480_p5 = pneg %p642_p3  ;;  %s527_s26 = scalar_lea.vmem %s144_s21, 80 }
   0xb   : > { %p528_p7 = scmp.ne.s32.totalorder %s144_s21, %s527_s26  ;;  %s534_s27 = scalar_lea.vmem %s144_s21, 128 }
   0xc   : > { %p660_p6 = pnand %p646_p4, %p480_p5  ;;  %p535_p11 = scmp.lt.s32.totalorder %s144_s21, %s144_s21 }
   0xd   : > { %p536_p12 = scmp.lt.s32.totalorder %s534_s27, %s527_s26 }
   0xe   : > { %p529_p8 = pneg %p660_p6 }
   0xf   : > { %p537_p13 = por %p536_p12, %p535_p11 }
  0x10   : > { %p530_p9 = pnand %p529_p8, %p528_p7 }
  0x12   : > { %p531_p10 = pneg %p530_p9 }
  0x14   : > { %p538_p0 = pnand %p537_p13, %p531_p10 }
  0x16   : > { %541 = shalt.err (!%p538_p0)
}
  0x17   : > { %s597_s28 = smov [#allocation2]   ;;  %s542_s29 = scalar_lea.vmem %s155_s24, 16 }
  0x18   : > { %483 = dma.vmem_to_smem (!%p660_p6), %s144_s21, 80, %s597_s28, [#allocation3]  }
  0x19   : > { %p543_p1 = scmp.ne.s32.totalorder %s155_s24, %s542_s29  ;;  %p550_p4 = scmp.lt.s32.totalorder %s155_s24, %s155_s24 }
  0x1a   : > { %p551_p7 = scmp.lt.s32.totalorder %s542_s29, %s542_s29 }
  0x1b   : > { %p545_p2 = pnand %p543_p1, %p529_p8 }
  0x1c   : > { %p552_p9 = por %p551_p7, %p550_p4 }
  0x1d   : > { %p546_p5 = pneg %p545_p2 }
  0x1f   : > { %p553_p3 = pnand %p552_p9, %p546_p5 }
  0x21   : > { %556 = shalt.err (!%p553_p3)
}
  0x22   : > { %s598_s30 = smov [#allocation4]   ;;  %p734_p10 = scmp.ne.s32.totalorder %s731_s17, 0 }
  0x23   : > { %486 = dma.vmem_to_smem (!%p660_p6), %s155_s24, 16, %s598_s30, [#allocation5]  }
  0x24   : > { %181 = sbr.rel (%p734_p10) target bundleno = 204 (0xcc), region = 32  ;;  %p735_p11 = scmp.ne.s32.totalorder (!%p734_p10), %s732_s18, 0 }
  0x2b   : > { %574 = dma.done.wait (%p735_p11), [#allocation3], 80  }
  0x2c   : > { %576 = vsyncadd (%p735_p11), [#allocation3], 4294967216 }
  0x2d   : > { %578 = dma.done.wait (%p735_p11), [#allocation5], 16  }
  0x2e   : > { %580 = vsyncadd (%p735_p11), [#allocation5], 4294967280 }
  0x2f   : > { %191 = sfence }
  0x30   : > { %p220_p3 = scmp.lt.s32.totalorder %s583_s12, 1  ;;  %s698_s15 = smov 0  }
  0x32   : > { %s741_s12 = smov (!%p220_p3, %s583_s12), 1 }
  0x33   : > { %s470_s4 = sshll.u32 %s741_s12, 10  ;;  %s471_s5 = sshll.u32 %s741_s12, 9 }
  0x34   : > { %s691_s8 = scalar_lea.vmem %s724_s0, %s470_s4  ;;  %s696_s11 = scalar_lea.vmem %s727_s3, %s471_s5 }
  0x35 LB: >> { %s466_s12 = sshll.u32 %s595_s15, 4  ;;  %s251_s17 = smul.u32 9, %s595_s15  ;;  %vm330_vm0 = vcmask 64512   ;;  %s595_s15 = sphi %s698_s15, %s245_s15  }
  0x36   : >> { %s249_s18 = scalar_lea.vmem %s691_s8, %s466_s12  ;;  %s599_s10 = smov 127  }
  0x37   : >> { %s256_s19 = sadd.s32 1, %s251_s17  ;;  %s265_s20 = sadd.s32 2, %s251_s17  ;;  %v250_v0 = vld [vmem:[%s249_s18] sm:$0xff] }
  0x38   : >> { %s257_s21 = sld [smem:[#allocation2 + %s256_s19]]  ;;  %s280_s23 = sadd.s32 4, %s251_s17  ;;  %v274_v3 = vld [vmem:[%s249_s18 + $0x1] sm:$0xff] }
  0x39   : >> { %s266_s22 = sld [smem:[#allocation2 + %s265_s20]]  ;;  %s289_s24 = sadd.s32 5, %s251_s17  ;;  %v298_v9 = vld [vmem:[%s249_s18 + $0x2] sm:$0xff] }
  0x3a   : >> { %s281_s25 = sld [smem:[#allocation2 + %s280_s23]]  ;;  %s304_s27 = sadd.s32 7, %s251_s17 }
  0x3b   : >> { %s290_s26 = sld [smem:[#allocation2 + %s289_s24]]  ;;  %s313_s28 = sadd.s32 8, %s251_s17 }
  0x3c   : >> { %s305_s29 = sld [smem:[#allocation2 + %s304_s27]]  ;;  %s275_s5 = sadd.s32 3, %s251_s17 }
  0x3d   : >> { %s706_s30 = sld [smem:[#allocation2 + %s313_s28]]  ;;  %s299_s7 = sadd.s32 6, %s251_s17 }
  0x3e   : >> { %s252_s4 = sld [smem:[#allocation2 + %s251_s17]]  ;;  %v258_v1 = vstv %s257_s21  ;;  %s600_s12 = smov 126  }
  0x3f   : >> { %v267_v2 = vstv %s266_s22  ;;  %s276_s6 = sld [smem:[#allocation2 + %s275_s5]]  ;;  %v259_v4 = vmul.f32 %v258_v1, %v250_v0  ;;  %s467_s18 = sshll.u32 %s595_s15, 3 }
  0x40   : >> { %s300_s9 = sld [smem:[#allocation2 + %s299_s7]]  ;;  %v282_v5 = vstv %s281_s25  ;;  %v268_v7 = vmul.f32 %v267_v2, %v250_v0  ;;  %s329_s19 = scalar_lea.vmem %s696_s11, %s467_s18 }
  0x41   : >> { %v291_v6 = vstv %s290_s26  ;;  %261 = vrot.lane.b32.xlu0 %v259_v4, %s599_s10  ;;  %v283_v8 = vmul.f32 %v282_v5, %v274_v3  ;;  %s322_s17 = sld [smem:[#allocation4 + %s595_s15]]  ;;  %s245_s15 = sadd.s32 1, %s595_s15  }
  0x42   : >> { %v306_v10 = vstv %s305_s29  ;;  %v292_v11 = vmul.f32 %v291_v6, %v274_v3  ;;  %p242_p4 = scmp.ge.s32.totalorder %s245_s15, 64  }
  0x43   : >> { %285 = vrot.lane.b32.xlu1 %v283_v8, %s599_s10  ;;  %v315_v13 = vstv %s706_s30  ;;  %v307_v16 = vmul.f32 %v306_v10, %v298_v9 }
  0x44   : >> { %v253_v12 = vstv %s252_s4  ;;  %v316_v20 = vmul.f32 %v315_v13, %v298_v9 }
  0x45   : >> { %v254_v14 = vmul.f32 %v253_v12, %v250_v0  ;;  %v277_v15 = vstv %s276_s6  ;;  %270 = vrot.lane.b32.xlu0 %v268_v7, %s600_s12 }
  0x46   : >> { %v278_v17 = vmul.f32 %v277_v15, %v274_v3  ;;  %v301_v18 = vstv %s300_s9 }
  0x47   : >> { %v302_v19 = vmul.f32 %v301_v18, %v298_v9  ;;  %294 = vrot.lane.b32.xlu1 %v292_v11, %s600_s12  ;;  %v323_v34 = vstv %s322_s17 }
  0x49   : >> { %309 = vrot.lane.b32.xlu0 %v307_v16, %s599_s10 }
  0x4b   : >> { %318 = vrot.lane.b32.xlu1 %v316_v20, %s600_s12 }
  0xb3   : >> { %v262_v21 = vpop.permute.xlu0 %261 }
  0xb4   : >> { %v264_v23 = vadd.f32 %v262_v21, %v254_v14 }
  0xb5   : >> { %v286_v22 = vpop.permute.xlu1 %285 }
  0xb7   : >> { %v271_v24 = vpop.permute.xlu0 %270 }
  0xb8   : >> { %v273_v25 = vadd.f32 %v271_v24, %v264_v23 }
  0xb9   : >> { %v295_v27 = vpop.permute.xlu1 %294 }
  0xba   : >> { %v279_v26 = vadd.f32 %v278_v17, %v273_v25 }
  0xbb   : >> { %v310_v30 = vpop.permute.xlu0 %309 }
  0xbc   : >> { %v288_v28 = vadd.f32 %v286_v22, %v279_v26 }
  0xbd   : >> { %v319_v32 = vpop.permute.xlu1 %318 }
  0xbe   : >> { %v297_v29 = vadd.f32 %v295_v27, %v288_v28 }
  0xc0   : >> { %v303_v31 = vadd.f32 %v302_v19, %v297_v29 }
  0xc2   : >> { %v312_v33 = vadd.f32 %v310_v30, %v303_v31 }
  0xc4   : >> { %v321_v35 = vadd.f32 %v319_v32, %v312_v33 }
  0xc5   : > { %244 = sbr.rel (!%p242_p4) target bundleno = 53 (0x35), region = 80 }
  0xc6   : >> { %v324_v36 = vadd.f32 %v323_v34, %v321_v35 }
  0xc8   : >> { %vm325_vm1 = vcmp.ge.f32.partialorder %v324_v36, 0.0  ;;  %v326_v37 = vmul.f32 0.1, %v324_v36 }
  0xca   : >> { %v327_v38 = vsel %vm325_vm1, %v324_v36, %v326_v37 }
  0xcb   : >> { %331 = vst.msk [vmem:[%s329_s19] sm:$0xff] %vm330_vm0, %v327_v38 }
  0xcc PF: > { %s15_s14 = sadd.s32 1, %s591_s14   ;;  %s736_s12 = smov %s587_s13 }
  0xcd   : > { %p12_p6 = scmp.ge.s32.totalorder %s15_s14, 4   ;;  %s737_s13 = smov %s739_s16 }
  0xcf   :  { %14 = sbr.rel (!%p12_p6) target bundleno = 3 (0x3), region = 91 }
  0xd6   :  { %362 = vsyncpa [#allocation3], 1 }
  0xd7   :  { %364 = vsyncpa [#allocation3 + $0x1], 1 }
  0xd8   :  { %365 = vsyncpa [#allocation5], 1 }

// kernel: _lambda_.38
= control target key start
LH: loop header
LB: loop body
LE: loop exit
PB: predicated region body
PF: predicated region fallthrough
CT: control target
= control target key end

     0   :  { %s672_s12 = smov 0   ;;  %s674_s13 = smov 0   ;;  %s786_s0 = inlined_call_operand.vmem [shape: f32[2,64,64], index: 0, kind: input, shape index: {}]   ;;  %s787_s1 = inlined_call_operand.vmem [shape: f32[64,64], index: 1, kind: input, shape index: {}]   ;;  %s788_s2 = inlined_call_operand.vmem [shape: f32[64,1], index: 2, kind: input, shape index: {}]   ;;  %s789_s3 = inlined_call_operand.vmem [shape: f32[2,64,64], index: 3, kind: output, shape index: {}]  }
   0x1   :  { %s676_s14 = smov 0  }
   0x2 LB: > { %s25_s15 = sadd.s32 1, %s645_s13  ;;  %p515_p0 = scmp.ge.s32.totalorder %s649_s14, 1  ;;  %s649_s14 = sphi %s676_s14, %s13_s14   ;;  %s645_s13 = sphi %s674_s13, %s791_s13   ;;  %s641_s12 = sphi %s672_s12, %s790_s12  }
   0x3   : > { %p27_p1 = scmp.ge.s32.totalorder %s25_s15, 2  ;;  %p156_p2 = scmp.lt.s32.totalorder %s649_s14, 3 }
   0x5   : > { %s793_s15 = smov (%p27_p1, %s25_s15), 0  ;;  %p157_p3 = pnand %p515_p0, %p156_p2 }
   0x6   : > { %p186_p4 = scmp.lt.s32.totalorder (!%p157_p3), %s641_s12, 1  ;;  %v202_v0 = vld [vmem:[%s787_s1] sm:$0xff] (!%p157_p3)  ;;  %vm266_vm0 = vcmask (!%p157_p3), 523264   ;;  %v651_v2 = vmov (!%p157_p3), 0   ;;  %v220_v3 = vld [vmem:[%s788_s2 + $0x10] sm:$0xff] (!%p157_p3)  ;;  %v221_v5 = vld [vmem:[%s788_s2 + $0x18] sm:$0xff] (!%p157_p3) }
   0x7   : > { %160 = sbr.rel (%p157_p3) target bundleno = 261 (0x105), region = 32  ;;  %v206_v1 = vld [vmem:[%s787_s1 + $0x20] sm:$0xff] (!%p157_p3)  ;;  %564 = vmatprep.mubr.msk.f32.mxu0 (!%p157_p3), %vm266_vm0, %v202_v0  ;;  %626 = vset.pattern.permute.xlu1 (!%p157_p3), %v651_v2  ;;  %v219_v6 = vld [vmem:[%s788_s2 + $0x8] sm:$0xff] (!%p157_p3)  ;;  %v225_v20 = vld [vmem:[%s788_s2 + $0x38] sm:$0xff] (!%p157_p3) }
   0x8   : > { %570 = vmatprep.mubr.msk.f32.mxu1 (!%p157_p3), %vm266_vm0, %v206_v1  ;;  %625 = vset.pattern.permute.xlu0 (!%p157_p3), %v651_v2  ;;  %v218_v4 = vld [vmem:[%s788_s2] sm:$0xff] (!%p157_p3)  ;;  %v223_v15 = vld [vmem:[%s788_s2 + $0x28] sm:$0xff] (!%p157_p3)  ;;  %v224_v21 = vld [vmem:[%s788_s2 + $0x30] sm:$0xff] (!%p157_p3) }
   0x9   : > { %238 = vperm.xlu1 (!%p157_p3), %626, %v220_v3   ;;  %228 = vperm.xlu0 (!%p157_p3), %625, %v218_v4   ;;  %v222_v16 = vld [vmem:[%s788_s2 + $0x20] sm:$0xff] (!%p157_p3)  ;;  %v203_v23 = vld [vmem:[%s787_s1 + $0x8] sm:$0xff] (!%p157_p3)  ;;  %v204_v25 = vld [vmem:[%s787_s1 + $0x10] sm:$0xff] (!%p157_p3) }
   0xa   : > { %v207_v24 = vld [vmem:[%s787_s1 + $0x28] sm:$0xff] (!%p157_p3)  ;;  %v208_v26 = vld [vmem:[%s787_s1 + $0x30] sm:$0xff] (!%p157_p3)  ;;  %v205_v27 = vld [vmem:[%s787_s1 + $0x18] sm:$0xff] (!%p157_p3) }
   0xb   : > { %v209_v28 = vld [vmem:[%s787_s1 + $0x38] sm:$0xff] (!%p157_p3) }
   0xd   : > { %243 = vperm.xlu1 (!%p157_p3), %626, %v221_v5   ;;  %233 = vperm.xlu0 (!%p157_p3), %625, %v219_v6  }
   0xe   : > { %s795_s12 = smov (!%p186_p4, %s641_s12), 1 }
   0xf   : > { %s530_s24 = sshll.u32 %s795_s12, 6 }
  0x10   : > { %s193_s29 = scalar_lea.vmem %s786_s0, %s530_s24  ;;  %s759_s5 = scalar_lea.vmem %s789_s3, %s530_s24 }
  0x11   : > { %v210_v7 = vld [vmem:[%s193_s29] sm:$0xff]  ;;  %v211_v8 = vld [vmem:[%s193_s29 + $0x8] sm:$0xff]  ;;  %v212_v9 = vld [vmem:[%s193_s29 + $0x10] sm:$0xff]  ;;  %253 = vperm.xlu1 %626, %v223_v15   ;;  %248 = vperm.xlu0 %625, %v222_v16  }
  0x12   : > { %v576_v10 = vpack.c.bf16 %v211_v8, %v210_v7  ;;  %v213_v11 = vld [vmem:[%s193_s29 + $0x18] sm:$0xff]  ;;  %v214_v13 = vld [vmem:[%s193_s29 + $0x20] sm:$0xff]  ;;  %v215_v14 = vld [vmem:[%s193_s29 + $0x28] sm:$0xff] }
  0x13   : > { %v580_v12 = vpack.c.bf16 %v213_v11, %v212_v9  ;;  %v584_v17 = vpack.c.bf16 %v215_v14, %v214_v13  ;;  %v216_v18 = vld [vmem:[%s193_s29 + $0x30] sm:$0xff]  ;;  %v217_v19 = vld [vmem:[%s193_s29 + $0x38] sm:$0xff] }
  0x14   : > { %577 = vmatprep.subr.bf16.mxu0 %v576_v10  ;;  %592 = vmatprep.subr.bf16.mxu1 %v576_v10  ;;  %v588_v22 = vpack.c.bf16 %v217_v19, %v216_v18 }
  0x15   : > { %579 = vmatpush3.bf16.msra.mxu0 %v576_v10  ;;  %596 = vmatpush3.bf16.msra.mxu1 %v576_v10 }
  0x16   : > { %581 = vmatprep.subr.bf16.mxu0 %v580_v12  ;;  %593 = vmatprep.subr.bf16.mxu1 %v580_v12 }
  0x17   : > { %263 = vperm.xlu1 %626, %v225_v20   ;;  %258 = vperm.xlu0 %625, %v224_v21  }
  0x19   : > { %583 = vmatpush3.bf16.msra.mxu0 %v580_v12  ;;  %597 = vmatpush3.bf16.msra.mxu1 %v580_v12 }
  0x1a   : > { %585 = vmatprep.subr.bf16.mxu0 %v584_v17  ;;  %594 = vmatprep.subr.bf16.mxu1 %v584_v17 }
  0x1d   : > { %587 = vmatpush3.bf16.msra.mxu0 %v584_v17  ;;  %598 = vmatpush3.bf16.msra.mxu1 %v584_v17 }
  0x1e   : > { %589 = vmatprep.subr.bf16.mxu0 %v588_v22  ;;  %595 = vmatprep.subr.bf16.mxu1 %v588_v22 }
  0x21   : > { %591 = vmatpush3.bf16.msra.mxu0 %v588_v22  ;;  %599 = vmatpush3.bf16.msra.mxu1 %v588_v22 }
  0x24   : > { %565 = vmatmul.mubr.msk.f32.vlgmr.msra.gmra.mrb[0].mxu0 %vm266_vm0, %v203_v23  ;;  %571 = vmatmul.mubr.msk.f32.vlgmr.msra.gmra.mrb[0].mxu1 %vm266_vm0, %v207_v24 }
  0x25   : > { %567 = vmatprep.mubr.msk.f32.mxu0 %vm266_vm0, %v204_v25  ;;  %573 = vmatprep.mubr.msk.f32.mxu1 %vm266_vm0, %v208_v26 }
  0x28   : > { %568 = vmatmul.mubr.msk.f32.gmra.mrb[2].mxu0 %vm266_vm0, %v205_v27  ;;  %574 = vmatmul.mubr.msk.f32.gmra.mrb[2].mxu1 %vm266_vm0, %v209_v28 }
  0x88   : > { %v239_v29 = vpop.permute.xlu1 %238  ;;  %v229_v30 = vpop.permute.xlu0 %228 }
  0x8c   : > { %v244_v31 = vpop.permute.xlu1 %243  ;;  %v234_v32 = vpop.permute.xlu0 %233 }
  0x90   : > { %v254_v33 = vpop.permute.xlu1 %253  ;;  %v249_v34 = vpop.permute.xlu0 %248 }
  0x96   : > { %v264_v45 = vpop.permute.xlu1 %263  ;;  %v259_v46 = vpop.permute.xlu0 %258 }
  0xf7   : > { %v566_v35 = vpop.f32.mrb[0].mxu0  ;;  %v572_v36 = vpop.f32.mrb[0].mxu1 }
  0xf8   : > { %v363_v37 = vadd.f32 %v566_v35, %v234_v32  ;;  %v383_v38 = vadd.f32 %v572_v36, %v254_v33  ;;  %v357_v39 = vpop.f32.mrb[1].mxu0  ;;  %v377_v40 = vpop.f32.mrb[1].mxu1 }
  0xf9   : > { %v358_v41 = vadd.f32 %v357_v39, %v229_v30  ;;  %v378_v42 = vadd.f32 %v377_v40, %v249_v34 }
  0xfa   : > { %vm397_vm1 = vcmp.ge.f32.partialorder %v363_v37, 0.0  ;;  %v405_v43 = vmul.f32 0.1, %v363_v37  ;;  %vm401_vm2 = vcmp.ge.f32.partialorder %v383_v38, 0.0  ;;  %v409_v44 = vmul.f32 0.1, %v383_v38 }
  0xfb   : > { %vm396_vm3 = vcmp.ge.f32.partialorder %v358_v41, 0.0  ;;  %v404_v47 = vmul.f32 0.1, %v358_v41  ;;  %vm400_vm4 = vcmp.ge.f32.partialorder %v378_v42, 0.0  ;;  %v408_v48 = vmul.f32 0.1, %v378_v42 }
  0xfc   : > { %v413_v49 = vsel %vm397_vm1, %v363_v37, %v405_v43  ;;  %v417_v50 = vsel %vm401_vm2, %v383_v38, %v409_v44  ;;  %v569_v51 = vpop.f32.mrb[2].mxu0  ;;  %v575_v52 = vpop.f32.mrb[2].mxu1 }
  0xfd   : > { %421 = vst.msk [vmem:[%s759_s5 + $0x8] sm:$0xff] %vm266_vm0, %v413_v49  ;;  %425 = vst.msk [vmem:[%s759_s5 + $0x28] sm:$0xff] %vm266_vm0, %v417_v50  ;;  %v412_v53 = vsel %vm396_vm3, %v358_v41, %v404_v47  ;;  %v416_v54 = vsel %vm400_vm4, %v378_v42, %v408_v48  ;;  %v373_v55 = vadd.f32 %v569_v51, %v244_v31  ;;  %v367_v57 = vpop.f32.mrb[3].mxu0  ;;  %v387_v58 = vpop.f32.mrb[3].mxu1 }
  0xfe   : > { %v393_v56 = vadd.f32 %v575_v52, %v264_v45  ;;  %420 = vst.msk [vmem:[%s759_s5] sm:$0xff] %vm266_vm0, %v412_v53  ;;  %424 = vst.msk [vmem:[%s759_s5 + $0x20] sm:$0xff] %vm266_vm0, %v416_v54  ;;  %v368_v59 = vadd.f32 %v367_v57, %v239_v29  ;;  %v388_v60 = vadd.f32 %v387_v58, %v259_v46 }
  0xff   : > { %vm399_vm5 = vcmp.ge.f32.partialorder %v373_v55, 0.0  ;;  %v407_v61 = vmul.f32 0.1, %v373_v55 }
 0x100   : > { %vm403_vm6 = vcmp.ge.f32.partialorder %v393_v56, 0.0  ;;  %v411_v62 = vmul.f32 0.1, %v393_v56  ;;  %vm398_vm7 = vcmp.ge.f32.partialorder %v368_v59, 0.0  ;;  %v406_v63 = vmul.f32 0.1, %v368_v59 }
 0x101   : > { %vm402_vm8 = vcmp.ge.f32.partialorder %v388_v60, 0.0  ;;  %v410_v0 = vmul.f32 0.1, %v388_v60  ;;  %v415_v1 = vsel %vm399_vm5, %v373_v55, %v407_v61 }
 0x102   : > { %v419_v2 = vsel %vm403_vm6, %v393_v56, %v411_v62  ;;  %423 = vst.msk [vmem:[%s759_s5 + $0x18] sm:$0xff] %vm266_vm0, %v415_v1  ;;  %v414_v3 = vsel %vm398_vm7, %v368_v59, %v406_v63 }
 0x103   : > { %427 = vst.msk [vmem:[%s759_s5 + $0x38] sm:$0xff] %vm266_vm0, %v419_v2  ;;  %v418_v4 = vsel %vm402_vm8, %v388_v60, %v410_v0  ;;  %422 = vst.msk [vmem:[%s759_s5 + $0x10] sm:$0xff] %vm266_vm0, %v414_v3 }
 0x104   : > { %426 = vst.msk [vmem:[%s759_s5 + $0x30] sm:$0xff] %vm266_vm0, %v418_v4 }
 0x105 PF: > { %s13_s14 = sadd.s32 1, %s649_s14   ;;  %s790_s12 = smov %s645_s13 }
 0x106   : > { %p10_p5 = scmp.ge.s32.totalorder %s13_s14, 4   ;;  %s791_s13 = smov %s793_s15 }
 0x108   :  { %12 = sbr.rel (!%p10_p5) target bundleno = 2 (0x2), region = 62 }

// kernel: _lambda_.39
= control target key start
LH: loop header
LB: loop body
LE: loop exit
PB: predicated region body
PF: predicated region fallthrough
CT: control target
= control target key end

     0   :  { %s1029_s0 = inlined_call_operand.vmem [shape: f32[2,64,5,5], index: 0, kind: input, shape index: {}]   ;;  %s1030_s1 = inlined_call_operand.vmem [shape: f32[2,64,5,5], index: 1, kind: input, shape index: {}]   ;;  %s1031_s2 = inlined_call_operand.vmem [shape: f32[2,64,5,5], index: 2, kind: input, shape index: {}]   ;;  %s1032_s3 = inlined_call_operand.vmem [shape: f32[2,64,5,5], index: 3, kind: input, shape index: {}]   ;;  %s1033_s4 = inlined_call_operand.vmem [shape: f32[576], index: 4, kind: input, shape index: {}]   ;;  %s1034_s5 = inlined_call_operand.vmem [shape: f32[64], index: 5, kind: input, shape index: {}]   ;;  %s1035_s6 = inlined_call_operand.vmem [shape: f32[2,64,4,4], index: 6, kind: output, shape index: {}]  }
   0x1   :  { %1039 = sst [smem:[#allocation8_spill]] %s1029_s0 }
   0x2   :  { %1040 = sst [smem:[#allocation9_spill]] %s1031_s2 }
   0x3   :  { %1041 = sst [smem:[#allocation10_spill]] %s1033_s4 }
   0x4   :  { %1042 = sst [smem:[#allocation11_spill]] %s1034_s5 }
   0x5   :  { %11 = vsyncpa [#allocation3], 0 }
   0x6   :  { %12 = vsyncpa [#allocation5], 0  ;;  %s880_s21 = smov 0   ;;  %s882_s22 = smov 0  }
   0x7   :  { %s884_s23 = smov 0  }
   0x8 LB: > { %s690_s24 = sadd.s32 4294967295, %s836_s23   ;;  %s30_s25 = sadd.s32 1, %s832_s22  ;;  %s836_s23 = sphi %s884_s23, %s18_s23   ;;  %s832_s22 = sphi %s882_s22, %s1059_s22   ;;  %s828_s21 = sphi %s880_s21, %s1058_s21  }
   0x9   : > { %p32_p0 = scmp.ge.s32.totalorder %s30_s25, 2  ;;  %p692_p1 = scmp.ge.s32.totalorder %s836_s23, 1 }
   0xa   : > { %p217_p2 = scmp.lt.s32.totalorder %s836_s23, 3  ;;  %p905_p4 = scmp.eq.s32.totalorder %s690_s24, 0 }
   0xb   : > { %s1061_s25 = smov (%p32_p0, %s30_s25), 0  ;;  %s1045_s4 = sld [smem:[#allocation10_spill]] }
   0xc   : > { %p901_p3 = pnand %p692_p1, %p217_p2  ;;  %s1046_s5 = sld [smem:[#allocation11_spill]] }
   0xd   : > { %s1044_s27 = scalar_select %p905_p4, 1, 0 }
   0xe   : > { %s1043_s26 = scalar_select %p901_p3, 1, 0 }
   0xf   : > { %p726_p5 = pneg %p901_p3 }
  0x11   : > { %s230_s30 = sshll.u32 %s1045_s4, 4  ;;  %p919_p6 = pnand %p905_p4, %p726_p5  ;;  %s231_s30 = int_to_ptr.vmem [resolvable:$true] %s230_s30 }
  0x12   : > { %s241_s9 = sshll.u32 %s1046_s5, 4  ;;  %s772_s11 = scalar_lea.vmem %s231_s30, 80  ;;  %s242_s9 = int_to_ptr.vmem [resolvable:$true] %s241_s9 }
  0x13   : > { %p773_p7 = scmp.ne.s32.totalorder %s231_s30, %s772_s11  ;;  %p774_p8 = pneg %p919_p6 }
  0x14   : > { %s779_s12 = scalar_lea.vmem %s231_s30, 128  ;;  %p780_p11 = scmp.lt.s32.totalorder %s231_s30, %s231_s30 }
  0x15   : > { %p775_p9 = pnand %p774_p8, %p773_p7  ;;  %p781_p12 = scmp.lt.s32.totalorder %s779_s12, %s772_s11 }
  0x17   : > { %p776_p10 = pneg %p775_p9  ;;  %p782_p13 = por %p781_p12, %p780_p11 }
  0x19   : > { %p783_p0 = pnand %p782_p13, %p776_p10 }
  0x1b   : > { %786 = shalt.err (!%p783_p0)
}
  0x1c   : > { %s842_s13 = smov [#allocation2]   ;;  %s787_s14 = scalar_lea.vmem %s242_s9, 16 }
  0x1d   : > { %729 = dma.vmem_to_smem (!%p919_p6), %s231_s30, 80, %s842_s13, [#allocation3]  }
  0x1e   : > { %p788_p1 = scmp.ne.s32.totalorder %s242_s9, %s787_s14  ;;  %p795_p4 = scmp.lt.s32.totalorder %s242_s9, %s242_s9 }
  0x1f   : > { %p796_p7 = scmp.lt.s32.totalorder %s787_s14, %s787_s14 }
  0x20   : > { %p790_p2 = pnand %p788_p1, %p774_p8 }
  0x21   : > { %p797_p9 = por %p796_p7, %p795_p4 }
  0x22   : > { %p791_p5 = pneg %p790_p2 }
  0x24   : > { %p798_p3 = pnand %p797_p9, %p791_p5 }
  0x26   : > { %801 = shalt.err (!%p798_p3)
}
  0x27   : > { %s843_s15 = smov [#allocation4]   ;;  %p1048_p10 = scmp.ne.s32.totalorder %s1043_s26, 0 }
  0x28   : > { %732 = dma.vmem_to_smem (!%p919_p6), %s242_s9, 16, %s843_s15, [#allocation5]  }
  0x29   : > { %306 = sbr.rel (%p1048_p10) target bundleno = 208 (0xd0), region = 44  ;;  %p1049_p11 = scmp.ne.s32.totalorder (!%p1048_p10), %s1044_s27, 0 }
  0x30   : > { %819 = dma.done.wait (%p1049_p11), [#allocation3], 80  }
  0x31   : > { %821 = vsyncadd (%p1049_p11), [#allocation3], 4294967216 }
  0x32   : > { %823 = dma.done.wait (%p1049_p11), [#allocation5], 16  }
  0x33   : > { %825 = vsyncadd (%p1049_p11), [#allocation5], 4294967280 }
  0x34   : > { %316 = sfence }
  0x35   : > { %p377_p3 = scmp.lt.s32.totalorder %s828_s21, 1  ;;  %s970_s12 = smov 0  }
  0x37   : > { %s1063_s21 = smov (!%p377_p3, %s828_s21), 1 }
  0x38   : > { %s947_s16 = sshll.u32 %s1063_s21, 9  ;;  %s717_s17 = sshll.u32 %s1063_s21, 8 }
  0x39   : > { %s968_s21 = scalar_lea.vmem %s1035_s6, %s717_s17 }
  0x3a LB: >> { %s976_s13 = sshll.u32 %s840_s12, 3  ;;  %s979_s14 = smul.u32 9, %s840_s12  ;;  %vm510_vm0 = vcmask 27648   ;;  %s840_s12 = sphi %s970_s12, %s431_s12  }
  0x3b   : >> { %s1052_s0 = sld [smem:[#allocation8_spill]]  ;;  %s1054_s2 = sld [smem:[#allocation9_spill]] }
  0x3c   : >> { %s438_s19 = sld [smem:[#allocation2 + %s979_s14]]  ;;  %s449_s24 = sadd.s32 2, %s979_s14 }
  0x3d   : >> { %s450_s26 = sld [smem:[#allocation2 + %s449_s24]]  ;;  %s472_s28 = sadd.s32 5, %s979_s14 }
  0x3e   : >> { %s473_s29 = sld [smem:[#allocation2 + %s472_s28]]  ;;  %s482_s7 = sadd.s32 6, %s979_s14 }
  0x3f   : >> { %s483_s8 = sld [smem:[#allocation2 + %s482_s7]]  ;;  %s493_s10 = sadd.s32 8, %s979_s14 }
  0x40   : >> { %s494_s9 = sld [smem:[#allocation2 + %s493_s10]]  ;;  %s460_s24 = sadd.s32 3, %s979_s14 }
  0x41   : >> { %s1053_s20 = scalar_lea.vmem %s1052_s0, %s947_s16  ;;  %s1055_s30 = scalar_lea.vmem %s1054_s2, %s947_s16 }
  0x42   : >> { %s435_s18 = scalar_lea.vmem %s1053_s20, %s976_s13  ;;  %s458_s17 = scalar_lea.vmem %s1055_s30, %s976_s13  ;;  %v439_v1 = vstv %s438_s19 }
  0x43   : >> { %v436_v0 = vld [vmem:[%s435_s18] sm:$0xf]  ;;  %s444_s20 = sadd.s32 1, %s979_s14  ;;  %s461_s0 = sld [smem:[#allocation2 + %s460_s24]]  ;;  %v451_v2 = vstv %s450_s26 }
  0x44   : >> { %s445_s27 = sld [smem:[#allocation2 + %s444_s20]]  ;;  %v440_v3 = vmul.f32 %v439_v1, %v436_v0  ;;  %v459_v4 = vld [vmem:[%s458_s17] sm:$0xf]  ;;  %s1056_s4 = scalar_lea.vmem %s1030_s1, %s947_s16  ;;  %v452_v5 = vmul.f32 %v451_v2, %v436_v0  ;;  %v474_v6 = vstv %s473_s29 }
  0x45   : >> { %s442_s11 = scalar_lea.vmem %s1056_s4, %s976_s13  ;;  %s467_s15 = sadd.s32 4, %s979_s14  ;;  %v481_v7 = vld [vmem:[%s435_s18 + $0x1] sm:$0xf]  ;;  %v484_v8 = vstv %s483_s8  ;;  %v475_v9 = vmul.f32 %v474_v6, %v459_v4 }
  0x46   : >> { %s468_s10 = sld [smem:[#allocation2 + %s467_s15]]  ;;  %s488_s30 = sadd.s32 7, %s979_s14  ;;  %v495_v10 = vstv %s494_s9  ;;  %v485_v11 = vmul.f32 %v484_v8, %v481_v7  ;;  %v443_v12 = vld [vmem:[%s442_s11] sm:$0xf] }
  0x47   : >> { %s1057_s20 = scalar_lea.vmem %s1032_s3, %s947_s16  ;;  %s489_s26 = sld [smem:[#allocation2 + %s488_s30]]  ;;  %v496_v13 = vmul.f32 %v495_v10, %v481_v7  ;;  %v487_v19 = vld [vmem:[%s442_s11 + $0x1] sm:$0xf] }
  0x48   : >> { %s465_s19 = scalar_lea.vmem %s1057_s20, %s976_s13  ;;  %s844_s24 = smov 127  }
  0x49   : >> { %454 = vrot.lane.b32.xlu0 %v452_v5, %s844_s24  ;;  %v462_v15 = vstv %s461_s0  ;;  %v466_v16 = vld [vmem:[%s465_s19] sm:$0xf]  ;;  %498 = vrot.lane.b32.xlu1 %v496_v13, %s844_s24  ;;  %s502_s2 = sld [smem:[#allocation4 + %s840_s12]]  ;;  %s710_s0 = sshll.u32 %s840_s12, 2 }
  0x4a   : >> { %v446_v14 = vstv %s445_s27  ;;  %v463_v18 = vmul.f32 %v462_v15, %v459_v4  ;;  %s509_s4 = scalar_lea.vmem %s968_s21, %s710_s0  ;;  %s431_s12 = sadd.s32 1, %s840_s12  }
  0x4b   : >> { %v447_v17 = vmul.f32 %v446_v14, %v443_v12  ;;  %p428_p4 = scmp.ge.s32.totalorder %s431_s12, 64  }
  0x4c   : >> { %v469_v20 = vstv %s468_s10 }
  0x4d   : >> { %477 = vrot.lane.b32.xlu0 %v475_v9, %s844_s24  ;;  %v448_v21 = vadd.f32 %v447_v17, %v440_v3  ;;  %v470_v22 = vmul.f32 %v469_v20, %v466_v16  ;;  %v490_v23 = vstv %s489_s26 }
  0x4e   : >> { %v491_v24 = vmul.f32 %v490_v23, %v487_v19 }
  0x4f   : >> { %v503_v34 = vstv %s502_s2 }
  0xbb   : >> { %v455_v25 = vpop.permute.xlu0 %454  ;;  %v499_v32 = vpop.permute.xlu1 %498 }
  0xbc   : >> { %v457_v26 = vadd.f32 %v455_v25, %v448_v21 }
  0xbe   : >> { %v464_v27 = vadd.f32 %v463_v18, %v457_v26 }
  0xbf   : >> { %v478_v28 = vpop.permute.xlu0 %477 }
  0xc0   : >> { %v471_v29 = vadd.f32 %v470_v22, %v464_v27 }
  0xc2   : >> { %v480_v30 = vadd.f32 %v478_v28, %v471_v29 }
  0xc4   : >> { %v486_v31 = vadd.f32 %v485_v11, %v480_v30 }
  0xc6   : >> { %v492_v33 = vadd.f32 %v491_v24, %v486_v31 }
  0xc8   : >> { %v501_v35 = vadd.f32 %v499_v32, %v492_v33 }
  0xc9   : > { %430 = sbr.rel (!%p428_p4) target bundleno = 58 (0x3a), region = 104 }
  0xca   : >> { %v504_v36 = vadd.f32 %v503_v34, %v501_v35 }
  0xcc   : >> { %vm505_vm1 = vcmp.ge.f32.partialorder %v504_v36, 0.0  ;;  %v506_v37 = vmul.f32 0.1, %v504_v36 }
  0xce   : >> { %v507_v38 = vsel %vm505_vm1, %v504_v36, %v506_v37 }
  0xcf   : >> { %511 = vst.msk [vmem:[%s509_s4] sm:$0xf] %vm510_vm0, %v507_v38 }
  0xd0 PF: > { %s18_s23 = sadd.s32 1, %s836_s23   ;;  %s1058_s21 = smov %s832_s22 }
  0xd1   : > { %p15_p6 = scmp.ge.s32.totalorder %s18_s23, 4   ;;  %s1059_s22 = smov %s1061_s25 }
  0xd3   :  { %17 = sbr.rel (!%p15_p6) target bundleno = 8 (0x8), region = 115 }
  0xda   :  { %542 = vsyncpa [#allocation3], 1 }
  0xdb   :  { %544 = vsyncpa [#allocation3 + $0x1], 1 }
  0xdc   :  { %545 = vsyncpa [#allocation5], 1 }

// kernel: _lambda_.40
= control target key start
LH: loop header
LB: loop body
LE: loop exit
PB: predicated region body
PF: predicated region fallthrough
CT: control target
= control target key end

     0   :  { %s853_s12 = smov 0   ;;  %s855_s13 = smov 0   ;;  %s1045_s0 = inlined_call_operand.vmem [shape: f32[2,64,16], index: 0, kind: input, shape index: {}]   ;;  %s1046_s1 = inlined_call_operand.vmem [shape: f32[128,64], index: 1, kind: input, shape index: {}]   ;;  %s1047_s2 = inlined_call_operand.vmem [shape: f32[128,1], index: 2, kind: input, shape index: {}]   ;;  %s1048_s3 = inlined_call_operand.vmem [shape: f32[2,128,16], index: 3, kind: output, shape index: {}]  }
   0x1   :  { %s857_s14 = smov 0  }
   0x2 LB: > { %s25_s15 = sadd.s32 1, %s826_s13  ;;  %p668_p0 = scmp.ge.s32.totalorder %s830_s14, 1  ;;  %s830_s14 = sphi %s857_s14, %s13_s14   ;;  %s826_s13 = sphi %s855_s13, %s1050_s13   ;;  %s822_s12 = sphi %s853_s12, %s1049_s12  }
   0x3   : > { %p27_p1 = scmp.ge.s32.totalorder %s25_s15, 2  ;;  %p156_p2 = scmp.lt.s32.totalorder %s830_s14, 3 }
   0x5   : > { %s1052_s15 = smov (%p27_p1, %s25_s15), 0  ;;  %p157_p3 = pnand %p668_p0, %p156_p2 }
   0x6   : > { %p186_p4 = scmp.lt.s32.totalorder (!%p157_p3), %s822_s12, 1  ;;  %v202_v0 = vld [vmem:[%s1046_s1] sm:$0xff] (!%p157_p3)  ;;  %vm322_vm0 = vcmask (!%p157_p3), 523264   ;;  %v832_v2 = vmov (!%p157_p3), 0   ;;  %v228_v3 = vld [vmem:[%s1047_s2 + $0x10] sm:$0xff] (!%p157_p3)  ;;  %v229_v13 = vld [vmem:[%s1047_s2 + $0x18] sm:$0xff] (!%p157_p3) }
   0x7   : > { %160 = sbr.rel (%p157_p3) target bundleno = 270 (0x10e), region = 32  ;;  %v210_v1 = vld [vmem:[%s1046_s1 + $0x40] sm:$0xff] (!%p157_p3)  ;;  %733 = vmatprep.mubr.msk.f32.mxu0 (!%p157_p3), %vm322_vm0, %v202_v0  ;;  %807 = vset.pattern.permute.xlu1 (!%p157_p3), %v832_v2  ;;  %v227_v14 = vld [vmem:[%s1047_s2 + $0x8] sm:$0xff] (!%p157_p3)  ;;  %v233_v21 = vld [vmem:[%s1047_s2 + $0x38] sm:$0xff] (!%p157_p3)  ;;  %vm564_vm1 = vcmask (!%p157_p3), 130048  }
   0x8   : > { %745 = vmatprep.mubr.msk.f32.mxu1 (!%p157_p3), %vm322_vm0, %v210_v1  ;;  %806 = vset.pattern.permute.xlu0 (!%p157_p3), %v832_v2  ;;  %v226_v4 = vld [vmem:[%s1047_s2] sm:$0xff] (!%p157_p3)  ;;  %v231_v18 = vld [vmem:[%s1047_s2 + $0x28] sm:$0xff] (!%p157_p3)  ;;  %v232_v22 = vld [vmem:[%s1047_s2 + $0x30] sm:$0xff] (!%p157_p3) }
   0x9   : > { %254 = vperm.xlu1 (!%p157_p3), %807, %v228_v3   ;;  %244 = vperm.xlu0 (!%p157_p3), %806, %v226_v4   ;;  %v230_v19 = vld [vmem:[%s1047_s2 + $0x20] sm:$0xff] (!%p157_p3)  ;;  %v235_v23 = vld [vmem:[%s1047_s2 + $0x48] sm:$0xff] (!%p157_p3)  ;;  %v204_v27 = vld [vmem:[%s1046_s1 + $0x10] sm:$0xff] (!%p157_p3) }
   0xa   : > { %v234_v24 = vld [vmem:[%s1047_s2 + $0x40] sm:$0xff] (!%p157_p3)  ;;  %v203_v25 = vld [vmem:[%s1046_s1 + $0x8] sm:$0xff] (!%p157_p3)  ;;  %v212_v28 = vld [vmem:[%s1046_s1 + $0x50] sm:$0xff] (!%p157_p3) }
   0xb   : > { %v211_v26 = vld [vmem:[%s1046_s1 + $0x48] sm:$0xff] (!%p157_p3)  ;;  %v237_v29 = vld [vmem:[%s1047_s2 + $0x58] sm:$0xff] (!%p157_p3)  ;;  %v236_v30 = vld [vmem:[%s1047_s2 + $0x50] sm:$0xff] (!%p157_p3) }
   0xc   : > { %v205_v31 = vld [vmem:[%s1046_s1 + $0x18] sm:$0xff] (!%p157_p3)  ;;  %v206_v33 = vld [vmem:[%s1046_s1 + $0x20] sm:$0xff] (!%p157_p3)  ;;  %v239_v35 = vld [vmem:[%s1047_s2 + $0x68] sm:$0xff] (!%p157_p3) }
   0xd   : > { %259 = vperm.xlu1 (!%p157_p3), %807, %v229_v13   ;;  %249 = vperm.xlu0 (!%p157_p3), %806, %v227_v14   ;;  %v213_v32 = vld [vmem:[%s1046_s1 + $0x58] sm:$0xff] (!%p157_p3)  ;;  %v214_v34 = vld [vmem:[%s1046_s1 + $0x60] sm:$0xff] (!%p157_p3)  ;;  %v207_v37 = vld [vmem:[%s1046_s1 + $0x28] sm:$0xff] (!%p157_p3) }
   0xe   : > { %s1054_s12 = smov (!%p186_p4, %s822_s12), 1  ;;  %v238_v36 = vld [vmem:[%s1047_s2 + $0x60] sm:$0xff]  ;;  %v215_v38 = vld [vmem:[%s1046_s1 + $0x68] sm:$0xff]  ;;  %v208_v39 = vld [vmem:[%s1046_s1 + $0x30] sm:$0xff] }
   0xf   : > { %s691_s20 = sshll.u32 %s1054_s12, 6  ;;  %v216_v40 = vld [vmem:[%s1046_s1 + $0x70] sm:$0xff]  ;;  %v241_v41 = vld [vmem:[%s1047_s2 + $0x78] sm:$0xff]  ;;  %s692_s11 = sshll.u32 %s1054_s12, 7 }
  0x10   : > { %s193_s23 = scalar_lea.vmem %s1045_s0, %s691_s20  ;;  %v240_v42 = vld [vmem:[%s1047_s2 + $0x70] sm:$0xff]  ;;  %v209_v43 = vld [vmem:[%s1046_s1 + $0x38] sm:$0xff]  ;;  %s999_s18 = scalar_lea.vmem %s1048_s3, %s692_s11 }
  0x11   : > { %v218_v5 = vld [vmem:[%s193_s23] sm:$0xff]  ;;  %v219_v6 = vld [vmem:[%s193_s23 + $0x8] sm:$0xff]  ;;  %v220_v7 = vld [vmem:[%s193_s23 + $0x10] sm:$0xff]  ;;  %269 = vperm.xlu1 %807, %v231_v18   ;;  %264 = vperm.xlu0 %806, %v230_v19  }
  0x12   : > { %v757_v8 = vpack.c.bf16 %v219_v6, %v218_v5  ;;  %v221_v9 = vld [vmem:[%s193_s23 + $0x18] sm:$0xff]  ;;  %v222_v11 = vld [vmem:[%s193_s23 + $0x20] sm:$0xff]  ;;  %v223_v12 = vld [vmem:[%s193_s23 + $0x28] sm:$0xff] }
  0x13   : > { %v761_v10 = vpack.c.bf16 %v221_v9, %v220_v7  ;;  %v765_v15 = vpack.c.bf16 %v223_v12, %v222_v11  ;;  %v224_v16 = vld [vmem:[%s193_s23 + $0x30] sm:$0xff]  ;;  %v225_v17 = vld [vmem:[%s193_s23 + $0x38] sm:$0xff] }
  0x14   : > { %758 = vmatprep.subr.bf16.mxu0 %v757_v8  ;;  %773 = vmatprep.subr.bf16.mxu1 %v757_v8  ;;  %v769_v20 = vpack.c.bf16 %v225_v17, %v224_v16  ;;  %v217_v44 = vld [vmem:[%s1046_s1 + $0x78] sm:$0xff] }
  0x15   : > { %760 = vmatpush3.bf16.msra.mxu0 %v757_v8  ;;  %777 = vmatpush3.bf16.msra.mxu1 %v757_v8 }
  0x16   : > { %762 = vmatprep.subr.bf16.mxu0 %v761_v10  ;;  %774 = vmatprep.subr.bf16.mxu1 %v761_v10 }
  0x17   : > { %279 = vperm.xlu1 %807, %v233_v21   ;;  %274 = vperm.xlu0 %806, %v232_v22  }
  0x19   : > { %764 = vmatpush3.bf16.msra.mxu0 %v761_v10  ;;  %778 = vmatpush3.bf16.msra.mxu1 %v761_v10 }
  0x1a   : > { %766 = vmatprep.subr.bf16.mxu0 %v765_v15  ;;  %775 = vmatprep.subr.bf16.mxu1 %v765_v15 }
  0x1b   : > { %289 = vperm.xlu1 %807, %v235_v23   ;;  %284 = vperm.xlu0 %806, %v234_v24  }
  0x1d   : > { %768 = vmatpush3.bf16.msra.mxu0 %v765_v15  ;;  %779 = vmatpush3.bf16.msra.mxu1 %v765_v15 }
  0x1e   : > { %770 = vmatprep.subr.bf16.mxu0 %v769_v20  ;;  %776 = vmatprep.subr.bf16.mxu1 %v769_v20 }
  0x1f   : > { %299 = vperm.xlu1 %807, %v237_v29   ;;  %294 = vperm.xlu0 %806, %v236_v30  }
  0x21   : > { %772 = vmatpush3.bf16.msra.mxu0 %v769_v20  ;;  %780 = vmatpush3.bf16.msra.mxu1 %v769_v20 }
  0x23   : > { %309 = vperm.xlu1 %807, %v239_v35   ;;  %304 = vperm.xlu0 %806, %v238_v36  }
  0x24   : > { %734 = vmatmul.mubr.msk.f32.vlgmr.msra.gmra.mrb[0].mxu0 %vm322_vm0, %v203_v25  ;;  %746 = vmatmul.mubr.msk.f32.vlgmr.msra.gmra.mrb[0].mxu1 %vm322_vm0, %v211_v26 }
  0x25   : > { %736 = vmatprep.mubr.msk.f32.mxu0 %vm322_vm0, %v204_v27  ;;  %748 = vmatprep.mubr.msk.f32.mxu1 %vm322_vm0, %v212_v28 }
  0x27   : > { %319 = vperm.xlu1 %807, %v241_v41   ;;  %314 = vperm.xlu0 %806, %v240_v42  }
  0x28   : > { %737 = vmatmul.mubr.msk.f32.gmra.mrb[2].mxu0 %vm322_vm0, %v205_v31  ;;  %749 = vmatmul.mubr.msk.f32.gmra.mrb[2].mxu1 %vm322_vm0, %v213_v32 }
  0x29   : > { %739 = vmatprep.mubr.msk.f32.mxu0 %vm322_vm0, %v206_v33  ;;  %751 = vmatprep.mubr.msk.f32.mxu1 %vm322_vm0, %v214_v34 }
  0x2c   : > { %740 = vmatmul.mubr.msk.f32.gmra.mrb[4].mxu0 %vm322_vm0, %v207_v37  ;;  %752 = vmatmul.mubr.msk.f32.gmra.mrb[4].mxu1 %vm322_vm0, %v215_v38 }
  0x2d   : > { %742 = vmatprep.mubr.msk.f32.mxu0 %vm322_vm0, %v208_v39  ;;  %754 = vmatprep.mubr.msk.f32.mxu1 %vm322_vm0, %v216_v40 }
  0x30   : > { %743 = vmatmul.mubr.msk.f32.gmra.mrb[6].mxu0 %vm322_vm0, %v209_v43  ;;  %755 = vmatmul.mubr.msk.f32.gmra.mrb[6].mxu1 %vm322_vm0, %v217_v44 }
  0x88   : > { %v255_v45 = vpop.permute.xlu1 %254  ;;  %v245_v46 = vpop.permute.xlu0 %244 }
  0x8c   : > { %v260_v47 = vpop.permute.xlu1 %259  ;;  %v250_v48 = vpop.permute.xlu0 %249 }
  0x90   : > { %v270_v49 = vpop.permute.xlu1 %269  ;;  %v989_v50 = vpop.permute.xlu0 %264 }
  0x96   : > { %v991_v51 = vpop.permute.xlu1 %279  ;;  %v993_v52 = vpop.permute.xlu0 %274 }
  0x9a   : > { %v290_v53 = vpop.permute.xlu1 %289  ;;  %v285_v54 = vpop.permute.xlu0 %284 }
  0x9e   : > { %v300_v61 = vpop.permute.xlu1 %299  ;;  %v295_v62 = vpop.permute.xlu0 %294 }
  0xa2   : > { %v310_v17 = vpop.permute.xlu1 %309  ;;  %v305_v18 = vpop.permute.xlu0 %304 }
  0xa6   : > { %v320_v39 = vpop.permute.xlu1 %319  ;;  %v315_v40 = vpop.permute.xlu0 %314 }
  0xf7   : > { %v735_v55 = vpop.f32.mrb[0].mxu0  ;;  %v747_v56 = vpop.f32.mrb[0].mxu1 }
  0xf8   : > { %v443_v57 = vadd.f32 %v735_v55, %v250_v48  ;;  %v483_v58 = vadd.f32 %v747_v56, %v290_v53  ;;  %v437_v59 = vpop.f32.mrb[1].mxu0  ;;  %v477_v60 = vpop.f32.mrb[1].mxu1 }
  0xf9   : > { %v438_v63 = vadd.f32 %v437_v59, %v245_v46  ;;  %v478_v0 = vadd.f32 %v477_v60, %v285_v54 }
  0xfa   : > { %vm517_vm2 = vcmp.ge.f32.partialorder %v443_v57, 0.0  ;;  %v533_v1 = vmul.f32 0.1, %v443_v57  ;;  %vm525_vm3 = vcmp.ge.f32.partialorder %v483_v58, 0.0  ;;  %v541_v2 = vmul.f32 0.1, %v483_v58 }
  0xfb   : > { %vm516_vm4 = vcmp.ge.f32.partialorder %v438_v63, 0.0  ;;  %v532_v3 = vmul.f32 0.1, %v438_v63  ;;  %vm524_vm5 = vcmp.ge.f32.partialorder %v478_v0, 0.0  ;;  %v540_v4 = vmul.f32 0.1, %v478_v0 }
  0xfc   : > { %v549_v5 = vsel %vm517_vm2, %v443_v57, %v533_v1  ;;  %v557_v6 = vsel %vm525_vm3, %v483_v58, %v541_v2  ;;  %v738_v7 = vpop.f32.mrb[2].mxu0  ;;  %v750_v8 = vpop.f32.mrb[2].mxu1 }
  0xfd   : > { %566 = vst.msk [vmem:[%s999_s18 + $0x8] sm:$0xff] %vm564_vm1, %v549_v5  ;;  %574 = vst.msk [vmem:[%s999_s18 + $0x48] sm:$0xff] %vm564_vm1, %v557_v6  ;;  %v548_v9 = vsel %vm516_vm4, %v438_v63, %v532_v3  ;;  %v556_v10 = vsel %vm524_vm5, %v478_v0, %v540_v4  ;;  %v453_v11 = vadd.f32 %v738_v7, %v260_v47  ;;  %v447_v13 = vpop.f32.mrb[3].mxu0  ;;  %v487_v14 = vpop.f32.mrb[3].mxu1 }
  0xfe   : > { %v493_v12 = vadd.f32 %v750_v8, %v300_v61  ;;  %565 = vst.msk [vmem:[%s999_s18] sm:$0xff] %vm564_vm1, %v548_v9  ;;  %573 = vst.msk [vmem:[%s999_s18 + $0x40] sm:$0xff] %vm564_vm1, %v556_v10  ;;  %v448_v15 = vadd.f32 %v447_v13, %v255_v45  ;;  %v488_v16 = vadd.f32 %v487_v14, %v295_v62 }
  0xff   : > { %vm519_vm6 = vcmp.ge.f32.partialorder %v453_v11, 0.0  ;;  %v535_v19 = vmul.f32 0.1, %v453_v11  ;;  %v741_v25 = vpop.f32.mrb[4].mxu0  ;;  %v753_v26 = vpop.f32.mrb[4].mxu1 }
 0x100   : > { %vm527_vm7 = vcmp.ge.f32.partialorder %v493_v12, 0.0  ;;  %v543_v20 = vmul.f32 0.1, %v493_v12  ;;  %vm518_vm8 = vcmp.ge.f32.partialorder %v448_v15, 0.0  ;;  %v534_v21 = vmul.f32 0.1, %v448_v15 }
 0x101   : > { %vm526_vm9 = vcmp.ge.f32.partialorder %v488_v16, 0.0  ;;  %v542_v22 = vmul.f32 0.1, %v488_v16  ;;  %v551_v23 = vsel %vm519_vm6, %v453_v11, %v535_v19  ;;  %v463_v29 = vadd.f32 %v741_v25, %v270_v49  ;;  %v457_v31 = vpop.f32.mrb[5].mxu0  ;;  %v497_v32 = vpop.f32.mrb[5].mxu1 }
 0x102   : > { %v559_v24 = vsel %vm527_vm7, %v493_v12, %v543_v20  ;;  %568 = vst.msk [vmem:[%s999_s18 + $0x18] sm:$0xff] %vm564_vm1, %v551_v23  ;;  %v550_v27 = vsel %vm518_vm8, %v448_v15, %v534_v21  ;;  %v503_v30 = vadd.f32 %v753_v26, %v310_v17  ;;  %v458_v33 = vadd.f32 %v457_v31, %v989_v50 }
 0x103   : > { %576 = vst.msk [vmem:[%s999_s18 + $0x58] sm:$0xff] %vm564_vm1, %v559_v24  ;;  %v558_v28 = vsel %vm526_vm9, %v488_v16, %v542_v22  ;;  %567 = vst.msk [vmem:[%s999_s18 + $0x10] sm:$0xff] %vm564_vm1, %v550_v27  ;;  %v498_v34 = vadd.f32 %v497_v32, %v305_v18  ;;  %v744_v35 = vpop.f32.mrb[6].mxu0  ;;  %v756_v36 = vpop.f32.mrb[6].mxu1  ;;  %vm521_vm10 = vcmp.ge.f32.partialorder %v463_v29, 0.0 }
 0x104   : > { %575 = vst.msk [vmem:[%s999_s18 + $0x50] sm:$0xff] %vm564_vm1, %v558_v28  ;;  %v537_v37 = vmul.f32 0.1, %v463_v29  ;;  %vm529_vm11 = vcmp.ge.f32.partialorder %v503_v30, 0.0  ;;  %v545_v38 = vmul.f32 0.1, %v503_v30  ;;  %v473_v45 = vadd.f32 %v744_v35, %v991_v51 }
 0x105   : > { %vm520_vm12 = vcmp.ge.f32.partialorder %v458_v33, 0.0  ;;  %v536_v41 = vmul.f32 0.1, %v458_v33  ;;  %vm528_vm13 = vcmp.ge.f32.partialorder %v498_v34, 0.0  ;;  %v544_v42 = vmul.f32 0.1, %v498_v34 }
 0x106   : > { %v553_v43 = vsel %vm521_vm10, %v463_v29, %v537_v37  ;;  %v561_v44 = vsel %vm529_vm11, %v503_v30, %v545_v38  ;;  %v513_v46 = vadd.f32 %v756_v36, %v320_v39  ;;  %v467_v47 = vpop.f32.mrb[7].mxu0  ;;  %v507_v48 = vpop.f32.mrb[7].mxu1  ;;  %vm523_vm14 = vcmp.ge.f32.partialorder %v473_v45, 0.0 }
 0x107   : > { %570 = vst.msk [vmem:[%s999_s18 + $0x28] sm:$0xff] %vm564_vm1, %v553_v43  ;;  %578 = vst.msk [vmem:[%s999_s18 + $0x68] sm:$0xff] %vm564_vm1, %v561_v44  ;;  %v552_v49 = vsel %vm520_vm12, %v458_v33, %v536_v41  ;;  %v560_v50 = vsel %vm528_vm13, %v498_v34, %v544_v42  ;;  %v468_v53 = vadd.f32 %v467_v47, %v993_v52  ;;  %v539_v51 = vmul.f32 0.1, %v473_v45 }
 0x108   : > { %v508_v54 = vadd.f32 %v507_v48, %v315_v40  ;;  %569 = vst.msk [vmem:[%s999_s18 + $0x20] sm:$0xff] %vm564_vm1, %v552_v49  ;;  %577 = vst.msk [vmem:[%s999_s18 + $0x60] sm:$0xff] %vm564_vm1, %v560_v50  ;;  %vm531_vm15 = vcmp.ge.f32.partialorder %v513_v46, 0.0  ;;  %v547_v55 = vmul.f32 0.1, %v513_v46 }
 0x109   : > { %vm522_vm0 = vcmp.ge.f32.partialorder %v468_v53, 0.0  ;;  %v538_v56 = vmul.f32 0.1, %v468_v53  ;;  %v555_v58 = vsel %vm523_vm14, %v473_v45, %v539_v51 }
 0x10a   : > { %vm530_vm2 = vcmp.ge.f32.partialorder %v508_v54, 0.0  ;;  %v546_v57 = vmul.f32 0.1, %v508_v54  ;;  %v563_v59 = vsel %vm531_vm15, %v513_v46, %v547_v55  ;;  %572 = vst.msk [vmem:[%s999_s18 + $0x38] sm:$0xff] %vm564_vm1, %v555_v58 }
 0x10b   : > { %580 = vst.msk [vmem:[%s999_s18 + $0x78] sm:$0xff] %vm564_vm1, %v563_v59  ;;  %v554_v52 = vsel %vm522_vm0, %v468_v53, %v538_v56 }
 0x10c   : > { %v562_v60 = vsel %vm530_vm2, %v508_v54, %v546_v57  ;;  %571 = vst.msk [vmem:[%s999_s18 + $0x30] sm:$0xff] %vm564_vm1, %v554_v52 }
 0x10d   : > { %579 = vst.msk [vmem:[%s999_s18 + $0x70] sm:$0xff] %vm564_vm1, %v562_v60 }
 0x10e PF: > { %s13_s14 = sadd.s32 1, %s830_s14   ;;  %s1049_s12 = smov %s826_s13 }
 0x10f   : > { %p10_p5 = scmp.ge.s32.totalorder %s13_s14, 4   ;;  %s1050_s13 = smov %s1052_s15 }
 0x111   :  { %12 = sbr.rel (!%p10_p5) target bundleno = 2 (0x2), region = 62 }

// kernel: _lambda_.41
= control target key start
LH: loop header
LB: loop body
LE: loop exit
PB: predicated region body
PF: predicated region fallthrough
CT: control target
= control target key end

     0   :  { %s783_s0 = inlined_call_operand.vmem [shape: f32[2,128,6,6], index: 0, kind: input, shape index: {}]   ;;  %s784_s1 = inlined_call_operand.vmem [shape: f32[1152], index: 1, kind: input, shape index: {}]   ;;  %s785_s2 = inlined_call_operand.vmem [shape: f32[128], index: 2, kind: input, shape index: {}]   ;;  %s786_s3 = inlined_call_operand.vmem [shape: f32[2,128,4,4], index: 3, kind: output, shape index: {}]  }
   0x1   :  { %790 = sst [smem:[#allocation8_spill]] %s783_s0 }
   0x2   :  { %8 = vsyncpa [#allocation3], 0 }
   0x3   :  { %9 = vsyncpa [#allocation5], 0  ;;  %s651_s12 = smov 0   ;;  %s653_s13 = smov 0  }
   0x4   :  { %s655_s14 = smov 0   ;;  %s657_s15 = smov 0  }
   0x5   :  { %s659_s16 = smov 0  }
   0x6 LB: > { %s450_s17 = sadd.s32 4294967295, %s621_s16   ;;  %s24_s18 = sadd.s32 1, %s613_s14  ;;  %s621_s16 = sphi %s659_s16, %s15_s16   ;;  %s617_s15 = sphi %s657_s15, %s800_s15   ;;  %s613_s14 = sphi %s655_s14, %s799_s14   ;;  %s609_s13 = sphi %s653_s13, %s798_s13   ;;  %s605_s12 = sphi %s651_s12, %s797_s12  }
   0x7   : > { %p25_p0 = scmp.ge.s32.totalorder %s24_s18, 2  ;;  %s27_s19 = sadd.s32 1, %s617_s15 }
   0x8   : > { %p452_p1 = scmp.ge.s32.totalorder %s621_s16, 1  ;;  %p130_p2 = scmp.lt.s32.totalorder %s621_s16, 5 }
   0x9   : > { %s802_s18 = smov (%p25_p0, %s24_s18), 0  ;;  %s804_s19 = smov (!%p25_p0, %s27_s19), %s617_s15 }
   0xa   : > { %p684_p3 = pnand %p452_p1, %p130_p2  ;;  %p29_p4 = scmp.ge.s32.totalorder %s804_s19, 2 }
   0xb   : > { %p688_p5 = scmp.eq.s32.totalorder %s450_s17, 0  ;;  %s143_s24 = sshll.u32 %s784_s1, 4  ;;  %s144_s24 = int_to_ptr.vmem [resolvable:$true] %s143_s24 }
   0xc   : > { %s791_s20 = scalar_select %p684_p3, 1, 0 }
   0xd   : > { %s792_s21 = scalar_select %p688_p5, 1, 0 }
   0xe   : > { %p478_p6 = pneg %p684_p3  ;;  %s806_s19 = smov (%p29_p4, %s804_s19), 0 }
   0xf   : > { %s154_s28 = sshll.u32 %s785_s2, 4  ;;  %s541_s29 = scalar_lea.vmem %s144_s24, 144  ;;  %s155_s28 = int_to_ptr.vmem [resolvable:$true] %s154_s28 }
  0x10   : > { %p701_p7 = pnand %p688_p5, %p478_p6  ;;  %p542_p8 = scmp.ne.s32.totalorder %s144_s24, %s541_s29 }
  0x11   : > { %s548_s30 = scalar_lea.vmem %s144_s24, 256  ;;  %p549_p12 = scmp.lt.s32.totalorder %s144_s24, %s144_s24 }
  0x12   : > { %p543_p9 = pneg %p701_p7  ;;  %p550_p13 = scmp.lt.s32.totalorder %s548_s30, %s541_s29 }
  0x14   : > { %p544_p10 = pnand %p543_p9, %p542_p8  ;;  %p551_p0 = por %p550_p13, %p549_p12 }
  0x16   : > { %p545_p11 = pneg %p544_p10 }
  0x18   : > { %p552_p1 = pnand %p551_p0, %p545_p11 }
  0x1a   : > { %555 = shalt.err (!%p552_p1)
}
  0x1b   : > { %s627_s4 = smov [#allocation2]   ;;  %s556_s5 = scalar_lea.vmem %s155_s28, 16 }
  0x1c   : > { %481 = dma.vmem_to_smem (!%p701_p7), %s144_s24, 144, %s627_s4, [#allocation3]  }
  0x1d   : > { %p557_p2 = scmp.ne.s32.totalorder %s155_s28, %s556_s5  ;;  %p564_p5 = scmp.lt.s32.totalorder %s155_s28, %s155_s28 }
  0x1e   : > { %p565_p8 = scmp.lt.s32.totalorder %s556_s5, %s556_s5 }
  0x1f   : > { %p559_p4 = pnand %p557_p2, %p543_p9 }
  0x20   : > { %p566_p10 = por %p565_p8, %p564_p5 }
  0x21   : > { %p560_p6 = pneg %p559_p4 }
  0x23   : > { %p567_p3 = pnand %p566_p10, %p560_p6 }
  0x25   : > { %570 = shalt.err (!%p567_p3)
}
  0x26   : > { %s628_s6 = smov [#allocation4]   ;;  %p794_p11 = scmp.ne.s32.totalorder %s791_s20, 0 }
  0x27   : > { %484 = dma.vmem_to_smem (!%p701_p7), %s155_s28, 16, %s628_s6, [#allocation5]  }
  0x28   : > { %180 = sbr.rel (%p794_p11) target bundleno = 212 (0xd4), region = 32  ;;  %p795_p12 = scmp.ne.s32.totalorder (!%p794_p11), %s792_s21, 0 }
  0x2f   : > { %596 = dma.done.wait (%p795_p12), [#allocation3], 144  }
  0x30   : > { %598 = vsyncadd (%p795_p12), [#allocation3], 4294967152 }
  0x31   : > { %600 = dma.done.wait (%p795_p12), [#allocation5], 16  }
  0x32   : > { %602 = vsyncadd (%p795_p12), [#allocation5], 4294967280 }
  0x33   : > { %190 = sfence }
  0x34   : > { %s731_s7 = sshll.u32 %s605_s12, 6  ;;  %p218_p3 = scmp.lt.s32.totalorder %s609_s13, 1 }
  0x35   : > { %p220_p5 = scmp.lt.s32.totalorder %s731_s7, 127  ;;  %s796_s0 = sld [smem:[#allocation8_spill]] }
  0x36   : > { %s808_s13 = smov (!%p218_p3, %s609_s13), 1  ;;  %s747_s25 = smov 0  }
  0x37   : > { %s221_s8 = scalar_select %p220_p5, %s731_s7, 127 }
  0x38   : > { %s460_s9 = sshll.u32 %s808_s13, 7 }
  0x39   : > { %s223_s10 = sadd.s32 %s460_s9, %s221_s8 }
  0x3a   : > { %s461_s11 = sshll.u32 %s223_s10, 3  ;;  %s464_s17 = sshll.u32 %s223_s10, 2 }
  0x3b   : > { %s740_s21 = scalar_lea.vmem %s796_s0, %s461_s11  ;;  %s745_s12 = scalar_lea.vmem %s786_s3, %s464_s17 }
  0x3c LB: >> { %s754_s13 = sadd.s32 %s625_s25, %s731_s7  ;;  %s466_s26 = sshll.u32 %s625_s25, 3  ;;  %vm327_vm0 = vcmask 27648   ;;  %s625_s25 = sphi %s747_s25, %s242_s25  }
  0x3d   : >> { %s248_s27 = smul.u32 9, %s754_s13  ;;  %s246_s28 = scalar_lea.vmem %s740_s21, %s466_s26 }
  0x3e   : >> { %v247_v0 = vld [vmem:[%s246_s28] sm:$0xf] }
  0x3f   : >> { %s253_s29 = sadd.s32 1, %s248_s27  ;;  %s262_s4 = sadd.s32 2, %s248_s27  ;;  %v271_v2 = vld [vmem:[%s246_s28 + $0x1] sm:$0xf] }
  0x40   : >> { %s254_s30 = sld [smem:[#allocation2 + %s253_s29]]  ;;  %s277_s6 = sadd.s32 4, %s248_s27  ;;  %v295_v9 = vld [vmem:[%s246_s28 + $0x2] sm:$0xf] }
  0x41   : >> { %s263_s5 = sld [smem:[#allocation2 + %s262_s4]]  ;;  %s286_s9 = sadd.s32 5, %s248_s27 }
  0x42   : >> { %s278_s8 = sld [smem:[#allocation2 + %s277_s6]]  ;;  %s301_s11 = sadd.s32 7, %s248_s27 }
  0x43   : >> { %s287_s10 = sld [smem:[#allocation2 + %s286_s9]]  ;;  %s310_s20 = sadd.s32 8, %s248_s27 }
  0x44   : >> { %s302_s17 = sld [smem:[#allocation2 + %s301_s11]]  ;;  %s272_s24 = sadd.s32 3, %s248_s27 }
  0x45   : >> { %s759_s22 = sld [smem:[#allocation2 + %s310_s20]]  ;;  %s296_s0 = sadd.s32 6, %s248_s27 }
  0x46   : >> { %s249_s23 = sld [smem:[#allocation2 + %s248_s27]]  ;;  %v255_v1 = vstv %s254_s30  ;;  %s629_s4 = smov 127  }
  0x47   : >> { %v256_v3 = vmul.f32 %v255_v1, %v247_v0  ;;  %v264_v4 = vstv %s263_s5  ;;  %s273_s26 = sld [smem:[#allocation2 + %s272_s24]]  ;;  %s630_s30 = smov 126  }
  0x48   : >> { %s297_s29 = sld [smem:[#allocation2 + %s296_s0]]  ;;  %v279_v5 = vstv %s278_s8  ;;  %v265_v6 = vmul.f32 %v264_v4, %v247_v0  ;;  %s467_s27 = sshll.u32 %s625_s25, 2 }
  0x49   : >> { %258 = vrot.lane.b32.xlu0 %v256_v3, %s629_s4  ;;  %v280_v7 = vmul.f32 %v279_v5, %v271_v2  ;;  %v288_v8 = vstv %s287_s10  ;;  %s319_s0 = sld [smem:[#allocation4 + %s754_s13]]  ;;  %s326_s28 = scalar_lea.vmem %s745_s12, %s467_s27 }
  0x4a   : >> { %v303_v10 = vstv %s302_s17  ;;  %v289_v11 = vmul.f32 %v288_v8, %v271_v2  ;;  %s242_s25 = sadd.s32 1, %s625_s25  }
  0x4b   : >> { %282 = vrot.lane.b32.xlu1 %v280_v7, %s629_s4  ;;  %v312_v13 = vstv %s759_s22  ;;  %v304_v15 = vmul.f32 %v303_v10, %v295_v9  ;;  %p239_p7 = scmp.ge.s32.totalorder %s242_s25, 64  }
  0x4c   : >> { %v250_v12 = vstv %s249_s23  ;;  %v313_v20 = vmul.f32 %v312_v13, %v295_v9 }
  0x4d   : >> { %v251_v14 = vmul.f32 %v250_v12, %v247_v0  ;;  %267 = vrot.lane.b32.xlu0 %v265_v6, %s630_s30  ;;  %v274_v16 = vstv %s273_s26 }
  0x4e   : >> { %v298_v17 = vstv %s297_s29  ;;  %v275_v18 = vmul.f32 %v274_v16, %v271_v2 }
  0x4f   : >> { %v299_v19 = vmul.f32 %v298_v17, %v295_v9  ;;  %291 = vrot.lane.b32.xlu1 %v289_v11, %s630_s30  ;;  %v320_v34 = vstv %s319_s0 }
  0x51   : >> { %306 = vrot.lane.b32.xlu0 %v304_v15, %s629_s4 }
  0x53   : >> { %315 = vrot.lane.b32.xlu1 %v313_v20, %s630_s30 }
  0xbb   : >> { %v259_v21 = vpop.permute.xlu0 %258 }
  0xbc   : >> { %v261_v23 = vadd.f32 %v259_v21, %v251_v14 }
  0xbd   : >> { %v283_v22 = vpop.permute.xlu1 %282 }
  0xbf   : >> { %v268_v24 = vpop.permute.xlu0 %267 }
  0xc0   : >> { %v270_v25 = vadd.f32 %v268_v24, %v261_v23 }
  0xc1   : >> { %v292_v27 = vpop.permute.xlu1 %291 }
  0xc2   : >> { %v276_v26 = vadd.f32 %v275_v18, %v270_v25 }
  0xc3   : >> { %v307_v30 = vpop.permute.xlu0 %306 }
  0xc4   : >> { %v285_v28 = vadd.f32 %v283_v22, %v276_v26 }
  0xc5   : >> { %v316_v32 = vpop.permute.xlu1 %315 }
  0xc6   : >> { %v294_v29 = vadd.f32 %v292_v27, %v285_v28 }
  0xc8   : >> { %v300_v31 = vadd.f32 %v299_v19, %v294_v29 }
  0xca   : >> { %v309_v33 = vadd.f32 %v307_v30, %v300_v31 }
  0xcc   : >> { %v318_v35 = vadd.f32 %v316_v32, %v309_v33 }
  0xcd   : > { %241 = sbr.rel (!%p239_p7) target bundleno = 60 (0x3c), region = 80 }
  0xce   : >> { %v321_v36 = vadd.f32 %v320_v34, %v318_v35 }
  0xd0   : >> { %vm322_vm1 = vcmp.ge.f32.partialorder %v321_v36, 0.0  ;;  %v323_v37 = vmul.f32 0.1, %v321_v36 }
  0xd2   : >> { %v324_v38 = vsel %vm322_vm1, %v321_v36, %v323_v37 }
  0xd3   : >> { %328 = vst.msk [vmem:[%s326_s28] sm:$0xf] %vm327_vm0, %v324_v38 }
  0xd4 PF: > { %s15_s16 = sadd.s32 1, %s621_s16   ;;  %s797_s12 = smov %s613_s14 }
  0xd5   : > { %p12_p9 = scmp.ge.s32.totalorder %s15_s16, 6   ;;  %s798_s13 = smov %s617_s15 }
  0xd6   : > { %s799_s14 = smov %s802_s18  ;;  %s800_s15 = smov %s806_s19 }
  0xd7   :  { %14 = sbr.rel (!%p12_p9) target bundleno = 6 (0x6), region = 91 }
  0xde   :  { %359 = vsyncpa [#allocation3], 1 }
  0xdf   :  { %361 = vsyncpa [#allocation3 + $0x1], 1 }
  0xe0   :  { %362 = vsyncpa [#allocation5], 1 }

// kernel: _lambda_.42
= control target key start
LH: loop header
LB: loop body
LE: loop exit
PB: predicated region body
PF: predicated region fallthrough
CT: control target
= control target key end

     0   :  { %s844_s12 = smov 0   ;;  %s846_s13 = smov 0   ;;  %s1041_s0 = inlined_call_operand.vmem [shape: f32[2,128,16], index: 0, kind: input, shape index: {}]   ;;  %s1042_s1 = inlined_call_operand.vmem [shape: f32[128,128], index: 1, kind: input, shape index: {}]   ;;  %s1043_s2 = inlined_call_operand.vmem [shape: f32[128,1], index: 2, kind: input, shape index: {}]   ;;  %s1044_s3 = inlined_call_operand.vmem [shape: f32[2,128,16], index: 3, kind: output, shape index: {}]  }
   0x1   :  { %s848_s14 = smov 0  }
   0x2 LB: > { %s25_s15 = sadd.s32 1, %s817_s13  ;;  %p627_p0 = scmp.ge.s32.totalorder %s821_s14, 1  ;;  %s821_s14 = sphi %s848_s14, %s13_s14   ;;  %s817_s13 = sphi %s846_s13, %s1046_s13   ;;  %s813_s12 = sphi %s844_s12, %s1045_s12  }
   0x3   : > { %p27_p1 = scmp.ge.s32.totalorder %s25_s15, 2  ;;  %p156_p2 = scmp.lt.s32.totalorder %s821_s14, 3 }
   0x5   : > { %s1048_s15 = smov (%p27_p1, %s25_s15), 0  ;;  %p157_p3 = pnand %p627_p0, %p156_p2 }
   0x6   : > { %p186_p4 = scmp.lt.s32.totalorder (!%p157_p3), %s813_s12, 1  ;;  %v202_v0 = vld [vmem:[%s1042_s1] sm:$0xff] (!%p157_p3)  ;;  %v823_v2 = vmov (!%p157_p3), 0   ;;  %v236_v3 = vld [vmem:[%s1043_s2 + $0x10] sm:$0xff] (!%p157_p3)  ;;  %v237_v14 = vld [vmem:[%s1043_s2 + $0x18] sm:$0xff] (!%p157_p3)  ;;  %vm523_vm0 = vcmask (!%p157_p3), 130048  }
   0x7   : > { %160 = sbr.rel (%p157_p3) target bundleno = 286 (0x11e), region = 32  ;;  %v210_v1 = vld [vmem:[%s1042_s1 + $0x40] sm:$0xff] (!%p157_p3)  ;;  %700 = vmatprep.mubr.f32.mxu0 (!%p157_p3), %v202_v0  ;;  %798 = vset.pattern.permute.xlu1 (!%p157_p3), %v823_v2  ;;  %v235_v15 = vld [vmem:[%s1043_s2 + $0x8] sm:$0xff] (!%p157_p3)  ;;  %v241_v23 = vld [vmem:[%s1043_s2 + $0x38] sm:$0xff] (!%p157_p3) }
   0x8   : > { %712 = vmatprep.mubr.f32.mxu1 (!%p157_p3), %v210_v1  ;;  %797 = vset.pattern.permute.xlu0 (!%p157_p3), %v823_v2  ;;  %v234_v4 = vld [vmem:[%s1043_s2] sm:$0xff] (!%p157_p3)  ;;  %v239_v18 = vld [vmem:[%s1043_s2 + $0x28] sm:$0xff] (!%p157_p3)  ;;  %v240_v24 = vld [vmem:[%s1043_s2 + $0x30] sm:$0xff] (!%p157_p3) }
   0x9   : > { %262 = vperm.xlu1 (!%p157_p3), %798, %v236_v3   ;;  %252 = vperm.xlu0 (!%p157_p3), %797, %v234_v4   ;;  %v238_v19 = vld [vmem:[%s1043_s2 + $0x20] sm:$0xff] (!%p157_p3)  ;;  %v243_v28 = vld [vmem:[%s1043_s2 + $0x48] sm:$0xff] (!%p157_p3)  ;;  %v245_v33 = vld [vmem:[%s1043_s2 + $0x58] sm:$0xff] (!%p157_p3) }
   0xa   : > { %v242_v29 = vld [vmem:[%s1043_s2 + $0x40] sm:$0xff] (!%p157_p3)  ;;  %v244_v34 = vld [vmem:[%s1043_s2 + $0x50] sm:$0xff] (!%p157_p3)  ;;  %v247_v38 = vld [vmem:[%s1043_s2 + $0x68] sm:$0xff] (!%p157_p3) }
   0xb   : > { %v246_v39 = vld [vmem:[%s1043_s2 + $0x60] sm:$0xff] (!%p157_p3)  ;;  %v249_v41 = vld [vmem:[%s1043_s2 + $0x78] sm:$0xff] (!%p157_p3)  ;;  %v248_v42 = vld [vmem:[%s1043_s2 + $0x70] sm:$0xff] (!%p157_p3) }
   0xc   : > { %v203_v43 = vld [vmem:[%s1042_s1 + $0x8] sm:$0xff] (!%p157_p3)  ;;  %v204_v45 = vld [vmem:[%s1042_s1 + $0x10] sm:$0xff] (!%p157_p3)  ;;  %v205_v47 = vld [vmem:[%s1042_s1 + $0x18] sm:$0xff] (!%p157_p3) }
   0xd   : > { %267 = vperm.xlu1 (!%p157_p3), %798, %v237_v14   ;;  %257 = vperm.xlu0 (!%p157_p3), %797, %v235_v15   ;;  %v211_v44 = vld [vmem:[%s1042_s1 + $0x48] sm:$0xff] (!%p157_p3)  ;;  %v212_v46 = vld [vmem:[%s1042_s1 + $0x50] sm:$0xff] (!%p157_p3)  ;;  %v213_v48 = vld [vmem:[%s1042_s1 + $0x58] sm:$0xff] (!%p157_p3) }
   0xe   : > { %s1050_s12 = smov (!%p186_p4, %s813_s12), 1  ;;  %v206_v49 = vld [vmem:[%s1042_s1 + $0x20] sm:$0xff]  ;;  %v207_v51 = vld [vmem:[%s1042_s1 + $0x28] sm:$0xff]  ;;  %v208_v53 = vld [vmem:[%s1042_s1 + $0x30] sm:$0xff] }
   0xf   : > { %s634_s20 = sshll.u32 %s1050_s12, 7  ;;  %v214_v50 = vld [vmem:[%s1042_s1 + $0x60] sm:$0xff]  ;;  %v215_v52 = vld [vmem:[%s1042_s1 + $0x68] sm:$0xff]  ;;  %v216_v54 = vld [vmem:[%s1042_s1 + $0x70] sm:$0xff] }
  0x10   : > { %s876_s23 = scalar_lea.vmem %s1041_s0, %s634_s20  ;;  %v209_v55 = vld [vmem:[%s1042_s1 + $0x38] sm:$0xff]  ;;  %s995_s19 = scalar_lea.vmem %s1044_s3, %s634_s20 }
  0x11   : > { %v218_v5 = vld [vmem:[%s876_s23] sm:$0xff]  ;;  %v219_v6 = vld [vmem:[%s876_s23 + $0x8] sm:$0xff]  ;;  %v220_v7 = vld [vmem:[%s876_s23 + $0x10] sm:$0xff]  ;;  %277 = vperm.xlu1 %798, %v239_v18   ;;  %272 = vperm.xlu0 %797, %v238_v19  }
  0x12   : > { %v724_v8 = vpack.c.bf16 %v219_v6, %v218_v5  ;;  %v221_v9 = vld [vmem:[%s876_s23 + $0x18] sm:$0xff]  ;;  %v222_v11 = vld [vmem:[%s876_s23 + $0x20] sm:$0xff]  ;;  %v223_v12 = vld [vmem:[%s876_s23 + $0x28] sm:$0xff] }
  0x13   : > { %v728_v10 = vpack.c.bf16 %v221_v9, %v220_v7  ;;  %v732_v13 = vpack.c.bf16 %v223_v12, %v222_v11  ;;  %v224_v16 = vld [vmem:[%s876_s23 + $0x30] sm:$0xff]  ;;  %v225_v17 = vld [vmem:[%s876_s23 + $0x38] sm:$0xff]  ;;  %v226_v21 = vld [vmem:[%s876_s23 + $0x40] sm:$0xff] }
  0x14   : > { %725 = vmatprep.subr.bf16.mxu0 %v724_v8  ;;  %756 = vmatprep.subr.bf16.mxu1 %v724_v8  ;;  %v736_v20 = vpack.c.bf16 %v225_v17, %v224_v16  ;;  %v227_v22 = vld [vmem:[%s876_s23 + $0x48] sm:$0xff]  ;;  %v228_v26 = vld [vmem:[%s876_s23 + $0x50] sm:$0xff]  ;;  %v229_v27 = vld [vmem:[%s876_s23 + $0x58] sm:$0xff] }
  0x15   : > { %727 = vmatpush3.bf16.msra.mxu0 %v724_v8  ;;  %764 = vmatpush3.bf16.msra.mxu1 %v724_v8  ;;  %v740_v25 = vpack.c.bf16 %v227_v22, %v226_v21  ;;  %v744_v30 = vpack.c.bf16 %v229_v27, %v228_v26  ;;  %v230_v31 = vld [vmem:[%s876_s23 + $0x60] sm:$0xff]  ;;  %v231_v32 = vld [vmem:[%s876_s23 + $0x68] sm:$0xff]  ;;  %v232_v36 = vld [vmem:[%s876_s23 + $0x70] sm:$0xff] }
  0x16   : > { %729 = vmatprep.subr.bf16.mxu0 %v728_v10  ;;  %757 = vmatprep.subr.bf16.mxu1 %v728_v10  ;;  %v748_v35 = vpack.c.bf16 %v231_v32, %v230_v31  ;;  %v233_v37 = vld [vmem:[%s876_s23 + $0x78] sm:$0xff] }
  0x17   : > { %287 = vperm.xlu1 %798, %v241_v23   ;;  %282 = vperm.xlu0 %797, %v240_v24   ;;  %v752_v40 = vpack.c.bf16 %v233_v37, %v232_v36  ;;  %v217_v56 = vld [vmem:[%s1042_s1 + $0x78] sm:$0xff] }
  0x19   : > { %731 = vmatpush3.bf16.msra.mxu0 %v728_v10  ;;  %765 = vmatpush3.bf16.msra.mxu1 %v728_v10 }
  0x1a   : > { %733 = vmatprep.subr.bf16.mxu0 %v732_v13  ;;  %758 = vmatprep.subr.bf16.mxu1 %v732_v13 }
  0x1b   : > { %297 = vperm.xlu1 %798, %v243_v28   ;;  %292 = vperm.xlu0 %797, %v242_v29  }
  0x1d   : > { %735 = vmatpush3.bf16.msra.mxu0 %v732_v13  ;;  %766 = vmatpush3.bf16.msra.mxu1 %v732_v13 }
  0x1e   : > { %737 = vmatprep.subr.bf16.mxu0 %v736_v20  ;;  %759 = vmatprep.subr.bf16.mxu1 %v736_v20 }
  0x1f   : > { %307 = vperm.xlu1 %798, %v245_v33   ;;  %302 = vperm.xlu0 %797, %v244_v34  }
  0x21   : > { %739 = vmatpush3.bf16.msra.mxu0 %v736_v20  ;;  %767 = vmatpush3.bf16.msra.mxu1 %v736_v20 }
  0x22   : > { %741 = vmatprep.subr.bf16.mxu0 %v740_v25  ;;  %760 = vmatprep.subr.bf16.mxu1 %v740_v25 }
  0x23   : > { %317 = vperm.xlu1 %798, %v247_v38   ;;  %312 = vperm.xlu0 %797, %v246_v39  }
  0x25   : > { %743 = vmatpush3.bf16.msra.mxu0 %v740_v25  ;;  %768 = vmatpush3.bf16.msra.mxu1 %v740_v25 }
  0x26   : > { %745 = vmatprep.subr.bf16.mxu0 %v744_v30  ;;  %761 = vmatprep.subr.bf16.mxu1 %v744_v30 }
  0x27   : > { %327 = vperm.xlu1 %798, %v249_v41   ;;  %322 = vperm.xlu0 %797, %v248_v42  }
  0x29   : > { %747 = vmatpush3.bf16.msra.mxu0 %v744_v30  ;;  %769 = vmatpush3.bf16.msra.mxu1 %v744_v30 }
  0x2a   : > { %749 = vmatprep.subr.bf16.mxu0 %v748_v35  ;;  %762 = vmatprep.subr.bf16.mxu1 %v748_v35 }
  0x2d   : > { %751 = vmatpush3.bf16.msra.mxu0 %v748_v35  ;;  %770 = vmatpush3.bf16.msra.mxu1 %v748_v35 }
  0x2e   : > { %753 = vmatprep.subr.bf16.mxu0 %v752_v40  ;;  %763 = vmatprep.subr.bf16.mxu1 %v752_v40 }
  0x31   : > { %755 = vmatpush3.bf16.msra.mxu0 %v752_v40  ;;  %771 = vmatpush3.bf16.msra.mxu1 %v752_v40 }
  0x34   : > { %701 = vmatmul.mubr.f32.vlgmr.msra.gmra.mrb[0].mxu0 %v203_v43  ;;  %713 = vmatmul.mubr.f32.vlgmr.msra.gmra.mrb[0].mxu1 %v211_v44 }
  0x35   : > { %703 = vmatprep.mubr.f32.mxu0 %v204_v45  ;;  %715 = vmatprep.mubr.f32.mxu1 %v212_v46 }
  0x38   : > { %704 = vmatmul.mubr.f32.gmra.mrb[2].mxu0 %v205_v47  ;;  %716 = vmatmul.mubr.f32.gmra.mrb[2].mxu1 %v213_v48 }
  0x39   : > { %706 = vmatprep.mubr.f32.mxu0 %v206_v49  ;;  %718 = vmatprep.mubr.f32.mxu1 %v214_v50 }
  0x3c   : > { %707 = vmatmul.mubr.f32.gmra.mrb[4].mxu0 %v207_v51  ;;  %719 = vmatmul.mubr.f32.gmra.mrb[4].mxu1 %v215_v52 }
  0x3d   : > { %709 = vmatprep.mubr.f32.mxu0 %v208_v53  ;;  %721 = vmatprep.mubr.f32.mxu1 %v216_v54 }
  0x40   : > { %710 = vmatmul.mubr.f32.gmra.mrb[6].mxu0 %v209_v55  ;;  %722 = vmatmul.mubr.f32.gmra.mrb[6].mxu1 %v217_v56 }
  0x88   : > { %v263_v57 = vpop.permute.xlu1 %262  ;;  %v253_v58 = vpop.permute.xlu0 %252 }
  0x8c   : > { %v268_v59 = vpop.permute.xlu1 %267  ;;  %v258_v60 = vpop.permute.xlu0 %257 }
  0x90   : > { %v278_v61 = vpop.permute.xlu1 %277  ;;  %v984_v62 = vpop.permute.xlu0 %272 }
  0x96   : > { %v986_v63 = vpop.permute.xlu1 %287  ;;  %v988_v0 = vpop.permute.xlu0 %282 }
  0x9a   : > { %v298_v1 = vpop.permute.xlu1 %297  ;;  %v293_v2 = vpop.permute.xlu0 %292 }
  0x9e   : > { %v308_v9 = vpop.permute.xlu1 %307  ;;  %v303_v10 = vpop.permute.xlu0 %302 }
  0xa2   : > { %v318_v29 = vpop.permute.xlu1 %317  ;;  %v313_v30 = vpop.permute.xlu0 %312 }
  0xa6   : > { %v328_v51 = vpop.permute.xlu1 %327  ;;  %v323_v52 = vpop.permute.xlu0 %322 }
 0x107   : > { %v702_v3 = vpop.f32.mrb[0].mxu0  ;;  %v714_v4 = vpop.f32.mrb[0].mxu1 }
 0x108   : > { %v402_v5 = vadd.f32 %v702_v3, %v258_v60  ;;  %v442_v6 = vadd.f32 %v714_v4, %v298_v1  ;;  %v396_v7 = vpop.f32.mrb[1].mxu0  ;;  %v436_v8 = vpop.f32.mrb[1].mxu1 }
 0x109   : > { %v397_v11 = vadd.f32 %v396_v7, %v253_v58  ;;  %v437_v12 = vadd.f32 %v436_v8, %v293_v2 }
 0x10a   : > { %vm476_vm1 = vcmp.ge.f32.partialorder %v402_v5, 0.0  ;;  %v492_v13 = vmul.f32 0.1, %v402_v5  ;;  %vm484_vm2 = vcmp.ge.f32.partialorder %v442_v6, 0.0  ;;  %v500_v14 = vmul.f32 0.1, %v442_v6 }
 0x10b   : > { %vm475_vm3 = vcmp.ge.f32.partialorder %v397_v11, 0.0  ;;  %v491_v15 = vmul.f32 0.1, %v397_v11  ;;  %vm483_vm4 = vcmp.ge.f32.partialorder %v437_v12, 0.0  ;;  %v499_v16 = vmul.f32 0.1, %v437_v12 }
 0x10c   : > { %v508_v17 = vsel %vm476_vm1, %v402_v5, %v492_v13  ;;  %v516_v18 = vsel %vm484_vm2, %v442_v6, %v500_v14  ;;  %v705_v19 = vpop.f32.mrb[2].mxu0  ;;  %v717_v20 = vpop.f32.mrb[2].mxu1 }
 0x10d   : > { %525 = vst.msk [vmem:[%s995_s19 + $0x8] sm:$0xff] %vm523_vm0, %v508_v17  ;;  %533 = vst.msk [vmem:[%s995_s19 + $0x48] sm:$0xff] %vm523_vm0, %v516_v18  ;;  %v507_v21 = vsel %vm475_vm3, %v397_v11, %v491_v15  ;;  %v515_v22 = vsel %vm483_vm4, %v437_v12, %v499_v16  ;;  %v412_v23 = vadd.f32 %v705_v19, %v268_v59  ;;  %v406_v25 = vpop.f32.mrb[3].mxu0  ;;  %v446_v26 = vpop.f32.mrb[3].mxu1 }
 0x10e   : > { %v452_v24 = vadd.f32 %v717_v20, %v308_v9  ;;  %524 = vst.msk [vmem:[%s995_s19] sm:$0xff] %vm523_vm0, %v507_v21  ;;  %532 = vst.msk [vmem:[%s995_s19 + $0x40] sm:$0xff] %vm523_vm0, %v515_v22  ;;  %v407_v27 = vadd.f32 %v406_v25, %v263_v57  ;;  %v447_v28 = vadd.f32 %v446_v26, %v303_v10 }
 0x10f   : > { %vm478_vm5 = vcmp.ge.f32.partialorder %v412_v23, 0.0  ;;  %v494_v31 = vmul.f32 0.1, %v412_v23  ;;  %v708_v37 = vpop.f32.mrb[4].mxu0  ;;  %v720_v38 = vpop.f32.mrb[4].mxu1 }
 0x110   : > { %vm486_vm6 = vcmp.ge.f32.partialorder %v452_v24, 0.0  ;;  %v502_v32 = vmul.f32 0.1, %v452_v24  ;;  %vm477_vm7 = vcmp.ge.f32.partialorder %v407_v27, 0.0  ;;  %v493_v33 = vmul.f32 0.1, %v407_v27 }
 0x111   : > { %vm485_vm8 = vcmp.ge.f32.partialorder %v447_v28, 0.0  ;;  %v501_v34 = vmul.f32 0.1, %v447_v28  ;;  %v510_v35 = vsel %vm478_vm5, %v412_v23, %v494_v31  ;;  %v422_v41 = vadd.f32 %v708_v37, %v278_v61  ;;  %v416_v43 = vpop.f32.mrb[5].mxu0  ;;  %v456_v44 = vpop.f32.mrb[5].mxu1 }
 0x112   : > { %v518_v36 = vsel %vm486_vm6, %v452_v24, %v502_v32  ;;  %527 = vst.msk [vmem:[%s995_s19 + $0x18] sm:$0xff] %vm523_vm0, %v510_v35  ;;  %v509_v39 = vsel %vm477_vm7, %v407_v27, %v493_v33  ;;  %v462_v42 = vadd.f32 %v720_v38, %v318_v29  ;;  %v417_v45 = vadd.f32 %v416_v43, %v984_v62 }
 0x113   : > { %535 = vst.msk [vmem:[%s995_s19 + $0x58] sm:$0xff] %vm523_vm0, %v518_v36  ;;  %v517_v40 = vsel %vm485_vm8, %v447_v28, %v501_v34  ;;  %526 = vst.msk [vmem:[%s995_s19 + $0x10] sm:$0xff] %vm523_vm0, %v509_v39  ;;  %v457_v46 = vadd.f32 %v456_v44, %v313_v30  ;;  %v711_v47 = vpop.f32.mrb[6].mxu0  ;;  %v723_v48 = vpop.f32.mrb[6].mxu1  ;;  %vm480_vm9 = vcmp.ge.f32.partialorder %v422_v41, 0.0 }
 0x114   : > { %534 = vst.msk [vmem:[%s995_s19 + $0x50] sm:$0xff] %vm523_vm0, %v517_v40  ;;  %v496_v49 = vmul.f32 0.1, %v422_v41  ;;  %vm488_vm10 = vcmp.ge.f32.partialorder %v462_v42, 0.0  ;;  %v504_v50 = vmul.f32 0.1, %v462_v42  ;;  %v432_v57 = vadd.f32 %v711_v47, %v986_v63 }
 0x115   : > { %vm479_vm11 = vcmp.ge.f32.partialorder %v417_v45, 0.0  ;;  %v495_v53 = vmul.f32 0.1, %v417_v45  ;;  %vm487_vm12 = vcmp.ge.f32.partialorder %v457_v46, 0.0  ;;  %v503_v54 = vmul.f32 0.1, %v457_v46 }
 0x116   : > { %v512_v55 = vsel %vm480_vm9, %v422_v41, %v496_v49  ;;  %v520_v56 = vsel %vm488_vm10, %v462_v42, %v504_v50  ;;  %v472_v58 = vadd.f32 %v723_v48, %v328_v51  ;;  %v426_v59 = vpop.f32.mrb[7].mxu0  ;;  %v466_v60 = vpop.f32.mrb[7].mxu1  ;;  %vm482_vm13 = vcmp.ge.f32.partialorder %v432_v57, 0.0 }
 0x117   : > { %529 = vst.msk [vmem:[%s995_s19 + $0x28] sm:$0xff] %vm523_vm0, %v512_v55  ;;  %537 = vst.msk [vmem:[%s995_s19 + $0x68] sm:$0xff] %vm523_vm0, %v520_v56  ;;  %v511_v61 = vsel %vm479_vm11, %v417_v45, %v495_v53  ;;  %v519_v62 = vsel %vm487_vm12, %v457_v46, %v503_v54  ;;  %v427_v1 = vadd.f32 %v426_v59, %v988_v0  ;;  %v498_v63 = vmul.f32 0.1, %v432_v57 }
 0x118   : > { %v467_v2 = vadd.f32 %v466_v60, %v323_v52  ;;  %528 = vst.msk [vmem:[%s995_s19 + $0x20] sm:$0xff] %vm523_vm0, %v511_v61  ;;  %536 = vst.msk [vmem:[%s995_s19 + $0x60] sm:$0xff] %vm523_vm0, %v519_v62  ;;  %vm490_vm14 = vcmp.ge.f32.partialorder %v472_v58, 0.0  ;;  %v506_v3 = vmul.f32 0.1, %v472_v58 }
 0x119   : > { %vm481_vm15 = vcmp.ge.f32.partialorder %v427_v1, 0.0  ;;  %v497_v4 = vmul.f32 0.1, %v427_v1  ;;  %v514_v6 = vsel %vm482_vm13, %v432_v57, %v498_v63 }
 0x11a   : > { %vm489_vm1 = vcmp.ge.f32.partialorder %v467_v2, 0.0  ;;  %v505_v5 = vmul.f32 0.1, %v467_v2  ;;  %v522_v7 = vsel %vm490_vm14, %v472_v58, %v506_v3  ;;  %531 = vst.msk [vmem:[%s995_s19 + $0x38] sm:$0xff] %vm523_vm0, %v514_v6 }
 0x11b   : > { %539 = vst.msk [vmem:[%s995_s19 + $0x78] sm:$0xff] %vm523_vm0, %v522_v7  ;;  %v513_v0 = vsel %vm481_vm15, %v427_v1, %v497_v4 }
 0x11c   : > { %v521_v8 = vsel %vm489_vm1, %v467_v2, %v505_v5  ;;  %530 = vst.msk [vmem:[%s995_s19 + $0x30] sm:$0xff] %vm523_vm0, %v513_v0 }
 0x11d   : > { %538 = vst.msk [vmem:[%s995_s19 + $0x70] sm:$0xff] %vm523_vm0, %v521_v8 }
 0x11e PF: > { %s13_s14 = sadd.s32 1, %s821_s14   ;;  %s1045_s12 = smov %s817_s13 }
 0x11f   : > { %p10_p5 = scmp.ge.s32.totalorder %s13_s14, 4   ;;  %s1046_s13 = smov %s1048_s15 }
 0x121   :  { %12 = sbr.rel (!%p10_p5) target bundleno = 2 (0x2), region = 62 }

// kernel: _lambda_.51
= control target key start
LH: loop header
LB: loop body
LE: loop exit
PB: predicated region body
PF: predicated region fallthrough
CT: control target
= control target key end

     0   :  { %s1094_s0 = inlined_call_operand.vmem [shape: f32[2,128,3,3], index: 0, kind: input, shape index: {}]   ;;  %s1095_s1 = inlined_call_operand.vmem [shape: f32[2,128,3,3], index: 1, kind: input, shape index: {}]   ;;  %s1096_s2 = inlined_call_operand.vmem [shape: f32[2,128,3,3], index: 2, kind: input, shape index: {}]   ;;  %s1097_s3 = inlined_call_operand.vmem [shape: f32[2,128,3,3], index: 3, kind: input, shape index: {}]   ;;  %s1098_s4 = inlined_call_operand.vmem [shape: f32[1152], index: 4, kind: input, shape index: {}]   ;;  %s1099_s5 = inlined_call_operand.vmem [shape: f32[128], index: 5, kind: input, shape index: {}]   ;;  %s1100_s6 = inlined_call_operand.vmem [shape: f32[2,128,2,2], index: 6, kind: output, shape index: {}]  }
   0x1   :  { %1105 = sst [smem:[#allocation10_spill]] %s1094_s0 }
   0x2   :  { %1106 = sst [smem:[#allocation11_spill]] %s1096_s2 }
   0x3   :  { %1107 = sst [smem:[#allocation12_spill]] %s1098_s4 }
   0x4   :  { %1108 = sst [smem:[#allocation13_spill]] %s1099_s5 }
   0x5   :  { %1109 = sst [smem:[#allocation14_spill]] %s1100_s6 }
   0x6   :  { %11 = vsyncpa [#allocation3], 0 }
   0x7   :  { %12 = vsyncpa [#allocation5], 0  ;;  %s916_s21 = smov 0   ;;  %s918_s22 = smov 0  }
   0x8   :  { %s920_s23 = smov 0   ;;  %s922_s24 = smov 0  }
   0x9   :  { %s924_s25 = smov 0  }
   0xa LB: > { %s693_s26 = sadd.s32 4294967295, %s872_s25   ;;  %s27_s27 = sadd.s32 1, %s864_s23  ;;  %s872_s25 = sphi %s924_s25, %s18_s25   ;;  %s868_s24 = sphi %s922_s24, %s1133_s24   ;;  %s864_s23 = sphi %s920_s23, %s1132_s23   ;;  %s860_s22 = sphi %s918_s22, %s1131_s22   ;;  %s856_s21 = sphi %s916_s21, %s1130_s21  }
   0xb   : > { %p28_p0 = scmp.ge.s32.totalorder %s27_s27, 2  ;;  %s30_s28 = sadd.s32 1, %s868_s24 }
   0xc   : > { %p695_p1 = scmp.ge.s32.totalorder %s872_s25, 1  ;;  %p217_p2 = scmp.lt.s32.totalorder %s872_s25, 5 }
   0xd   : > { %s1135_s27 = smov (%p28_p0, %s27_s27), 0  ;;  %s1137_s28 = smov (!%p28_p0, %s30_s28), %s868_s24 }
   0xe   : > { %p949_p3 = pnand %p695_p1, %p217_p2  ;;  %p32_p4 = scmp.ge.s32.totalorder %s1137_s28, 2 }
   0xf   : > { %p953_p5 = scmp.eq.s32.totalorder %s693_s26, 0  ;;  %s1112_s4 = sld [smem:[#allocation12_spill]] }
  0x10   : > { %s1110_s29 = scalar_select %p949_p3, 1, 0 }
  0x11   : > { %s1111_s30 = scalar_select %p953_p5, 1, 0 }
  0x12   : > { %p730_p6 = pneg %p949_p3  ;;  %s1139_s28 = smov (%p32_p4, %s1137_s28), 0 }
  0x13   : > { %1113 = sst [smem:[#allocation8_spill]] %s1139_s28  ;;  %s1115_s5 = sld [smem:[#allocation13_spill]] }
  0x14   : > { %p966_p7 = pnand %p953_p5, %p730_p6 }
  0x15   : > { %s230_s9 = sshll.u32 %s1112_s4, 4  ;;  %s231_s9 = int_to_ptr.vmem [resolvable:$true] %s230_s9 }
  0x16   : > { %s792_s14 = scalar_lea.vmem %s231_s9, 144  ;;  %p794_p9 = pneg %p966_p7 }
  0x17   : > { %p793_p8 = scmp.ne.s32.totalorder %s231_s9, %s792_s14  ;;  %s799_s15 = scalar_lea.vmem %s231_s9, 256 }
  0x18   : > { %p800_p12 = scmp.lt.s32.totalorder %s231_s9, %s231_s9  ;;  %p801_p13 = scmp.lt.s32.totalorder %s799_s15, %s792_s14 }
  0x19   : > { %s241_s13 = sshll.u32 %s1115_s5, 4  ;;  %p795_p10 = pnand %p794_p9, %p793_p8  ;;  %s242_s13 = int_to_ptr.vmem [resolvable:$true] %s241_s13 }
  0x1a   : > { %p802_p0 = por %p801_p13, %p800_p12 }
  0x1b   : > { %p796_p11 = pneg %p795_p10 }
  0x1d   : > { %p803_p1 = pnand %p802_p0, %p796_p11 }
  0x1f   : > { %806 = shalt.err (!%p803_p1)
}
  0x20   : > { %s878_s16 = smov [#allocation2]   ;;  %s807_s17 = scalar_lea.vmem %s242_s13, 16 }
  0x21   : > { %733 = dma.vmem_to_smem (!%p966_p7), %s231_s9, 144, %s878_s16, [#allocation3]  }
  0x22   : > { %p808_p2 = scmp.ne.s32.totalorder %s242_s13, %s807_s17  ;;  %p815_p5 = scmp.lt.s32.totalorder %s242_s13, %s242_s13 }
  0x23   : > { %p816_p8 = scmp.lt.s32.totalorder %s807_s17, %s807_s17 }
  0x24   : > { %p810_p4 = pnand %p808_p2, %p794_p9 }
  0x25   : > { %p817_p10 = por %p816_p8, %p815_p5 }
  0x26   : > { %p811_p6 = pneg %p810_p4 }
  0x28   : > { %p818_p3 = pnand %p817_p10, %p811_p6 }
  0x2a   : > { %821 = shalt.err (!%p818_p3)
}
  0x2b   : > { %s879_s18 = smov [#allocation4]   ;;  %p1116_p11 = scmp.ne.s32.totalorder %s1110_s29, 0 }
  0x2c   : > { %736 = dma.vmem_to_smem (!%p966_p7), %s242_s13, 16, %s879_s18, [#allocation5]  }
  0x2d   : > { %306 = sbr.rel (%p1116_p11) target bundleno = 221 (0xdd), region = 44  ;;  %p1117_p12 = scmp.ne.s32.totalorder (!%p1116_p11), %s1111_s30, 0 }
  0x34   : > { %847 = dma.done.wait (%p1117_p12), [#allocation3], 144  }
  0x35   : > { %849 = vsyncadd (%p1117_p12), [#allocation3], 4294967152 }
  0x36   : > { %851 = dma.done.wait (%p1117_p12), [#allocation5], 16  }
  0x37   : > { %853 = vsyncadd (%p1117_p12), [#allocation5], 4294967280 }
  0x38   : > { %316 = sfence }
  0x39   : > { %s996_s19 = sshll.u32 %s856_s21, 6  ;;  %p377_p3 = scmp.lt.s32.totalorder %s860_s22, 1 }
  0x3a   : > { %1118 = sst [smem:[#allocation9_spill]] %s996_s19  ;;  %p379_p5 = scmp.lt.s32.totalorder %s996_s19, 127 }
  0x3b   : > { %s1141_s22 = smov (!%p377_p3, %s860_s22), 1  ;;  %s1121_s6 = sld [smem:[#allocation14_spill]] }
  0x3c   : > { %s380_s20 = scalar_select %p379_p5, %s996_s19, 127 }
  0x3d   : > { %s703_s26 = sshll.u32 %s1141_s22, 7 }
  0x3e   : > { %s382_s29 = sadd.s32 %s703_s26, %s380_s20 }
  0x3f   : > { %s1002_s7 = sshll.u32 %s382_s29, 2  ;;  %s716_s30 = sshll.u32 %s382_s29, 1 }
  0x40   : > { %s1025_s29 = smov 0  }
  0x41   : > { %s1023_s26 = scalar_lea.vmem %s1121_s6, %s716_s30 }
  0x42 LB: >> { %s1122_s19 = sld [smem:[#allocation9_spill]]  ;;  %s1035_s9 = sshll.u32 %s876_s29, 2  ;;  %vm510_vm0 = vcmask 9216   ;;  %s876_s29 = sphi %s1025_s29, %s431_s29  }
  0x43   : >> { %s1123_s0 = sld [smem:[#allocation10_spill]]  ;;  %s1125_s2 = sld [smem:[#allocation11_spill]] }
  0x48   : >> { %s1032_s8 = sadd.s32 %s876_s29, %s1122_s19 }
  0x49   : >> { %s1038_s30 = smul.u32 9, %s1032_s8  ;;  %s1124_s21 = scalar_lea.vmem %s1123_s0, %s1002_s7 }
  0x4a   : >> { %s435_s13 = scalar_lea.vmem %s1124_s21, %s1035_s9  ;;  %s1126_s22 = scalar_lea.vmem %s1125_s2, %s1002_s7 }
  0x4b   : >> { %s458_s16 = scalar_lea.vmem %s1126_s22, %s1035_s9  ;;  %s449_s18 = sadd.s32 2, %s1038_s30  ;;  %v436_v0 = vld [vmem:[%s435_s13] sm:$0x3] }
  0x4c   : >> { %s438_s20 = sld [smem:[#allocation2 + %s1038_s30]]  ;;  %s472_s12 = sadd.s32 5, %s1038_s30  ;;  %v459_v4 = vld [vmem:[%s458_s16] sm:$0x3] }
  0x4d   : >> { %s450_s17 = sld [smem:[#allocation2 + %s449_s18]]  ;;  %s493_s11 = sadd.s32 8, %s1038_s30  ;;  %v481_v5 = vld [vmem:[%s435_s13 + $0x1] sm:$0x3] }
  0x4e   : >> { %s473_s10 = sld [smem:[#allocation2 + %s472_s12]]  ;;  %s482_s4 = sadd.s32 6, %s1038_s30 }
  0x4f   : >> { %s494_s0 = sld [smem:[#allocation2 + %s493_s11]]  ;;  %s460_s6 = sadd.s32 3, %s1038_s30 }
  0x50   : >> { %s483_s5 = sld [smem:[#allocation2 + %s482_s4]]  ;;  %s444_s15 = sadd.s32 1, %s1038_s30 }
  0x51   : >> { %s461_s14 = sld [smem:[#allocation2 + %s460_s6]]  ;;  %s1127_s22 = scalar_lea.vmem %s1095_s1, %s1002_s7 }
  0x52   : >> { %v439_v1 = vstv %s438_s20  ;;  %s445_s21 = sld [smem:[#allocation2 + %s444_s15]]  ;;  %s442_s11 = scalar_lea.vmem %s1127_s22, %s1035_s9 }
  0x53   : >> { %v451_v2 = vstv %s450_s17  ;;  %v440_v3 = vmul.f32 %v439_v1, %v436_v0  ;;  %s467_s2 = sadd.s32 4, %s1038_s30  ;;  %s1128_s6 = scalar_lea.vmem %s1097_s3, %s1002_s7  ;;  %v443_v12 = vld [vmem:[%s442_s11] sm:$0x3] }
  0x54   : >> { %v452_v6 = vmul.f32 %v451_v2, %v436_v0  ;;  %v474_v7 = vstv %s473_s10  ;;  %s468_s4 = sld [smem:[#allocation2 + %s467_s2]]  ;;  %s465_s20 = scalar_lea.vmem %s1128_s6, %s1035_s9  ;;  %v487_v20 = vld [vmem:[%s442_s11 + $0x1] sm:$0x3] }
  0x55   : >> { %v495_v8 = vstv %s494_s0  ;;  %s488_s15 = sadd.s32 7, %s1038_s30  ;;  %s880_s17 = smov 127   ;;  %v475_v9 = vmul.f32 %v474_v7, %v459_v4  ;;  %v466_v17 = vld [vmem:[%s465_s20] sm:$0x3] }
  0x56   : >> { %454 = vrot.lane.b32.xlu0 %v452_v6, %s880_s17  ;;  %v496_v10 = vmul.f32 %v495_v8, %v481_v5  ;;  %v484_v11 = vstv %s483_s5  ;;  %s489_s13 = sld [smem:[#allocation2 + %s488_s15]]  ;;  %s719_s2 = sshll.u32 %s876_s29, 1 }
  0x57   : >> { %v485_v13 = vmul.f32 %v484_v11, %v481_v5  ;;  %v462_v14 = vstv %s461_s14  ;;  %s502_s0 = sld [smem:[#allocation4 + %s1032_s8]]  ;;  %s509_s5 = scalar_lea.vmem %s1023_s26, %s719_s2 }
  0x58   : >> { %498 = vrot.lane.b32.xlu1 %v496_v10, %s880_s17  ;;  %v463_v15 = vmul.f32 %v462_v14, %v459_v4  ;;  %v446_v16 = vstv %s445_s21  ;;  %s431_s29 = sadd.s32 1, %s876_s29  }
  0x59   : >> { %v447_v18 = vmul.f32 %v446_v16, %v443_v12  ;;  %p428_p7 = scmp.ge.s32.totalorder %s431_s29, 64  }
  0x5a   : >> { %477 = vrot.lane.b32.xlu0 %v475_v9, %s880_s17  ;;  %v469_v19 = vstv %s468_s4 }
  0x5b   : >> { %v448_v21 = vadd.f32 %v447_v18, %v440_v3  ;;  %v470_v22 = vmul.f32 %v469_v19, %v466_v17 }
  0x5c   : >> { %v490_v23 = vstv %s489_s13 }
  0x5d   : >> { %v491_v24 = vmul.f32 %v490_v23, %v487_v20  ;;  %v503_v34 = vstv %s502_s0 }
  0xc8   : >> { %v455_v25 = vpop.permute.xlu0 %454 }
  0xc9   : >> { %v457_v26 = vadd.f32 %v455_v25, %v448_v21 }
  0xca   : >> { %v499_v32 = vpop.permute.xlu1 %498 }
  0xcb   : >> { %v464_v27 = vadd.f32 %v463_v15, %v457_v26 }
  0xcc   : >> { %v478_v28 = vpop.permute.xlu0 %477 }
  0xcd   : >> { %v471_v29 = vadd.f32 %v470_v22, %v464_v27 }
  0xcf   : >> { %v480_v30 = vadd.f32 %v478_v28, %v471_v29 }
  0xd1   : >> { %v486_v31 = vadd.f32 %v485_v13, %v480_v30 }
  0xd3   : >> { %v492_v33 = vadd.f32 %v491_v24, %v486_v31 }
  0xd5   : >> { %v501_v35 = vadd.f32 %v499_v32, %v492_v33 }
  0xd6   : > { %430 = sbr.rel (!%p428_p7) target bundleno = 66 (0x42), region = 104 }
  0xd7   : >> { %v504_v36 = vadd.f32 %v503_v34, %v501_v35 }
  0xd9   : >> { %vm505_vm1 = vcmp.ge.f32.partialorder %v504_v36, 0.0  ;;  %v506_v37 = vmul.f32 0.1, %v504_v36 }
  0xdb   : >> { %v507_v38 = vsel %vm505_vm1, %v504_v36, %v506_v37 }
  0xdc   : >> { %511 = vst.msk [vmem:[%s509_s5] sm:$0x3] %vm510_vm0, %v507_v38 }
  0xdd PF: > { %s18_s25 = sadd.s32 1, %s872_s25   ;;  %s1129_s28 = sld [smem:[#allocation8_spill]] }
  0xde   : > { %p15_p9 = scmp.ge.s32.totalorder %s18_s25, 6   ;;  %s1130_s21 = smov %s864_s23 }
  0xdf   : > { %s1131_s22 = smov %s868_s24  ;;  %s1132_s23 = smov %s1135_s27 }
  0xe0   :  { %17 = sbr.rel (!%p15_p9) target bundleno = 10 (0xa), region = 115 }
  0xe3   : > { %s1133_s24 = smov %s1129_s28 }
  0xe7   :  { %542 = vsyncpa [#allocation3], 1 }
  0xe8   :  { %544 = vsyncpa [#allocation3 + $0x1], 1 }
  0xe9   :  { %545 = vsyncpa [#allocation5], 1 }

// kernel: _lambda_.52
= control target key start
LH: loop header
LB: loop body
LE: loop exit
PB: predicated region body
PF: predicated region fallthrough
CT: control target
= control target key end

     0   :  { %s1140_s12 = smov 0   ;;  %s1142_s13 = smov 0   ;;  %s1507_s0 = inlined_call_operand.vmem [shape: f32[2,128,4], index: 0, kind: input, shape index: {}]   ;;  %s1508_s1 = inlined_call_operand.vmem [shape: f32[256,128], index: 1, kind: input, shape index: {}]   ;;  %s1509_s2 = inlined_call_operand.vmem [shape: f32[256,1], index: 2, kind: input, shape index: {}]   ;;  %s1510_s3 = inlined_call_operand.vmem [shape: f32[2,256,4], index: 3, kind: output, shape index: {}]  }
   0x1   :  { %s1144_s14 = smov 0  }
   0x2 LB: > { %s25_s15 = sadd.s32 1, %s1113_s13  ;;  %p883_p0 = scmp.ge.s32.totalorder %s1117_s14, 1  ;;  %s1117_s14 = sphi %s1144_s14, %s13_s14   ;;  %s1113_s13 = sphi %s1142_s13, %s1512_s13   ;;  %s1109_s12 = sphi %s1140_s12, %s1511_s12  }
   0x3   : > { %p27_p1 = scmp.ge.s32.totalorder %s25_s15, 2  ;;  %p156_p2 = scmp.lt.s32.totalorder %s1117_s14, 3 }
   0x5   : > { %s1514_s15 = smov (%p27_p1, %s25_s15), 0  ;;  %p157_p3 = pnand %p883_p0, %p156_p2 }
   0x6   : > { %p186_p4 = scmp.lt.s32.totalorder (!%p157_p3), %s1109_s12, 1  ;;  %v252_v0 = vld [vmem:[%s1509_s2 + $0x10] sm:$0xff] (!%p157_p3)  ;;  %v250_v1 = vld [vmem:[%s1509_s2] sm:$0xff] (!%p157_p3)  ;;  %v1119_v2 = vmov (!%p157_p3), 0   ;;  %v253_v5 = vld [vmem:[%s1509_s2 + $0x18] sm:$0xff] (!%p157_p3)  ;;  %vm763_vm0 = vcmask (!%p157_p3), 31744  }
   0x7   : > { %160 = sbr.rel (%p157_p3) target bundleno = 302 (0x12e), region = 32  ;;  %1094 = vset.pattern.permute.xlu1 (!%p157_p3), %v1119_v2  ;;  %1093 = vset.pattern.permute.xlu0 (!%p157_p3), %v1119_v2  ;;  %v202_v3 = vld [vmem:[%s1508_s1] sm:$0xff] (!%p157_p3)  ;;  %v251_v6 = vld [vmem:[%s1509_s2 + $0x8] sm:$0xff] (!%p157_p3)  ;;  %v257_v20 = vld [vmem:[%s1509_s2 + $0x38] sm:$0xff] (!%p157_p3) }
   0x8   : > { %v218_v4 = vld [vmem:[%s1508_s1 + $0x80] sm:$0xff] (!%p157_p3)  ;;  %294 = vperm.xlu1 (!%p157_p3), %1094, %v252_v0   ;;  %284 = vperm.xlu0 (!%p157_p3), %1093, %v250_v1   ;;  %v255_v15 = vld [vmem:[%s1509_s2 + $0x28] sm:$0xff] (!%p157_p3)  ;;  %v256_v21 = vld [vmem:[%s1509_s2 + $0x30] sm:$0xff] (!%p157_p3) }
   0x9   : > { %972 = vmatprep.mubr.f32.mxu0 (!%p157_p3), %v202_v3  ;;  %996 = vmatprep.mubr.f32.mxu1 (!%p157_p3), %v218_v4  ;;  %v254_v16 = vld [vmem:[%s1509_s2 + $0x20] sm:$0xff] (!%p157_p3)  ;;  %v259_v25 = vld [vmem:[%s1509_s2 + $0x48] sm:$0xff] (!%p157_p3)  ;;  %v261_v30 = vld [vmem:[%s1509_s2 + $0x58] sm:$0xff] (!%p157_p3) }
   0xa   : > { %v258_v26 = vld [vmem:[%s1509_s2 + $0x40] sm:$0xff] (!%p157_p3)  ;;  %v260_v31 = vld [vmem:[%s1509_s2 + $0x50] sm:$0xff] (!%p157_p3)  ;;  %v263_v35 = vld [vmem:[%s1509_s2 + $0x68] sm:$0xff] (!%p157_p3) }
   0xb   : > { %v262_v36 = vld [vmem:[%s1509_s2 + $0x60] sm:$0xff] (!%p157_p3)  ;;  %v265_v40 = vld [vmem:[%s1509_s2 + $0x78] sm:$0xff] (!%p157_p3)  ;;  %v264_v41 = vld [vmem:[%s1509_s2 + $0x70] sm:$0xff] (!%p157_p3) }
   0xc   : > { %299 = vperm.xlu1 (!%p157_p3), %1094, %v253_v5   ;;  %289 = vperm.xlu0 (!%p157_p3), %1093, %v251_v6   ;;  %v267_v43 = vld [vmem:[%s1509_s2 + $0x88] sm:$0xff] (!%p157_p3)  ;;  %v266_v44 = vld [vmem:[%s1509_s2 + $0x80] sm:$0xff] (!%p157_p3)  ;;  %v269_v45 = vld [vmem:[%s1509_s2 + $0x98] sm:$0xff] (!%p157_p3) }
   0xd   : > { %v268_v46 = vld [vmem:[%s1509_s2 + $0x90] sm:$0xff] (!%p157_p3)  ;;  %v203_v47 = vld [vmem:[%s1508_s1 + $0x8] sm:$0xff] (!%p157_p3)  ;;  %v270_v52 = vld [vmem:[%s1509_s2 + $0xa0] sm:$0xff] (!%p157_p3) }
   0xe   : > { %s1516_s12 = smov (!%p186_p4, %s1109_s12), 1  ;;  %v219_v48 = vld [vmem:[%s1508_s1 + $0x88] sm:$0xff]  ;;  %v204_v49 = vld [vmem:[%s1508_s1 + $0x10] sm:$0xff]  ;;  %v205_v53 = vld [vmem:[%s1508_s1 + $0x18] sm:$0xff] }
   0xf   : > { %s890_s28 = sshll.u32 %s1516_s12, 7  ;;  %v220_v50 = vld [vmem:[%s1508_s1 + $0x90] sm:$0xff]  ;;  %v271_v51 = vld [vmem:[%s1509_s2 + $0xa8] sm:$0xff]  ;;  %v221_v54 = vld [vmem:[%s1508_s1 + $0x98] sm:$0xff]  ;;  %s891_s7 = sshll.u32 %s1516_s12, 8 }
  0x10   : > { %s1182_s4 = scalar_lea.vmem %s1507_s0, %s890_s28  ;;  %309 = vperm.xlu1 %1094, %v255_v15   ;;  %304 = vperm.xlu0 %1093, %v254_v16   ;;  %v206_v55 = vld [vmem:[%s1508_s1 + $0x20] sm:$0xff]  ;;  %v273_v57 = vld [vmem:[%s1509_s2 + $0xb8] sm:$0xff]  ;;  %v272_v58 = vld [vmem:[%s1509_s2 + $0xb0] sm:$0xff]  ;;  %s1408_s9 = scalar_lea.vmem %s1510_s3, %s891_s7 }
  0x11   : > { %v234_v7 = vld [vmem:[%s1182_s4] sm:$0xff]  ;;  %v235_v8 = vld [vmem:[%s1182_s4 + $0x8] sm:$0xff]  ;;  %v236_v9 = vld [vmem:[%s1182_s4 + $0x10] sm:$0xff] }
  0x12   : > { %v1020_v10 = vpack.c.bf16 %v235_v8, %v234_v7  ;;  %v237_v11 = vld [vmem:[%s1182_s4 + $0x18] sm:$0xff]  ;;  %v238_v13 = vld [vmem:[%s1182_s4 + $0x20] sm:$0xff]  ;;  %v239_v14 = vld [vmem:[%s1182_s4 + $0x28] sm:$0xff] }
  0x13   : > { %v1024_v12 = vpack.c.bf16 %v237_v11, %v236_v9  ;;  %v1028_v17 = vpack.c.bf16 %v239_v14, %v238_v13  ;;  %v240_v18 = vld [vmem:[%s1182_s4 + $0x30] sm:$0xff]  ;;  %v241_v19 = vld [vmem:[%s1182_s4 + $0x38] sm:$0xff]  ;;  %v242_v23 = vld [vmem:[%s1182_s4 + $0x40] sm:$0xff] }
  0x14   : > { %1021 = vmatprep.subr.bf16.mxu0 %v1020_v10  ;;  %1052 = vmatprep.subr.bf16.mxu1 %v1020_v10  ;;  %v1032_v22 = vpack.c.bf16 %v241_v19, %v240_v18  ;;  %v243_v24 = vld [vmem:[%s1182_s4 + $0x48] sm:$0xff]  ;;  %v244_v28 = vld [vmem:[%s1182_s4 + $0x50] sm:$0xff]  ;;  %v245_v29 = vld [vmem:[%s1182_s4 + $0x58] sm:$0xff] }
  0x15   : > { %1023 = vmatpush3.bf16.msra.mxu0 %v1020_v10  ;;  %1060 = vmatpush3.bf16.msra.mxu1 %v1020_v10  ;;  %v1036_v27 = vpack.c.bf16 %v243_v24, %v242_v23  ;;  %v1040_v32 = vpack.c.bf16 %v245_v29, %v244_v28  ;;  %v246_v33 = vld [vmem:[%s1182_s4 + $0x60] sm:$0xff]  ;;  %v247_v34 = vld [vmem:[%s1182_s4 + $0x68] sm:$0xff]  ;;  %v248_v38 = vld [vmem:[%s1182_s4 + $0x70] sm:$0xff] }
  0x16   : > { %1025 = vmatprep.subr.bf16.mxu0 %v1024_v12  ;;  %1053 = vmatprep.subr.bf16.mxu1 %v1024_v12  ;;  %v1044_v37 = vpack.c.bf16 %v247_v34, %v246_v33  ;;  %v249_v39 = vld [vmem:[%s1182_s4 + $0x78] sm:$0xff]  ;;  %v222_v56 = vld [vmem:[%s1508_s1 + $0xa0] sm:$0xff]  ;;  %v207_v59 = vld [vmem:[%s1508_s1 + $0x28] sm:$0xff] }
  0x17   : > { %319 = vperm.xlu1 %1094, %v257_v20   ;;  %314 = vperm.xlu0 %1093, %v256_v21   ;;  %v1048_v42 = vpack.c.bf16 %v249_v39, %v248_v38  ;;  %v223_v60 = vld [vmem:[%s1508_s1 + $0xa8] sm:$0xff]  ;;  %v208_v61 = vld [vmem:[%s1508_s1 + $0x30] sm:$0xff]  ;;  %v274_v0 = vld [vmem:[%s1509_s2 + $0xc0] sm:$0xff] }
  0x18   : > { %v224_v62 = vld [vmem:[%s1508_s1 + $0xb0] sm:$0xff]  ;;  %v275_v63 = vld [vmem:[%s1509_s2 + $0xc8] sm:$0xff]  ;;  %v209_v1 = vld [vmem:[%s1508_s1 + $0x38] sm:$0xff] }
  0x19   : > { %1027 = vmatpush3.bf16.msra.mxu0 %v1024_v12  ;;  %1061 = vmatpush3.bf16.msra.mxu1 %v1024_v12  ;;  %v225_v2 = vld [vmem:[%s1508_s1 + $0xb8] sm:$0xff]  ;;  %v210_v3 = vld [vmem:[%s1508_s1 + $0x40] sm:$0xff]  ;;  %v276_v6 = vld [vmem:[%s1509_s2 + $0xd0] sm:$0xff] }
  0x1a   : > { %1029 = vmatprep.subr.bf16.mxu0 %v1028_v17  ;;  %1054 = vmatprep.subr.bf16.mxu1 %v1028_v17  ;;  %v226_v4 = vld [vmem:[%s1508_s1 + $0xc0] sm:$0xff]  ;;  %v277_v5 = vld [vmem:[%s1509_s2 + $0xd8] sm:$0xff]  ;;  %v211_v7 = vld [vmem:[%s1508_s1 + $0x48] sm:$0xff] }
  0x1b   : > { %329 = vperm.xlu1 %1094, %v259_v25   ;;  %324 = vperm.xlu0 %1093, %v258_v26   ;;  %v227_v8 = vld [vmem:[%s1508_s1 + $0xc8] sm:$0xff]  ;;  %v212_v9 = vld [vmem:[%s1508_s1 + $0x50] sm:$0xff]  ;;  %v278_v12 = vld [vmem:[%s1509_s2 + $0xe0] sm:$0xff] }
  0x1c   : > { %v228_v10 = vld [vmem:[%s1508_s1 + $0xd0] sm:$0xff]  ;;  %v279_v11 = vld [vmem:[%s1509_s2 + $0xe8] sm:$0xff]  ;;  %v213_v13 = vld [vmem:[%s1508_s1 + $0x58] sm:$0xff] }
  0x1d   : > { %1031 = vmatpush3.bf16.msra.mxu0 %v1028_v17  ;;  %1062 = vmatpush3.bf16.msra.mxu1 %v1028_v17  ;;  %v229_v14 = vld [vmem:[%s1508_s1 + $0xd8] sm:$0xff]  ;;  %v214_v15 = vld [vmem:[%s1508_s1 + $0x60] sm:$0xff]  ;;  %v280_v18 = vld [vmem:[%s1509_s2 + $0xf0] sm:$0xff] }
  0x1e   : > { %1033 = vmatprep.subr.bf16.mxu0 %v1032_v22  ;;  %1055 = vmatprep.subr.bf16.mxu1 %v1032_v22  ;;  %v230_v16 = vld [vmem:[%s1508_s1 + $0xe0] sm:$0xff]  ;;  %v281_v17 = vld [vmem:[%s1509_s2 + $0xf8] sm:$0xff]  ;;  %v215_v19 = vld [vmem:[%s1508_s1 + $0x68] sm:$0xff] }
  0x1f   : > { %339 = vperm.xlu1 %1094, %v261_v30   ;;  %334 = vperm.xlu0 %1093, %v260_v31   ;;  %v231_v20 = vld [vmem:[%s1508_s1 + $0xe8] sm:$0xff]  ;;  %v216_v21 = vld [vmem:[%s1508_s1 + $0x70] sm:$0xff]  ;;  %v217_v23 = vld [vmem:[%s1508_s1 + $0x78] sm:$0xff] }
  0x20   : > { %v233_v24 = vld [vmem:[%s1508_s1 + $0xf8] sm:$0xff] }
  0x21   : > { %1035 = vmatpush3.bf16.msra.mxu0 %v1032_v22  ;;  %1063 = vmatpush3.bf16.msra.mxu1 %v1032_v22  ;;  %v232_v22 = vld [vmem:[%s1508_s1 + $0xf0] sm:$0xff] }
  0x22   : > { %1037 = vmatprep.subr.bf16.mxu0 %v1036_v27  ;;  %1056 = vmatprep.subr.bf16.mxu1 %v1036_v27 }
  0x23   : > { %349 = vperm.xlu1 %1094, %v263_v35   ;;  %344 = vperm.xlu0 %1093, %v262_v36  }
  0x25   : > { %1039 = vmatpush3.bf16.msra.mxu0 %v1036_v27  ;;  %1064 = vmatpush3.bf16.msra.mxu1 %v1036_v27 }
  0x26   : > { %1041 = vmatprep.subr.bf16.mxu0 %v1040_v32  ;;  %1057 = vmatprep.subr.bf16.mxu1 %v1040_v32 }
  0x27   : > { %359 = vperm.xlu1 %1094, %v265_v40   ;;  %354 = vperm.xlu0 %1093, %v264_v41  }
  0x29   : > { %1043 = vmatpush3.bf16.msra.mxu0 %v1040_v32  ;;  %1065 = vmatpush3.bf16.msra.mxu1 %v1040_v32 }
  0x2a   : > { %1045 = vmatprep.subr.bf16.mxu0 %v1044_v37  ;;  %1058 = vmatprep.subr.bf16.mxu1 %v1044_v37 }
  0x2b   : > { %369 = vperm.xlu1 %1094, %v267_v43   ;;  %364 = vperm.xlu0 %1093, %v266_v44  }
  0x2d   : > { %1047 = vmatpush3.bf16.msra.mxu0 %v1044_v37  ;;  %1066 = vmatpush3.bf16.msra.mxu1 %v1044_v37 }
  0x2e   : > { %1049 = vmatprep.subr.bf16.mxu0 %v1048_v42  ;;  %1059 = vmatprep.subr.bf16.mxu1 %v1048_v42 }
  0x2f   : > { %379 = vperm.xlu1 %1094, %v269_v45   ;;  %374 = vperm.xlu0 %1093, %v268_v46  }
  0x31   : > { %1051 = vmatpush3.bf16.msra.mxu0 %v1048_v42  ;;  %1067 = vmatpush3.bf16.msra.mxu1 %v1048_v42 }
  0x33   : > { %389 = vperm.xlu1 %1094, %v271_v51   ;;  %384 = vperm.xlu0 %1093, %v270_v52  }
  0x34   : > { %973 = vmatmul.mubr.f32.vlgmr.msra.gmra.mrb[0].mxu0 %v203_v47  ;;  %997 = vmatmul.mubr.f32.vlgmr.msra.gmra.mrb[0].mxu1 %v219_v48 }
  0x35   : > { %975 = vmatprep.mubr.f32.mxu0 %v204_v49  ;;  %999 = vmatprep.mubr.f32.mxu1 %v220_v50 }
  0x37   : > { %399 = vperm.xlu1 %1094, %v273_v57   ;;  %394 = vperm.xlu0 %1093, %v272_v58  }
  0x38   : > { %976 = vmatmul.mubr.f32.gmra.mrb[2].mxu0 %v205_v53  ;;  %1000 = vmatmul.mubr.f32.gmra.mrb[2].mxu1 %v221_v54 }
  0x39   : > { %978 = vmatprep.mubr.f32.mxu0 %v206_v55  ;;  %1002 = vmatprep.mubr.f32.mxu1 %v222_v56 }
  0x3b   : > { %409 = vperm.xlu1 %1094, %v275_v63   ;;  %404 = vperm.xlu0 %1093, %v274_v0  }
  0x3c   : > { %979 = vmatmul.mubr.f32.gmra.mrb[4].mxu0 %v207_v59  ;;  %1003 = vmatmul.mubr.f32.gmra.mrb[4].mxu1 %v223_v60 }
  0x3d   : > { %981 = vmatprep.mubr.f32.mxu0 %v208_v61  ;;  %1005 = vmatprep.mubr.f32.mxu1 %v224_v62 }
  0x3f   : > { %419 = vperm.xlu1 %1094, %v277_v5   ;;  %414 = vperm.xlu0 %1093, %v276_v6  }
  0x40   : > { %982 = vmatmul.mubr.f32.gmra.mrb[6].mxu0 %v209_v1  ;;  %1006 = vmatmul.mubr.f32.gmra.mrb[6].mxu1 %v225_v2 }
  0x41   : > { %984 = vmatprep.mubr.f32.mxu0 %v210_v3  ;;  %1008 = vmatprep.mubr.f32.mxu1 %v226_v4 }
  0x43   : > { %429 = vperm.xlu1 %1094, %v279_v11   ;;  %424 = vperm.xlu0 %1093, %v278_v12  }
  0x44   : > { %985 = vmatmul.mubr.f32.gmra.mrb[8].mxu0 %v211_v7  ;;  %1009 = vmatmul.mubr.f32.gmra.mrb[8].mxu1 %v227_v8 }
  0x45   : > { %987 = vmatprep.mubr.f32.mxu0 %v212_v9  ;;  %1011 = vmatprep.mubr.f32.mxu1 %v228_v10 }
  0x47   : > { %439 = vperm.xlu1 %1094, %v281_v17   ;;  %434 = vperm.xlu0 %1093, %v280_v18  }
  0x48   : > { %988 = vmatmul.mubr.f32.gmra.mrb[10].mxu0 %v213_v13  ;;  %1012 = vmatmul.mubr.f32.gmra.mrb[10].mxu1 %v229_v14 }
  0x49   : > { %990 = vmatprep.mubr.f32.mxu0 %v214_v15  ;;  %1014 = vmatprep.mubr.f32.mxu1 %v230_v16 }
  0x4c   : > { %991 = vmatmul.mubr.f32.gmra.mrb[12].mxu0 %v215_v19  ;;  %1015 = vmatmul.mubr.f32.gmra.mrb[12].mxu1 %v231_v20 }
  0x4d   : > { %993 = vmatprep.mubr.f32.mxu0 %v216_v21  ;;  %1017 = vmatprep.mubr.f32.mxu1 %v232_v22 }
  0x50   : > { %994 = vmatmul.mubr.f32.gmra.mrb[14].mxu0 %v217_v23  ;;  %1018 = vmatmul.mubr.f32.gmra.mrb[14].mxu1 %v233_v24 }
  0x87   : > { %v295_v25 = vpop.permute.xlu1 %294  ;;  %v285_v26 = vpop.permute.xlu0 %284 }
  0x8b   : > { %v300_v27 = vpop.permute.xlu1 %299  ;;  %v290_v28 = vpop.permute.xlu0 %289 }
  0x8f   : > { %v1374_v29 = vpop.permute.xlu1 %309  ;;  %v1376_v30 = vpop.permute.xlu0 %304 }
  0x96   : > { %v1378_v31 = vpop.permute.xlu1 %319  ;;  %v1380_v32 = vpop.permute.xlu0 %314 }
  0x9a   : > { %v1382_v33 = vpop.permute.xlu1 %329  ;;  %v1384_v34 = vpop.permute.xlu0 %324 }
  0x9e   : > { %v1386_v35 = vpop.permute.xlu1 %339  ;;  %v1388_v36 = vpop.permute.xlu0 %334 }
  0xa2   : > { %v1390_v37 = vpop.permute.xlu1 %349  ;;  %v1392_v38 = vpop.permute.xlu0 %344 }
  0xa6   : > { %v1394_v39 = vpop.permute.xlu1 %359  ;;  %v1396_v40 = vpop.permute.xlu0 %354 }
  0xaa   : > { %v370_v41 = vpop.permute.xlu1 %369  ;;  %v365_v42 = vpop.permute.xlu0 %364 }
  0xae   : > { %v380_v43 = vpop.permute.xlu1 %379  ;;  %v375_v44 = vpop.permute.xlu0 %374 }
  0xb2   : > { %v390_v45 = vpop.permute.xlu1 %389  ;;  %v1398_v46 = vpop.permute.xlu0 %384 }
  0xb6   : > { %v1401_v53 = vpop.permute.xlu1 %399  ;;  %v1403_v54 = vpop.permute.xlu0 %394 }
  0xba   : > { %v1418_v9 = vpop.permute.xlu1 %409  ;;  %v1420_v10 = vpop.permute.xlu0 %404 }
 0x107   : > { %v974_v47 = vpop.f32.mrb[0].mxu0  ;;  %v998_v48 = vpop.f32.mrb[0].mxu1 }
 0x108   : > { %v514_v49 = vadd.f32 %v974_v47, %v290_v28  ;;  %v594_v50 = vadd.f32 %v998_v48, %v370_v41  ;;  %v508_v51 = vpop.f32.mrb[1].mxu0  ;;  %v588_v52 = vpop.f32.mrb[1].mxu1 }
 0x109   : > { %v509_v55 = vadd.f32 %v508_v51, %v285_v26  ;;  %v589_v56 = vadd.f32 %v588_v52, %v365_v42 }
 0x10a   : > { %vm668_vm1 = vcmp.ge.f32.partialorder %v514_v49, 0.0  ;;  %v700_v57 = vmul.f32 0.1, %v514_v49  ;;  %vm684_vm2 = vcmp.ge.f32.partialorder %v594_v50, 0.0  ;;  %v716_v58 = vmul.f32 0.1, %v594_v50 }
 0x10b   : > { %vm667_vm3 = vcmp.ge.f32.partialorder %v509_v55, 0.0  ;;  %v699_v59 = vmul.f32 0.1, %v509_v55  ;;  %vm683_vm4 = vcmp.ge.f32.partialorder %v589_v56, 0.0  ;;  %v715_v60 = vmul.f32 0.1, %v589_v56 }
 0x10c   : > { %v732_v61 = vsel %vm668_vm1, %v514_v49, %v700_v57  ;;  %v748_v62 = vsel %vm684_vm2, %v594_v50, %v716_v58  ;;  %v977_v63 = vpop.f32.mrb[2].mxu0  ;;  %v1001_v0 = vpop.f32.mrb[2].mxu1 }
 0x10d   : > { %765 = vst.msk [vmem:[%s1408_s9 + $0x8] sm:$0xff] %vm763_vm0, %v732_v61  ;;  %781 = vst.msk [vmem:[%s1408_s9 + $0x88] sm:$0xff] %vm763_vm0, %v748_v62  ;;  %v731_v1 = vsel %vm667_vm3, %v509_v55, %v699_v59  ;;  %v747_v2 = vsel %vm683_vm4, %v589_v56, %v715_v60  ;;  %v524_v3 = vadd.f32 %v977_v63, %v300_v27  ;;  %v518_v5 = vpop.f32.mrb[3].mxu0  ;;  %v598_v6 = vpop.f32.mrb[3].mxu1 }
 0x10e   : > { %v604_v4 = vadd.f32 %v1001_v0, %v380_v43  ;;  %764 = vst.msk [vmem:[%s1408_s9] sm:$0xff] %vm763_vm0, %v731_v1  ;;  %780 = vst.msk [vmem:[%s1408_s9 + $0x80] sm:$0xff] %vm763_vm0, %v747_v2  ;;  %v519_v7 = vadd.f32 %v518_v5, %v295_v25  ;;  %v599_v8 = vadd.f32 %v598_v6, %v375_v44  ;;  %v1433_v43 = vpop.permute.xlu0 %414 }
 0x10f   : > { %vm670_vm5 = vcmp.ge.f32.partialorder %v524_v3, 0.0  ;;  %v702_v11 = vmul.f32 0.1, %v524_v3  ;;  %v980_v17 = vpop.f32.mrb[4].mxu0  ;;  %v1004_v18 = vpop.f32.mrb[4].mxu1 }
 0x110   : > { %vm686_vm6 = vcmp.ge.f32.partialorder %v604_v4, 0.0  ;;  %v718_v12 = vmul.f32 0.1, %v604_v4  ;;  %vm669_vm7 = vcmp.ge.f32.partialorder %v519_v7, 0.0  ;;  %v701_v13 = vmul.f32 0.1, %v519_v7 }
 0x111   : > { %vm685_vm8 = vcmp.ge.f32.partialorder %v599_v8, 0.0  ;;  %v717_v14 = vmul.f32 0.1, %v599_v8  ;;  %v734_v15 = vsel %vm670_vm5, %v524_v3, %v702_v11  ;;  %v534_v21 = vadd.f32 %v980_v17, %v1374_v29  ;;  %v528_v23 = vpop.f32.mrb[5].mxu0  ;;  %v608_v24 = vpop.f32.mrb[5].mxu1 }
 0x112   : > { %v750_v16 = vsel %vm686_vm6, %v604_v4, %v718_v12  ;;  %767 = vst.msk [vmem:[%s1408_s9 + $0x18] sm:$0xff] %vm763_vm0, %v734_v15  ;;  %v733_v19 = vsel %vm669_vm7, %v519_v7, %v701_v13  ;;  %v614_v22 = vadd.f32 %v1004_v18, %v390_v45  ;;  %v529_v25 = vadd.f32 %v528_v23, %v1376_v30  ;;  %v420_v29 = vpop.permute.xlu1 %419 }
 0x113   : > { %783 = vst.msk [vmem:[%s1408_s9 + $0x98] sm:$0xff] %vm763_vm0, %v750_v16  ;;  %v749_v20 = vsel %vm685_vm8, %v599_v8, %v717_v14  ;;  %766 = vst.msk [vmem:[%s1408_s9 + $0x10] sm:$0xff] %vm763_vm0, %v733_v19  ;;  %v609_v26 = vadd.f32 %v608_v24, %v1398_v46  ;;  %v983_v27 = vpop.f32.mrb[6].mxu0  ;;  %v1007_v28 = vpop.f32.mrb[6].mxu1  ;;  %vm672_vm9 = vcmp.ge.f32.partialorder %v534_v21, 0.0 }
 0x114   : > { %782 = vst.msk [vmem:[%s1408_s9 + $0x90] sm:$0xff] %vm763_vm0, %v749_v20  ;;  %v704_v41 = vmul.f32 0.1, %v534_v21  ;;  %vm688_vm10 = vcmp.ge.f32.partialorder %v614_v22, 0.0  ;;  %v720_v42 = vmul.f32 0.1, %v614_v22  ;;  %v544_v46 = vadd.f32 %v983_v27, %v1378_v31 }
 0x115   : > { %vm671_vm11 = vcmp.ge.f32.partialorder %v529_v25, 0.0  ;;  %v703_v44 = vmul.f32 0.1, %v529_v25  ;;  %vm687_vm12 = vcmp.ge.f32.partialorder %v609_v26, 0.0  ;;  %v719_v45 = vmul.f32 0.1, %v609_v26 }
 0x116   : > { %v736_v30 = vsel %vm672_vm9, %v534_v21, %v704_v41  ;;  %v752_v47 = vsel %vm688_vm10, %v614_v22, %v720_v42  ;;  %v624_v48 = vadd.f32 %v1007_v28, %v1401_v53  ;;  %v538_v49 = vpop.f32.mrb[7].mxu0  ;;  %v618_v50 = vpop.f32.mrb[7].mxu1  ;;  %vm674_vm13 = vcmp.ge.f32.partialorder %v544_v46, 0.0 }
 0x117   : > { %769 = vst.msk [vmem:[%s1408_s9 + $0x28] sm:$0xff] %vm763_vm0, %v736_v30  ;;  %785 = vst.msk [vmem:[%s1408_s9 + $0xa8] sm:$0xff] %vm763_vm0, %v752_v47  ;;  %v735_v51 = vsel %vm671_vm11, %v529_v25, %v703_v44  ;;  %v751_v52 = vsel %vm687_vm12, %v609_v26, %v719_v45  ;;  %v539_v55 = vadd.f32 %v538_v49, %v1380_v32  ;;  %v986_v57 = vpop.f32.mrb[8].mxu0  ;;  %v1010_v58 = vpop.f32.mrb[8].mxu1  ;;  %v706_v31 = vmul.f32 0.1, %v544_v46 }
 0x118   : > { %v619_v56 = vadd.f32 %v618_v50, %v1403_v54  ;;  %768 = vst.msk [vmem:[%s1408_s9 + $0x20] sm:$0xff] %vm763_vm0, %v735_v51  ;;  %784 = vst.msk [vmem:[%s1408_s9 + $0xa0] sm:$0xff] %vm763_vm0, %v751_v52  ;;  %vm690_vm14 = vcmp.ge.f32.partialorder %v624_v48, 0.0  ;;  %v722_v53 = vmul.f32 0.1, %v624_v48  ;;  %v554_v61 = vadd.f32 %v986_v57, %v1382_v33  ;;  %v548_v63 = vpop.f32.mrb[9].mxu0  ;;  %v430_v8 = vpop.permute.xlu1 %429 }
 0x119   : > { %vm673_vm15 = vcmp.ge.f32.partialorder %v539_v55, 0.0  ;;  %v705_v59 = vmul.f32 0.1, %v539_v55  ;;  %v738_v32 = vsel %vm674_vm13, %v544_v46, %v706_v31  ;;  %v634_v62 = vadd.f32 %v1010_v58, %v1418_v9  ;;  %v628_v0 = vpop.f32.mrb[9].mxu1  ;;  %v425_v9 = vpop.permute.xlu0 %424 }
 0x11a   : > { %vm689_vm1 = vcmp.ge.f32.partialorder %v619_v56, 0.0  ;;  %v721_v60 = vmul.f32 0.1, %v619_v56  ;;  %v754_v54 = vsel %vm690_vm14, %v624_v48, %v722_v53  ;;  %771 = vst.msk [vmem:[%s1408_s9 + $0x38] sm:$0xff] %vm763_vm0, %v738_v32  ;;  %v549_v3 = vadd.f32 %v548_v63, %v1384_v34 }
 0x11b   : > { %787 = vst.msk [vmem:[%s1408_s9 + $0xb8] sm:$0xff] %vm763_vm0, %v754_v54  ;;  %v737_v1 = vsel %vm673_vm15, %v539_v55, %v705_v59  ;;  %v629_v4 = vadd.f32 %v628_v0, %v1420_v10  ;;  %v989_v5 = vpop.f32.mrb[10].mxu0  ;;  %v1013_v6 = vpop.f32.mrb[10].mxu1  ;;  %vm676_vm2 = vcmp.ge.f32.partialorder %v554_v61, 0.0  ;;  %v708_v33 = vmul.f32 0.1, %v554_v61 }
 0x11c   : > { %v753_v2 = vsel %vm689_vm1, %v619_v56, %v721_v60  ;;  %770 = vst.msk [vmem:[%s1408_s9 + $0x30] sm:$0xff] %vm763_vm0, %v737_v1  ;;  %vm692_vm3 = vcmp.ge.f32.partialorder %v634_v62, 0.0  ;;  %v724_v7 = vmul.f32 0.1, %v634_v62  ;;  %vm675_vm4 = vcmp.ge.f32.partialorder %v549_v3, 0.0  ;;  %v558_v15 = vpop.f32.mrb[11].mxu0  ;;  %v440_v48 = vpop.permute.xlu1 %439 }
 0x11d   : > { %786 = vst.msk [vmem:[%s1408_s9 + $0xb0] sm:$0xff] %vm763_vm0, %v753_v2  ;;  %v707_v11 = vmul.f32 0.1, %v549_v3  ;;  %vm691_vm5 = vcmp.ge.f32.partialorder %v629_v4, 0.0  ;;  %v723_v34 = vmul.f32 0.1, %v629_v4  ;;  %v740_v10 = vsel %vm676_vm2, %v554_v61, %v708_v33  ;;  %v435_v49 = vpop.permute.xlu0 %434 }
 0x11e   : > { %v756_v12 = vsel %vm692_vm3, %v634_v62, %v724_v7  ;;  %v564_v13 = vadd.f32 %v989_v5, %v1386_v35  ;;  %v644_v14 = vadd.f32 %v1013_v6, %v420_v29  ;;  %v638_v16 = vpop.f32.mrb[11].mxu1  ;;  %773 = vst.msk [vmem:[%s1408_s9 + $0x48] sm:$0xff] %vm763_vm0, %v740_v10  ;;  %v559_v19 = vadd.f32 %v558_v15, %v1388_v36 }
 0x11f   : > { %789 = vst.msk [vmem:[%s1408_s9 + $0xc8] sm:$0xff] %vm763_vm0, %v756_v12  ;;  %v739_v17 = vsel %vm675_vm4, %v549_v3, %v707_v11  ;;  %v755_v18 = vsel %vm691_vm5, %v629_v4, %v723_v34  ;;  %v639_v20 = vadd.f32 %v638_v16, %v1433_v43  ;;  %v992_v21 = vpop.f32.mrb[12].mxu0  ;;  %v1016_v22 = vpop.f32.mrb[12].mxu1 }
 0x120   : > { %772 = vst.msk [vmem:[%s1408_s9 + $0x40] sm:$0xff] %vm763_vm0, %v739_v17  ;;  %788 = vst.msk [vmem:[%s1408_s9 + $0xc0] sm:$0xff] %vm763_vm0, %v755_v18  ;;  %vm678_vm6 = vcmp.ge.f32.partialorder %v564_v13, 0.0  ;;  %v710_v35 = vmul.f32 0.1, %v564_v13  ;;  %vm694_vm7 = vcmp.ge.f32.partialorder %v644_v14, 0.0  ;;  %v574_v27 = vadd.f32 %v992_v21, %v1390_v37 }
 0x121   : > { %v726_v23 = vmul.f32 0.1, %v644_v14  ;;  %vm677_vm8 = vcmp.ge.f32.partialorder %v559_v19, 0.0  ;;  %v709_v24 = vmul.f32 0.1, %v559_v19  ;;  %vm693_vm9 = vcmp.ge.f32.partialorder %v639_v20, 0.0 }
 0x122   : > { %v725_v25 = vmul.f32 0.1, %v639_v20  ;;  %v742_v36 = vsel %vm678_vm6, %v564_v13, %v710_v35  ;;  %v654_v28 = vadd.f32 %v1016_v22, %v430_v8  ;;  %v568_v41 = vpop.f32.mrb[13].mxu0  ;;  %v648_v42 = vpop.f32.mrb[13].mxu1  ;;  %vm680_vm10 = vcmp.ge.f32.partialorder %v574_v27, 0.0 }
 0x123   : > { %v758_v26 = vsel %vm694_vm7, %v644_v14, %v726_v23  ;;  %775 = vst.msk [vmem:[%s1408_s9 + $0x58] sm:$0xff] %vm763_vm0, %v742_v36  ;;  %v741_v29 = vsel %vm677_vm8, %v559_v19, %v709_v24  ;;  %v569_v44 = vadd.f32 %v568_v41, %v1392_v38  ;;  %v649_v45 = vadd.f32 %v648_v42, %v425_v9  ;;  %v995_v30 = vpop.f32.mrb[14].mxu0  ;;  %v1019_v47 = vpop.f32.mrb[14].mxu1 }
 0x124   : > { %791 = vst.msk [vmem:[%s1408_s9 + $0xd8] sm:$0xff] %vm763_vm0, %v758_v26  ;;  %v757_v43 = vsel %vm693_vm9, %v639_v20, %v725_v25  ;;  %774 = vst.msk [vmem:[%s1408_s9 + $0x50] sm:$0xff] %vm763_vm0, %v741_v29  ;;  %v712_v37 = vmul.f32 0.1, %v574_v27  ;;  %vm696_vm11 = vcmp.ge.f32.partialorder %v654_v28, 0.0  ;;  %v584_v55 = vadd.f32 %v995_v30, %v1394_v39  ;;  %v578_v57 = vpop.f32.mrb[15].mxu0 }
 0x125   : > { %790 = vst.msk [vmem:[%s1408_s9 + $0xd0] sm:$0xff] %vm763_vm0, %v757_v43  ;;  %v728_v46 = vmul.f32 0.1, %v654_v28  ;;  %vm679_vm12 = vcmp.ge.f32.partialorder %v569_v44, 0.0  ;;  %v711_v50 = vmul.f32 0.1, %v569_v44  ;;  %v664_v56 = vadd.f32 %v1019_v47, %v440_v48 }
 0x126   : > { %vm695_vm13 = vcmp.ge.f32.partialorder %v649_v45, 0.0  ;;  %v727_v38 = vmul.f32 0.1, %v649_v45  ;;  %v744_v51 = vsel %vm680_vm10, %v574_v27, %v712_v37  ;;  %v658_v58 = vpop.f32.mrb[15].mxu1  ;;  %v579_v59 = vadd.f32 %v578_v57, %v1396_v40 }
 0x127   : > { %v760_v52 = vsel %vm696_vm11, %v654_v28, %v728_v46  ;;  %777 = vst.msk [vmem:[%s1408_s9 + $0x68] sm:$0xff] %vm763_vm0, %v744_v51  ;;  %v743_v31 = vsel %vm679_vm12, %v569_v44, %v711_v50  ;;  %v659_v60 = vadd.f32 %v658_v58, %v435_v49  ;;  %vm682_vm14 = vcmp.ge.f32.partialorder %v584_v55, 0.0 }
 0x128   : > { %793 = vst.msk [vmem:[%s1408_s9 + $0xe8] sm:$0xff] %vm763_vm0, %v760_v52  ;;  %v759_v53 = vsel %vm695_vm13, %v649_v45, %v727_v38  ;;  %776 = vst.msk [vmem:[%s1408_s9 + $0x60] sm:$0xff] %vm763_vm0, %v743_v31  ;;  %v714_v39 = vmul.f32 0.1, %v584_v55  ;;  %vm698_vm15 = vcmp.ge.f32.partialorder %v664_v56, 0.0  ;;  %vm681_vm1 = vcmp.ge.f32.partialorder %v579_v59, 0.0 }
 0x129   : > { %792 = vst.msk [vmem:[%s1408_s9 + $0xe0] sm:$0xff] %vm763_vm0, %v759_v53  ;;  %v730_v32 = vmul.f32 0.1, %v664_v56  ;;  %v713_v54 = vmul.f32 0.1, %v579_v59  ;;  %vm697_vm2 = vcmp.ge.f32.partialorder %v659_v60, 0.0 }
 0x12a   : > { %v729_v61 = vmul.f32 0.1, %v659_v60  ;;  %v746_v62 = vsel %vm682_vm14, %v584_v55, %v714_v39 }
 0x12b   : > { %v762_v63 = vsel %vm698_vm15, %v664_v56, %v730_v32  ;;  %779 = vst.msk [vmem:[%s1408_s9 + $0x78] sm:$0xff] %vm763_vm0, %v746_v62  ;;  %v745_v40 = vsel %vm681_vm1, %v579_v59, %v713_v54 }
 0x12c   : > { %795 = vst.msk [vmem:[%s1408_s9 + $0xf8] sm:$0xff] %vm763_vm0, %v762_v63  ;;  %v761_v0 = vsel %vm697_vm2, %v659_v60, %v729_v61  ;;  %778 = vst.msk [vmem:[%s1408_s9 + $0x70] sm:$0xff] %vm763_vm0, %v745_v40 }
 0x12d   : > { %794 = vst.msk [vmem:[%s1408_s9 + $0xf0] sm:$0xff] %vm763_vm0, %v761_v0 }
 0x12e PF: > { %s13_s14 = sadd.s32 1, %s1117_s14   ;;  %s1511_s12 = smov %s1113_s13 }
 0x12f   : > { %p10_p5 = scmp.ge.s32.totalorder %s13_s14, 4   ;;  %s1512_s13 = smov %s1514_s15 }
 0x131   :  { %12 = sbr.rel (!%p10_p5) target bundleno = 2 (0x2), region = 62 }

// kernel: _lambda_.53
= control target key start
LH: loop header
LB: loop body
LE: loop exit
PB: predicated region body
PF: predicated region fallthrough
CT: control target
= control target key end

     0   :  { %s783_s0 = inlined_call_operand.vmem [shape: f32[2,256,4,4], index: 0, kind: input, shape index: {}]   ;;  %s784_s1 = inlined_call_operand.vmem [shape: f32[2304], index: 1, kind: input, shape index: {}]   ;;  %s785_s2 = inlined_call_operand.vmem [shape: f32[256], index: 2, kind: input, shape index: {}]   ;;  %s786_s3 = inlined_call_operand.vmem [shape: f32[2,256,2,2], index: 3, kind: output, shape index: {}]  }
   0x1   :  { %790 = sst [smem:[#allocation8_spill]] %s783_s0 }
   0x2   :  { %8 = vsyncpa [#allocation3], 0 }
   0x3   :  { %9 = vsyncpa [#allocation5], 0  ;;  %s651_s12 = smov 0   ;;  %s653_s13 = smov 0  }
   0x4   :  { %s655_s14 = smov 0   ;;  %s657_s15 = smov 0  }
   0x5   :  { %s659_s16 = smov 0  }
   0x6 LB: > { %s450_s17 = sadd.s32 4294967295, %s621_s16   ;;  %s24_s18 = sadd.s32 1, %s613_s14  ;;  %s621_s16 = sphi %s659_s16, %s15_s16   ;;  %s617_s15 = sphi %s657_s15, %s800_s15   ;;  %s613_s14 = sphi %s655_s14, %s799_s14   ;;  %s609_s13 = sphi %s653_s13, %s798_s13   ;;  %s605_s12 = sphi %s651_s12, %s797_s12  }
   0x7   : > { %p25_p0 = scmp.ge.s32.totalorder %s24_s18, 4  ;;  %s27_s19 = sadd.s32 1, %s617_s15 }
   0x8   : > { %p452_p1 = scmp.ge.s32.totalorder %s621_s16, 1  ;;  %p130_p2 = scmp.lt.s32.totalorder %s621_s16, 9 }
   0x9   : > { %s802_s18 = smov (%p25_p0, %s24_s18), 0  ;;  %s804_s19 = smov (!%p25_p0, %s27_s19), %s617_s15 }
   0xa   : > { %p684_p3 = pnand %p452_p1, %p130_p2  ;;  %p29_p4 = scmp.ge.s32.totalorder %s804_s19, 2 }
   0xb   : > { %p688_p5 = scmp.eq.s32.totalorder %s450_s17, 0  ;;  %s143_s24 = sshll.u32 %s784_s1, 4  ;;  %s144_s24 = int_to_ptr.vmem [resolvable:$true] %s143_s24 }
   0xc   : > { %s791_s20 = scalar_select %p684_p3, 1, 0 }
   0xd   : > { %s792_s21 = scalar_select %p688_p5, 1, 0 }
   0xe   : > { %p478_p6 = pneg %p684_p3  ;;  %s806_s19 = smov (%p29_p4, %s804_s19), 0 }
   0xf   : > { %s154_s28 = sshll.u32 %s785_s2, 4  ;;  %s541_s29 = scalar_lea.vmem %s144_s24, 288  ;;  %s155_s28 = int_to_ptr.vmem [resolvable:$true] %s154_s28 }
  0x10   : > { %p701_p7 = pnand %p688_p5, %p478_p6  ;;  %p542_p8 = scmp.ne.s32.totalorder %s144_s24, %s541_s29 }
  0x11   : > { %s548_s30 = scalar_lea.vmem %s144_s24, 384  ;;  %p549_p12 = scmp.lt.s32.totalorder %s144_s24, %s144_s24 }
  0x12   : > { %p543_p9 = pneg %p701_p7  ;;  %p550_p13 = scmp.lt.s32.totalorder %s548_s30, %s541_s29 }
  0x14   : > { %p544_p10 = pnand %p543_p9, %p542_p8  ;;  %p551_p0 = por %p550_p13, %p549_p12 }
  0x16   : > { %p545_p11 = pneg %p544_p10 }
  0x18   : > { %p552_p1 = pnand %p551_p0, %p545_p11 }
  0x1a   : > { %555 = shalt.err (!%p552_p1)
}
  0x1b   : > { %s627_s4 = smov [#allocation2]   ;;  %s556_s5 = scalar_lea.vmem %s155_s28, 32 }
  0x1c   : > { %481 = dma.vmem_to_smem (!%p701_p7), %s144_s24, 288, %s627_s4, [#allocation3]  }
  0x1d   : > { %p557_p2 = scmp.ne.s32.totalorder %s155_s28, %s556_s5  ;;  %p564_p5 = scmp.lt.s32.totalorder %s155_s28, %s155_s28 }
  0x1e   : > { %p565_p8 = scmp.lt.s32.totalorder %s556_s5, %s556_s5 }
  0x1f   : > { %p559_p4 = pnand %p557_p2, %p543_p9 }
  0x20   : > { %p566_p10 = por %p565_p8, %p564_p5 }
  0x21   : > { %p560_p6 = pneg %p559_p4 }
  0x23   : > { %p567_p3 = pnand %p566_p10, %p560_p6 }
  0x25   : > { %570 = shalt.err (!%p567_p3)
}
  0x26   : > { %s628_s6 = smov [#allocation4]   ;;  %p794_p11 = scmp.ne.s32.totalorder %s791_s20, 0 }
  0x27   : > { %484 = dma.vmem_to_smem (!%p701_p7), %s155_s28, 32, %s628_s6, [#allocation5]  }
  0x28   : > { %180 = sbr.rel (%p794_p11) target bundleno = 212 (0xd4), region = 32  ;;  %p795_p12 = scmp.ne.s32.totalorder (!%p794_p11), %s792_s21, 0 }
  0x2f   : > { %596 = dma.done.wait (%p795_p12), [#allocation3], 288  }
  0x30   : > { %598 = vsyncadd (%p795_p12), [#allocation3], 4294967008 }
  0x31   : > { %600 = dma.done.wait (%p795_p12), [#allocation5], 32  }
  0x32   : > { %602 = vsyncadd (%p795_p12), [#allocation5], 4294967264 }
  0x33   : > { %190 = sfence }
  0x34   : > { %s731_s7 = sshll.u32 %s605_s12, 6  ;;  %p218_p3 = scmp.lt.s32.totalorder %s609_s13, 1 }
  0x35   : > { %p220_p5 = scmp.lt.s32.totalorder %s731_s7, 255  ;;  %s796_s0 = sld [smem:[#allocation8_spill]] }
  0x36   : > { %s808_s13 = smov (!%p218_p3, %s609_s13), 1  ;;  %s747_s25 = smov 0  }
  0x37   : > { %s221_s8 = scalar_select %p220_p5, %s731_s7, 255 }
  0x38   : > { %s460_s9 = sshll.u32 %s808_s13, 8 }
  0x39   : > { %s223_s10 = sadd.s32 %s460_s9, %s221_s8 }
  0x3a   : > { %s461_s11 = sshll.u32 %s223_s10, 2  ;;  %s464_s17 = sshll.u32 %s223_s10, 1 }
  0x3b   : > { %s740_s21 = scalar_lea.vmem %s796_s0, %s461_s11  ;;  %s745_s12 = scalar_lea.vmem %s786_s3, %s464_s17 }
  0x3c LB: >> { %s754_s13 = sadd.s32 %s625_s25, %s731_s7  ;;  %s466_s26 = sshll.u32 %s625_s25, 2  ;;  %vm327_vm0 = vcmask 9216   ;;  %s625_s25 = sphi %s747_s25, %s242_s25  }
  0x3d   : >> { %s248_s27 = smul.u32 9, %s754_s13  ;;  %s246_s28 = scalar_lea.vmem %s740_s21, %s466_s26 }
  0x3e   : >> { %v247_v0 = vld [vmem:[%s246_s28] sm:$0x3]  ;;  %v295_v9 = vld [vmem:[%s246_s28 + $0x2] sm:$0x3] }
  0x3f   : >> { %s253_s29 = sadd.s32 1, %s248_s27  ;;  %s262_s4 = sadd.s32 2, %s248_s27  ;;  %v271_v2 = vld [vmem:[%s246_s28 + $0x1] sm:$0x3] }
  0x40   : >> { %s254_s30 = sld [smem:[#allocation2 + %s253_s29]]  ;;  %s277_s6 = sadd.s32 4, %s248_s27 }
  0x41   : >> { %s263_s5 = sld [smem:[#allocation2 + %s262_s4]]  ;;  %s286_s9 = sadd.s32 5, %s248_s27 }
  0x42   : >> { %s278_s8 = sld [smem:[#allocation2 + %s277_s6]]  ;;  %s301_s11 = sadd.s32 7, %s248_s27 }
  0x43   : >> { %s287_s10 = sld [smem:[#allocation2 + %s286_s9]]  ;;  %s310_s20 = sadd.s32 8, %s248_s27 }
  0x44   : >> { %s302_s17 = sld [smem:[#allocation2 + %s301_s11]]  ;;  %s272_s24 = sadd.s32 3, %s248_s27 }
  0x45   : >> { %s759_s22 = sld [smem:[#allocation2 + %s310_s20]]  ;;  %s296_s0 = sadd.s32 6, %s248_s27 }
  0x46   : >> { %s249_s23 = sld [smem:[#allocation2 + %s248_s27]]  ;;  %v255_v1 = vstv %s254_s30  ;;  %s629_s4 = smov 127  }
  0x47   : >> { %v256_v3 = vmul.f32 %v255_v1, %v247_v0  ;;  %v264_v4 = vstv %s263_s5  ;;  %s273_s26 = sld [smem:[#allocation2 + %s272_s24]]  ;;  %s630_s30 = smov 126  }
  0x48   : >> { %s297_s29 = sld [smem:[#allocation2 + %s296_s0]]  ;;  %v279_v5 = vstv %s278_s8  ;;  %v265_v6 = vmul.f32 %v264_v4, %v247_v0  ;;  %s467_s27 = sshll.u32 %s625_s25, 1 }
  0x49   : >> { %258 = vrot.lane.b32.xlu0 %v256_v3, %s629_s4  ;;  %v280_v7 = vmul.f32 %v279_v5, %v271_v2  ;;  %v288_v8 = vstv %s287_s10  ;;  %s319_s0 = sld [smem:[#allocation4 + %s754_s13]]  ;;  %s326_s28 = scalar_lea.vmem %s745_s12, %s467_s27 }
  0x4a   : >> { %v303_v10 = vstv %s302_s17  ;;  %v289_v11 = vmul.f32 %v288_v8, %v271_v2  ;;  %s242_s25 = sadd.s32 1, %s625_s25  }
  0x4b   : >> { %282 = vrot.lane.b32.xlu1 %v280_v7, %s629_s4  ;;  %v312_v13 = vstv %s759_s22  ;;  %v304_v15 = vmul.f32 %v303_v10, %v295_v9  ;;  %p239_p7 = scmp.ge.s32.totalorder %s242_s25, 64  }
  0x4c   : >> { %v250_v12 = vstv %s249_s23  ;;  %v313_v20 = vmul.f32 %v312_v13, %v295_v9 }
  0x4d   : >> { %v251_v14 = vmul.f32 %v250_v12, %v247_v0  ;;  %267 = vrot.lane.b32.xlu0 %v265_v6, %s630_s30  ;;  %v274_v16 = vstv %s273_s26 }
  0x4e   : >> { %v298_v17 = vstv %s297_s29  ;;  %v275_v18 = vmul.f32 %v274_v16, %v271_v2 }
  0x4f   : >> { %v299_v19 = vmul.f32 %v298_v17, %v295_v9  ;;  %291 = vrot.lane.b32.xlu1 %v289_v11, %s630_s30  ;;  %v320_v34 = vstv %s319_s0 }
  0x51   : >> { %306 = vrot.lane.b32.xlu0 %v304_v15, %s629_s4 }
  0x53   : >> { %315 = vrot.lane.b32.xlu1 %v313_v20, %s630_s30 }
  0xbb   : >> { %v259_v21 = vpop.permute.xlu0 %258 }
  0xbc   : >> { %v261_v23 = vadd.f32 %v259_v21, %v251_v14 }
  0xbd   : >> { %v283_v22 = vpop.permute.xlu1 %282 }
  0xbf   : >> { %v268_v24 = vpop.permute.xlu0 %267 }
  0xc0   : >> { %v270_v25 = vadd.f32 %v268_v24, %v261_v23 }
  0xc1   : >> { %v292_v27 = vpop.permute.xlu1 %291 }
  0xc2   : >> { %v276_v26 = vadd.f32 %v275_v18, %v270_v25 }
  0xc3   : >> { %v307_v30 = vpop.permute.xlu0 %306 }
  0xc4   : >> { %v285_v28 = vadd.f32 %v283_v22, %v276_v26 }
  0xc5   : >> { %v316_v32 = vpop.permute.xlu1 %315 }
  0xc6   : >> { %v294_v29 = vadd.f32 %v292_v27, %v285_v28 }
  0xc8   : >> { %v300_v31 = vadd.f32 %v299_v19, %v294_v29 }
  0xca   : >> { %v309_v33 = vadd.f32 %v307_v30, %v300_v31 }
  0xcc   : >> { %v318_v35 = vadd.f32 %v316_v32, %v309_v33 }
  0xcd   : > { %241 = sbr.rel (!%p239_p7) target bundleno = 60 (0x3c), region = 80 }
  0xce   : >> { %v321_v36 = vadd.f32 %v320_v34, %v318_v35 }
  0xd0   : >> { %vm322_vm1 = vcmp.ge.f32.partialorder %v321_v36, 0.0  ;;  %v323_v37 = vmul.f32 0.1, %v321_v36 }
  0xd2   : >> { %v324_v38 = vsel %vm322_vm1, %v321_v36, %v323_v37 }
  0xd3   : >> { %328 = vst.msk [vmem:[%s326_s28] sm:$0x3] %vm327_vm0, %v324_v38 }
  0xd4 PF: > { %s15_s16 = sadd.s32 1, %s621_s16   ;;  %s797_s12 = smov %s613_s14 }
  0xd5   : > { %p12_p9 = scmp.ge.s32.totalorder %s15_s16, 10   ;;  %s798_s13 = smov %s617_s15 }
  0xd6   : > { %s799_s14 = smov %s802_s18  ;;  %s800_s15 = smov %s806_s19 }
  0xd7   :  { %14 = sbr.rel (!%p12_p9) target bundleno = 6 (0x6), region = 91 }
  0xde   :  { %359 = vsyncpa [#allocation3], 1 }
  0xdf   :  { %361 = vsyncpa [#allocation3 + $0x1], 1 }
  0xe0   :  { %362 = vsyncpa [#allocation5], 1 }

// kernel: _lambda_.54
= control target key start
LH: loop header
LB: loop body
LE: loop exit
PB: predicated region body
PF: predicated region fallthrough
CT: control target
= control target key end

     0   :  { %s1094_s12 = smov 0   ;;  %s1096_s13 = smov 0   ;;  %s1590_s0 = inlined_call_operand.vmem [shape: f32[2,256,4], index: 0, kind: input, shape index: {}]   ;;  %s1591_s1 = inlined_call_operand.vmem [shape: f32[256,256], index: 1, kind: input, shape index: {}]   ;;  %s1592_s2 = inlined_call_operand.vmem [shape: f32[256,1], index: 2, kind: input, shape index: {}]   ;;  %s1593_s3 = inlined_call_operand.vmem [shape: f32[2,256,4], index: 3, kind: output, shape index: {}]  }
   0x1   :  { %s1098_s14 = smov 0  }
   0x2 LB: > { %s25_s15 = sadd.s32 1, %s1066_s13  ;;  %p931_p0 = scmp.ge.s32.totalorder %s1070_s14, 1  ;;  %s1070_s14 = sphi %s1098_s14, %s13_s14   ;;  %s1066_s13 = sphi %s1096_s13, %s1595_s13   ;;  %s1062_s12 = sphi %s1094_s12, %s1594_s12  }
   0x3   : > { %p27_p1 = scmp.ge.s32.totalorder %s25_s15, 2  ;;  %p156_p2 = scmp.lt.s32.totalorder %s1070_s14, 3 }
   0x5   : > { %s1597_s15 = smov (%p27_p1, %s25_s15), 0  ;;  %p157_p3 = pnand %p931_p0, %p156_p2 }
   0x6   : > { %p186_p4 = scmp.lt.s32.totalorder (!%p157_p3), %s1062_s12, 1  ;;  %v203_v0 = vld [vmem:[%s1591_s1 + $0x8] sm:$0xff] (!%p157_p3)  ;;  %v1072_v2 = vmov (!%p157_p3), 0.0|0.0   ;;  %v1073_v3 = vmov (!%p157_p3), 0   ;;  %v300_v18 = vld [vmem:[%s1592_s2 + $0x10] sm:$0xff] (!%p157_p3)  ;;  %v298_v19 = vld [vmem:[%s1592_s2] sm:$0xff] (!%p157_p3) }
   0x7   : > { %160 = sbr.rel (%p157_p3) target bundleno = 361 (0x169), region = 32  ;;  %v235_v1 = vld [vmem:[%s1591_s1 + $0x108] sm:$0xff] (!%p157_p3)  ;;  %940 = vmatprep.subr.bf16.mxu0 (!%p157_p3), %v1072_v2  ;;  %988 = vmatprep.subr.bf16.mxu1 (!%p157_p3), %v1072_v2  ;;  %v301_v21 = vld [vmem:[%s1592_s2 + $0x18] sm:$0xff] (!%p157_p3)  ;;  %v302_v27 = vld [vmem:[%s1592_s2 + $0x20] sm:$0xff] (!%p157_p3)  ;;  %vm811_vm0 = vcmask (!%p157_p3), 31744  }
   0x8   : > { %554 = vmatprep.mubr.f32.mxu0 (!%p157_p3), %v203_v0  ;;  %634 = vmatprep.mubr.f32.mxu1 (!%p157_p3), %v235_v1  ;;  %v299_v22 = vld [vmem:[%s1592_s2 + $0x8] sm:$0xff] (!%p157_p3)  ;;  %v305_v31 = vld [vmem:[%s1592_s2 + $0x38] sm:$0xff] (!%p157_p3)  ;;  %v304_v32 = vld [vmem:[%s1592_s2 + $0x30] sm:$0xff] (!%p157_p3) }
   0x9   : > { %1047 = vset.pattern.permute.xlu1 (!%p157_p3), %v1073_v3  ;;  %1046 = vset.pattern.permute.xlu0 (!%p157_p3), %v1073_v3  ;;  %v303_v26 = vld [vmem:[%s1592_s2 + $0x28] sm:$0xff] (!%p157_p3)  ;;  %v306_v37 = vld [vmem:[%s1592_s2 + $0x40] sm:$0xff] (!%p157_p3)  ;;  %v309_v41 = vld [vmem:[%s1592_s2 + $0x58] sm:$0xff] (!%p157_p3) }
   0xa   : > { %342 = vperm.xlu1 (!%p157_p3), %1047, %v300_v18   ;;  %332 = vperm.xlu0 (!%p157_p3), %1046, %v298_v19   ;;  %v307_v36 = vld [vmem:[%s1592_s2 + $0x48] sm:$0xff] (!%p157_p3)  ;;  %v308_v42 = vld [vmem:[%s1592_s2 + $0x50] sm:$0xff] (!%p157_p3)  ;;  %v310_v47 = vld [vmem:[%s1592_s2 + $0x60] sm:$0xff] (!%p157_p3) }
   0xb   : > { %v311_v46 = vld [vmem:[%s1592_s2 + $0x68] sm:$0xff] (!%p157_p3)  ;;  %v313_v51 = vld [vmem:[%s1592_s2 + $0x78] sm:$0xff] (!%p157_p3)  ;;  %v312_v52 = vld [vmem:[%s1592_s2 + $0x70] sm:$0xff] (!%p157_p3) }
   0xc   : > { %v315_v56 = vld [vmem:[%s1592_s2 + $0x88] sm:$0xff] (!%p157_p3)  ;;  %v314_v57 = vld [vmem:[%s1592_s2 + $0x80] sm:$0xff] (!%p157_p3)  ;;  %v317_v61 = vld [vmem:[%s1592_s2 + $0x98] sm:$0xff] (!%p157_p3) }
   0xd   : > { %v316_v62 = vld [vmem:[%s1592_s2 + $0x90] sm:$0xff] (!%p157_p3)  ;;  %v319_v3 = vld [vmem:[%s1592_s2 + $0xa8] sm:$0xff] (!%p157_p3)  ;;  %v325_v18 = vld [vmem:[%s1592_s2 + $0xd8] sm:$0xff] (!%p157_p3) }
   0xe   : > { %s1599_s12 = smov (!%p186_p4, %s1062_s12), 1  ;;  %347 = vperm.xlu1 %1047, %v301_v21   ;;  %337 = vperm.xlu0 %1046, %v299_v22   ;;  %v324_v19 = vld [vmem:[%s1592_s2 + $0xd0] sm:$0xff]  ;;  %v207_v22 = vld [vmem:[%s1591_s1 + $0x28] sm:$0xff] }
   0xf   : > { %s938_s20 = sshll.u32 %s1599_s12, 8  ;;  %v236_v21 = vld [vmem:[%s1591_s1 + $0x110] sm:$0xff] }
  0x10   : > { %s1128_s23 = scalar_lea.vmem %s1590_s0, %s938_s20  ;;  %s1503_s16 = scalar_lea.vmem %s1593_s3, %s938_s20 }
  0x11   : > { %v266_v4 = vld [vmem:[%s1128_s23] sm:$0xff]  ;;  %v267_v5 = vld [vmem:[%s1128_s23 + $0x8] sm:$0xff]  ;;  %v268_v6 = vld [vmem:[%s1128_s23 + $0x10] sm:$0xff] }
  0x12   : > { %v941_v7 = vpack.c.bf16 %v267_v5, %v266_v4  ;;  %v269_v8 = vld [vmem:[%s1128_s23 + $0x18] sm:$0xff]  ;;  %v270_v10 = vld [vmem:[%s1128_s23 + $0x20] sm:$0xff]  ;;  %v271_v11 = vld [vmem:[%s1128_s23 + $0x28] sm:$0xff]  ;;  %357 = vperm.xlu1 %1047, %v303_v26   ;;  %352 = vperm.xlu0 %1046, %v302_v27  }
  0x13   : > { %v944_v9 = vpack.c.bf16 %v269_v8, %v268_v6  ;;  %v947_v12 = vpack.c.bf16 %v271_v11, %v270_v10  ;;  %v272_v13 = vld [vmem:[%s1128_s23 + $0x30] sm:$0xff]  ;;  %v273_v14 = vld [vmem:[%s1128_s23 + $0x38] sm:$0xff]  ;;  %v274_v16 = vld [vmem:[%s1128_s23 + $0x40] sm:$0xff] }
  0x14   : > { %942 = vmatpush1.bf16.msra.mxu0 %v941_v7  ;;  %1004 = vmatpush1.bf16.msra.mxu1 %v941_v7  ;;  %v950_v15 = vpack.c.bf16 %v273_v14, %v272_v13  ;;  %v275_v17 = vld [vmem:[%s1128_s23 + $0x48] sm:$0xff]  ;;  %v276_v23 = vld [vmem:[%s1128_s23 + $0x50] sm:$0xff]  ;;  %v277_v24 = vld [vmem:[%s1128_s23 + $0x58] sm:$0xff] }
  0x15   : > { %943 = vmatprep.subr.bf16.mxu0 %v1072_v2  ;;  %989 = vmatprep.subr.bf16.mxu1 %v1072_v2  ;;  %v953_v20 = vpack.c.bf16 %v275_v17, %v274_v16  ;;  %v956_v25 = vpack.c.bf16 %v277_v24, %v276_v23  ;;  %v278_v28 = vld [vmem:[%s1128_s23 + $0x60] sm:$0xff]  ;;  %v279_v29 = vld [vmem:[%s1128_s23 + $0x68] sm:$0xff]  ;;  %v280_v33 = vld [vmem:[%s1128_s23 + $0x70] sm:$0xff] }
  0x16   : > { %v959_v30 = vpack.c.bf16 %v279_v29, %v278_v28  ;;  %v281_v34 = vld [vmem:[%s1128_s23 + $0x78] sm:$0xff]  ;;  %367 = vperm.xlu1 %1047, %v305_v31   ;;  %362 = vperm.xlu0 %1046, %v304_v32   ;;  %v282_v38 = vld [vmem:[%s1128_s23 + $0x80] sm:$0xff]  ;;  %v283_v39 = vld [vmem:[%s1128_s23 + $0x88] sm:$0xff] }
  0x17   : > { %v962_v35 = vpack.c.bf16 %v281_v34, %v280_v33  ;;  %v965_v40 = vpack.c.bf16 %v283_v39, %v282_v38  ;;  %v284_v43 = vld [vmem:[%s1128_s23 + $0x90] sm:$0xff]  ;;  %v285_v44 = vld [vmem:[%s1128_s23 + $0x98] sm:$0xff]  ;;  %v286_v48 = vld [vmem:[%s1128_s23 + $0xa0] sm:$0xff] }
  0x18   : > { %945 = vmatpush1.bf16.msra.mxu0 %v944_v9  ;;  %1005 = vmatpush1.bf16.msra.mxu1 %v944_v9  ;;  %v968_v45 = vpack.c.bf16 %v285_v44, %v284_v43  ;;  %v287_v49 = vld [vmem:[%s1128_s23 + $0xa8] sm:$0xff]  ;;  %v288_v53 = vld [vmem:[%s1128_s23 + $0xb0] sm:$0xff]  ;;  %v289_v54 = vld [vmem:[%s1128_s23 + $0xb8] sm:$0xff] }
  0x19   : > { %946 = vmatprep.subr.bf16.mxu0 %v1072_v2  ;;  %990 = vmatprep.subr.bf16.mxu1 %v1072_v2  ;;  %v971_v50 = vpack.c.bf16 %v287_v49, %v286_v48  ;;  %v974_v55 = vpack.c.bf16 %v289_v54, %v288_v53  ;;  %v290_v58 = vld [vmem:[%s1128_s23 + $0xc0] sm:$0xff]  ;;  %v291_v59 = vld [vmem:[%s1128_s23 + $0xc8] sm:$0xff]  ;;  %v292_v63 = vld [vmem:[%s1128_s23 + $0xd0] sm:$0xff] }
  0x1a   : > { %377 = vperm.xlu1 %1047, %v307_v36   ;;  %372 = vperm.xlu0 %1046, %v306_v37   ;;  %v977_v60 = vpack.c.bf16 %v291_v59, %v290_v58  ;;  %v293_v0 = vld [vmem:[%s1128_s23 + $0xd8] sm:$0xff]  ;;  %v318_v4 = vld [vmem:[%s1592_s2 + $0xa0] sm:$0xff]  ;;  %v295_v6 = vld [vmem:[%s1128_s23 + $0xe8] sm:$0xff] }
  0x1b   : > { %v980_v1 = vpack.c.bf16 %v293_v0, %v292_v63  ;;  %v294_v5 = vld [vmem:[%s1128_s23 + $0xe0] sm:$0xff]  ;;  %v321_v8 = vld [vmem:[%s1592_s2 + $0xb8] sm:$0xff]  ;;  %v320_v9 = vld [vmem:[%s1592_s2 + $0xb0] sm:$0xff] }
  0x1c   : > { %948 = vmatpush1.bf16.msra.mxu0 %v947_v12  ;;  %1006 = vmatpush1.bf16.msra.mxu1 %v947_v12  ;;  %v983_v7 = vpack.c.bf16 %v295_v6, %v294_v5  ;;  %v296_v10 = vld [vmem:[%s1128_s23 + $0xf0] sm:$0xff]  ;;  %v297_v11 = vld [vmem:[%s1128_s23 + $0xf8] sm:$0xff]  ;;  %v323_v13 = vld [vmem:[%s1592_s2 + $0xc8] sm:$0xff] }
  0x1d   : > { %949 = vmatprep.subr.bf16.mxu0 %v1072_v2  ;;  %991 = vmatprep.subr.bf16.mxu1 %v1072_v2  ;;  %v986_v12 = vpack.c.bf16 %v297_v11, %v296_v10  ;;  %v322_v14 = vld [vmem:[%s1592_s2 + $0xc0] sm:$0xff]  ;;  %v205_v17 = vld [vmem:[%s1591_s1 + $0x18] sm:$0xff]  ;;  %v239_v23 = vld [vmem:[%s1591_s1 + $0x128] sm:$0xff] }
  0x1e   : > { %387 = vperm.xlu1 %1047, %v309_v41   ;;  %382 = vperm.xlu0 %1046, %v308_v42   ;;  %v234_v16 = vld [vmem:[%s1591_s1 + $0x100] sm:$0xff]  ;;  %v327_v24 = vld [vmem:[%s1592_s2 + $0xe8] sm:$0xff]  ;;  %v209_v28 = vld [vmem:[%s1591_s1 + $0x38] sm:$0xff] }
  0x1f   : > { %v206_v26 = vld [vmem:[%s1591_s1 + $0x20] sm:$0xff]  ;;  %v241_v29 = vld [vmem:[%s1591_s1 + $0x138] sm:$0xff]  ;;  %v328_v31 = vld [vmem:[%s1592_s2 + $0xf0] sm:$0xff] }
  0x20   : > { %951 = vmatpush1.bf16.msra.mxu0 %v950_v15  ;;  %1007 = vmatpush1.bf16.msra.mxu1 %v950_v15  ;;  %v202_v15 = vld [vmem:[%s1591_s1] sm:$0xff]  ;;  %v208_v32 = vld [vmem:[%s1591_s1 + $0x30] sm:$0xff]  ;;  %v211_v34 = vld [vmem:[%s1591_s1 + $0x48] sm:$0xff] }
  0x21   : > { %952 = vmatprep.subr.bf16.mxu0 %v1072_v2  ;;  %992 = vmatprep.subr.bf16.mxu1 %v1072_v2  ;;  %v238_v27 = vld [vmem:[%s1591_s1 + $0x120] sm:$0xff]  ;;  %v240_v33 = vld [vmem:[%s1591_s1 + $0x130] sm:$0xff]  ;;  %v213_v38 = vld [vmem:[%s1591_s1 + $0x58] sm:$0xff] }
  0x22   : > { %397 = vperm.xlu1 %1047, %v311_v46   ;;  %392 = vperm.xlu0 %1046, %v310_v47   ;;  %v210_v36 = vld [vmem:[%s1591_s1 + $0x40] sm:$0xff]  ;;  %v245_v39 = vld [vmem:[%s1591_s1 + $0x158] sm:$0xff]  ;;  %v244_v41 = vld [vmem:[%s1591_s1 + $0x150] sm:$0xff] }
  0x23   : > { %v242_v37 = vld [vmem:[%s1591_s1 + $0x140] sm:$0xff]  ;;  %v215_v42 = vld [vmem:[%s1591_s1 + $0x68] sm:$0xff]  ;;  %v217_v46 = vld [vmem:[%s1591_s1 + $0x78] sm:$0xff] }
  0x24   : > { %954 = vmatpush1.bf16.msra.mxu0 %v953_v20  ;;  %1008 = vmatpush1.bf16.msra.mxu1 %v953_v20  ;;  %v204_v20 = vld [vmem:[%s1591_s1 + $0x10] sm:$0xff]  ;;  %v247_v43 = vld [vmem:[%s1591_s1 + $0x168] sm:$0xff]  ;;  %v214_v44 = vld [vmem:[%s1591_s1 + $0x60] sm:$0xff] }
  0x25   : > { %955 = vmatprep.subr.bf16.mxu0 %v1072_v2  ;;  %993 = vmatprep.subr.bf16.mxu1 %v1072_v2  ;;  %v249_v47 = vld [vmem:[%s1591_s1 + $0x178] sm:$0xff]  ;;  %v216_v48 = vld [vmem:[%s1591_s1 + $0x70] sm:$0xff]  ;;  %v250_v53 = vld [vmem:[%s1591_s1 + $0x180] sm:$0xff] }
  0x26   : > { %407 = vperm.xlu1 %1047, %v313_v51   ;;  %402 = vperm.xlu0 %1046, %v312_v52   ;;  %v248_v49 = vld [vmem:[%s1591_s1 + $0x170] sm:$0xff]  ;;  %v251_v51 = vld [vmem:[%s1591_s1 + $0x188] sm:$0xff]  ;;  %v218_v52 = vld [vmem:[%s1591_s1 + $0x80] sm:$0xff] }
  0x27   : > { %v221_v54 = vld [vmem:[%s1591_s1 + $0x98] sm:$0xff]  ;;  %v223_v58 = vld [vmem:[%s1591_s1 + $0xa8] sm:$0xff]  ;;  %v224_v0 = vld [vmem:[%s1591_s1 + $0xb0] sm:$0xff] }
  0x28   : > { %957 = vmatpush1.bf16.msra.mxu0 %v956_v25  ;;  %1009 = vmatpush1.bf16.msra.mxu1 %v956_v25  ;;  %v326_v25 = vld [vmem:[%s1592_s2 + $0xe0] sm:$0xff]  ;;  %v255_v59 = vld [vmem:[%s1591_s1 + $0x1a8] sm:$0xff]  ;;  %v257_v63 = vld [vmem:[%s1591_s1 + $0x1b8] sm:$0xff] }
  0x29   : > { %958 = vmatprep.subr.bf16.mxu0 %v1072_v2  ;;  %994 = vmatprep.subr.bf16.mxu1 %v1072_v2  ;;  %v226_v5 = vld [vmem:[%s1591_s1 + $0xc0] sm:$0xff]  ;;  %v260_v10 = vld [vmem:[%s1591_s1 + $0x1d0] sm:$0xff]  ;;  %v231_v11 = vld [vmem:[%s1591_s1 + $0xe8] sm:$0xff] }
  0x2a   : > { %417 = vperm.xlu1 %1047, %v315_v56   ;;  %412 = vperm.xlu0 %1046, %v314_v57   ;;  %v220_v56 = vld [vmem:[%s1591_s1 + $0x90] sm:$0xff]  ;;  %v258_v6 = vld [vmem:[%s1591_s1 + $0x1c0] sm:$0xff] }
  0x2b   : > { %v252_v57 = vld [vmem:[%s1591_s1 + $0x190] sm:$0xff] }
  0x2c   : > { %960 = vmatpush1.bf16.msra.mxu0 %v959_v30  ;;  %1010 = vmatpush1.bf16.msra.mxu1 %v959_v30  ;;  %v329_v30 = vld [vmem:[%s1592_s2 + $0xf8] sm:$0xff] }
  0x2d   : > { %961 = vmatprep.subr.bf16.mxu0 %v1072_v2  ;;  %995 = vmatprep.subr.bf16.mxu1 %v1072_v2 }
  0x2e   : > { %427 = vperm.xlu1 %1047, %v317_v61   ;;  %422 = vperm.xlu0 %1046, %v316_v62   ;;  %v254_v61 = vld [vmem:[%s1591_s1 + $0x1a0] sm:$0xff]  ;;  %v225_v62 = vld [vmem:[%s1591_s1 + $0xb8] sm:$0xff] }
  0x30   : > { %963 = vmatpush1.bf16.msra.mxu0 %v962_v35  ;;  %1011 = vmatpush1.bf16.msra.mxu1 %v962_v35  ;;  %v243_v35 = vld [vmem:[%s1591_s1 + $0x148] sm:$0xff] }
  0x31   : > { %964 = vmatprep.subr.bf16.mxu0 %v1072_v2  ;;  %996 = vmatprep.subr.bf16.mxu1 %v1072_v2 }
  0x32   : > { %437 = vperm.xlu1 %1047, %v319_v3   ;;  %432 = vperm.xlu0 %1046, %v318_v4   ;;  %v227_v3 = vld [vmem:[%s1591_s1 + $0xc8] sm:$0xff] }
  0x33   : > { %v259_v4 = vld [vmem:[%s1591_s1 + $0x1c8] sm:$0xff] }
  0x34   : > { %966 = vmatpush1.bf16.msra.mxu0 %v965_v40  ;;  %1012 = vmatpush1.bf16.msra.mxu1 %v965_v40  ;;  %v212_v40 = vld [vmem:[%s1591_s1 + $0x50] sm:$0xff] }
  0x35   : > { %967 = vmatprep.subr.bf16.mxu0 %v1072_v2  ;;  %997 = vmatprep.subr.bf16.mxu1 %v1072_v2 }
  0x36   : > { %447 = vperm.xlu1 %1047, %v321_v8   ;;  %442 = vperm.xlu0 %1046, %v320_v9   ;;  %v261_v8 = vld [vmem:[%s1591_s1 + $0x1d8] sm:$0xff]  ;;  %v228_v9 = vld [vmem:[%s1591_s1 + $0xd0] sm:$0xff] }
  0x38   : > { %969 = vmatpush1.bf16.msra.mxu0 %v968_v45  ;;  %1013 = vmatpush1.bf16.msra.mxu1 %v968_v45  ;;  %v246_v45 = vld [vmem:[%s1591_s1 + $0x160] sm:$0xff] }
  0x39   : > { %970 = vmatprep.subr.bf16.mxu0 %v1072_v2  ;;  %998 = vmatprep.subr.bf16.mxu1 %v1072_v2 }
  0x3a   : > { %457 = vperm.xlu1 %1047, %v323_v13   ;;  %452 = vperm.xlu0 %1046, %v322_v14   ;;  %v230_v13 = vld [vmem:[%s1591_s1 + $0xe0] sm:$0xff] }
  0x3b   : > { %v262_v14 = vld [vmem:[%s1591_s1 + $0x1e0] sm:$0xff] }
  0x3c   : > { %972 = vmatpush1.bf16.msra.mxu0 %v971_v50  ;;  %1014 = vmatpush1.bf16.msra.mxu1 %v971_v50  ;;  %v219_v50 = vld [vmem:[%s1591_s1 + $0x88] sm:$0xff] }
  0x3d   : > { %973 = vmatprep.subr.bf16.mxu0 %v1072_v2  ;;  %999 = vmatprep.subr.bf16.mxu1 %v1072_v2 }
  0x3e   : > { %467 = vperm.xlu1 %1047, %v325_v18   ;;  %462 = vperm.xlu0 %1046, %v324_v19  }
  0x40   : > { %975 = vmatpush1.bf16.msra.mxu0 %v974_v55  ;;  %1015 = vmatpush1.bf16.msra.mxu1 %v974_v55  ;;  %v253_v55 = vld [vmem:[%s1591_s1 + $0x198] sm:$0xff] }
  0x41   : > { %976 = vmatprep.subr.bf16.mxu0 %v1072_v2  ;;  %1000 = vmatprep.subr.bf16.mxu1 %v1072_v2 }
  0x42   : > { %477 = vperm.xlu1 %1047, %v327_v24   ;;  %472 = vperm.xlu0 %1046, %v326_v25  }
  0x44   : > { %978 = vmatpush1.bf16.msra.mxu0 %v977_v60  ;;  %1016 = vmatpush1.bf16.msra.mxu1 %v977_v60  ;;  %v222_v60 = vld [vmem:[%s1591_s1 + $0xa0] sm:$0xff] }
  0x45   : > { %979 = vmatprep.subr.bf16.mxu0 %v1072_v2  ;;  %1001 = vmatprep.subr.bf16.mxu1 %v1072_v2 }
  0x46   : > { %487 = vperm.xlu1 %1047, %v329_v30   ;;  %482 = vperm.xlu0 %1046, %v328_v31  }
  0x48   : > { %981 = vmatpush1.bf16.msra.mxu0 %v980_v1  ;;  %1017 = vmatpush1.bf16.msra.mxu1 %v980_v1  ;;  %v256_v1 = vld [vmem:[%s1591_s1 + $0x1b0] sm:$0xff] }
  0x49   : > { %982 = vmatprep.subr.bf16.mxu0 %v1072_v2  ;;  %1002 = vmatprep.subr.bf16.mxu1 %v1072_v2 }
  0x4c   : > { %984 = vmatpush1.bf16.msra.mxu0 %v983_v7  ;;  %1018 = vmatpush1.bf16.msra.mxu1 %v983_v7  ;;  %v229_v7 = vld [vmem:[%s1591_s1 + $0xd8] sm:$0xff] }
  0x4d   : > { %985 = vmatprep.subr.bf16.mxu0 %v1072_v2  ;;  %1003 = vmatprep.subr.bf16.mxu1 %v1072_v2  ;;  %v237_v2 = vld [vmem:[%s1591_s1 + $0x118] sm:$0xff] }
  0x50   : > { %987 = vmatpush1.bf16.msra.mxu0 %v986_v12  ;;  %1019 = vmatpush1.bf16.msra.mxu1 %v986_v12  ;;  %v263_v12 = vld [vmem:[%s1591_s1 + $0x1e8] sm:$0xff] }
  0x53   : > { %555 = vmatmul.mubr.f32.vlgmr.msra.gmra.mrb[0].mxu0 %v202_v15  ;;  %635 = vmatmul.mubr.f32.vlgmr.msra.gmra.mrb[0].mxu1 %v234_v16  ;;  %v233_v15 = vld [vmem:[%s1591_s1 + $0xf8] sm:$0xff] }
  0x54   : > { %559 = vmatprep.mubr.f32.mxu0 %v205_v17  ;;  %639 = vmatprep.mubr.f32.mxu1 %v237_v2  ;;  %v265_v16 = vld [vmem:[%s1591_s1 + $0x1f8] sm:$0xff]  ;;  %v232_v17 = vld [vmem:[%s1591_s1 + $0xf0] sm:$0xff] }
  0x55   : > { %v264_v2 = vld [vmem:[%s1591_s1 + $0x1f0] sm:$0xff] }
  0x57   : > { %560 = vmatmul.mubr.f32.gmra.mrb[2].mxu0 %v204_v20  ;;  %640 = vmatmul.mubr.f32.gmra.mrb[2].mxu1 %v236_v21 }
  0x58   : > { %564 = vmatprep.mubr.f32.mxu0 %v207_v22  ;;  %644 = vmatprep.mubr.f32.mxu1 %v239_v23 }
  0x5b   : > { %565 = vmatmul.mubr.f32.gmra.mrb[4].mxu0 %v206_v26  ;;  %645 = vmatmul.mubr.f32.gmra.mrb[4].mxu1 %v238_v27 }
  0x5c   : > { %569 = vmatprep.mubr.f32.mxu0 %v209_v28  ;;  %649 = vmatprep.mubr.f32.mxu1 %v241_v29 }
  0x5f   : > { %570 = vmatmul.mubr.f32.gmra.mrb[6].mxu0 %v208_v32  ;;  %650 = vmatmul.mubr.f32.gmra.mrb[6].mxu1 %v240_v33 }
  0x60   : > { %574 = vmatprep.mubr.f32.mxu0 %v211_v34  ;;  %654 = vmatprep.mubr.f32.mxu1 %v243_v35 }
  0x63   : > { %575 = vmatmul.mubr.f32.gmra.mrb[8].mxu0 %v210_v36  ;;  %655 = vmatmul.mubr.f32.gmra.mrb[8].mxu1 %v242_v37 }
  0x64   : > { %579 = vmatprep.mubr.f32.mxu0 %v213_v38  ;;  %659 = vmatprep.mubr.f32.mxu1 %v245_v39 }
  0x67   : > { %580 = vmatmul.mubr.f32.gmra.mrb[10].mxu0 %v212_v40  ;;  %660 = vmatmul.mubr.f32.gmra.mrb[10].mxu1 %v244_v41 }
  0x68   : > { %584 = vmatprep.mubr.f32.mxu0 %v215_v42  ;;  %664 = vmatprep.mubr.f32.mxu1 %v247_v43 }
  0x6b   : > { %585 = vmatmul.mubr.f32.gmra.mrb[12].mxu0 %v214_v44  ;;  %665 = vmatmul.mubr.f32.gmra.mrb[12].mxu1 %v246_v45 }
  0x6c   : > { %589 = vmatprep.mubr.f32.mxu0 %v217_v46  ;;  %669 = vmatprep.mubr.f32.mxu1 %v249_v47 }
  0x6f   : > { %590 = vmatmul.mubr.f32.gmra.mrb[14].mxu0 %v216_v48  ;;  %670 = vmatmul.mubr.f32.gmra.mrb[14].mxu1 %v248_v49 }
  0x70   : > { %594 = vmatprep.mubr.f32.mxu0 %v219_v50  ;;  %674 = vmatprep.mubr.f32.mxu1 %v251_v51 }
  0x73   : > { %595 = vmatmul.mubr.f32.gmra.mrb[16].mxu0 %v218_v52  ;;  %675 = vmatmul.mubr.f32.gmra.mrb[16].mxu1 %v250_v53 }
  0x74   : > { %599 = vmatprep.mubr.f32.mxu0 %v221_v54  ;;  %679 = vmatprep.mubr.f32.mxu1 %v253_v55 }
  0x77   : > { %600 = vmatmul.mubr.f32.gmra.mrb[18].mxu0 %v220_v56  ;;  %680 = vmatmul.mubr.f32.gmra.mrb[18].mxu1 %v252_v57 }
  0x78   : > { %604 = vmatprep.mubr.f32.mxu0 %v223_v58  ;;  %684 = vmatprep.mubr.f32.mxu1 %v255_v59 }
  0x7b   : > { %605 = vmatmul.mubr.f32.gmra.mrb[20].mxu0 %v222_v60  ;;  %685 = vmatmul.mubr.f32.gmra.mrb[20].mxu1 %v254_v61 }
  0x7c   : > { %609 = vmatprep.mubr.f32.mxu0 %v225_v62  ;;  %689 = vmatprep.mubr.f32.mxu1 %v257_v63 }
  0x7f   : > { %610 = vmatmul.mubr.f32.gmra.mrb[22].mxu0 %v224_v0  ;;  %690 = vmatmul.mubr.f32.gmra.mrb[22].mxu1 %v256_v1 }
  0x80   : > { %614 = vmatprep.mubr.f32.mxu0 %v227_v3  ;;  %694 = vmatprep.mubr.f32.mxu1 %v259_v4 }
  0x83   : > { %615 = vmatmul.mubr.f32.gmra.mrb[24].mxu0 %v226_v5  ;;  %695 = vmatmul.mubr.f32.gmra.mrb[24].mxu1 %v258_v6 }
  0x84   : > { %619 = vmatprep.mubr.f32.mxu0 %v229_v7  ;;  %699 = vmatprep.mubr.f32.mxu1 %v261_v8 }
  0x87   : > { %620 = vmatmul.mubr.f32.gmra.mrb[26].mxu0 %v228_v9  ;;  %700 = vmatmul.mubr.f32.gmra.mrb[26].mxu1 %v260_v10 }
  0x88   : > { %624 = vmatprep.mubr.f32.mxu0 %v231_v11  ;;  %704 = vmatprep.mubr.f32.mxu1 %v263_v12 }
  0x89   : > { %v333_v18 = vpop.permute.xlu0 %332  ;;  %v343_v19 = vpop.permute.xlu1 %342 }
  0x8b   : > { %625 = vmatmul.mubr.f32.gmra.mrb[28].mxu0 %v230_v13  ;;  %705 = vmatmul.mubr.f32.gmra.mrb[28].mxu1 %v262_v14 }
  0x8c   : > { %629 = vmatprep.mubr.f32.mxu0 %v233_v15  ;;  %709 = vmatprep.mubr.f32.mxu1 %v265_v16 }
  0x8d   : > { %v338_v20 = vpop.permute.xlu0 %337  ;;  %v348_v21 = vpop.permute.xlu1 %347 }
  0x8f   : > { %630 = vmatmul.mubr.f32.gmra.mrb[30].mxu0 %v232_v17  ;;  %710 = vmatmul.mubr.f32.gmra.mrb[30].mxu1 %v264_v2 }
  0x91   : > { %v1474_v22 = vpop.permute.xlu0 %352  ;;  %v1476_v23 = vpop.permute.xlu1 %357 }
  0x95   : > { %v1478_v24 = vpop.permute.xlu0 %362  ;;  %v1480_v25 = vpop.permute.xlu1 %367 }
  0x99   : > { %v1482_v26 = vpop.permute.xlu0 %372  ;;  %v1484_v27 = vpop.permute.xlu1 %377 }
  0x9d   : > { %v1486_v28 = vpop.permute.xlu0 %382  ;;  %v1488_v29 = vpop.permute.xlu1 %387 }
  0xa1   : > { %v1490_v30 = vpop.permute.xlu0 %392  ;;  %v1492_v31 = vpop.permute.xlu1 %397 }
  0xa5   : > { %v1494_v32 = vpop.permute.xlu0 %402  ;;  %v1496_v33 = vpop.permute.xlu1 %407 }
  0xa9   : > { %v413_v34 = vpop.permute.xlu0 %412  ;;  %v418_v41 = vpop.permute.xlu1 %417 }
  0xad   : > { %v423_v52 = vpop.permute.xlu0 %422  ;;  %v428_v63 = vpop.permute.xlu1 %427 }
  0xb1   : > { %v433_v11 = vpop.permute.xlu0 %432 }
 0x126   : > { %v556_v35 = vpop.f32.mrb[0].mxu0  ;;  %v636_v36 = vpop.f32.mrb[0].mxu1 }
 0x127   : > { %v557_v37 = vadd.f32 %v556_v35, %v333_v18  ;;  %v637_v38 = vadd.f32 %v636_v36, %v413_v34  ;;  %v558_v39 = vpop.f32.mrb[1].mxu0  ;;  %v638_v40 = vpop.f32.mrb[1].mxu1 }
 0x129   : > { %vm715_vm1 = vcmp.ge.f32.partialorder %v557_v37, 0.0  ;;  %v747_v42 = vmul.f32 0.1, %v557_v37  ;;  %vm731_vm2 = vcmp.ge.f32.partialorder %v637_v38, 0.0  ;;  %v763_v43 = vmul.f32 0.1, %v637_v38 }
 0x12a   : > { %v561_v44 = vpop.f32.mrb[2].mxu0  ;;  %v641_v45 = vpop.f32.mrb[2].mxu1 }
 0x12b   : > { %v779_v46 = vsel %vm715_vm1, %v557_v37, %v747_v42  ;;  %v795_v47 = vsel %vm731_vm2, %v637_v38, %v763_v43  ;;  %v562_v48 = vadd.f32 %v561_v44, %v338_v20  ;;  %v642_v49 = vadd.f32 %v641_v45, %v418_v41  ;;  %v563_v50 = vpop.f32.mrb[3].mxu0  ;;  %v643_v51 = vpop.f32.mrb[3].mxu1 }
 0x12c   : > { %812 = vst.msk [vmem:[%s1503_s16] sm:$0xff] %vm811_vm0, %v779_v46  ;;  %828 = vst.msk [vmem:[%s1503_s16 + $0x80] sm:$0xff] %vm811_vm0, %v795_v47  ;;  %v443_v43 = vpop.permute.xlu0 %442 }
 0x12d   : > { %vm716_vm3 = vcmp.ge.f32.partialorder %v562_v48, 0.0  ;;  %v748_v53 = vmul.f32 0.1, %v562_v48  ;;  %vm732_vm4 = vcmp.ge.f32.partialorder %v642_v49, 0.0  ;;  %v764_v54 = vmul.f32 0.1, %v642_v49 }
 0x12e   : > { %v566_v55 = vpop.f32.mrb[4].mxu0  ;;  %v646_v56 = vpop.f32.mrb[4].mxu1 }
 0x12f   : > { %v780_v57 = vsel %vm716_vm3, %v562_v48, %v748_v53  ;;  %v796_v58 = vsel %vm732_vm4, %v642_v49, %v764_v54  ;;  %v567_v59 = vadd.f32 %v566_v55, %v343_v19  ;;  %v647_v60 = vadd.f32 %v646_v56, %v423_v52  ;;  %v568_v61 = vpop.f32.mrb[5].mxu0  ;;  %v648_v62 = vpop.f32.mrb[5].mxu1 }
 0x130   : > { %813 = vst.msk [vmem:[%s1503_s16 + $0x8] sm:$0xff] %vm811_vm0, %v780_v57  ;;  %829 = vst.msk [vmem:[%s1503_s16 + $0x88] sm:$0xff] %vm811_vm0, %v796_v58 }
 0x131   : > { %vm717_vm5 = vcmp.ge.f32.partialorder %v567_v59, 0.0  ;;  %v749_v0 = vmul.f32 0.1, %v567_v59  ;;  %vm733_vm6 = vcmp.ge.f32.partialorder %v647_v60, 0.0  ;;  %v765_v1 = vmul.f32 0.1, %v647_v60 }
 0x132   : > { %v571_v3 = vpop.f32.mrb[6].mxu0  ;;  %v651_v4 = vpop.f32.mrb[6].mxu1 }
 0x133   : > { %v781_v5 = vsel %vm717_vm5, %v567_v59, %v749_v0  ;;  %v797_v6 = vsel %vm733_vm6, %v647_v60, %v765_v1  ;;  %v572_v7 = vadd.f32 %v571_v3, %v348_v21  ;;  %v652_v8 = vadd.f32 %v651_v4, %v428_v63  ;;  %v573_v9 = vpop.f32.mrb[7].mxu0  ;;  %v653_v10 = vpop.f32.mrb[7].mxu1 }
 0x134   : > { %814 = vst.msk [vmem:[%s1503_s16 + $0x10] sm:$0xff] %vm811_vm0, %v781_v5  ;;  %830 = vst.msk [vmem:[%s1503_s16 + $0x90] sm:$0xff] %vm811_vm0, %v797_v6  ;;  %v438_v21 = vpop.permute.xlu1 %437  ;;  %v453_v63 = vpop.permute.xlu0 %452 }
 0x135   : > { %vm718_vm7 = vcmp.ge.f32.partialorder %v572_v7, 0.0  ;;  %v750_v12 = vmul.f32 0.1, %v572_v7  ;;  %vm734_vm8 = vcmp.ge.f32.partialorder %v652_v8, 0.0  ;;  %v766_v13 = vmul.f32 0.1, %v652_v8 }
 0x136   : > { %v576_v14 = vpop.f32.mrb[8].mxu0  ;;  %v656_v15 = vpop.f32.mrb[8].mxu1 }
 0x137   : > { %v782_v16 = vsel %vm718_vm7, %v572_v7, %v750_v12  ;;  %v798_v17 = vsel %vm734_vm8, %v652_v8, %v766_v13  ;;  %v577_v2 = vadd.f32 %v576_v14, %v1474_v22  ;;  %v657_v18 = vadd.f32 %v656_v15, %v433_v11  ;;  %v578_v19 = vpop.f32.mrb[9].mxu0  ;;  %v658_v20 = vpop.f32.mrb[9].mxu1 }
 0x138   : > { %815 = vst.msk [vmem:[%s1503_s16 + $0x18] sm:$0xff] %vm811_vm0, %v782_v16  ;;  %831 = vst.msk [vmem:[%s1503_s16 + $0x98] sm:$0xff] %vm811_vm0, %v798_v17  ;;  %v448_v53 = vpop.permute.xlu1 %447  ;;  %v463_v19 = vpop.permute.xlu0 %462 }
 0x139   : > { %vm719_vm9 = vcmp.ge.f32.partialorder %v577_v2, 0.0  ;;  %v751_v34 = vmul.f32 0.1, %v577_v2  ;;  %vm735_vm10 = vcmp.ge.f32.partialorder %v657_v18, 0.0  ;;  %v767_v35 = vmul.f32 0.1, %v657_v18 }
 0x13a   : > { %v581_v36 = vpop.f32.mrb[10].mxu0  ;;  %v661_v37 = vpop.f32.mrb[10].mxu1 }
 0x13b   : > { %v783_v38 = vsel %vm719_vm9, %v577_v2, %v751_v34  ;;  %v799_v39 = vsel %vm735_vm10, %v657_v18, %v767_v35  ;;  %v582_v22 = vadd.f32 %v581_v36, %v1476_v23  ;;  %v662_v40 = vadd.f32 %v661_v37, %v438_v21  ;;  %v583_v41 = vpop.f32.mrb[11].mxu0  ;;  %v663_v42 = vpop.f32.mrb[11].mxu1 }
 0x13c   : > { %816 = vst.msk [vmem:[%s1503_s16 + $0x20] sm:$0xff] %vm811_vm0, %v783_v38  ;;  %832 = vst.msk [vmem:[%s1503_s16 + $0xa0] sm:$0xff] %vm811_vm0, %v799_v39  ;;  %v458_v10 = vpop.permute.xlu1 %457 }
 0x13d   : > { %vm720_vm11 = vcmp.ge.f32.partialorder %v582_v22, 0.0  ;;  %v752_v44 = vmul.f32 0.1, %v582_v22  ;;  %vm736_vm12 = vcmp.ge.f32.partialorder %v662_v40, 0.0  ;;  %v768_v45 = vmul.f32 0.1, %v662_v40 }
 0x13e   : > { %v586_v46 = vpop.f32.mrb[12].mxu0  ;;  %v666_v47 = vpop.f32.mrb[12].mxu1 }
 0x13f   : > { %v784_v48 = vsel %vm720_vm11, %v582_v22, %v752_v44  ;;  %v800_v49 = vsel %vm736_vm12, %v662_v40, %v768_v45  ;;  %v587_v23 = vadd.f32 %v586_v46, %v1478_v24  ;;  %v667_v50 = vadd.f32 %v666_v47, %v443_v43  ;;  %v588_v51 = vpop.f32.mrb[13].mxu0  ;;  %v668_v52 = vpop.f32.mrb[13].mxu1 }
 0x140   : > { %817 = vst.msk [vmem:[%s1503_s16 + $0x28] sm:$0xff] %vm811_vm0, %v784_v48  ;;  %833 = vst.msk [vmem:[%s1503_s16 + $0xa8] sm:$0xff] %vm811_vm0, %v800_v49  ;;  %v468_v40 = vpop.permute.xlu1 %467 }
 0x141   : > { %vm721_vm13 = vcmp.ge.f32.partialorder %v587_v23, 0.0  ;;  %v753_v54 = vmul.f32 0.1, %v587_v23  ;;  %vm737_vm14 = vcmp.ge.f32.partialorder %v667_v50, 0.0  ;;  %v769_v55 = vmul.f32 0.1, %v667_v50 }
 0x142   : > { %v591_v56 = vpop.f32.mrb[14].mxu0  ;;  %v671_v57 = vpop.f32.mrb[14].mxu1 }
 0x143   : > { %v785_v58 = vsel %vm721_vm13, %v587_v23, %v753_v54  ;;  %v801_v59 = vsel %vm737_vm14, %v667_v50, %v769_v55  ;;  %v592_v24 = vadd.f32 %v591_v56, %v1480_v25  ;;  %v672_v60 = vadd.f32 %v671_v57, %v448_v53  ;;  %v593_v61 = vpop.f32.mrb[15].mxu0  ;;  %v673_v62 = vpop.f32.mrb[15].mxu1 }
 0x144   : > { %818 = vst.msk [vmem:[%s1503_s16 + $0x30] sm:$0xff] %vm811_vm0, %v785_v58  ;;  %834 = vst.msk [vmem:[%s1503_s16 + $0xb0] sm:$0xff] %vm811_vm0, %v801_v59  ;;  %v473_v23 = vpop.permute.xlu0 %472  ;;  %v478_v59 = vpop.permute.xlu1 %477 }
 0x145   : > { %vm722_vm15 = vcmp.ge.f32.partialorder %v592_v24, 0.0  ;;  %v754_v0 = vmul.f32 0.1, %v592_v24  ;;  %vm738_vm1 = vcmp.ge.f32.partialorder %v672_v60, 0.0  ;;  %v770_v1 = vmul.f32 0.1, %v672_v60 }
 0x146   : > { %v596_v3 = vpop.f32.mrb[16].mxu0  ;;  %v676_v4 = vpop.f32.mrb[16].mxu1 }
 0x147   : > { %v786_v5 = vsel %vm722_vm15, %v592_v24, %v754_v0  ;;  %v802_v6 = vsel %vm738_vm1, %v672_v60, %v770_v1  ;;  %v597_v25 = vadd.f32 %v596_v3, %v1482_v26  ;;  %v677_v7 = vadd.f32 %v676_v4, %v453_v63  ;;  %v598_v8 = vpop.f32.mrb[17].mxu0  ;;  %v678_v9 = vpop.f32.mrb[17].mxu1 }
 0x148   : > { %819 = vst.msk [vmem:[%s1503_s16 + $0x38] sm:$0xff] %vm811_vm0, %v786_v5  ;;  %835 = vst.msk [vmem:[%s1503_s16 + $0xb8] sm:$0xff] %vm811_vm0, %v802_v6  ;;  %v483_v5 = vpop.permute.xlu0 %482 }
 0x149   : > { %vm723_vm2 = vcmp.ge.f32.partialorder %v597_v25, 0.0  ;;  %v755_v11 = vmul.f32 0.1, %v597_v25  ;;  %vm739_vm3 = vcmp.ge.f32.partialorder %v677_v7, 0.0  ;;  %v771_v12 = vmul.f32 0.1, %v677_v7 }
 0x14a   : > { %v601_v13 = vpop.f32.mrb[18].mxu0  ;;  %v681_v14 = vpop.f32.mrb[18].mxu1 }
 0x14b   : > { %v787_v15 = vsel %vm723_vm2, %v597_v25, %v755_v11  ;;  %v803_v16 = vsel %vm739_vm3, %v677_v7, %v771_v12  ;;  %v602_v26 = vadd.f32 %v601_v13, %v1484_v27  ;;  %v682_v17 = vadd.f32 %v681_v14, %v458_v10  ;;  %v603_v2 = vpop.f32.mrb[19].mxu0  ;;  %v683_v18 = vpop.f32.mrb[19].mxu1 }
 0x14c   : > { %820 = vst.msk [vmem:[%s1503_s16 + $0x40] sm:$0xff] %vm811_vm0, %v787_v15  ;;  %836 = vst.msk [vmem:[%s1503_s16 + $0xc0] sm:$0xff] %vm811_vm0, %v803_v16  ;;  %v488_v14 = vpop.permute.xlu1 %487 }
 0x14d   : > { %vm724_vm4 = vcmp.ge.f32.partialorder %v602_v26, 0.0  ;;  %v756_v20 = vmul.f32 0.1, %v602_v26  ;;  %vm740_vm5 = vcmp.ge.f32.partialorder %v682_v17, 0.0  ;;  %v772_v21 = vmul.f32 0.1, %v682_v17 }
 0x14e   : > { %v606_v34 = vpop.f32.mrb[20].mxu0  ;;  %v686_v35 = vpop.f32.mrb[20].mxu1 }
 0x14f   : > { %v788_v36 = vsel %vm724_vm4, %v602_v26, %v756_v20  ;;  %v804_v37 = vsel %vm740_vm5, %v682_v17, %v772_v21  ;;  %v607_v27 = vadd.f32 %v606_v34, %v1486_v28  ;;  %v687_v38 = vadd.f32 %v686_v35, %v463_v19  ;;  %v608_v39 = vpop.f32.mrb[21].mxu0  ;;  %v688_v22 = vpop.f32.mrb[21].mxu1 }
 0x150   : > { %821 = vst.msk [vmem:[%s1503_s16 + $0x48] sm:$0xff] %vm811_vm0, %v788_v36  ;;  %837 = vst.msk [vmem:[%s1503_s16 + $0xc8] sm:$0xff] %vm811_vm0, %v804_v37 }
 0x151   : > { %vm725_vm6 = vcmp.ge.f32.partialorder %v607_v27, 0.0  ;;  %v757_v41 = vmul.f32 0.1, %v607_v27  ;;  %vm741_vm7 = vcmp.ge.f32.partialorder %v687_v38, 0.0  ;;  %v773_v42 = vmul.f32 0.1, %v687_v38 }
 0x152   : > { %v611_v43 = vpop.f32.mrb[22].mxu0  ;;  %v691_v44 = vpop.f32.mrb[22].mxu1 }
 0x153   : > { %v789_v45 = vsel %vm725_vm6, %v607_v27, %v757_v41  ;;  %v805_v46 = vsel %vm741_vm7, %v687_v38, %v773_v42  ;;  %v612_v28 = vadd.f32 %v611_v43, %v1488_v29  ;;  %v692_v47 = vadd.f32 %v691_v44, %v468_v40  ;;  %v613_v48 = vpop.f32.mrb[23].mxu0  ;;  %v693_v49 = vpop.f32.mrb[23].mxu1 }
 0x154   : > { %822 = vst.msk [vmem:[%s1503_s16 + $0x50] sm:$0xff] %vm811_vm0, %v789_v45  ;;  %838 = vst.msk [vmem:[%s1503_s16 + $0xd0] sm:$0xff] %vm811_vm0, %v805_v46 }
 0x155   : > { %vm726_vm8 = vcmp.ge.f32.partialorder %v612_v28, 0.0  ;;  %v758_v50 = vmul.f32 0.1, %v612_v28  ;;  %vm742_vm9 = vcmp.ge.f32.partialorder %v692_v47, 0.0  ;;  %v774_v51 = vmul.f32 0.1, %v692_v47 }
 0x156   : > { %v616_v52 = vpop.f32.mrb[24].mxu0  ;;  %v696_v53 = vpop.f32.mrb[24].mxu1 }
 0x157   : > { %v790_v54 = vsel %vm726_vm8, %v612_v28, %v758_v50  ;;  %v806_v55 = vsel %vm742_vm9, %v692_v47, %v774_v51  ;;  %v617_v29 = vadd.f32 %v616_v52, %v1490_v30  ;;  %v697_v56 = vadd.f32 %v696_v53, %v473_v23  ;;  %v618_v57 = vpop.f32.mrb[25].mxu0  ;;  %v698_v58 = vpop.f32.mrb[25].mxu1 }
 0x158   : > { %823 = vst.msk [vmem:[%s1503_s16 + $0x58] sm:$0xff] %vm811_vm0, %v790_v54  ;;  %839 = vst.msk [vmem:[%s1503_s16 + $0xd8] sm:$0xff] %vm811_vm0, %v806_v55 }
 0x159   : > { %vm727_vm10 = vcmp.ge.f32.partialorder %v617_v29, 0.0  ;;  %v759_v24 = vmul.f32 0.1, %v617_v29  ;;  %vm743_vm11 = vcmp.ge.f32.partialorder %v697_v56, 0.0  ;;  %v775_v60 = vmul.f32 0.1, %v697_v56 }
 0x15a   : > { %v621_v61 = vpop.f32.mrb[26].mxu0  ;;  %v701_v62 = vpop.f32.mrb[26].mxu1 }
 0x15b   : > { %v791_v63 = vsel %vm727_vm10, %v617_v29, %v759_v24  ;;  %v807_v0 = vsel %vm743_vm11, %v697_v56, %v775_v60  ;;  %v622_v30 = vadd.f32 %v621_v61, %v1492_v31  ;;  %v702_v1 = vadd.f32 %v701_v62, %v478_v59  ;;  %v623_v3 = vpop.f32.mrb[27].mxu0  ;;  %v703_v4 = vpop.f32.mrb[27].mxu1 }
 0x15c   : > { %824 = vst.msk [vmem:[%s1503_s16 + $0x60] sm:$0xff] %vm811_vm0, %v791_v63  ;;  %840 = vst.msk [vmem:[%s1503_s16 + $0xe0] sm:$0xff] %vm811_vm0, %v807_v0 }
 0x15d   : > { %vm728_vm12 = vcmp.ge.f32.partialorder %v622_v30, 0.0  ;;  %v760_v6 = vmul.f32 0.1, %v622_v30  ;;  %vm744_vm13 = vcmp.ge.f32.partialorder %v702_v1, 0.0  ;;  %v776_v25 = vmul.f32 0.1, %v702_v1 }
 0x15e   : > { %v626_v7 = vpop.f32.mrb[28].mxu0  ;;  %v706_v8 = vpop.f32.mrb[28].mxu1 }
 0x15f   : > { %v792_v9 = vsel %vm728_vm12, %v622_v30, %v760_v6  ;;  %v808_v10 = vsel %vm744_vm13, %v702_v1, %v776_v25  ;;  %v627_v31 = vadd.f32 %v626_v7, %v1494_v32  ;;  %v707_v11 = vadd.f32 %v706_v8, %v483_v5  ;;  %v628_v12 = vpop.f32.mrb[29].mxu0  ;;  %v708_v13 = vpop.f32.mrb[29].mxu1 }
 0x160   : > { %825 = vst.msk [vmem:[%s1503_s16 + $0x68] sm:$0xff] %vm811_vm0, %v792_v9  ;;  %841 = vst.msk [vmem:[%s1503_s16 + $0xe8] sm:$0xff] %vm811_vm0, %v808_v10 }
 0x161   : > { %vm729_vm14 = vcmp.ge.f32.partialorder %v627_v31, 0.0  ;;  %v761_v15 = vmul.f32 0.1, %v627_v31  ;;  %vm745_vm15 = vcmp.ge.f32.partialorder %v707_v11, 0.0  ;;  %v777_v16 = vmul.f32 0.1, %v707_v11 }
 0x162   : > { %v631_v26 = vpop.f32.mrb[30].mxu0  ;;  %v711_v17 = vpop.f32.mrb[30].mxu1 }
 0x163   : > { %v793_v2 = vsel %vm729_vm14, %v627_v31, %v761_v15  ;;  %v809_v32 = vsel %vm745_vm15, %v707_v11, %v777_v16  ;;  %v632_v18 = vadd.f32 %v631_v26, %v1496_v33  ;;  %v712_v19 = vadd.f32 %v711_v17, %v488_v14  ;;  %v633_v20 = vpop.f32.mrb[31].mxu0  ;;  %v713_v21 = vpop.f32.mrb[31].mxu1 }
 0x164   : > { %826 = vst.msk [vmem:[%s1503_s16 + $0x70] sm:$0xff] %vm811_vm0, %v793_v2  ;;  %842 = vst.msk [vmem:[%s1503_s16 + $0xf0] sm:$0xff] %vm811_vm0, %v809_v32 }
 0x165   : > { %vm730_vm1 = vcmp.ge.f32.partialorder %v632_v18, 0.0  ;;  %v762_v34 = vmul.f32 0.1, %v632_v18  ;;  %vm746_vm2 = vcmp.ge.f32.partialorder %v712_v19, 0.0  ;;  %v778_v35 = vmul.f32 0.1, %v712_v19 }
 0x167   : > { %v794_v36 = vsel %vm730_vm1, %v632_v18, %v762_v34  ;;  %v810_v37 = vsel %vm746_vm2, %v712_v19, %v778_v35 }
 0x168   : > { %827 = vst.msk [vmem:[%s1503_s16 + $0x78] sm:$0xff] %vm811_vm0, %v794_v36  ;;  %843 = vst.msk [vmem:[%s1503_s16 + $0xf8] sm:$0xff] %vm811_vm0, %v810_v37 }
 0x169 PF: > { %s13_s14 = sadd.s32 1, %s1070_s14   ;;  %s1594_s12 = smov %s1066_s13 }
 0x16a   : > { %p10_p5 = scmp.ge.s32.totalorder %s13_s14, 4   ;;  %s1595_s13 = smov %s1597_s15 }
 0x16c   :  { %12 = sbr.rel (!%p10_p5) target bundleno = 2 (0x2), region = 62 }

// kernel: _lambda_.55
= control target key start
LH: loop header
LB: loop body
LE: loop exit
PB: predicated region body
PF: predicated region fallthrough
CT: control target
= control target key end

     0   :  { %vm79_vm0 = vcmask 31744   ;;  %s2973_s0 = inlined_call_operand.vmem [shape: f32[2,256,4], index: 0, kind: input, shape index: {}]   ;;  %s2974_s1 = inlined_call_operand.vmem [shape: f32[256,1000], index: 1, kind: input, shape index: {}]   ;;  %s2975_s2 = inlined_call_operand.vmem [shape: f32[1,1000], index: 2, kind: input, shape index: {}]   ;;  %s2976_s3 = inlined_call_operand.hbm [shape: f32[2,1000], index: 3, kind: output, shape index: {}]  }
   0x1   :  { %v63_v0 = vld [vmem:[%s2973_s0 + $0x180] sm:$0xff]  ;;  %v64_v2 = vld [vmem:[%s2973_s0 + $0x188] sm:$0xff]  ;;  %v33_v13 = vld [vmem:[%s2973_s0 + $0x90] sm:$0xff] }
   0x2   :  { %v31_v1 = vld [vmem:[%s2973_s0 + $0x80] sm:$0xff]  ;;  %v224_v3 = vsel %vm79_vm0, %v63_v0, 0.0  ;;  %v32_v5 = vld [vmem:[%s2973_s0 + $0x88] sm:$0xff]  ;;  %v227_v6 = vsel %vm79_vm0, %v64_v2, 0.0  ;;  %v134_v15 = vsel %vm79_vm0, %v33_v13, 0.0  ;;  %v65_v16 = vld [vmem:[%s2973_s0 + $0x190] sm:$0xff] }
   0x3   :  { %v128_v4 = vsel %vm79_vm0, %v31_v1, 0.0  ;;  %225 = vadd.xlane.f32.xlu1 %v224_v3  ;;  %v131_v7 = vsel %vm79_vm0, %v32_v5, 0.0  ;;  %v16_v8 = vld [vmem:[%s2973_s0 + $0x8] sm:$0xff]  ;;  %v15_v9 = vld [vmem:[%s2973_s0] sm:$0xff]  ;;  %v230_v18 = vsel %vm79_vm0, %v65_v16, 0.0  ;;  %v34_v20 = vld [vmem:[%s2973_s0 + $0x98] sm:$0xff] }
   0x4   :  { %129 = vadd.xlane.f32.xlu0 %v128_v4  ;;  %v83_v10 = vsel %vm79_vm0, %v16_v8, 0.0  ;;  %v80_v11 = vsel %vm79_vm0, %v15_v9, 0.0  ;;  %v47_v12 = vld [vmem:[%s2973_s0 + $0x100] sm:$0xff]  ;;  %v48_v17 = vld [vmem:[%s2973_s0 + $0x108] sm:$0xff]  ;;  %v17_v21 = vld [vmem:[%s2973_s0 + $0x10] sm:$0xff]  ;;  %v137_v22 = vsel %vm79_vm0, %v34_v20, 0.0 }
   0x5   :  { %v176_v14 = vsel %vm79_vm0, %v47_v12, 0.0  ;;  %v179_v19 = vsel %vm79_vm0, %v48_v17, 0.0  ;;  %v86_v23 = vsel %vm79_vm0, %v17_v21, 0.0  ;;  %v66_v24 = vld [vmem:[%s2973_s0 + $0x198] sm:$0xff]  ;;  %v49_v25 = vld [vmem:[%s2973_s0 + $0x110] sm:$0xff] }
   0x7   :  { %228 = vadd.xlane.f32.xlu1 %v227_v6 }
   0x8   :  { %132 = vadd.xlane.f32.xlu0 %v131_v7 }
   0xb   :  { %84 = vadd.xlane.f32.xlu1 %v83_v10 }
   0xc   :  { %81 = vadd.xlane.f32.xlu0 %v80_v11 }
   0xf   :  { %177 = vadd.xlane.f32.xlu1 %v176_v14 }
  0x10   :  { %135 = vadd.xlane.f32.xlu0 %v134_v15 }
  0x13   :  { %231 = vadd.xlane.f32.xlu1 %v230_v18 }
  0x14   :  { %180 = vadd.xlane.f32.xlu0 %v179_v19 }
  0x17   :  { %138 = vadd.xlane.f32.xlu1 %v137_v22 }
  0x18   :  { %87 = vadd.xlane.f32.xlu0 %v86_v23 }
  0x19   :  { %8 = vsyncpa [#allocation3], 0  ;;  %v233_v26 = vsel %vm79_vm0, %v66_v24, 0.0  ;;  %v182_v27 = vsel %vm79_vm0, %v49_v25, 0.0  ;;  %v35_v28 = vld [vmem:[%s2973_s0 + $0xa0] sm:$0xff]  ;;  %v18_v29 = vld [vmem:[%s2973_s0 + $0x18] sm:$0xff] }
  0x1a   :  { %v140_v30 = vsel %vm79_vm0, %v35_v28, 0.0  ;;  %v89_v31 = vsel %vm79_vm0, %v18_v29, 0.0  ;;  %v67_v32 = vld [vmem:[%s2973_s0 + $0x1a0] sm:$0xff]  ;;  %v50_v33 = vld [vmem:[%s2973_s0 + $0x118] sm:$0xff]  ;;  %v36_v36 = vld [vmem:[%s2973_s0 + $0xa8] sm:$0xff]  ;;  %vm710_vm1 = vcmask 130112  }
  0x1b   :  { %234 = vadd.xlane.f32.xlu1 %v233_v26  ;;  %v236_v34 = vsel %vm79_vm0, %v67_v32, 0.0  ;;  %v185_v35 = vsel %vm79_vm0, %v50_v33, 0.0  ;;  %v19_v37 = vld [vmem:[%s2973_s0 + $0x20] sm:$0xff]  ;;  %v143_v38 = vsel %vm79_vm0, %v36_v36, 0.0  ;;  %v68_v40 = vld [vmem:[%s2973_s0 + $0x1a8] sm:$0xff]  ;;  %v37_v44 = vld [vmem:[%s2973_s0 + $0xb0] sm:$0xff] }
  0x1c   :  { %183 = vadd.xlane.f32.xlu0 %v182_v27  ;;  %v92_v39 = vsel %vm79_vm0, %v19_v37, 0.0  ;;  %v51_v41 = vld [vmem:[%s2973_s0 + $0x120] sm:$0xff]  ;;  %v239_v42 = vsel %vm79_vm0, %v68_v40, 0.0  ;;  %v20_v45 = vld [vmem:[%s2973_s0 + $0x28] sm:$0xff]  ;;  %v146_v46 = vsel %vm79_vm0, %v37_v44, 0.0  ;;  %v69_v48 = vld [vmem:[%s2973_s0 + $0x1b0] sm:$0xff] }
  0x1d   :  { %v188_v43 = vsel %vm79_vm0, %v51_v41, 0.0  ;;  %v95_v47 = vsel %vm79_vm0, %v20_v45, 0.0  ;;  %v52_v49 = vld [vmem:[%s2973_s0 + $0x128] sm:$0xff]  ;;  %v242_v50 = vsel %vm79_vm0, %v69_v48, 0.0  ;;  %v38_v52 = vld [vmem:[%s2973_s0 + $0xb8] sm:$0xff]  ;;  %v21_v53 = vld [vmem:[%s2973_s0 + $0x30] sm:$0xff] }
  0x1e   :  { %v191_v51 = vsel %vm79_vm0, %v52_v49, 0.0  ;;  %v149_v54 = vsel %vm79_vm0, %v38_v52, 0.0  ;;  %v98_v55 = vsel %vm79_vm0, %v21_v53, 0.0  ;;  %v70_v56 = vld [vmem:[%s2973_s0 + $0x1b8] sm:$0xff]  ;;  %v53_v57 = vld [vmem:[%s2973_s0 + $0x130] sm:$0xff]  ;;  %v39_v60 = vld [vmem:[%s2973_s0 + $0xc0] sm:$0xff] }
  0x1f   :  { %141 = vadd.xlane.f32.xlu1 %v140_v30  ;;  %v245_v58 = vsel %vm79_vm0, %v70_v56, 0.0  ;;  %v194_v59 = vsel %vm79_vm0, %v53_v57, 0.0  ;;  %v22_v61 = vld [vmem:[%s2973_s0 + $0x38] sm:$0xff]  ;;  %v152_v62 = vsel %vm79_vm0, %v39_v60, 0.0  ;;  %v71_v0 = vld [vmem:[%s2973_s0 + $0x1c0] sm:$0xff]  ;;  %v40_v4 = vld [vmem:[%s2973_s0 + $0xc8] sm:$0xff] }
  0x20   :  { %90 = vadd.xlane.f32.xlu0 %v89_v31  ;;  %v101_v63 = vsel %vm79_vm0, %v22_v61, 0.0  ;;  %v54_v1 = vld [vmem:[%s2973_s0 + $0x138] sm:$0xff]  ;;  %v248_v2 = vsel %vm79_vm0, %v71_v0, 0.0  ;;  %v23_v5 = vld [vmem:[%s2973_s0 + $0x40] sm:$0xff]  ;;  %v155_v6 = vsel %vm79_vm0, %v40_v4, 0.0  ;;  %v72_v8 = vld [vmem:[%s2973_s0 + $0x1c8] sm:$0xff] }
  0x21   :  { %v197_v3 = vsel %vm79_vm0, %v54_v1, 0.0  ;;  %v104_v7 = vsel %vm79_vm0, %v23_v5, 0.0  ;;  %v55_v9 = vld [vmem:[%s2973_s0 + $0x140] sm:$0xff]  ;;  %v251_v10 = vsel %vm79_vm0, %v72_v8, 0.0  ;;  %v41_v12 = vld [vmem:[%s2973_s0 + $0xd0] sm:$0xff]  ;;  %v24_v13 = vld [vmem:[%s2973_s0 + $0x48] sm:$0xff] }
  0x22   :  { %v200_v11 = vsel %vm79_vm0, %v55_v9, 0.0  ;;  %v158_v14 = vsel %vm79_vm0, %v41_v12, 0.0  ;;  %v107_v15 = vsel %vm79_vm0, %v24_v13, 0.0  ;;  %v73_v16 = vld [vmem:[%s2973_s0 + $0x1d0] sm:$0xff]  ;;  %v56_v17 = vld [vmem:[%s2973_s0 + $0x148] sm:$0xff]  ;;  %v42_v18 = vld [vmem:[%s2973_s0 + $0xd8] sm:$0xff] }
  0x23   :  { %237 = vadd.xlane.f32.xlu1 %v236_v34  ;;  %v338_v19 = vld [vmem:[%s2974_s1 + $0x8] sm:$0xff]  ;;  %v340_v21 = vld [vmem:[%s2974_s1 + $0x18] sm:$0xff]  ;;  %v254_v22 = vsel %vm79_vm0, %v73_v16, 0.0  ;;  %v203_v23 = vsel %vm79_vm0, %v56_v17, 0.0  ;;  %v337_v26 = vld [vmem:[%s2974_s1] sm:$0xff]  ;;  %vm717_vm2 = vcmask 195712  }
  0x24   :  { %186 = vadd.xlane.f32.xlu0 %v185_v35  ;;  %v346_v20 = vld [vmem:[%s2974_s1 + $0x48] sm:$0xff]  ;;  %v348_v25 = vld [vmem:[%s2974_s1 + $0x58] sm:$0xff]  ;;  %v345_v27 = vld [vmem:[%s2974_s1 + $0x40] sm:$0xff]  ;;  %vm724_vm3 = vcmask 261312   ;;  %vm731_vm4 = vcmask 326912   ;;  %vm738_vm5 = vcmask 392512  }
  0x25   :  { %v1403_v24 = vpack.c.bf16 %v346_v20, %v338_v19  ;;  %v25_v28 = vld [vmem:[%s2973_s0 + $0x50] sm:$0xff]  ;;  %v1467_v29 = vpack.c.bf16 %v348_v25, %v340_v21  ;;  %v1405_v30 = vpack.c.bf16 %v345_v27, %v337_v26  ;;  %v74_v34 = vld [vmem:[%s2973_s0 + $0x1d8] sm:$0xff]  ;;  %v354_v35 = vld [vmem:[%s2974_s1 + $0x88] sm:$0xff]  ;;  %vm745_vm6 = vcmask 458112  }
  0x26   :  { %v339_v31 = vld [vmem:[%s2974_s1 + $0x10] sm:$0xff]  ;;  %v362_v36 = vld [vmem:[%s2974_s1 + $0xc8] sm:$0xff]  ;;  %v356_v37 = vld [vmem:[%s2974_s1 + $0x98] sm:$0xff]  ;;  %vm752_vm7 = vcmask 523712   ;;  %vm759_vm8 = vcmask 589312   ;;  %vm766_vm9 = vcmask 654912  }
  0x27   :  { %144 = vadd.xlane.f32.xlu1 %v143_v38  ;;  %v347_v32 = vld [vmem:[%s2974_s1 + $0x50] sm:$0xff]  ;;  %1404 = vmatprep.subr.bf16.mxu0 %v1403_v24  ;;  %v161_v38 = vsel %vm79_vm0, %v42_v18, 0.0  ;;  %v1407_v40 = vpack.c.bf16 %v362_v36, %v354_v35  ;;  %v364_v41 = vld [vmem:[%s2974_s1 + $0xd8] sm:$0xff]  ;;  %v378_v52 = vld [vmem:[%s2974_s1 + $0x148] sm:$0xff]  ;;  %vm773_vm10 = vcmask 720512   ;;  %vm780_vm11 = vcmask 786112  }
  0x28   :  { %93 = vadd.xlane.f32.xlu0 %v92_v39  ;;  %v1469_v33 = vpack.c.bf16 %v347_v32, %v339_v31  ;;  %v110_v39 = vsel %vm79_vm0, %v25_v28, 0.0  ;;  %1468 = vmatprep.subr.bf16.mxu1 %v1467_v29  ;;  %v57_v44 = vld [vmem:[%s2973_s0 + $0x150] sm:$0xff]  ;;  %v1471_v45 = vpack.c.bf16 %v364_v41, %v356_v37  ;;  %v372_v53 = vld [vmem:[%s2974_s1 + $0x118] sm:$0xff]  ;;  %v394_v4 = vld [vmem:[%s2974_s1 + $0x1c8] sm:$0xff]  ;;  %vm787_vm12 = vcmask 851712  }
  0x29   :  { %1406 = vmatpush1.bf16.msra.mxu0 %v1405_v30  ;;  %v363_v48 = vld [vmem:[%s2974_s1 + $0xd0] sm:$0xff]  ;;  %v380_v57 = vld [vmem:[%s2974_s1 + $0x158] sm:$0xff]  ;;  %v44_v18 = vld [vmem:[%s2973_s0 + $0xe8] sm:$0xff]  ;;  %vm794_vm13 = vcmask 917312   ;;  %vm801_vm14 = vcmask 982912   ;;  %vm808_vm15 = vcmask 1048512  }
  0x2a   :  { %1470 = vmatpush1.bf16.msra.mxu1 %v1469_v33  ;;  %1408 = vmatprep.subr.bf16.mxu0 %v1407_v40  ;;  %v26_v60 = vld [vmem:[%s2973_s0 + $0x58] sm:$0xff]  ;;  %v1475_v61 = vpack.c.bf16 %v380_v57, %v372_v53  ;;  %v379_v0 = vld [vmem:[%s2974_s1 + $0x150] sm:$0xff]  ;;  %v402_v19 = vld [vmem:[%s2974_s1 + $0x208] sm:$0xff] }
  0x2b   :  { %240 = vadd.xlane.f32.xlu1 %v239_v42  ;;  %v353_v42 = vld [vmem:[%s2974_s1 + $0x80] sm:$0xff]  ;;  %1472 = vmatprep.subr.bf16.mxu1 %v1471_v45  ;;  %v388_v5 = vld [vmem:[%s2974_s1 + $0x198] sm:$0xff]  ;;  %v395_v16 = vld [vmem:[%s2974_s1 + $0x1d0] sm:$0xff] }
  0x2c   :  { %189 = vadd.xlane.f32.xlu0 %v188_v43  ;;  %v361_v43 = vld [vmem:[%s2974_s1 + $0xc0] sm:$0xff]  ;;  %v396_v9 = vld [vmem:[%s2974_s1 + $0x1d8] sm:$0xff]  ;;  %v410_v20 = vld [vmem:[%s2974_s1 + $0x248] sm:$0xff] }
  0x2d   :  { %v58_v12 = vld [vmem:[%s2973_s0 + $0x158] sm:$0xff]  ;;  %v1479_v13 = vpack.c.bf16 %v396_v9, %v388_v5  ;;  %v1419_v24 = vpack.c.bf16 %v410_v20, %v402_v19  ;;  %v401_v26 = vld [vmem:[%s2974_s1 + $0x200] sm:$0xff]  ;;  %v403_v31 = vld [vmem:[%s2974_s1 + $0x210] sm:$0xff] }
  0x2e   :  { %v404_v21 = vld [vmem:[%s2974_s1 + $0x218] sm:$0xff]  ;;  %v409_v27 = vld [vmem:[%s2974_s1 + $0x240] sm:$0xff]  ;;  %v411_v32 = vld [vmem:[%s2974_s1 + $0x250] sm:$0xff] }
  0x2f   :  { %147 = vadd.xlane.f32.xlu1 %v146_v46  ;;  %v1409_v46 = vpack.c.bf16 %v361_v43, %v353_v42  ;;  %v412_v25 = vld [vmem:[%s2974_s1 + $0x258] sm:$0xff]  ;;  %v27_v28 = vld [vmem:[%s2973_s0 + $0x60] sm:$0xff]  ;;  %v1421_v30 = vpack.c.bf16 %v409_v27, %v401_v26  ;;  %v1485_v33 = vpack.c.bf16 %v411_v32, %v403_v31  ;;  %v418_v35 = vld [vmem:[%s2974_s1 + $0x288] sm:$0xff] }
  0x30   :  { %96 = vadd.xlane.f32.xlu0 %v95_v47  ;;  %v355_v47 = vld [vmem:[%s2974_s1 + $0x90] sm:$0xff]  ;;  %v1483_v29 = vpack.c.bf16 %v412_v25, %v404_v21  ;;  %v426_v36 = vld [vmem:[%s2974_s1 + $0x2c8] sm:$0xff]  ;;  %v420_v37 = vld [vmem:[%s2974_s1 + $0x298] sm:$0xff] }
  0x31   :  { %v1473_v49 = vpack.c.bf16 %v363_v48, %v355_v47  ;;  %1410 = vmatpush1.bf16.msra.mxu0 %v1409_v46  ;;  %v1423_v40 = vpack.c.bf16 %v426_v36, %v418_v35  ;;  %v428_v41 = vld [vmem:[%s2974_s1 + $0x2d8] sm:$0xff]  ;;  %v417_v42 = vld [vmem:[%s2974_s1 + $0x280] sm:$0xff]  ;;  %v419_v47 = vld [vmem:[%s2974_s1 + $0x290] sm:$0xff] }
  0x32   :  { %v425_v43 = vld [vmem:[%s2974_s1 + $0x2c0] sm:$0xff]  ;;  %v1487_v45 = vpack.c.bf16 %v428_v41, %v420_v37  ;;  %v427_v48 = vld [vmem:[%s2974_s1 + $0x2d0] sm:$0xff]  ;;  %v436_v53 = vld [vmem:[%s2974_s1 + $0x318] sm:$0xff] }
  0x33   :  { %243 = vadd.xlane.f32.xlu1 %v242_v50  ;;  %v43_v50 = vld [vmem:[%s2973_s0 + $0xe0] sm:$0xff]  ;;  %1474 = vmatpush1.bf16.msra.mxu1 %v1473_v49  ;;  %v1425_v46 = vpack.c.bf16 %v425_v43, %v417_v42  ;;  %v1489_v49 = vpack.c.bf16 %v427_v48, %v419_v47  ;;  %v444_v57 = vld [vmem:[%s2974_s1 + $0x358] sm:$0xff]  ;;  %v466_v19 = vld [vmem:[%s2974_s1 + $0x408] sm:$0xff] }
  0x34   :  { %192 = vadd.xlane.f32.xlu0 %v191_v51  ;;  %v370_v51 = vld [vmem:[%s2974_s1 + $0x108] sm:$0xff]  ;;  %1476 = vmatprep.subr.bf16.mxu1 %v1475_v61  ;;  %v1491_v61 = vpack.c.bf16 %v444_v57, %v436_v53  ;;  %v452_v5 = vld [vmem:[%s2974_s1 + $0x398] sm:$0xff]  ;;  %v465_v26 = vld [vmem:[%s2974_s1 + $0x400] sm:$0xff] }
  0x35   :  { %v1411_v56 = vpack.c.bf16 %v378_v52, %v370_v51  ;;  %v434_v51 = vld [vmem:[%s2974_s1 + $0x308] sm:$0xff]  ;;  %v460_v9 = vld [vmem:[%s2974_s1 + $0x3d8] sm:$0xff]  ;;  %v473_v27 = vld [vmem:[%s2974_s1 + $0x440] sm:$0xff] }
  0x36   :  { %v442_v52 = vld [vmem:[%s2974_s1 + $0x348] sm:$0xff]  ;;  %v468_v21 = vld [vmem:[%s2974_s1 + $0x418] sm:$0xff]  ;;  %v467_v31 = vld [vmem:[%s2974_s1 + $0x410] sm:$0xff] }
  0x37   :  { %150 = vadd.xlane.f32.xlu1 %v149_v54  ;;  %v257_v54 = vsel %vm79_vm0, %v74_v34, 0.0  ;;  %1412 = vmatprep.subr.bf16.mxu0 %v1411_v56  ;;  %v76_v34 = vld [vmem:[%s2973_s0 + $0x1e8] sm:$0xff]  ;;  %v1427_v56 = vpack.c.bf16 %v442_v52, %v434_v51  ;;  %v476_v25 = vld [vmem:[%s2974_s1 + $0x458] sm:$0xff]  ;;  %v475_v32 = vld [vmem:[%s2974_s1 + $0x450] sm:$0xff] }
  0x38   :  { %99 = vadd.xlane.f32.xlu0 %v98_v55  ;;  %v206_v55 = vsel %vm79_vm0, %v57_v44, 0.0  ;;  %v59_v44 = vld [vmem:[%s2973_s0 + $0x160] sm:$0xff]  ;;  %v474_v20 = vld [vmem:[%s2974_s1 + $0x448] sm:$0xff]  ;;  %v484_v37 = vld [vmem:[%s2974_s1 + $0x498] sm:$0xff] }
  0x39   :  { %v482_v35 = vld [vmem:[%s2974_s1 + $0x488] sm:$0xff]  ;;  %v492_v41 = vld [vmem:[%s2974_s1 + $0x4d8] sm:$0xff]  ;;  %v481_v42 = vld [vmem:[%s2974_s1 + $0x480] sm:$0xff] }
  0x3a   :  { %v490_v36 = vld [vmem:[%s2974_s1 + $0x4c8] sm:$0xff]  ;;  %v489_v43 = vld [vmem:[%s2974_s1 + $0x4c0] sm:$0xff]  ;;  %v483_v47 = vld [vmem:[%s2974_s1 + $0x490] sm:$0xff] }
  0x3b   :  { %246 = vadd.xlane.f32.xlu1 %v245_v58  ;;  %v369_v58 = vld [vmem:[%s2974_s1 + $0x100] sm:$0xff]  ;;  %v491_v48 = vld [vmem:[%s2974_s1 + $0x4d0] sm:$0xff]  ;;  %v498_v51 = vld [vmem:[%s2974_s1 + $0x508] sm:$0xff] }
  0x3c   :  { %195 = vadd.xlane.f32.xlu0 %v194_v59  ;;  %v377_v59 = vld [vmem:[%s2974_s1 + $0x140] sm:$0xff]  ;;  %v506_v52 = vld [vmem:[%s2974_s1 + $0x548] sm:$0xff]  ;;  %v500_v53 = vld [vmem:[%s2974_s1 + $0x518] sm:$0xff] }
  0x3d   :  { %v508_v57 = vld [vmem:[%s2974_s1 + $0x558] sm:$0xff] }
  0x3f   :  { %153 = vadd.xlane.f32.xlu1 %v152_v62  ;;  %v1413_v62 = vpack.c.bf16 %v377_v59, %v369_v58  ;;  %v433_v58 = vld [vmem:[%s2974_s1 + $0x300] sm:$0xff] }
  0x40   :  { %102 = vadd.xlane.f32.xlu0 %v101_v63  ;;  %v371_v63 = vld [vmem:[%s2974_s1 + $0x110] sm:$0xff]  ;;  %v441_v59 = vld [vmem:[%s2974_s1 + $0x340] sm:$0xff] }
  0x41   :  { %v1477_v1 = vpack.c.bf16 %v379_v0, %v371_v63  ;;  %1414 = vmatpush1.bf16.msra.mxu0 %v1413_v62  ;;  %v1429_v62 = vpack.c.bf16 %v441_v59, %v433_v58  ;;  %v435_v63 = vld [vmem:[%s2974_s1 + $0x310] sm:$0xff]  ;;  %v497_v58 = vld [vmem:[%s2974_s1 + $0x500] sm:$0xff] }
  0x42   :  { %v443_v0 = vld [vmem:[%s2974_s1 + $0x350] sm:$0xff]  ;;  %v505_v59 = vld [vmem:[%s2974_s1 + $0x540] sm:$0xff] }
  0x43   :  { %249 = vadd.xlane.f32.xlu1 %v248_v2  ;;  %v75_v2 = vld [vmem:[%s2973_s0 + $0x1e0] sm:$0xff]  ;;  %1478 = vmatpush1.bf16.msra.mxu1 %v1477_v1  ;;  %v1493_v1 = vpack.c.bf16 %v443_v0, %v435_v63  ;;  %v499_v63 = vld [vmem:[%s2974_s1 + $0x510] sm:$0xff] }
  0x44   :  { %198 = vadd.xlane.f32.xlu0 %v197_v3  ;;  %v386_v3 = vld [vmem:[%s2974_s1 + $0x188] sm:$0xff]  ;;  %1480 = vmatprep.subr.bf16.mxu1 %v1479_v13  ;;  %v1495_v13 = vpack.c.bf16 %v460_v9, %v452_v5  ;;  %v507_v0 = vld [vmem:[%s2974_s1 + $0x550] sm:$0xff]  ;;  %v513_v9 = vld [vmem:[%s2974_s1 + $0x580] sm:$0xff] }
  0x45   :  { %v1415_v8 = vpack.c.bf16 %v394_v4, %v386_v3  ;;  %v450_v3 = vld [vmem:[%s2974_s1 + $0x388] sm:$0xff] }
  0x46   :  { %v458_v4 = vld [vmem:[%s2974_s1 + $0x3c8] sm:$0xff] }
  0x47   :  { %156 = vadd.xlane.f32.xlu1 %v155_v6  ;;  %v164_v6 = vsel %vm79_vm0, %v43_v50, 0.0  ;;  %1416 = vmatprep.subr.bf16.mxu0 %v1415_v8  ;;  %v45_v50 = vld [vmem:[%s2973_s0 + $0xf0] sm:$0xff]  ;;  %v1431_v8 = vpack.c.bf16 %v458_v4, %v450_v3  ;;  %v522_v3 = vld [vmem:[%s2974_s1 + $0x5c8] sm:$0xff]  ;;  %v516_v4 = vld [vmem:[%s2974_s1 + $0x598] sm:$0xff] }
  0x48   :  { %105 = vadd.xlane.f32.xlu0 %v104_v7  ;;  %v113_v7 = vsel %vm79_vm0, %v26_v60, 0.0  ;;  %v28_v60 = vld [vmem:[%s2973_s0 + $0x68] sm:$0xff] }
  0x4b   :  { %252 = vadd.xlane.f32.xlu1 %v251_v10  ;;  %v385_v10 = vld [vmem:[%s2974_s1 + $0x180] sm:$0xff] }
  0x4c   :  { %201 = vadd.xlane.f32.xlu0 %v200_v11  ;;  %v393_v11 = vld [vmem:[%s2974_s1 + $0x1c0] sm:$0xff] }
  0x4f   :  { %159 = vadd.xlane.f32.xlu1 %v158_v14  ;;  %v1417_v14 = vpack.c.bf16 %v393_v11, %v385_v10  ;;  %v449_v10 = vld [vmem:[%s2974_s1 + $0x380] sm:$0xff] }
  0x50   :  { %108 = vadd.xlane.f32.xlu0 %v107_v15  ;;  %v387_v15 = vld [vmem:[%s2974_s1 + $0x190] sm:$0xff]  ;;  %v457_v11 = vld [vmem:[%s2974_s1 + $0x3c0] sm:$0xff] }
  0x51   :  { %v1481_v17 = vpack.c.bf16 %v395_v16, %v387_v15  ;;  %1418 = vmatpush1.bf16.msra.mxu0 %v1417_v14  ;;  %v1433_v14 = vpack.c.bf16 %v457_v11, %v449_v10  ;;  %v451_v15 = vld [vmem:[%s2974_s1 + $0x390] sm:$0xff]  ;;  %v521_v10 = vld [vmem:[%s2974_s1 + $0x5c0] sm:$0xff] }
  0x52   :  { %1420 = vmatprep.subr.bf16.mxu0 %v1419_v24  ;;  %v459_v16 = vld [vmem:[%s2974_s1 + $0x3d0] sm:$0xff]  ;;  %v1435_v24 = vpack.c.bf16 %v474_v20, %v466_v19  ;;  %v540_v20 = vld [vmem:[%s2974_s1 + $0x658] sm:$0xff] }
  0x53   :  { %255 = vadd.xlane.f32.xlu1 %v254_v22  ;;  %v260_v22 = vsel %vm79_vm0, %v75_v2, 0.0  ;;  %1482 = vmatpush1.bf16.msra.mxu1 %v1481_v17  ;;  %v77_v2 = vld [vmem:[%s2973_s0 + $0x1f0] sm:$0xff]  ;;  %v1497_v17 = vpack.c.bf16 %v459_v16, %v451_v15  ;;  %v530_v16 = vld [vmem:[%s2974_s1 + $0x608] sm:$0xff] }
  0x54   :  { %204 = vadd.xlane.f32.xlu0 %v203_v23  ;;  %v209_v23 = vsel %vm79_vm0, %v58_v12, 0.0  ;;  %1484 = vmatprep.subr.bf16.mxu1 %v1483_v29  ;;  %v60_v12 = vld [vmem:[%s2973_s0 + $0x168] sm:$0xff]  ;;  %v1499_v29 = vpack.c.bf16 %v476_v25, %v468_v21  ;;  %v529_v21 = vld [vmem:[%s2974_s1 + $0x600] sm:$0xff]  ;;  %v531_v25 = vld [vmem:[%s2974_s1 + $0x610] sm:$0xff] }
  0x55   :  { %1422 = vmatpush1.bf16.msra.mxu0 %v1421_v30  ;;  %v1437_v30 = vpack.c.bf16 %v473_v27, %v465_v26  ;;  %v539_v26 = vld [vmem:[%s2974_s1 + $0x650] sm:$0xff] }
  0x56   :  { %1424 = vmatprep.subr.bf16.mxu0 %v1423_v40  ;;  %v1439_v40 = vpack.c.bf16 %v490_v36, %v482_v35  ;;  %v1517_v27 = vpack.c.bf16 %v539_v26, %v531_v25 }
  0x57   :  { %162 = vadd.xlane.f32.xlu1 %v161_v38  ;;  %v167_v38 = vsel %vm79_vm0, %v44_v18, 0.0  ;;  %1486 = vmatpush1.bf16.msra.mxu1 %v1485_v33  ;;  %v46_v18 = vld [vmem:[%s2973_s0 + $0xf8] sm:$0xff]  ;;  %v1501_v33 = vpack.c.bf16 %v475_v32, %v467_v31 }
  0x58   :  { %111 = vadd.xlane.f32.xlu0 %v110_v39  ;;  %v116_v39 = vsel %vm79_vm0, %v27_v28, 0.0  ;;  %1488 = vmatprep.subr.bf16.mxu1 %v1487_v45  ;;  %v29_v28 = vld [vmem:[%s2973_s0 + $0x70] sm:$0xff]  ;;  %v1503_v45 = vpack.c.bf16 %v492_v41, %v484_v37  ;;  %v556_v32 = vld [vmem:[%s2974_s1 + $0x6d8] sm:$0xff]  ;;  %v570_v41 = vld [vmem:[%s2974_s1 + $0x748] sm:$0xff] }
  0x59   :  { %1426 = vmatpush1.bf16.msra.mxu0 %v1425_v46  ;;  %v1441_v46 = vpack.c.bf16 %v489_v43, %v481_v42  ;;  %v547_v37 = vld [vmem:[%s2974_s1 + $0x690] sm:$0xff]  ;;  %v564_v42 = vld [vmem:[%s2974_s1 + $0x718] sm:$0xff] }
  0x5a   :  { %1428 = vmatprep.subr.bf16.mxu0 %v1427_v56  ;;  %v1443_v56 = vpack.c.bf16 %v506_v52, %v498_v51  ;;  %v571_v51 = vld [vmem:[%s2974_s1 + $0x750] sm:$0xff] }
  0x5b   :  { %258 = vadd.xlane.f32.xlu1 %v257_v54  ;;  %v263_v54 = vsel %vm79_vm0, %v76_v34, 0.0  ;;  %1490 = vmatpush1.bf16.msra.mxu1 %v1489_v49  ;;  %v78_v34 = vld [vmem:[%s2973_s0 + $0x1f8] sm:$0xff]  ;;  %v1505_v49 = vpack.c.bf16 %v491_v48, %v483_v47  ;;  %v595_v47 = vlaneseq }
  0x5c   :  { %207 = vadd.xlane.f32.xlu0 %v206_v55  ;;  %v212_v55 = vsel %vm79_vm0, %v59_v44, 0.0  ;;  %1492 = vmatprep.subr.bf16.mxu1 %v1491_v61  ;;  %v61_v44 = vld [vmem:[%s2973_s0 + $0x170] sm:$0xff]  ;;  %v1507_v61 = vpack.c.bf16 %v508_v57, %v500_v53  ;;  %v578_v53 = vld [vmem:[%s2974_s1 + $0x788] sm:$0xff]  ;;  %v588_v57 = vld [vmem:[%s2974_s1 + $0x7d8] sm:$0xff] }
  0x5d   :  { %1430 = vmatpush1.bf16.msra.mxu0 %v1429_v62  ;;  %v1445_v62 = vpack.c.bf16 %v505_v59, %v497_v58  ;;  %v577_v58 = vld [vmem:[%s2974_s1 + $0x780] sm:$0xff] }
  0x5e   :  { %1432 = vmatprep.subr.bf16.mxu0 %v1431_v8  ;;  %v524_v8 = vld [vmem:[%s2974_s1 + $0x5d8] sm:$0xff]  ;;  %v585_v59 = vld [vmem:[%s2974_s1 + $0x7c0] sm:$0xff] }
  0x5f   :  { %165 = vadd.xlane.f32.xlu1 %v164_v6  ;;  %v170_v6 = vsel %vm79_vm0, %v45_v50, 0.0  ;;  %1494 = vmatpush1.bf16.msra.mxu1 %v1493_v1  ;;  %v62_v50 = vld [vmem:[%s2973_s0 + $0x178] sm:$0xff]  ;;  %v1509_v1 = vpack.c.bf16 %v507_v0, %v499_v63  ;;  %v1511_v11 = vpack.c.bf16 %v524_v8, %v516_v4  ;;  %v579_v63 = vld [vmem:[%s2974_s1 + $0x790] sm:$0xff]  ;;  %v342_v4 = vld [vmem:[%s2974_s1 + $0x28] sm:$0xff] }
  0x60   :  { %114 = vadd.xlane.f32.xlu0 %v113_v7  ;;  %v119_v7 = vsel %vm79_vm0, %v28_v60, 0.0  ;;  %1496 = vmatprep.subr.bf16.mxu1 %v1495_v13  ;;  %v30_v60 = vld [vmem:[%s2973_s0 + $0x78] sm:$0xff]  ;;  %v221_v5 = vsel %vm79_vm0, %v62_v50, 0.0  ;;  %v515_v13 = vld [vmem:[%s2974_s1 + $0x590] sm:$0xff] }
  0x61   :  { %1434 = vmatpush1.bf16.msra.mxu0 %v1433_v14  ;;  %v523_v14 = vld [vmem:[%s2974_s1 + $0x5d0] sm:$0xff] }
  0x62   :  { %1436 = vmatprep.subr.bf16.mxu0 %v1435_v24  ;;  %v1513_v15 = vpack.c.bf16 %v523_v14, %v515_v13  ;;  %v563_v50 = vld [vmem:[%s2974_s1 + $0x710] sm:$0xff] }
  0x63   :  { %261 = vadd.xlane.f32.xlu1 %v260_v22  ;;  %v266_v22 = vsel %vm79_vm0, %v77_v2, 0.0  ;;  %1498 = vmatpush1.bf16.msra.mxu1 %v1497_v17  ;;  %v514_v2 = vld [vmem:[%s2974_s1 + $0x588] sm:$0xff]  ;;  %v1525_v52 = vpack.c.bf16 %v571_v51, %v563_v50  ;;  %v587_v0 = vld [vmem:[%s2974_s1 + $0x7d0] sm:$0xff] }
  0x64   :  { %210 = vadd.xlane.f32.xlu0 %v209_v23  ;;  %v215_v23 = vsel %vm79_vm0, %v60_v12, 0.0  ;;  %1500 = vmatprep.subr.bf16.mxu1 %v1499_v29  ;;  %v1449_v12 = vpack.c.bf16 %v521_v10, %v513_v9  ;;  %v538_v17 = vld [vmem:[%s2974_s1 + $0x648] sm:$0xff]  ;;  %v352_v10 = vld [vmem:[%s2974_s1 + $0x78] sm:$0xff] }
  0x65   :  { %1438 = vmatpush1.bf16.msra.mxu0 %v1437_v30  ;;  %v1451_v19 = vpack.c.bf16 %v538_v17, %v530_v16  ;;  %v554_v29 = vld [vmem:[%s2974_s1 + $0x6c8] sm:$0xff]  ;;  %v548_v30 = vld [vmem:[%s2974_s1 + $0x698] sm:$0xff] }
  0x66   :  { %1440 = vmatprep.subr.bf16.mxu0 %v1439_v40  ;;  %v1519_v35 = vpack.c.bf16 %v556_v32, %v548_v30  ;;  %v562_v40 = vld [vmem:[%s2974_s1 + $0x708] sm:$0xff] }
  0x67   :  { %168 = vadd.xlane.f32.xlu1 %v167_v38  ;;  %v173_v38 = vsel %vm79_vm0, %v46_v18, 0.0  ;;  %1502 = vmatpush1.bf16.msra.mxu1 %v1501_v33  ;;  %v532_v18 = vld [vmem:[%s2974_s1 + $0x618] sm:$0xff]  ;;  %v545_v33 = vld [vmem:[%s2974_s1 + $0x680] sm:$0xff]  ;;  %v1459_v43 = vpack.c.bf16 %v570_v41, %v562_v40 }
  0x68   :  { %117 = vadd.xlane.f32.xlu0 %v116_v39  ;;  %v122_v39 = vsel %vm79_vm0, %v29_v28, 0.0  ;;  %1504 = vmatprep.subr.bf16.mxu1 %v1503_v45  ;;  %v546_v28 = vld [vmem:[%s2974_s1 + $0x688] sm:$0xff]  ;;  %v561_v45 = vld [vmem:[%s2974_s1 + $0x700] sm:$0xff] }
  0x69   :  { %1442 = vmatpush1.bf16.msra.mxu0 %v1441_v46  ;;  %v1455_v31 = vpack.c.bf16 %v554_v29, %v546_v28  ;;  %v569_v46 = vld [vmem:[%s2974_s1 + $0x740] sm:$0xff] }
  0x6a   :  { %1444 = vmatprep.subr.bf16.mxu0 %v1443_v56 }
  0x6b   :  { %264 = vadd.xlane.f32.xlu1 %v263_v54  ;;  %v269_v54 = vsel %vm79_vm0, %v78_v34, 0.0  ;;  %1506 = vmatpush1.bf16.msra.mxu1 %v1505_v49  ;;  %v553_v34 = vld [vmem:[%s2974_s1 + $0x6c0] sm:$0xff]  ;;  %v1461_v49 = vpack.c.bf16 %v569_v46, %v561_v45 }
  0x6c   :  { %213 = vadd.xlane.f32.xlu0 %v212_v55  ;;  %v218_v55 = vsel %vm79_vm0, %v61_v44, 0.0  ;;  %1508 = vmatprep.subr.bf16.mxu1 %v1507_v61  ;;  %v1457_v36 = vpack.c.bf16 %v553_v34, %v545_v33  ;;  %v572_v44 = vld [vmem:[%s2974_s1 + $0x758] sm:$0xff] }
  0x6d   :  { %1446 = vmatpush1.bf16.msra.mxu0 %v1445_v62  ;;  %v1523_v48 = vpack.c.bf16 %v572_v44, %v564_v42  ;;  %v1465_v62 = vpack.c.bf16 %v585_v59, %v577_v58 }
  0x6f   :  { %171 = vadd.xlane.f32.xlu1 %v170_v6  ;;  %v125_v6 = vsel %vm79_vm0, %v30_v60, 0.0  ;;  %1510 = vmatpush1.bf16.msra.mxu1 %v1509_v1  ;;  %v2341_v60 = vand.u32 127, %v595_v47  ;;  %v1529_v1 = vpack.c.bf16 %v587_v0, %v579_v63  ;;  %vm1047_vm0 = vcmask 1041409  }
  0x70   :  { %120 = vadd.xlane.f32.xlu0 %v119_v7  ;;  %v1447_v7 = vpack.c.bf16 %v522_v3, %v514_v2  ;;  %1512 = vmatprep.subr.bf16.mxu1 %v1511_v11  ;;  %v2349_v2 = vshrl.u32 %v595_v47, 7 }
  0x71   :  { %v705_v3 = vadd.s32 4294967288, %v2341_v60  ;;  %v719_v40 = vadd.s32 4294967272, %v2341_v60  ;;  %v726_v58 = vadd.s32 4294967264, %v2341_v60 }
  0x72   :  { %1448 = vmatprep.subr.bf16.mxu0 %v1447_v7 }
  0x73   :  { %267 = vadd.xlane.f32.xlu1 %v266_v22  ;;  %1450 = vmatpush1.bf16.msra.mxu0 %v1449_v12  ;;  %v537_v22 = vld [vmem:[%s2974_s1 + $0x640] sm:$0xff]  ;;  %v703_v12 = vsub.s32 %v2341_v60, %v2349_v2 }
  0x74   :  { %216 = vadd.xlane.f32.xlu0 %v215_v23  ;;  %1514 = vmatpush1.bf16.msra.mxu1 %v1513_v15  ;;  %v1515_v23 = vpack.c.bf16 %v540_v20, %v532_v18  ;;  %v1453_v24 = vpack.c.bf16 %v537_v22, %v529_v21  ;;  %v708_v15 = vsub.s32 %v705_v3, %v2349_v2  ;;  %v712_v20 = vadd.s32 4294967280, %v2341_v60 }
  0x75   :  { %1452 = vmatprep.subr.bf16.mxu0 %v1451_v19 }
  0x76   :  { %1516 = vmatprep.subr.bf16.mxu1 %v1515_v23  ;;  %v715_v33 = vsub.s32 %v712_v20, %v2349_v2 }
  0x77   :  { %174 = vadd.xlane.f32.xlu1 %v173_v38  ;;  %1454 = vmatpush1.bf16.msra.mxu0 %v1453_v24  ;;  %v555_v38 = vld [vmem:[%s2974_s1 + $0x6d0] sm:$0xff] }
  0x78   :  { %123 = vadd.xlane.f32.xlu0 %v122_v39  ;;  %1518 = vmatpush1.bf16.msra.mxu1 %v1517_v27  ;;  %v1521_v39 = vpack.c.bf16 %v555_v38, %v547_v37 }
  0x79   :  { %1456 = vmatprep.subr.bf16.mxu0 %v1455_v31  ;;  %1520 = vmatprep.subr.bf16.mxu1 %v1519_v35 }
  0x7b   :  { %270 = vadd.xlane.f32.xlu1 %v269_v54  ;;  %1458 = vmatpush1.bf16.msra.mxu0 %v1457_v36  ;;  %v586_v54 = vld [vmem:[%s2974_s1 + $0x7c8] sm:$0xff] }
  0x7c   :  { %219 = vadd.xlane.f32.xlu0 %v218_v55  ;;  %1522 = vmatpush1.bf16.msra.mxu1 %v1521_v39  ;;  %v580_v55 = vld [vmem:[%s2974_s1 + $0x798] sm:$0xff]  ;;  %v1463_v56 = vpack.c.bf16 %v586_v54, %v578_v53 }
  0x7d   :  { %1460 = vmatprep.subr.bf16.mxu0 %v1459_v43  ;;  %1524 = vmatprep.subr.bf16.mxu1 %v1523_v48  ;;  %v1527_v61 = vpack.c.bf16 %v588_v57, %v580_v55 }
  0x7f   :  { %222 = vadd.xlane.f32.xlu1 %v221_v5  ;;  %1462 = vmatpush1.bf16.msra.mxu0 %v1461_v49  ;;  %v350_v5 = vld [vmem:[%s2974_s1 + $0x68] sm:$0xff]  ;;  %v722_v49 = vsub.s32 %v719_v40, %v2349_v2 }
  0x80   :  { %126 = vadd.xlane.f32.xlu0 %v125_v6  ;;  %1526 = vmatpush1.bf16.msra.mxu1 %v1525_v52  ;;  %v344_v6 = vld [vmem:[%s2974_s1 + $0x38] sm:$0xff]  ;;  %v1531_v9 = vpack.c.bf16 %v350_v5, %v342_v4  ;;  %v729_v5 = vsub.s32 %v726_v58, %v2349_v2 }
  0x81   :  { %1464 = vmatprep.subr.bf16.mxu0 %v1463_v56  ;;  %1528 = vmatprep.subr.bf16.mxu1 %v1527_v61  ;;  %v1595_v11 = vpack.c.bf16 %v352_v10, %v344_v6 }
  0x83   :  { %1466 = vmatpush1.bf16.msra.mxu0 %v1465_v62 }
  0x84   :  { %1530 = vmatpush1.bf16.msra.mxu1 %v1529_v1  ;;  %1532 = vmatprep.subr.bf16.mxu0 %v1531_v9 }
  0x85   :  { %1596 = vmatprep.subr.bf16.mxu1 %v1595_v11 }
  0x90   :  { %v226_v7 = vpop.xlane.xlu1 %225 }
  0x91   :  { %v130_v8 = vpop.xlane.xlu0 %129  ;;  %v321_v13 = vmul.f32 0.25, %v226_v7 }
  0x92   :  { %v289_v14 = vmul.f32 0.25, %v130_v8 }
  0x93   :  { %v971_v21 = vrot.slane %v321_v13, %v703_v12 }
  0x94   :  { %v229_v16 = vpop.xlane.xlu1 %228  ;;  %v813_v22 = vrot.slane %v289_v14, %v703_v12  ;;  %v733_v14 = vadd.s32 4294967256, %v2341_v60 }
  0x95   :  { %v133_v17 = vpop.xlane.xlu0 %132  ;;  %v322_v18 = vmul.f32 0.25, %v229_v16 }
  0x96   :  { %v290_v19 = vmul.f32 0.25, %v133_v17 }
  0x97   :  { %v975_v23 = vrot.slane %v322_v18, %v708_v15 }
  0x98   :  { %v817_v24 = vrot.slane %v290_v19, %v708_v15  ;;  %v85_v25 = vpop.xlane.xlu1 %84 }
  0x99   :  { %v82_v26 = vpop.xlane.xlu0 %81  ;;  %v976_v27 = vsel %vm710_vm1, %v975_v23, %v971_v21  ;;  %v274_v29 = vmul.f32 0.25, %v85_v25  ;;  %v736_v23 = vsub.s32 %v733_v14, %v2349_v2 }
  0x9a   :  { %v818_v28 = vsel %vm710_vm1, %v817_v24, %v813_v22  ;;  %v273_v30 = vmul.f32 0.25, %v82_v26 }
  0x9b   :  { %v709_v31 = vrot.slane %v274_v29, %v708_v15 }
  0x9c   :  { %v704_v32 = vrot.slane %v273_v30, %v703_v12  ;;  %v178_v34 = vpop.xlane.xlu1 %177 }
  0x9d   :  { %v136_v35 = vpop.xlane.xlu0 %135  ;;  %v305_v38 = vmul.f32 0.25, %v178_v34 }
  0x9e   :  { %v711_v36 = vsel %vm710_vm1, %v709_v31, %v704_v32  ;;  %v291_v37 = vmul.f32 0.25, %v136_v35  ;;  %v740_v32 = vadd.s32 4294967248, %v2341_v60 }
  0x9f   :  { %v892_v46 = vrot.slane %v305_v38, %v703_v12 }
  0xa0   :  { %v822_v39 = vrot.slane %v291_v37, %v715_v33  ;;  %v232_v41 = vpop.xlane.xlu1 %231 }
  0xa1   :  { %v181_v42 = vpop.xlane.xlu0 %180  ;;  %v323_v44 = vmul.f32 0.25, %v232_v41  ;;  %v2393_v41 = vsub.s32 %v740_v32, %v2349_v2 }
  0xa2   :  { %v823_v43 = vsel %vm717_vm2, %v822_v39, %v818_v28  ;;  %v306_v45 = vmul.f32 0.25, %v181_v42 }
  0xa3   :  { %v980_v47 = vrot.slane %v323_v44, %v715_v33 }
  0xa4   :  { %v896_v48 = vrot.slane %v306_v45, %v708_v15  ;;  %v139_v50 = vpop.xlane.xlu1 %138 }
  0xa5   :  { %v88_v51 = vpop.xlane.xlu0 %87  ;;  %v981_v52 = vsel %vm717_vm2, %v980_v47, %v976_v27  ;;  %v292_v54 = vmul.f32 0.25, %v139_v50 }
  0xa6   :  { %v897_v53 = vsel %vm710_vm1, %v896_v48, %v892_v46  ;;  %v275_v55 = vmul.f32 0.25, %v88_v51  ;;  %vm1381_vm1 = vcmask 1041408  }
  0xa7   :  { %v827_v56 = vrot.slane %v292_v54, %v722_v49 }
  0xa8   :  { %v716_v57 = vrot.slane %v275_v55, %v715_v33  ;;  %v235_v59 = vpop.xlane.xlu1 %234 }
  0xa9   :  { %v184_v61 = vpop.xlane.xlu0 %183  ;;  %v828_v62 = vsel %vm724_vm3, %v827_v56, %v823_v43  ;;  %v324_v0 = vmul.f32 0.25, %v235_v59 }
  0xaa   :  { %v718_v63 = vsel %vm717_vm2, %v716_v57, %v711_v36  ;;  %v307_v1 = vmul.f32 0.25, %v184_v61 }
  0xab   :  { %v985_v3 = vrot.slane %v324_v0, %v722_v49 }
  0xac   :  { %v901_v4 = vrot.slane %v307_v1, %v715_v33  ;;  %v142_v6 = vpop.xlane.xlu1 %141 }
  0xad   :  { %v91_v7 = vpop.xlane.xlu0 %90  ;;  %v986_v8 = vsel %vm724_vm3, %v985_v3, %v981_v52  ;;  %v293_v10 = vmul.f32 0.25, %v142_v6 }
  0xae   :  { %v902_v9 = vsel %vm717_vm2, %v901_v4, %v897_v53  ;;  %v276_v11 = vmul.f32 0.25, %v91_v7  ;;  %vm1382_vm2 = vcmask 1043458  }
  0xaf   :  { %v832_v12 = vrot.slane %v293_v10, %v729_v5 }
  0xb0   :  { %v723_v13 = vrot.slane %v276_v11, %v722_v49  ;;  %v238_v15 = vpop.xlane.xlu1 %237 }
  0xb1   :  { %v187_v16 = vpop.xlane.xlu0 %186  ;;  %v833_v17 = vsel %vm731_vm4, %v832_v12, %v828_v62  ;;  %v325_v19 = vmul.f32 0.25, %v238_v15  ;;  %v747_v15 = vadd.s32 4294967240, %v2341_v60 }
  0xb2   :  { %v725_v18 = vsel %vm724_vm3, %v723_v13, %v718_v63  ;;  %v308_v20 = vmul.f32 0.25, %v187_v16 }
  0xb3   :  { %v990_v21 = vrot.slane %v325_v19, %v729_v5 }
  0xb4   :  { %v906_v22 = vrot.slane %v308_v20, %v722_v49  ;;  %v145_v24 = vpop.xlane.xlu1 %144  ;;  %v761_v20 = vadd.s32 4294967224, %v2341_v60 }
  0xb5   :  { %v94_v25 = vpop.xlane.xlu0 %93  ;;  %v991_v26 = vsel %vm731_vm4, %v990_v21, %v986_v8  ;;  %v294_v28 = vmul.f32 0.25, %v145_v24  ;;  %v2431_v21 = vsub.s32 %v747_v15, %v2349_v2  ;;  %v775_v24 = vadd.s32 4294967208, %v2341_v60 }
  0xb6   :  { %v907_v27 = vsel %vm724_vm3, %v906_v22, %v902_v9  ;;  %v277_v29 = vmul.f32 0.25, %v94_v25  ;;  %vm1383_vm3 = vmor %vm1382_vm2, %vm1381_vm1 }
  0xb7   :  { %v837_v30 = vrot.slane %v294_v28, %v736_v23 }
  0xb8   :  { %v730_v31 = vrot.slane %v277_v29, %v729_v5  ;;  %v241_v33 = vpop.xlane.xlu1 %240  ;;  %v789_v29 = vadd.s32 4294967192, %v2341_v60 }
  0xb9   :  { %v190_v34 = vpop.xlane.xlu0 %189  ;;  %v838_v35 = vsel %vm738_vm5, %v837_v30, %v833_v17  ;;  %v326_v37 = vmul.f32 0.25, %v241_v33  ;;  %v796_v33 = vadd.s32 4294967184, %v2341_v60 }
  0xba   :  { %v732_v36 = vsel %vm731_vm4, %v730_v31, %v725_v18  ;;  %v309_v38 = vmul.f32 0.25, %v190_v34  ;;  %v754_v18 = vadd.s32 4294967232, %v2341_v60 }
  0xbb   :  { %v995_v39 = vrot.slane %v326_v37, %v736_v23 }
  0xbc   :  { %v911_v40 = vrot.slane %v309_v38, %v729_v5  ;;  %v148_v42 = vpop.xlane.xlu1 %147  ;;  %v2442_v32 = vsub.s32 %v754_v18, %v2349_v2 }
  0xbd   :  { %v97_v43 = vpop.xlane.xlu0 %96  ;;  %v2396_v44 = vsel %vm738_vm5, %v995_v39, %v991_v26  ;;  %v295_v46 = vmul.f32 0.25, %v148_v42  ;;  %v782_v26 = vadd.s32 4294967200, %v2341_v60 }
  0xbe   :  { %v912_v45 = vsel %vm731_vm4, %v911_v40, %v907_v27  ;;  %v278_v47 = vmul.f32 0.25, %v97_v43  ;;  %v2455_v40 = vsub.s32 %v775_v24, %v2349_v2  ;;  %vm1384_vm4 = vcmask 1045508  }
  0xbf   :  { %v842_v48 = vrot.slane %v295_v46, %v2393_v41  ;;  %v2462_v46 = vsub.s32 %v789_v29, %v2349_v2 }
  0xc0   :  { %v737_v49 = vrot.slane %v278_v47, %v736_v23  ;;  %v244_v50 = vpop.xlane.xlu1 %243 }
  0xc1   :  { %v193_v51 = vpop.xlane.xlu0 %192  ;;  %v2401_v52 = vsel %vm745_vm6, %v842_v48, %v838_v35  ;;  %v327_v19 = vmul.f32 0.25, %v244_v50  ;;  %v2447_v35 = vsub.s32 %v761_v20, %v2349_v2 }
  0xc2   :  { %v2404_v53 = vsel %vm738_vm5, %v737_v49, %v732_v36  ;;  %v310_v54 = vmul.f32 0.25, %v193_v51  ;;  %v803_v36 = vadd.s32 4294967176, %v2341_v60  ;;  %v2471_v51 = vsub.s32 %v796_v33, %v2349_v2 }
  0xc3   :  { %v1000_v34 = vrot.slane %v327_v19, %v2393_v41 }
  0xc4   :  { %v916_v55 = vrot.slane %v310_v54, %v736_v23  ;;  %v151_v56 = vpop.xlane.xlu1 %150  ;;  %v768_v23 = vadd.s32 4294967216, %v2341_v60 }
  0xc5   :  { %v100_v57 = vpop.xlane.xlu0 %99  ;;  %v296_v22 = vmul.f32 0.25, %v151_v56  ;;  %v1001_v54 = vsel %vm745_vm6, %v1000_v34, %v2396_v44 }
  0xc6   :  { %v2407_v58 = vsel %vm738_vm5, %v916_v55, %v912_v45  ;;  %v279_v25 = vmul.f32 0.25, %v100_v57  ;;  %v2452_v39 = vsub.s32 %v768_v23, %v2349_v2  ;;  %v2459_v45 = vsub.s32 %v782_v26, %v2349_v2  ;;  %vm1385_vm5 = vmor %vm1384_vm4, %vm1383_vm3 }
  0xc7   :  { %v847_v37 = vrot.slane %v296_v22, %v2431_v21  ;;  %v2476_v57 = vsub.s32 %v803_v36, %v2349_v2 }
  0xc8   :  { %v247_v59 = vpop.xlane.xlu1 %246  ;;  %v744_v42 = vrot.slane %v279_v25, %v2393_v41 }
  0xc9   :  { %v196_v61 = vpop.xlane.xlu0 %195  ;;  %v328_v30 = vmul.f32 0.25, %v247_v59  ;;  %v848_v59 = vsel %vm752_vm7, %v847_v37, %v2401_v52 }
  0xca   :  { %v311_v31 = vmul.f32 0.25, %v196_v61 }
  0xcb   :  { %v1005_v48 = vrot.slane %v328_v30, %v2431_v21 }
  0xcc   :  { %v154_v62 = vpop.xlane.xlu1 %153  ;;  %v921_v49 = vrot.slane %v311_v31, %v2393_v41 }
  0xcd   :  { %v103_v63 = vpop.xlane.xlu0 %102  ;;  %v297_v38 = vmul.f32 0.25, %v154_v62 }
  0xce   :  { %v280_v43 = vmul.f32 0.25, %v103_v63  ;;  %v746_v63 = vsel %vm745_vm6, %v744_v42, %v2404_v53  ;;  %v922_v52 = vsel %vm745_vm6, %v921_v49, %v2407_v58  ;;  %vm1386_vm6 = vcmask 850950  }
  0xcf   :  { %v852_v61 = vrot.slane %v297_v38, %v2442_v32 }
  0xd0   :  { %v250_v0 = vpop.xlane.xlu1 %249 }
  0xd1   :  { %v199_v1 = vpop.xlane.xlu0 %198  ;;  %v329_v50 = vmul.f32 0.25, %v250_v0  ;;  %v751_v0 = vrot.slane %v280_v43, %v2431_v21  ;;  %v853_v20 = vsel %vm759_vm8, %v852_v61, %v848_v59 }
  0xd2   :  { %v312_v55 = vmul.f32 0.25, %v199_v1 }
  0xd3   :  { %v1010_v19 = vrot.slane %v329_v50, %v2442_v32  ;;  %v753_v24 = vsel %vm752_vm7, %v751_v0, %v746_v63 }
  0xd4   :  { %v157_v3 = vpop.xlane.xlu1 %156 }
  0xd5   :  { %v106_v4 = vpop.xlane.xlu0 %105  ;;  %v298_v56 = vmul.f32 0.25, %v157_v3  ;;  %v1006_v3 = vsel %vm752_vm7, %v1005_v48, %v1001_v54 }
  0xd6   :  { %v281_v62 = vmul.f32 0.25, %v106_v4 }
  0xd7   :  { %v857_v53 = vrot.slane %v298_v56, %v2447_v35 }
  0xd8   :  { %v253_v5 = vpop.xlane.xlu1 %252  ;;  %v758_v22 = vrot.slane %v281_v62, %v2442_v32 }
  0xd9   :  { %v202_v6 = vpop.xlane.xlu0 %201  ;;  %v330_v41 = vmul.f32 0.25, %v253_v5  ;;  %v926_v5 = vrot.slane %v312_v55, %v2431_v21  ;;  %v858_v33 = vsel %vm766_vm9, %v857_v53, %v853_v20 }
  0xda   :  { %v313_v15 = vmul.f32 0.25, %v202_v6 }
  0xdb   :  { %v1015_v23 = vrot.slane %v330_v41, %v2447_v35 }
  0xdc   :  { %v160_v7 = vpop.xlane.xlu1 %159 }
  0xdd   :  { %v2409_v8 = vpop.xlane.xlu0 %108  ;;  %v299_v18 = vmul.f32 0.25, %v160_v7 }
  0xde   :  { %v282_v4 = vmul.f32 0.25, %v2409_v8  ;;  %v931_v8 = vrot.slane %v313_v15, %v2442_v32 }
  0xdf   :  { %v862_v21 = vrot.slane %v299_v18, %v2452_v39 }
  0xe0   :  { %v2411_v9 = vpop.xlane.xlu1 %255  ;;  %v765_v29 = vrot.slane %v282_v4, %v2447_v35 }
  0xe1   :  { %v2413_v10 = vpop.xlane.xlu0 %204  ;;  %v331_v6 = vmul.f32 0.25, %v2411_v9 }
  0xe2   :  { %v314_v7 = vmul.f32 0.25, %v2413_v10  ;;  %v1011_v10 = vsel %vm759_vm8, %v1010_v19, %v1006_v3 }
  0xe3   :  { %v1020_v32 = vrot.slane %v331_v6, %v2452_v39  ;;  %v1016_v36 = vsel %vm766_vm9, %v1015_v23, %v1011_v10 }
  0xe4   :  { %v2415_v11 = vpop.xlane.xlu1 %162  ;;  %v936_v34 = vrot.slane %v314_v7, %v2447_v35 }
  0xe5   :  { %v2417_v12 = vpop.xlane.xlu0 %111  ;;  %v300_v58 = vmul.f32 0.25, %v2415_v11  ;;  %v927_v11 = vsel %vm752_vm7, %v926_v5, %v922_v52  ;;  %vm1387_vm7 = vmor %vm1386_vm6, %vm1385_vm5 }
  0xe6   :  { %v283_v25 = vmul.f32 0.25, %v2417_v12  ;;  %v760_v12 = vsel %vm759_vm8, %v758_v22, %v753_v24 }
  0xe7   :  { %v867_v37 = vrot.slane %v300_v58, %v2455_v40  ;;  %v767_v35 = vsel %vm766_vm9, %v765_v29, %v760_v12 }
  0xe8   :  { %v2419_v13 = vpop.xlane.xlu1 %258  ;;  %v772_v42 = vrot.slane %v283_v25, %v2452_v39 }
  0xe9   :  { %v2421_v14 = vpop.xlane.xlu0 %207  ;;  %v332_v30 = vmul.f32 0.25, %v2419_v13  ;;  %v932_v13 = vsel %vm759_vm8, %v931_v8, %v927_v11 }
  0xea   :  { %v315_v31 = vmul.f32 0.25, %v2421_v14  ;;  %v863_v14 = vsel %vm773_vm10, %v862_v21, %v858_v33  ;;  %v937_v56 = vsel %vm766_vm9, %v936_v34, %v932_v13  ;;  %v341_v13 = vld [vmem:[%s2974_s1 + $0x20] sm:$0xff] }
  0xeb   :  { %v1025_v50 = vrot.slane %v332_v30, %v2455_v40 }
  0xec   :  { %v2424_v16 = vpop.xlane.xlu1 %165  ;;  %v941_v54 = vrot.slane %v315_v31, %v2452_v39 }
  0xed   :  { %v2426_v17 = vpop.xlane.xlu0 %114  ;;  %v301_v38 = vmul.f32 0.25, %v2424_v16  ;;  %v1021_v16 = vsel %vm773_vm10, %v1020_v32, %v1016_v36 }
  0xee   :  { %v284_v43 = vmul.f32 0.25, %v2426_v17  ;;  %v868_v17 = vsel %vm780_vm11, %v867_v37, %v863_v14 }
  0xef   :  { %v872_v62 = vrot.slane %v301_v38, %v2459_v45 }
  0xf0   :  { %v2436_v27 = vpop.xlane.xlu1 %261  ;;  %v779_v39 = vrot.slane %v284_v43, %v2455_v40 }
  0xf1   :  { %v2438_v28 = vpop.xlane.xlu0 %210  ;;  %v333_v55 = vmul.f32 0.25, %v2436_v27  ;;  %v774_v27 = vsel %vm773_vm10, %v772_v42, %v767_v35  ;;  %v873_v53 = vsel %vm787_vm12, %v872_v62, %v868_v17  ;;  %v360_v17 = vld [vmem:[%s2974_s1 + $0xb8] sm:$0xff] }
  0xf2   :  { %v316_v59 = vmul.f32 0.25, %v2438_v28  ;;  %v1026_v28 = vsel %vm780_vm11, %v1025_v50, %v1021_v16  ;;  %v781_v22 = vsel %vm780_vm11, %v779_v39, %v774_v27  ;;  %v368_v62 = vld [vmem:[%s2974_s1 + $0xf8] sm:$0xff]  ;;  %v357_v39 = vld [vmem:[%s2974_s1 + $0xa0] sm:$0xff] }
  0xf3   :  { %v1030_v52 = vrot.slane %v333_v55, %v2459_v45  ;;  %v358_v55 = vld [vmem:[%s2974_s1 + $0xa8] sm:$0xff] }
  0xf4   :  { %v2464_v60 = vpop.xlane.xlu1 %168  ;;  %v946_v4 = vrot.slane %v316_v59, %v2455_v40 }
  0xf5   :  { %v2466_v47 = vpop.xlane.xlu0 %117  ;;  %v302_v61 = vmul.f32 0.25, %v2464_v60  ;;  %v942_v60 = vsel %vm773_vm10, %v941_v54, %v937_v56  ;;  %v1031_v21 = vsel %vm787_vm12, %v1030_v52, %v1026_v28  ;;  %v367_v28 = vld [vmem:[%s2974_s1 + $0xf0] sm:$0xff] }
  0xf6   :  { %v285_v41 = vmul.f32 0.25, %v2466_v47 }
  0xf7   :  { %v877_v47 = vrot.slane %v302_v61, %v2462_v46  ;;  %v366_v61 = vld [vmem:[%s2974_s1 + $0xe8] sm:$0xff] }
  0xf8   :  { %v265_v44 = vpop.xlane.xlu1 %264  ;;  %v786_v6 = vrot.slane %v285_v41, %v2459_v45 }
  0xf9   :  { %v2484_v1 = vpop.xlane.xlu0 %213  ;;  %v334_v63 = vmul.f32 0.25, %v265_v44  ;;  %v878_v10 = vsel %vm794_vm13, %v877_v47, %v873_v53  ;;  %v382_v47 = vld [vmem:[%s2974_s1 + $0x168] sm:$0xff] }
  0xfa   :  { %v317_v44 = vmul.f32 0.25, %v2484_v1  ;;  %v788_v31 = vsel %vm787_vm12, %v786_v6, %v781_v22 }
  0xfb   :  { %v1035_v7 = vrot.slane %v334_v63, %v2462_v46 }
  0xfc   :  { %v172_v9 = vpop.xlane.xlu1 %171  ;;  %v951_v29 = vrot.slane %v317_v44, %v2459_v45  ;;  %v376_v44 = vld [vmem:[%s2974_s1 + $0x138] sm:$0xff] }
  0xfd   :  { %v121_v26 = vpop.xlane.xlu0 %120  ;;  %v303_v0 = vmul.f32 0.25, %v172_v9  ;;  %v1036_v11 = vsel %vm794_vm13, %v1035_v7, %v1031_v21  ;;  %v373_v7 = vld [vmem:[%s2974_s1 + $0x120] sm:$0xff]  ;;  %v392_v21 = vld [vmem:[%s2974_s1 + $0x1b8] sm:$0xff] }
  0xfe   :  { %v286_v5 = vmul.f32 0.25, %v121_v26  ;;  %v947_v26 = vsel %vm780_vm11, %v946_v4, %v942_v60  ;;  %v374_v60 = vld [vmem:[%s2974_s1 + $0x128] sm:$0xff]  ;;  %v1599_v4 = vpack.c.bf16 %v368_v62, %v360_v17 }
  0xff   :  { %v882_v23 = vrot.slane %v303_v0, %v2471_v51  ;;  %v952_v35 = vsel %vm787_vm12, %v951_v29, %v947_v26  ;;  %v365_v0 = vld [vmem:[%s2974_s1 + $0xe0] sm:$0xff]  ;;  %v1539_v22 = vpack.c.bf16 %v382_v47, %v374_v60  ;;  %v438_v17 = vld [vmem:[%s2974_s1 + $0x328] sm:$0xff]  ;;  %v464_v47 = vld [vmem:[%s2974_s1 + $0x3f8] sm:$0xff] }
 0x100   :  { %v268_v48 = vpop.xlane.xlu1 %267  ;;  %v793_v30 = vrot.slane %v286_v5, %v2462_v46  ;;  %v384_v5 = vld [vmem:[%s2974_s1 + $0x178] sm:$0xff]  ;;  %v1537_v53 = vpack.c.bf16 %v365_v0, %v357_v39  ;;  %v389_v26 = vld [vmem:[%s2974_s1 + $0x1a0] sm:$0xff]  ;;  %v446_v62 = vld [vmem:[%s2974_s1 + $0x368] sm:$0xff] }
 0x101   :  { %v217_v49 = vpop.xlane.xlu0 %216  ;;  %v335_v15 = vmul.f32 0.25, %v268_v48  ;;  %v883_v34 = vsel %vm801_vm14, %v882_v23, %v878_v10  ;;  %v349_v48 = vld [vmem:[%s2974_s1 + $0x60] sm:$0xff]  ;;  %v1603_v23 = vpack.c.bf16 %v384_v5, %v376_v44  ;;  %v454_v60 = vld [vmem:[%s2974_s1 + $0x3a8] sm:$0xff] }
 0x102   :  { %v318_v20 = vmul.f32 0.25, %v217_v49  ;;  %v351_v49 = vld [vmem:[%s2974_s1 + $0x70] sm:$0xff]  ;;  %v795_v50 = vsel %vm794_vm13, %v793_v30, %v788_v31  ;;  %v1533_v27 = vpack.c.bf16 %v349_v48, %v341_v13  ;;  %v397_v10 = vld [vmem:[%s2974_s1 + $0x1e0] sm:$0xff]  ;;  %v430_v48 = vld [vmem:[%s2974_s1 + $0x2e8] sm:$0xff] }
 0x103   :  { %v1040_v58 = vrot.slane %v335_v15, %v2471_v51  ;;  %v391_v31 = vld [vmem:[%s2974_s1 + $0x1b0] sm:$0xff]  ;;  %v437_v39 = vld [vmem:[%s2974_s1 + $0x320] sm:$0xff] }
 0x104   :  { %v175_v18 = vpop.xlane.xlu1 %174  ;;  %v956_v33 = vrot.slane %v318_v20, %v2462_v46  ;;  %v381_v20 = vld [vmem:[%s2974_s1 + $0x160] sm:$0xff] }
 0x105   :  { %v124_v3 = vpop.xlane.xlu0 %123  ;;  %v304_v19 = vmul.f32 0.25, %v175_v18  ;;  %v1041_v12 = vsel %vm801_vm14, %v1040_v58, %v1036_v11  ;;  %v375_v58 = vld [vmem:[%s2974_s1 + $0x130] sm:$0xff]  ;;  %v445_v0 = vld [vmem:[%s2974_s1 + $0x360] sm:$0xff] }
 0x106   :  { %v287_v24 = vmul.f32 0.25, %v124_v3  ;;  %v957_v16 = vsel %vm794_vm13, %v956_v33, %v952_v35  ;;  %v359_v3 = vld [vmem:[%s2974_s1 + $0xb0] sm:$0xff]  ;;  %v406_v33 = vld [vmem:[%s2974_s1 + $0x228] sm:$0xff]  ;;  %v1557_v44 = vpack.c.bf16 %v445_v0, %v437_v39 }
 0x107   :  { %v887_v1 = vrot.slane %v304_v19, %v2476_v57  ;;  %v1535_v19 = vpack.c.bf16 %v366_v61, %v358_v55  ;;  %v1601_v6 = vpack.c.bf16 %v367_v28, %v359_v3  ;;  %v399_v11 = vld [vmem:[%s2974_s1 + $0x1f0] sm:$0xff]  ;;  %v429_v55 = vld [vmem:[%s2974_s1 + $0x2e0] sm:$0xff] }
 0x108   :  { %v271_v40 = vpop.xlane.xlu1 %270  ;;  %v800_v36 = vrot.slane %v287_v24, %v2471_v51  ;;  %v383_v24 = vld [vmem:[%s2974_s1 + $0x170] sm:$0xff] }
 0x109   :  { %v220_v8 = vpop.xlane.xlu0 %219  ;;  %v336_v25 = vmul.f32 0.25, %v271_v40  ;;  %v888_v46 = vsel %vm808_vm15, %v887_v1, %v883_v34  ;;  %v390_v40 = vld [vmem:[%s2974_s1 + $0x1a8] sm:$0xff]  ;;  %v400_v1 = vld [vmem:[%s2974_s1 + $0x1f8] sm:$0xff]  ;;  %v431_v61 = vld [vmem:[%s2974_s1 + $0x2f0] sm:$0xff] }
 0x10a   :  { %v319_v9 = vmul.f32 0.25, %v220_v8  ;;  %v802_v41 = vsel %vm801_vm14, %v800_v36, %v795_v50  ;;  %v398_v8 = vld [vmem:[%s2974_s1 + $0x1e8] sm:$0xff]  ;;  %v1607_v30 = vpack.c.bf16 %v400_v1, %v392_v21  ;;  %v408_v34 = vld [vmem:[%s2974_s1 + $0x238] sm:$0xff]  ;;  %v1545_v36 = vpack.c.bf16 %v397_v10, %v389_v26  ;;  %v439_v3 = vld [vmem:[%s2974_s1 + $0x330] sm:$0xff] }
 0x10b   :  { %v1045_v32 = vrot.slane %v336_v25, %v2476_v57  ;;  %v1541_v25 = vpack.c.bf16 %v381_v20, %v373_v7  ;;  %v1543_v29 = vpack.c.bf16 %v398_v8, %v390_v40  ;;  %v447_v28 = vld [vmem:[%s2974_s1 + $0x370] sm:$0xff]  ;;  %v472_v40 = vld [vmem:[%s2974_s1 + $0x438] sm:$0xff] }
 0x10c   :  { %v961_v37 = vrot.slane %v319_v9, %v2471_v51  ;;  %v223_v38 = vpop.xlane.xlu1 %222  ;;  %v343_v51 = vld [vmem:[%s2974_s1 + $0x30] sm:$0xff]  ;;  %v1605_v9 = vpack.c.bf16 %v383_v24, %v375_v58  ;;  %v1621_v5 = vpack.c.bf16 %v447_v28, %v439_v3  ;;  %v470_v58 = vld [vmem:[%s2974_s1 + $0x428] sm:$0xff]  ;;  %v480_v8 = vld [vmem:[%s2974_s1 + $0x478] sm:$0xff] }
 0x10d   :  { %v127_v45 = vpop.xlane.xlu0 %126  ;;  %v320_v14 = vmul.f32 0.25, %v223_v38  ;;  %v1046_v43 = vsel %vm808_vm15, %v1045_v32, %v1041_v12  ;;  %v414_v32 = vld [vmem:[%s2974_s1 + $0x268] sm:$0xff]  ;;  %v416_v12 = vld [vmem:[%s2974_s1 + $0x278] sm:$0xff]  ;;  %v405_v38 = vld [vmem:[%s2974_s1 + $0x220] sm:$0xff]  ;;  %v1627_v10 = vpack.c.bf16 %v480_v8, %v472_v40 }
 0x10e   :  { %v288_v42 = vmul.f32 0.25, %v127_v45  ;;  %v1049_v54 = vsel %vm1047_vm0, %v1046_v43, %v888_v46  ;;  %v962_v63 = vsel %vm801_vm14, %v961_v37, %v957_v16  ;;  %v1609_v37 = vpack.c.bf16 %v399_v11, %v391_v31  ;;  %v413_v45 = vld [vmem:[%s2974_s1 + $0x260] sm:$0xff]  ;;  %v415_v46 = vld [vmem:[%s2974_s1 + $0x270] sm:$0xff]  ;;  %v422_v43 = vld [vmem:[%s2974_s1 + $0x2a8] sm:$0xff] }
 0x10f   :  { %v966_v56 = vrot.slane %v320_v14, %v2476_v57  ;;  %1116 = vmatprep.mubr.f32.mxu0 %v1049_v54  ;;  %1187 = vmatprep.mubr.f32.mxu1 %v1049_v54  ;;  %v1547_v13 = vpack.c.bf16 %v414_v32, %v406_v33  ;;  %v1611_v14 = vpack.c.bf16 %v416_v12, %v408_v34  ;;  %v478_v24 = vld [vmem:[%s2974_s1 + $0x468] sm:$0xff]  ;;  %v488_v33 = vld [vmem:[%s2974_s1 + $0x4b8] sm:$0xff] }
 0x110   :  { %v807_v59 = vrot.slane %v288_v42, %v2476_v57  ;;  %v1597_v57 = vpack.c.bf16 %v351_v49, %v343_v51  ;;  %v407_v42 = vld [vmem:[%s2974_s1 + $0x230] sm:$0xff]  ;;  %v424_v51 = vld [vmem:[%s2974_s1 + $0x2b8] sm:$0xff]  ;;  %v1549_v35 = vpack.c.bf16 %v413_v45, %v405_v38  ;;  %v1551_v16 = vpack.c.bf16 %v430_v48, %v422_v43  ;;  %v486_v31 = vld [vmem:[%s2974_s1 + $0x4a8] sm:$0xff] }
 0x111   :  { %v967_v18 = vsel %vm808_vm15, %v966_v56, %v962_v63  ;;  %v432_v49 = vld [vmem:[%s2974_s1 + $0x2f8] sm:$0xff]  ;;  %v1613_v50 = vpack.c.bf16 %v415_v46, %v407_v42  ;;  %v1563_v26 = vpack.c.bf16 %v478_v24, %v470_v58  ;;  %v494_v11 = vld [vmem:[%s2974_s1 + $0x4e8] sm:$0xff] }
 0x112   :  { %v809_v15 = vsel %vm808_vm15, %v807_v59, %v802_v41  ;;  %v1615_v56 = vpack.c.bf16 %v432_v49, %v424_v51  ;;  %v423_v59 = vld [vmem:[%s2974_s1 + $0x2b0] sm:$0xff]  ;;  %v440_v41 = vld [vmem:[%s2974_s1 + $0x338] sm:$0xff]  ;;  %v1567_v38 = vpack.c.bf16 %v494_v11, %v486_v31  ;;  %v502_v42 = vld [vmem:[%s2974_s1 + $0x528] sm:$0xff] }
 0x113   :  { %v2610_v52 = vsel %vm1047_vm0, %v967_v18, %v809_v15  ;;  %v448_v63 = vld [vmem:[%s2974_s1 + $0x378] sm:$0xff]  ;;  %v1555_v15 = vpack.c.bf16 %v446_v62, %v438_v17  ;;  %v510_v46 = vld [vmem:[%s2974_s1 + $0x568] sm:$0xff] }
 0x114   :  { %1117 = vmatmul.mubr.f32.vlgmr.msra.gmra.mrb[0].mxu0 %v2610_v52  ;;  %1188 = vmatmul.mubr.f32.vlgmr.msra.gmra.mrb[0].mxu1 %v2610_v52  ;;  %v1619_v18 = vpack.c.bf16 %v448_v63, %v440_v41  ;;  %v496_v32 = vld [vmem:[%s2974_s1 + $0x4f8] sm:$0xff]  ;;  %v534_v3 = vld [vmem:[%s2974_s1 + $0x628] sm:$0xff] }
 0x115   :  { %1534 = vmatpush1.bf16.msra.mxu0 %v1533_v27  ;;  %1598 = vmatpush1.bf16.msra.mxu1 %v1597_v57  ;;  %v1617_v57 = vpack.c.bf16 %v431_v61, %v423_v59  ;;  %v1631_v45 = vpack.c.bf16 %v496_v32, %v488_v33  ;;  %v504_v43 = vld [vmem:[%s2974_s1 + $0x538] sm:$0xff]  ;;  %v518_v59 = vld [vmem:[%s2974_s1 + $0x5a8] sm:$0xff] }
 0x116   :  { %1258 = vmatprep.mubr.f32.mxu0 %v1049_v54  ;;  %1329 = vmatprep.mubr.f32.mxu1 %v1049_v54  ;;  %v421_v54 = vld [vmem:[%s2974_s1 + $0x2a0] sm:$0xff]  ;;  %v512_v48 = vld [vmem:[%s2974_s1 + $0x578] sm:$0xff]  ;;  %v526_v61 = vld [vmem:[%s2974_s1 + $0x5e8] sm:$0xff] }
 0x117   :  { %1536 = vmatprep.subr.bf16.mxu0 %v1535_v19  ;;  %1600 = vmatprep.subr.bf16.mxu1 %v1599_v4  ;;  %v1553_v27 = vpack.c.bf16 %v429_v55, %v421_v54  ;;  %v462_v19 = vld [vmem:[%s2974_s1 + $0x3e8] sm:$0xff]  ;;  %v456_v4 = vld [vmem:[%s2974_s1 + $0x3b8] sm:$0xff]  ;;  %v1571_v54 = vpack.c.bf16 %v510_v46, %v502_v42  ;;  %v1635_v55 = vpack.c.bf16 %v512_v48, %v504_v43 }
 0x118   :  { %v1559_v7 = vpack.c.bf16 %v462_v19, %v454_v60  ;;  %v1623_v20 = vpack.c.bf16 %v464_v47, %v456_v4  ;;  %v520_v17 = vld [vmem:[%s2974_s1 + $0x5b8] sm:$0xff]  ;;  %v1575_v39 = vpack.c.bf16 %v526_v61, %v518_v59  ;;  %v542_v28 = vld [vmem:[%s2974_s1 + $0x668] sm:$0xff]  ;;  %v597_v59 = vsub.s32 0, %v2349_v2 }
 0x119   :  { %1538 = vmatpush1.bf16.msra.mxu0 %v1537_v53  ;;  %1602 = vmatpush1.bf16.msra.mxu1 %v1601_v6  ;;  %v453_v53 = vld [vmem:[%s2974_s1 + $0x3a0] sm:$0xff]  ;;  %v528_v62 = vld [vmem:[%s2974_s1 + $0x5f8] sm:$0xff]  ;;  %v605_v61 = vsub.s32 2, %v2349_v2 }
 0x11a   :  { %1540 = vmatprep.subr.bf16.mxu0 %v1539_v22  ;;  %1604 = vmatprep.subr.bf16.mxu1 %v1603_v23  ;;  %v461_v6 = vld [vmem:[%s2974_s1 + $0x3e0] sm:$0xff]  ;;  %v455_v22 = vld [vmem:[%s2974_s1 + $0x3b0] sm:$0xff]  ;;  %v1639_v0 = vpack.c.bf16 %v528_v62, %v520_v17  ;;  %v536_v60 = vld [vmem:[%s2974_s1 + $0x638] sm:$0xff]  ;;  %v601_v62 = vsub.s32 1, %v2349_v2 }
 0x11b   :  { %v463_v23 = vld [vmem:[%s2974_s1 + $0x3f0] sm:$0xff]  ;;  %v1561_v21 = vpack.c.bf16 %v461_v6, %v453_v53  ;;  %v544_v19 = vld [vmem:[%s2974_s1 + $0x678] sm:$0xff]  ;;  %v1579_v53 = vpack.c.bf16 %v542_v28, %v534_v3  ;;  %v593_v17 = vld [vmem:[%s2975_s2] sm:$0xff] }
 0x11c   :  { %v1625_v1 = vpack.c.bf16 %v463_v23, %v455_v22  ;;  %v1643_v6 = vpack.c.bf16 %v544_v19, %v536_v60  ;;  %v550_v22 = vld [vmem:[%s2974_s1 + $0x6a8] sm:$0xff]  ;;  %v552_v58 = vld [vmem:[%s2974_s1 + $0x6b8] sm:$0xff] }
 0x11d   :  { %1542 = vmatpush1.bf16.msra.mxu0 %v1541_v25  ;;  %1606 = vmatpush1.bf16.msra.mxu1 %v1605_v9  ;;  %v469_v25 = vld [vmem:[%s2974_s1 + $0x420] sm:$0xff]  ;;  %v558_v23 = vld [vmem:[%s2974_s1 + $0x6e8] sm:$0xff]  ;;  %v560_v24 = vld [vmem:[%s2974_s1 + $0x6f8] sm:$0xff] }
 0x11e   :  { %1544 = vmatprep.subr.bf16.mxu0 %v1543_v29  ;;  %1608 = vmatprep.subr.bf16.mxu1 %v1607_v30  ;;  %v477_v9 = vld [vmem:[%s2974_s1 + $0x460] sm:$0xff]  ;;  %v471_v29 = vld [vmem:[%s2974_s1 + $0x430] sm:$0xff]  ;;  %v568_v31 = vld [vmem:[%s2974_s1 + $0x738] sm:$0xff] }
 0x11f   :  { %v479_v30 = vld [vmem:[%s2974_s1 + $0x470] sm:$0xff]  ;;  %v1565_v34 = vpack.c.bf16 %v477_v9, %v469_v25  ;;  %v1583_v25 = vpack.c.bf16 %v558_v23, %v550_v22  ;;  %v1647_v9 = vpack.c.bf16 %v560_v24, %v552_v58  ;;  %v576_v11 = vld [vmem:[%s2974_s1 + $0x778] sm:$0xff]  ;;  %v613_v23 = vsub.s32 4, %v2349_v2 }
 0x120   :  { %v1629_v12 = vpack.c.bf16 %v479_v30, %v471_v29  ;;  %v566_v29 = vld [vmem:[%s2974_s1 + $0x728] sm:$0xff]  ;;  %v584_v42 = vld [vmem:[%s2974_s1 + $0x7b8] sm:$0xff]  ;;  %v621_v58 = vsub.s32 6, %v2349_v2  ;;  %v617_v24 = vsub.s32 5, %v2349_v2 }
 0x121   :  { %1546 = vmatpush1.bf16.msra.mxu0 %v1545_v36  ;;  %1610 = vmatpush1.bf16.msra.mxu1 %v1609_v37  ;;  %v485_v36 = vld [vmem:[%s2974_s1 + $0x4a0] sm:$0xff]  ;;  %v574_v30 = vld [vmem:[%s2974_s1 + $0x768] sm:$0xff]  ;;  %v592_v46 = vld [vmem:[%s2974_s1 + $0x7f8] sm:$0xff] }
 0x122   :  { %1548 = vmatprep.subr.bf16.mxu0 %v1547_v13  ;;  %1612 = vmatprep.subr.bf16.mxu1 %v1611_v14  ;;  %v493_v37 = vld [vmem:[%s2974_s1 + $0x4e0] sm:$0xff]  ;;  %v487_v13 = vld [vmem:[%s2974_s1 + $0x4b0] sm:$0xff] }
 0x123   :  { %v495_v14 = vld [vmem:[%s2974_s1 + $0x4f0] sm:$0xff]  ;;  %v1569_v51 = vpack.c.bf16 %v493_v37, %v485_v36  ;;  %v1587_v36 = vpack.c.bf16 %v574_v30, %v566_v29  ;;  %v1651_v37 = vpack.c.bf16 %v576_v11, %v568_v31 }
 0x124   :  { %v1633_v49 = vpack.c.bf16 %v495_v14, %v487_v13  ;;  %v582_v13 = vld [vmem:[%s2974_s1 + $0x7a8] sm:$0xff] }
 0x125   :  { %1550 = vmatpush1.bf16.msra.mxu0 %v1549_v35  ;;  %1614 = vmatpush1.bf16.msra.mxu1 %v1613_v50  ;;  %v501_v35 = vld [vmem:[%s2974_s1 + $0x520] sm:$0xff]  ;;  %v590_v14 = vld [vmem:[%s2974_s1 + $0x7e8] sm:$0xff] }
 0x126   :  { %1552 = vmatprep.subr.bf16.mxu0 %v1551_v16  ;;  %1616 = vmatprep.subr.bf16.mxu1 %v1615_v56  ;;  %v509_v50 = vld [vmem:[%s2974_s1 + $0x560] sm:$0xff]  ;;  %v503_v16 = vld [vmem:[%s2974_s1 + $0x530] sm:$0xff] }
 0x127   :  { %v511_v56 = vld [vmem:[%s2974_s1 + $0x570] sm:$0xff]  ;;  %v1573_v41 = vpack.c.bf16 %v509_v50, %v501_v35  ;;  %v1655_v35 = vpack.c.bf16 %v592_v46, %v584_v42  ;;  %v589_v50 = vld [vmem:[%s2974_s1 + $0x7e0] sm:$0xff] }
 0x128   :  { %v1637_v63 = vpack.c.bf16 %v511_v56, %v503_v16 }
 0x129   :  { %1554 = vmatpush1.bf16.msra.mxu0 %v1553_v27  ;;  %1618 = vmatpush1.bf16.msra.mxu1 %v1617_v57  ;;  %v517_v27 = vld [vmem:[%s2974_s1 + $0x5a0] sm:$0xff] }
 0x12a   :  { %1556 = vmatprep.subr.bf16.mxu0 %v1555_v15  ;;  %1620 = vmatprep.subr.bf16.mxu1 %v1619_v18  ;;  %v525_v57 = vld [vmem:[%s2974_s1 + $0x5e0] sm:$0xff]  ;;  %v519_v15 = vld [vmem:[%s2974_s1 + $0x5b0] sm:$0xff] }
 0x12b   :  { %v527_v18 = vld [vmem:[%s2974_s1 + $0x5f0] sm:$0xff]  ;;  %v1577_v4 = vpack.c.bf16 %v525_v57, %v517_v27  ;;  %v609_v27 = vsub.s32 3, %v2349_v2  ;;  %v598_v57 = vrot.slane %v593_v17, %v597_v59 }
 0x12c   :  { %v1641_v47 = vpack.c.bf16 %v527_v18, %v519_v15 }
 0x12d   :  { %1558 = vmatpush1.bf16.msra.mxu0 %v1557_v44  ;;  %1622 = vmatpush1.bf16.msra.mxu1 %v1621_v5  ;;  %v533_v44 = vld [vmem:[%s2974_s1 + $0x620] sm:$0xff]  ;;  %v610_v18 = vrot.slane %v593_v17, %v609_v27 }
 0x12e   :  { %1560 = vmatprep.subr.bf16.mxu0 %v1559_v7  ;;  %1624 = vmatprep.subr.bf16.mxu1 %v1623_v20  ;;  %v541_v5 = vld [vmem:[%s2974_s1 + $0x660] sm:$0xff]  ;;  %v535_v7 = vld [vmem:[%s2974_s1 + $0x630] sm:$0xff] }
 0x12f   :  { %v543_v20 = vld [vmem:[%s2974_s1 + $0x670] sm:$0xff]  ;;  %v1581_v40 = vpack.c.bf16 %v541_v5, %v533_v44 }
 0x130   :  { %v1645_v8 = vpack.c.bf16 %v543_v20, %v535_v7 }
 0x131   :  { %1562 = vmatpush1.bf16.msra.mxu0 %v1561_v21  ;;  %1626 = vmatpush1.bf16.msra.mxu1 %v1625_v1  ;;  %v549_v21 = vld [vmem:[%s2974_s1 + $0x6a0] sm:$0xff] }
 0x132   :  { %1564 = vmatprep.subr.bf16.mxu0 %v1563_v26  ;;  %1628 = vmatprep.subr.bf16.mxu1 %v1627_v10  ;;  %v557_v1 = vld [vmem:[%s2974_s1 + $0x6e0] sm:$0xff]  ;;  %v551_v26 = vld [vmem:[%s2974_s1 + $0x6b0] sm:$0xff] }
 0x133   :  { %v559_v10 = vld [vmem:[%s2974_s1 + $0x6f0] sm:$0xff]  ;;  %v1585_v33 = vpack.c.bf16 %v557_v1, %v549_v21  ;;  %v622_v21 = vrot.slane %v593_v17, %v621_v58  ;;  %v618_v1 = vrot.slane %v593_v17, %v617_v24 }
 0x134   :  { %v1649_v32 = vpack.c.bf16 %v559_v10, %v551_v26 }
 0x135   :  { %1566 = vmatpush1.bf16.msra.mxu0 %v1565_v34  ;;  %1630 = vmatpush1.bf16.msra.mxu1 %v1629_v12  ;;  %v565_v34 = vld [vmem:[%s2974_s1 + $0x720] sm:$0xff] }
 0x136   :  { %1568 = vmatprep.subr.bf16.mxu0 %v1567_v38  ;;  %1632 = vmatprep.subr.bf16.mxu1 %v1631_v45  ;;  %v573_v12 = vld [vmem:[%s2974_s1 + $0x760] sm:$0xff]  ;;  %v567_v38 = vld [vmem:[%s2974_s1 + $0x730] sm:$0xff] }
 0x137   :  { %v575_v45 = vld [vmem:[%s2974_s1 + $0x770] sm:$0xff]  ;;  %v1589_v43 = vpack.c.bf16 %v573_v12, %v565_v34 }
 0x138   :  { %v1653_v48 = vpack.c.bf16 %v575_v45, %v567_v38 }
 0x139   :  { %1570 = vmatpush1.bf16.msra.mxu0 %v1569_v51  ;;  %1634 = vmatpush1.bf16.msra.mxu1 %v1633_v49  ;;  %v581_v51 = vld [vmem:[%s2974_s1 + $0x7a0] sm:$0xff]  ;;  %v1591_v49 = vpack.c.bf16 %v590_v14, %v582_v13 }
 0x13a   :  { %1572 = vmatprep.subr.bf16.mxu0 %v1571_v54  ;;  %1636 = vmatprep.subr.bf16.mxu1 %v1635_v55  ;;  %v583_v54 = vld [vmem:[%s2974_s1 + $0x7b0] sm:$0xff]  ;;  %v1593_v16 = vpack.c.bf16 %v589_v50, %v581_v51 }
 0x13b   :  { %v591_v55 = vld [vmem:[%s2974_s1 + $0x7f0] sm:$0xff]  ;;  %s1686_s1 = smov [#allocation2]  }
 0x13c   :  { %v1657_v56 = vpack.c.bf16 %v591_v55, %v583_v54  ;;  %s1395_s2 = sshll.u32 %s1686_s1, 4  ;;  %s1396_s2 = int_to_ptr.vmem [resolvable:$true] %s1395_s2 }
 0x13d   :  { %1574 = vmatpush1.bf16.msra.mxu0 %v1573_v41  ;;  %1638 = vmatpush1.bf16.msra.mxu1 %v1637_v63  ;;  %v1685_v41 = vmov 1983009808   ;;  %s1661_s0 = scalar_lea.vmem %s1396_s2, 256  ;;  %p1666_p1 = scmp.lt.s32.totalorder %s1396_s2, %s1396_s2 }
 0x13e   :  { %1576 = vmatprep.subr.bf16.mxu0 %v1575_v39  ;;  %1640 = vmatprep.subr.bf16.mxu1 %v1639_v0  ;;  %v1347_v63 = vunpack.c.l.s4 %v1685_v41  ;;  %v606_v39 = vrot.slane %v593_v17, %v605_v61  ;;  %v602_v0 = vrot.slane %v593_v17, %v601_v62  ;;  %p1662_p0 = scmp.ne.s32.totalorder %s1396_s2, %s1661_s0  ;;  %p1667_p2 = scmp.lt.s32.totalorder %s1661_s0, %s1661_s0 }
 0x140   :  { %v1348_v15 = vunpack.c.0.s8 %v1347_v63  ;;  %p1668_p3 = por %p1667_p2, %p1666_p1 }
 0x141   :  { %1578 = vmatpush1.bf16.msra.mxu0 %v1577_v4  ;;  %1642 = vmatpush1.bf16.msra.mxu1 %v1641_v47 }
 0x142   :  { %1580 = vmatprep.subr.bf16.mxu0 %v1579_v53  ;;  %1644 = vmatprep.subr.bf16.mxu1 %v1643_v6  ;;  %v1351_v44 = vsub.s32 %v1348_v15, %v2349_v2  ;;  %p1669_p4 = pnand %p1668_p3, %p1662_p0 }
 0x145   :  { %1582 = vmatpush1.bf16.msra.mxu0 %v1581_v40  ;;  %1646 = vmatpush1.bf16.msra.mxu1 %v1645_v8  ;;  %v625_v40 = vsub.s32 7, %v2349_v2  ;;  %v614_v8 = vrot.slane %v593_v17, %v613_v23 }
 0x146   :  { %1584 = vmatprep.subr.bf16.mxu0 %v1583_v25  ;;  %1648 = vmatprep.subr.bf16.mxu1 %v1647_v9 }
 0x147   :  { %v626_v25 = vrot.slane %v593_v17, %v625_v40 }
 0x149   :  { %1586 = vmatpush1.bf16.msra.mxu0 %v1585_v33  ;;  %1650 = vmatpush1.bf16.msra.mxu1 %v1649_v32 }
 0x14a   :  { %1588 = vmatprep.subr.bf16.mxu0 %v1587_v36  ;;  %1652 = vmatprep.subr.bf16.mxu1 %v1651_v37 }
 0x14d   :  { %1590 = vmatpush1.bf16.msra.mxu0 %v1589_v43  ;;  %1654 = vmatpush1.bf16.msra.mxu1 %v1653_v48 }
 0x14e   :  { %1592 = vmatprep.subr.bf16.mxu0 %v1591_v49  ;;  %1656 = vmatprep.subr.bf16.mxu1 %v1655_v35 }
 0x151   :  { %1594 = vmatpush1.bf16.msra.mxu0 %v1593_v16  ;;  %1658 = vmatpush1.bf16.msra.mxu1 %v1657_v56 }
 0x154   :  { %1259 = vmatmul.mubr.f32.vlgmr.msra.gmra.mrb[2].mxu0 %v2610_v52  ;;  %1330 = vmatmul.mubr.f32.vlgmr.msra.gmra.mrb[2].mxu1 %v2610_v52 }
 0x1e7   :  { %v1118_v52 = vpop.f32.mrb[0].mxu0  ;;  %v1189_v3 = vpop.f32.mrb[0].mxu1 }
 0x1e8   :  { %v1119_v28 = vadd.f32 %v1118_v52, %v598_v57  ;;  %v1190_v60 = vadd.f32 %v1189_v3, %v606_v39  ;;  %v1120_v19 = vpop.f32.mrb[1].mxu0  ;;  %v1191_v4 = vpop.f32.mrb[1].mxu1 }
 0x1e9   :  { %v1121_v47 = vadd.f32 %v1120_v19, %v602_v0  ;;  %v1192_v5 = vadd.f32 %v1191_v4, %v610_v18 }
 0x1eb   :  { %v1344_v53 = vcombine.low %v1119_v28, %v1121_v47  ;;  %v1345_v6 = vcombine.low %v1190_v60, %v1192_v5 }
 0x1ed   :  { %v1352_v7 = vrot.slane %v1344_v53, %v1351_v44  ;;  %v1359_v20 = vrot.slane %v1345_v6, %v1351_v44 }
 0x1ef   :  { %v1360_v22 = vcombine.low %v1352_v7, %v1359_v20 }
 0x1f1   :  { %1380 = vst [vmem:[#allocation2] sm:$0xff] %v1360_v22 }
 0x227   :  { %v1260_v9 = vpop.f32.mrb[2].mxu0  ;;  %v1331_v26 = vpop.f32.mrb[2].mxu1 }
 0x228   :  { %v1261_v10 = vadd.f32 %v1260_v9, %v614_v8  ;;  %v1332_v29 = vadd.f32 %v1331_v26, %v622_v21  ;;  %v1262_v30 = vpop.f32.mrb[3].mxu0  ;;  %v1333_v31 = vpop.f32.mrb[3].mxu1 }
 0x229   :  { %v1263_v11 = vadd.f32 %v1262_v30, %v618_v1  ;;  %v1334_v33 = vadd.f32 %v1333_v31, %v626_v25 }
 0x22b   :  { %v1361_v32 = vcombine.low %v1261_v10, %v1263_v11  ;;  %v1362_v34 = vcombine.low %v1332_v29, %v1334_v33 }
 0x22d   :  { %v1369_v2 = vrot.slane %v1361_v32, %v1351_v44  ;;  %v1376_v12 = vrot.slane %v1362_v34, %v1351_v44 }
 0x22f   :  { %v1377_v36 = vcombine.low %v1369_v2, %v1376_v12 }
 0x231   :  { %1388 = vst.msk [vmem:[#allocation2 + $0x8] sm:$0xff] %vm1387_vm7, %v1377_v36 }
 0x232   :  { %1672 = shalt.err (!%p1669_p4)
}
 0x233   :  { %s1673_s23 = scalar_lea.hbm %s2976_s3, 256 }
 0x234   :  { %p1674_p5 = scmp.ne.s32.totalorder %s2976_s3, %s1673_s23  ;;  %p1677_p6 = scmp.lt.u32.totalorder %s1673_s23, %s2976_s3 }
 0x236   :  { %p1679_p7 = pnand %p1677_p6, %p1674_p5 }
 0x238   :  { %1682 = shalt.err (!%p1679_p7)
}
 0x239   :  { %1398 = dma.vmem_to_hbm [thread:$0]  %s1396_s2, 256, %s2976_s3, [#allocation3]  }
 0x23a   :  { %1683 = dma.done.wait [#allocation3], 256  }
 0x23b   :  { %1684 = vsyncadd [#allocation3], 4294967040 }
 0x23c   :  { %1402 = vsyncpa [#allocation3], 1 }

</bundles_post_ra>
